<compile_context>
chip_gen: v6e
topology: v6e:2x2x1
jax: 0.10.0
libtpu: 0.0.40
codegen_flags: <defaults>
</compile_context>

<pallas_src>
import functools

import jax
import jax.numpy as jnp
import numpy as np
from jax import lax
from jax.experimental import pallas as pl
from jax.experimental.pallas import tpu as pltpu

BN_EPS = 1e-5
_INV_SQRT2 = 0.7071067811865476
NUM_EXPERTS = 5
NUM_CLASSES = 10
IN_CHANNELS = 1
LSTM_HIDDEN = 128
C0, C1, C2 = 32, 64, 128          # channels of the three vision blocks
FC_DIM = 256                       # expert feature dim


def _gelu_exact(x):
    # matches torch.nn.functional.gelu (erf formulation)
    return 0.5 * x * (1.0 + lax.erf(x * _INV_SQRT2))


# -----------------------------------------------------------------------------
# Fused per-expert vision pipeline:
#   conv3x3+BN+GELU+pool (x3)  ->  Linear(2048->256)+GELU
# One grid step per expert; all intermediates live in VMEM scratch.
# -----------------------------------------------------------------------------
def fused_expert_kernel(x9_ref, w0_ref, b0_ref, w1_ref, b1_ref, w2_ref, b2_ref,
                        fcw_ref, fcb_ref, out_ref,
                        p1pad_ref, p2pad_ref, hp0_ref, hp1_ref, hp2_ref):
    B = x9_ref.shape[0]
    K0 = x9_ref.shape[-1]                       # 9 * in_channels

    # zero the padded inter-block scratches (interior is overwritten below)
    p1pad_ref[...] = jnp.zeros_like(p1pad_ref)
    p2pad_ref[...] = jnp.zeros_like(p2pad_ref)

    # ---- block 0: conv3x3(Cin->32) as one im2col matmul per 8-row slab
    #      (BN folded into w/b), GELU, 2x2 maxpool -> padded block-1 input.
    @pl.loop(0, 4)
    def _blk0(s):
        h0 = pl.multiple_of(s * 8, 8)
        patch = x9_ref[:, pl.ds(h0, 8), :, :]                      # (B,8,32,K0)
        acc = jnp.dot(patch.reshape(B * 8 * 32, K0), w0_ref[...],
                      preferred_element_type=jnp.float32)          # (B*8*32,C0)
        y = _gelu_exact(acc + b0_ref[...]).reshape(B, 8, 32, C0)
        # pool H (leading dim -> pairwise max), then pool W via stride-2 reads
        yh = jnp.stack([jnp.maximum(y[:, 2 * i], y[:, 2 * i + 1])
                        for i in range(4)], axis=1)                # (B,4,32,C0)
        hp0_ref[...] = yh
        pooled = jnp.maximum(hp0_ref[:, :, pl.ds(0, 16, stride=2), :],
                             hp0_ref[:, :, pl.ds(1, 16, stride=2), :])  # (B,4,16,C0)
        p1pad_ref[:, pl.ds(1 + 4 * s, 4), 1:17, :] = pooled

    # ---- block 1: conv3x3(32->64), 9 tap matmuls per 8-row slab (acc <= 16 vregs)
    @pl.loop(0, 2)
    def _blk1(s):
        r0 = pl.multiple_of(s * 8, 8)
        acc = jnp.zeros((B * 8 * 16, C1), jnp.float32)
        for dh in range(3):
            for dw in range(3):
                patch = p1pad_ref[:, pl.ds(r0 + dh, 8), dw:dw + 16, :]  # (B,8,16,C0)
                acc = acc + jnp.dot(patch.reshape(B * 8 * 16, C0),
                                    w1_ref[3 * dh + dw],
                                    preferred_element_type=jnp.float32)
        y = _gelu_exact(acc + b1_ref[...]).reshape(B, 8, 16, C1)
        yh = jnp.stack([jnp.maximum(y[:, 2 * i], y[:, 2 * i + 1])
                        for i in range(4)], axis=1)                # (B,4,16,C1)
        hp1_ref[...] = yh
        pooled = jnp.maximum(hp1_ref[:, :, pl.ds(0, 8, stride=2), :],
                             hp1_ref[:, :, pl.ds(1, 8, stride=2), :])   # (B,4,8,C1)
        p2pad_ref[:, pl.ds(1 + 4 * s, 4), 1:9, :] = pooled

    # ---- block 2: conv3x3(64->128), single 8-row slab (acc = 16 vregs)
    acc = jnp.zeros((B * 8 * 8, C2), jnp.float32)
    for dh in range(3):
        for dw in range(3):
            patch = p2pad_ref[:, dh:dh + 8, dw:dw + 8, :]          # (B,8,8,C1)
            acc = acc + jnp.dot(patch.reshape(B * 8 * 8, C1),
                                w2_ref[3 * dh + dw],
                                preferred_element_type=jnp.float32)
    y = _gelu_exact(acc + b2_ref[...]).reshape(B, 8, 8, C2)
    yh = jnp.stack([jnp.maximum(y[:, 2 * i], y[:, 2 * i + 1])
                    for i in range(4)], axis=1)                    # (B,4,8,C2)
    hp2_ref[...] = yh

    # finish the 2x2 pool along W and flatten (h, w, c) into a lane-dense
    # (B, 2048) value that feeds the FC matmul directly (no HBM round trip).
    pieces = []
    for h in range(4):
        for w in range(4):
            pieces.append(jnp.maximum(hp2_ref[:, h, 2 * w, :],
                                      hp2_ref[:, h, 2 * w + 1, :]))    # (B, C2)
    flat = jnp.concatenate(pieces, axis=-1)                        # (B, 2048)

    # ---- expert FC head: Linear(2048->256) + GELU (dropout = identity in eval)
    # fc weights are streamed as bf16; accumulate in f32 on the MXU.
    feats = jnp.dot(flat.astype(jnp.bfloat16), fcw_ref[...],
                    preferred_element_type=jnp.float32) + fcb_ref[...]
    out_ref[...] = _gelu_exact(feats)


def vision_experts(x9, w0, b0, w1, b1, w2, b2, fcw, fcb):
    """x9: (B,32,32,9*Cin) shared im2col input; per-expert params stacked on E."""
    E = w0.shape[0]
    B, H, W, K0 = x9.shape
    return pl.pallas_call(
        fused_expert_kernel,
        out_shape=jax.ShapeDtypeStruct((E, B, FC_DIM), jnp.float32),
        grid=(E,),
        in_specs=[
            pl.BlockSpec((B, H, W, K0), lambda e: (0, 0, 0, 0)),       # shared image
            pl.BlockSpec((None, K0, C0), lambda e: (e, 0, 0)),
            pl.BlockSpec((None, 1, C0), lambda e: (e, 0, 0)),
            pl.BlockSpec((None, 9, C0, C1), lambda e: (e, 0, 0, 0)),
            pl.BlockSpec((None, 1, C1), lambda e: (e, 0, 0)),
            pl.BlockSpec((None, 9, C1, C2), lambda e: (e, 0, 0, 0)),
            pl.BlockSpec((None, 1, C2), lambda e: (e, 0, 0)),
            pl.BlockSpec((None, 16 * C2, FC_DIM), lambda e: (e, 0, 0)),  # bf16, per-expert stream
            pl.BlockSpec((None, 1, FC_DIM), lambda e: (e, 0, 0)),
        ],
        out_specs=pl.BlockSpec((None, B, FC_DIM), lambda e: (e, 0, 0)),
        scratch_shapes=[
            pltpu.VMEM((B, 18, 18, C0), jnp.float32),   # padded input of block 1
            pltpu.VMEM((B, 10, 10, C1), jnp.float32),   # padded input of block 2
            pltpu.VMEM((B, 4, 32, C0), jnp.float32),    # H-pooled slab, block 0
            pltpu.VMEM((B, 4, 16, C1), jnp.float32),    # H-pooled slab, block 1
            pltpu.VMEM((B, 4, 8, C2), jnp.float32),     # H-pooled slab, block 2
        ],
        compiler_params=pltpu.CompilerParams(
            dimension_semantics=("parallel",)),          # experts are independent
    )(x9, w0, b0, w1, b1, w2, b2, fcw, fcb)


# -----------------------------------------------------------------------------
# LSTM over the 5 experts + fusion (Linear+ReLU) + classifier, fused.
# PyTorch gate order [i, f, g, o]; last time-step hidden state is used.
# -----------------------------------------------------------------------------
def lstm_head_kernel(seq_ref, wih_ref, whh_ref, b_ref, wf_ref, bf_ref,
                     wc_ref, bc_ref, o_ref, *, num_steps, batch):
    Hd = whh_ref.shape[0]
    # input projection of all timesteps hoisted out of the recurrence
    gx = jnp.dot(seq_ref[...], wih_ref[...],
                 preferred_element_type=jnp.float32) + b_ref[...]      # (T*B, 4H)
    h = jnp.zeros((batch, Hd), jnp.float32)
    c = jnp.zeros((batch, Hd), jnp.float32)
    for t in range(num_steps):   # T == num_experts (static, small) -> unrolled
        gates = gx[t * batch:(t + 1) * batch, :] + jnp.dot(
            h, whh_ref[...], preferred_element_type=jnp.float32)
        i = jax.nn.sigmoid(gates[:, 0 * Hd:1 * Hd])
        f = jax.nn.sigmoid(gates[:, 1 * Hd:2 * Hd])
        g = jnp.tanh(gates[:, 2 * Hd:3 * Hd])
        o = jax.nn.sigmoid(gates[:, 3 * Hd:4 * Hd])
        c = f * c + i * g
        h = o * jnp.tanh(c)
    fused = jnp.maximum(
        jnp.dot(h, wf_ref[...], preferred_element_type=jnp.float32) + bf_ref[...], 0.0)
    # fusion dropout is identity in eval mode
    o_ref[...] = jnp.dot(fused, wc_ref[...],
                         preferred_element_type=jnp.float32) + bc_ref[...]


def lstm_head(feats, p):
    """feats: (E, B, 256) time-major expert features -> (B, num_classes)."""
    E, B, F = feats.shape
    seq2d = feats.reshape(E * B, F)             # row = t * B + b (time-major)
    kernel = functools.partial(lstm_head_kernel, num_steps=E, batch=B)
    return pl.pallas_call(
        kernel,
        out_shape=jax.ShapeDtypeStruct((B, p["cls_w"].shape[-1]), jnp.float32),
    )(seq2d, p["lstm_wih"], p["lstm_whh"], p["lstm_b"],
      p["fusion_w"], p["fusion_b"], p["cls_w"], p["cls_b"])


# -----------------------------------------------------------------------------
# Parameters (deterministic synthetic init, stacked over the E experts).
# -----------------------------------------------------------------------------
def init_params(key, num_experts=NUM_EXPERTS, in_channels=IN_CHANNELS,
                num_classes=NUM_CLASSES):
    E = num_experts
    chans = [in_channels, C0, C1, C2]
    keys = iter(jax.random.split(key, 64))
    p = {}
    for blk in range(3):
        cin, cout = chans[blk], chans[blk + 1]
        p[f"conv{blk}_w"] = (jax.random.normal(next(keys), (E, 3, 3, cin, cout), jnp.float32)
                             / jnp.sqrt(9.0 * cin))
        p[f"conv{blk}_b"] = 0.1 * jax.random.normal(next(keys), (E, 1, cout), jnp.float32)
        p[f"bn{blk}_gamma"] = 1.0 + 0.1 * jax.random.normal(next(keys), (E, 1, cout), jnp.float32)
        p[f"bn{blk}_beta"] = 0.1 * jax.random.normal(next(keys), (E, 1, cout), jnp.float32)
        p[f"bn{blk}_mean"] = 0.1 * jax.random.normal(next(keys), (E, 1, cout), jnp.float32)
        p[f"bn{blk}_var"] = jax.random.uniform(next(keys), (E, 1, cout), jnp.float32, 0.5, 1.5)
    feat = C2 * 4 * 4
    # fc weight generated in the PyTorch (out, C*H*W) layout, remapped to the
    # NHWC flatten order; stored in bf16 (dominant HBM traffic of the model).
    fc_pt = jax.random.normal(next(keys), (E, FC_DIM, C2, 4, 4), jnp.float32) / jnp.sqrt(feat)
    p["fc_w"] = fc_pt.transpose(0, 3, 4, 2, 1).reshape(E, feat, FC_DIM).astype(jnp.bfloat16)
    p["fc_b"] = 0.1 * jax.random.normal(next(keys), (E, 1, FC_DIM), jnp.float32)
    s = 1.0 / jnp.sqrt(float(LSTM_HIDDEN))
    p["lstm_wih"] = (jax.random.normal(next(keys), (4 * LSTM_HIDDEN, FC_DIM), jnp.float32) * s).T
    p["lstm_whh"] = (jax.random.normal(next(keys), (4 * LSTM_HIDDEN, LSTM_HIDDEN), jnp.float32) * s).T
    b_ih = jax.random.normal(next(keys), (4 * LSTM_HIDDEN,), jnp.float32) * s
    b_hh = jax.random.normal(next(keys), (4 * LSTM_HIDDEN,), jnp.float32) * s
    p["lstm_b"] = (b_ih + b_hh).reshape(1, 4 * LSTM_HIDDEN)
    p["fusion_w"] = (jax.random.normal(next(keys), (FC_DIM, LSTM_HIDDEN), jnp.float32)
                     / jnp.sqrt(float(LSTM_HIDDEN))).T
    p["fusion_b"] = 0.1 * jax.random.normal(next(keys), (1, FC_DIM), jnp.float32)
    p["cls_w"] = (jax.random.normal(next(keys), (num_classes, FC_DIM), jnp.float32)
                  / jnp.sqrt(float(FC_DIM))).T
    p["cls_b"] = 0.1 * jax.random.normal(next(keys), (1, num_classes), jnp.float32)
    return p


def _fold_bn(w, b, gamma, beta, mean, var):
    """Fold eval-mode BatchNorm into the conv weight/bias (exact algebra)."""
    scale = gamma * lax.rsqrt(var + BN_EPS)               # (E, 1, Cout)
    w_f = w * scale[:, :, None, None, :]                  # w: (E, 3, 3, Cin, Cout)
    b_f = (b - mean) * scale + beta
    return w_f, b_f


# -----------------------------------------------------------------------------
# Full forward pass: one fused vision+FC pallas_call (grid over experts) + one
# LSTM-head pallas_call.  Reshapes / padding / BN folding done once in JAX.
# -----------------------------------------------------------------------------
def multi_fashion_expert_forward(x_nchw, p, num_experts=NUM_EXPERTS):
    E = num_experts
    B, cin, H, W = x_nchw.shape        # H = W = 32 required (feature_size = 128*4*4)
    x = jnp.transpose(x_nchw, (0, 2, 3, 1)).astype(jnp.float32)     # NCHW -> NHWC
    xpad = jnp.pad(x, ((0, 0), (1, 1), (1, 1), (0, 0)))
    # block-0 im2col done once in plain JAX: the image is shared by all experts
    x9 = jnp.concatenate([xpad[:, dh:dh + H, dw:dw + W, :]
                          for dh in range(3) for dw in range(3)], axis=-1)

    w0, b0 = _fold_bn(p["conv0_w"], p["conv0_b"], p["bn0_gamma"], p["bn0_beta"],
                      p["bn0_mean"], p["bn0_var"])
    w1, b1 = _fold_bn(p["conv1_w"], p["conv1_b"], p["bn1_gamma"], p["bn1_beta"],
                      p["bn1_mean"], p["bn1_var"])
    w2, b2 = _fold_bn(p["conv2_w"], p["conv2_b"], p["bn2_gamma"], p["bn2_beta"],
                      p["bn2_mean"], p["bn2_var"])
    w0 = w0.reshape(E, 9 * cin, C0)    # tap-major / cin-minor: matches x9 layout
    w1 = w1.reshape(E, 9, C0, C1)
    w2 = w2.reshape(E, 9, C1, C2)

    feats = vision_experts(x9, w0, b0, w1, b1, w2, b2, p["fc_w"], p["fc_b"])  # (E,B,256)
    return lstm_head(feats, p)                                                 # (B, classes)


# -----------------------------------------------------------------------------
# Pure-JAX reference (same inference-mode semantics) for a numerical check.
# -----------------------------------------------------------------------------
def reference_forward(x_nchw, p, num_experts=NUM_EXPERTS):
    B = x_nchw.shape[0]
    feats = []
    for e in range(num_experts):
        h = x_nchw.astype(jnp.float32)
        for blk in range(3):
            w = p[f"conv{blk}_w"][e]
            cout = w.shape[-1]
            h = lax.conv_general_dilated(h, w, (1, 1), ((1, 1), (1, 1)),
                                         dimension_numbers=("NCHW", "HWIO", "NCHW"))
            h = h + p[f"conv{blk}_b"][e].reshape(1, cout, 1, 1)
            mu = p[f"bn{blk}_mean"][e].reshape(1, cout, 1, 1)
            var = p[f"bn{blk}_var"][e].reshape(1, cout, 1, 1)
            g = p[f"bn{blk}_gamma"][e].reshape(1, cout, 1, 1)
            bet = p[f"bn{blk}_beta"][e].reshape(1, cout, 1, 1)
            h = (h - mu) * g / jnp.sqrt(var + BN_EPS) + bet
            h = _gelu_exact(h)
            h = lax.reduce_window(h, -jnp.inf, lax.max, (1, 1, 2, 2), (1, 1, 2, 2), "VALID")
        flat = jnp.transpose(h, (0, 2, 3, 1)).reshape(B, -1)
        fc = jnp.dot(flat.astype(jnp.bfloat16), p["fc_w"][e],
                     preferred_element_type=jnp.float32) + p["fc_b"][e]
        feats.append(_gelu_exact(fc))
    seq = jnp.stack(feats, axis=1)
    hd = LSTM_HIDDEN
    hs = jnp.zeros((B, hd), jnp.float32)
    cs = jnp.zeros((B, hd), jnp.float32)
    for t in range(num_experts):
        gates = seq[:, t, :] @ p["lstm_wih"] + hs @ p["lstm_whh"] + p["lstm_b"]
        i = jax.nn.sigmoid(gates[:, :hd])
        f = jax.nn.sigmoid(gates[:, hd:2 * hd])
        g = jnp.tanh(gates[:, 2 * hd:3 * hd])
        o = jax.nn.sigmoid(gates[:, 3 * hd:])
        cs = f * cs + i * g
        hs = o * jnp.tanh(cs)
    fused = jnp.maximum(hs @ p["fusion_w"] + p["fusion_b"], 0.0)
    return fused @ p["cls_w"] + p["cls_b"]


if __name__ == "__main__":
    key = jax.random.PRNGKey(0)
    pkey, xkey = jax.random.split(key)
    params = init_params(pkey)
    # batch=2, in_channels=1, 32x32 input (3 pools -> 4x4; feature_size = 128*4*4)
    x = jax.random.normal(xkey, (2, IN_CHANNELS, 32, 32), jnp.float32)

    fwd = jax.jit(multi_fashion_expert_forward)
    logits = jax.block_until_ready(fwd(x, params))
    assert logits.shape == (2, NUM_CLASSES), logits.shape

    ref = jax.block_until_ready(reference_forward(x, params))
    np.testing.assert_allclose(np.asarray(logits), np.asarray(ref), rtol=1e-2, atol=1e-2)

    print("KERNEL_OK")
</pallas_src>

<mosaic_0001>
module attributes {stable_mosaic.version = 11 : i64} {
  func.func @fused_expert_kernel(%arg0: i32, %arg1: memref<2x32x32x9xf32, #tpu.memory_space<vmem>>, %arg2: memref<1x9x32xf32, #tpu.memory_space<vmem>>, %arg3: memref<1x1x32xf32, #tpu.memory_space<vmem>>, %arg4: memref<1x9x32x64xf32, #tpu.memory_space<vmem>>, %arg5: memref<1x1x64xf32, #tpu.memory_space<vmem>>, %arg6: memref<1x9x64x128xf32, #tpu.memory_space<vmem>>, %arg7: memref<1x1x128xf32, #tpu.memory_space<vmem>>, %arg8: memref<1x2048x256xbf16, #tpu.memory_space<vmem>>, %arg9: memref<1x1x256xf32, #tpu.memory_space<vmem>>, %arg10: memref<1x2x256xf32, #tpu.memory_space<vmem>>, %arg11: memref<2x18x18x32xf32, #tpu.memory_space<vmem>>, %arg12: memref<2x10x10x64xf32, #tpu.memory_space<vmem>>, %arg13: memref<2x4x32x32xf32, #tpu.memory_space<vmem>>, %arg14: memref<2x4x16x64xf32, #tpu.memory_space<vmem>>, %arg15: memref<2x4x8x128xf32, #tpu.memory_space<vmem>>) attributes {dimension_semantics = [#tpu.dimension_semantics<parallel>], iteration_bounds = array<i64: 5>, scalar_prefetch = 0 : i64, scratch_operands = 5 : i64, tpu.core_type = #tpu.core_type<tc>, window_params = [{pipeline_mode = #tpu.pipeline_mode<synchronous>, transform_indices = @transform_0, window_bounds = array<i64: 2, 32, 32, 9>}, {transform_indices = @transform_1, window_bounds = array<i64: 1, 9, 32>}, {transform_indices = @transform_2, window_bounds = array<i64: 1, 1, 32>}, {transform_indices = @transform_3, window_bounds = array<i64: 1, 9, 32, 64>}, {transform_indices = @transform_4, window_bounds = array<i64: 1, 1, 64>}, {transform_indices = @transform_5, window_bounds = array<i64: 1, 9, 64, 128>}, {transform_indices = @transform_6, window_bounds = array<i64: 1, 1, 128>}, {transform_indices = @transform_7, window_bounds = array<i64: 1, 2048, 256>}, {transform_indices = @transform_8, window_bounds = array<i64: 1, 1, 256>}, {transform_indices = @transform_9, window_bounds = array<i64: 1, 2, 256>}]} {
    %cst = arith.constant 0.000000e+00 : f32
    %0 = vector.broadcast %cst : f32 to vector<2x18x18x32xf32>
    %c0 = arith.constant 0 : index
    %c0_0 = arith.constant 0 : index
    %c0_1 = arith.constant 0 : index
    %c0_2 = arith.constant 0 : index
    %1 = vector.load %arg11[%c0, %c0_0, %c0_1, %c0_2] : memref<2x18x18x32xf32, #tpu.memory_space<vmem>>, vector<2x18x18x32xf32>
    tpu.vector_store %arg11[%c0, %c0_0, %c0_1, %c0_2], %0 {strides = array<i32>} : memref<2x18x18x32xf32, #tpu.memory_space<vmem>>, vector<2x18x18x32xf32>,
    %cst_3 = arith.constant 0.000000e+00 : f32
    %2 = vector.broadcast %cst_3 : f32 to vector<2x10x10x64xf32>
    %c0_4 = arith.constant 0 : index
    %c0_5 = arith.constant 0 : index
    %c0_6 = arith.constant 0 : index
    %c0_7 = arith.constant 0 : index
    %3 = vector.load %arg12[%c0_4, %c0_5, %c0_6, %c0_7] : memref<2x10x10x64xf32, #tpu.memory_space<vmem>>, vector<2x10x10x64xf32>
    tpu.vector_store %arg12[%c0_4, %c0_5, %c0_6, %c0_7], %2 {strides = array<i32>} : memref<2x10x10x64xf32, #tpu.memory_space<vmem>>, vector<2x10x10x64xf32>,
    %c0_i32 = arith.constant 0 : i32
    %c4_i32 = arith.constant 4 : i32
    %4 = arith.addi %c0_i32, %c4_i32 : i32
    %c1_i32 = arith.constant 1 : i32
    scf.for %arg16 = %c0_i32 to %4 step %c1_i32  : i32 {
      %c1_i32_237 = arith.constant 1 : i32
      %200 = arith.muli %arg16, %c1_i32_237 : i32
      %c0_i32_238 = arith.constant 0 : i32
      %201 = arith.addi %c0_i32_238, %200 : i32
      %c8_i32 = arith.constant 8 : i32
      %202 = arith.muli %201, %c8_i32 : i32
      %203 = tpu.assume_multiple %202, 8 : i32
      %c0_239 = arith.constant 0 : index
      %204 = arith.index_cast %203 : i32 to index
      %c0_240 = arith.constant 0 : index
      %c0_241 = arith.constant 0 : index
      %205 = vector.load %arg1[%c0_239, %204, %c0_240, %c0_241] : memref<2x32x32x9xf32, #tpu.memory_space<vmem>>, vector<2x8x32x9xf32>
      %206 = vector.shape_cast %205 : vector<2x8x32x9xf32> to vector<512x9xf32>
      %c0_242 = arith.constant 0 : index
      %c0_243 = arith.constant 0 : index
      %c0_244 = arith.constant 0 : index
      %207 = vector.load %arg2[%c0_242, %c0_243, %c0_244] : memref<1x9x32xf32, #tpu.memory_space<vmem>>, vector<1x9x32xf32>
      %208 = vector.shape_cast %207 : vector<1x9x32xf32> to vector<9x32xf32>
      %cst_245 = arith.constant dense<0.000000e+00> : vector<512x32xf32>
      %209 = tpu.matmul %206, %208, %cst_245 {dimension_numbers = #tpu.dot_dimension_numbers<[1], [0], [0], [1], [0, 0, 1, 1], [], []>} : vector<512x9xf32>, vector<9x32xf32>, vector<512x32xf32> -> vector<512x32xf32>
      %c0_246 = arith.constant 0 : index
      %c0_247 = arith.constant 0 : index
      %c0_248 = arith.constant 0 : index
      %210 = vector.load %arg3[%c0_246, %c0_247, %c0_248] : memref<1x1x32xf32, #tpu.memory_space<vmem>>, vector<1x1x32xf32>
      %211 = vector.shape_cast %210 : vector<1x1x32xf32> to vector<1x32xf32>
      %212 = vector.broadcast %211 : vector<1x32xf32> to vector<512x32xf32>
      %213 = arith.addf %209, %212 : vector<512x32xf32>
      %cst_249 = arith.constant 5.000000e-01 : f32
      %214 = vector.broadcast %cst_249 : f32 to vector<512x32xf32>
      %215 = arith.mulf %214, %213 : vector<512x32xf32>
      %cst_250 = arith.constant 0.707106769 : f32
      %216 = vector.broadcast %cst_250 : f32 to vector<512x32xf32>
      %217 = arith.mulf %213, %216 : vector<512x32xf32>
      %218 = math.erf %217 : vector<512x32xf32>
      %cst_251 = arith.constant 1.000000e+00 : f32
      %219 = vector.broadcast %cst_251 : f32 to vector<512x32xf32>
      %220 = arith.addf %219, %218 : vector<512x32xf32>
      %221 = arith.mulf %215, %220 : vector<512x32xf32>
      %222 = vector.shape_cast %221 : vector<512x32xf32> to vector<2x8x32x32xf32>
      %223 = vector.extract_strided_slice %222 {offsets = [0, 0, 0, 0], sizes = [2, 1, 32, 32], strides = [1, 1, 1, 1]} : vector<2x8x32x32xf32> to vector<2x1x32x32xf32>
      %224 = vector.shape_cast %223 : vector<2x1x32x32xf32> to vector<2x32x32xf32>
      %225 = vector.extract_strided_slice %222 {offsets = [0, 1, 0, 0], sizes = [2, 1, 32, 32], strides = [1, 1, 1, 1]} : vector<2x8x32x32xf32> to vector<2x1x32x32xf32>
      %226 = vector.shape_cast %225 : vector<2x1x32x32xf32> to vector<2x32x32xf32>
      %227 = arith.maximumf %224, %226 : vector<2x32x32xf32>
      %228 = vector.extract_strided_slice %222 {offsets = [0, 2, 0, 0], sizes = [2, 1, 32, 32], strides = [1, 1, 1, 1]} : vector<2x8x32x32xf32> to vector<2x1x32x32xf32>
      %229 = vector.shape_cast %228 : vector<2x1x32x32xf32> to vector<2x32x32xf32>
      %230 = vector.extract_strided_slice %222 {offsets = [0, 3, 0, 0], sizes = [2, 1, 32, 32], strides = [1, 1, 1, 1]} : vector<2x8x32x32xf32> to vector<2x1x32x32xf32>
      %231 = vector.shape_cast %230 : vector<2x1x32x32xf32> to vector<2x32x32xf32>
      %232 = arith.maximumf %229, %231 : vector<2x32x32xf32>
      %233 = vector.extract_strided_slice %222 {offsets = [0, 4, 0, 0], sizes = [2, 1, 32, 32], strides = [1, 1, 1, 1]} : vector<2x8x32x32xf32> to vector<2x1x32x32xf32>
      %234 = vector.shape_cast %233 : vector<2x1x32x32xf32> to vector<2x32x32xf32>
      %235 = vector.extract_strided_slice %222 {offsets = [0, 5, 0, 0], sizes = [2, 1, 32, 32], strides = [1, 1, 1, 1]} : vector<2x8x32x32xf32> to vector<2x1x32x32xf32>
      %236 = vector.shape_cast %235 : vector<2x1x32x32xf32> to vector<2x32x32xf32>
      %237 = arith.maximumf %234, %236 : vector<2x32x32xf32>
      %238 = vector.extract_strided_slice %222 {offsets = [0, 6, 0, 0], sizes = [2, 1, 32, 32], strides = [1, 1, 1, 1]} : vector<2x8x32x32xf32> to vector<2x1x32x32xf32>
      %239 = vector.shape_cast %238 : vector<2x1x32x32xf32> to vector<2x32x32xf32>
      %240 = vector.extract_strided_slice %222 {offsets = [0, 7, 0, 0], sizes = [2, 1, 32, 32], strides = [1, 1, 1, 1]} : vector<2x8x32x32xf32> to vector<2x1x32x32xf32>
      %241 = vector.shape_cast %240 : vector<2x1x32x32xf32> to vector<2x32x32xf32>
      %242 = arith.maximumf %239, %241 : vector<2x32x32xf32>
      %243 = vector.shape_cast %227 : vector<2x32x32xf32> to vector<2x1x32x32xf32>
      %244 = vector.shape_cast %232 : vector<2x32x32xf32> to vector<2x1x32x32xf32>
      %245 = vector.shape_cast %237 : vector<2x32x32xf32> to vector<2x1x32x32xf32>
      %246 = vector.shape_cast %242 : vector<2x32x32xf32> to vector<2x1x32x32xf32>
      %247 = tpu.concatenate %243, %244, %245, %246 in 1 : vector<2x1x32x32xf32>, vector<2x1x32x32xf32>, vector<2x1x32x32xf32>, vector<2x1x32x32xf32> -> vector<2x4x32x32xf32>
      %c0_252 = arith.constant 0 : index
      %c0_253 = arith.constant 0 : index
      %c0_254 = arith.constant 0 : index
      %c0_255 = arith.constant 0 : index
      %248 = vector.load %arg13[%c0_252, %c0_253, %c0_254, %c0_255] : memref<2x4x32x32xf32, #tpu.memory_space<vmem>>, vector<2x4x32x32xf32>
      tpu.vector_store %arg13[%c0_252, %c0_253, %c0_254, %c0_255], %247 {strides = array<i32>} : memref<2x4x32x32xf32, #tpu.memory_space<vmem>>, vector<2x4x32x32xf32>,
      %c0_256 = arith.constant 0 : index
      %c0_257 = arith.constant 0 : index
      %c0_258 = arith.constant 0 : index
      %c0_259 = arith.constant 0 : index
      %249 = tpu.strided_load %arg13[%c0_256, %c0_257, %c0_258, %c0_259] {strides = array<i32: 1, 1, 2, 1>} : memref<2x4x32x32xf32, #tpu.memory_space<vmem>>, vector<2x4x16x32xf32>
      %c0_260 = arith.constant 0 : index
      %c0_261 = arith.constant 0 : index
      %c1_262 = arith.constant 1 : index
      %c0_263 = arith.constant 0 : index
      %250 = tpu.strided_load %arg13[%c0_260, %c0_261, %c1_262, %c0_263] {strides = array<i32: 1, 1, 2, 1>} : memref<2x4x32x32xf32, #tpu.memory_space<vmem>>, vector<2x4x16x32xf32>
      %251 = arith.maximumf %249, %250 : vector<2x4x16x32xf32>
      %c4_i32_264 = arith.constant 4 : i32
      %252 = arith.muli %c4_i32_264, %201 : i32
      %c1_i32_265 = arith.constant 1 : i32
      %253 = arith.addi %c1_i32_265, %252 : i32
      %c0_266 = arith.constant 0 : index
      %254 = arith.index_cast %253 : i32 to index
      %c1_267 = arith.constant 1 : index
      %c0_268 = arith.constant 0 : index
      %255 = vector.load %arg11[%c0_266, %254, %c1_267, %c0_268] : memref<2x18x18x32xf32, #tpu.memory_space<vmem>>, vector<2x4x16x32xf32>
      tpu.vector_store %arg11[%c0_266, %254, %c1_267, %c0_268], %251 {strides = array<i32>} : memref<2x18x18x32xf32, #tpu.memory_space<vmem>>, vector<2x4x16x32xf32>,
    }
    %c4_i32_8 = arith.constant 4 : i32
    %c0_i32_9 = arith.constant 0 : i32
    %c2_i32 = arith.constant 2 : i32
    %5 = arith.addi %c0_i32_9, %c2_i32 : i32
    %c1_i32_10 = arith.constant 1 : i32
    scf.for %arg16 = %c0_i32_9 to %5 step %c1_i32_10  : i32 {
      %c1_i32_237 = arith.constant 1 : i32
      %200 = arith.muli %arg16, %c1_i32_237 : i32
      %c0_i32_238 = arith.constant 0 : i32
      %201 = arith.addi %c0_i32_238, %200 : i32
      %c8_i32 = arith.constant 8 : i32
      %202 = arith.muli %201, %c8_i32 : i32
      %203 = tpu.assume_multiple %202, 8 : i32
      %cst_239 = arith.constant 0.000000e+00 : f32
      %204 = vector.broadcast %cst_239 : f32 to vector<256x64xf32>
      %c0_i32_240 = arith.constant 0 : i32
      %205 = arith.addi %203, %c0_i32_240 : i32
      %c0_241 = arith.constant 0 : index
      %206 = arith.index_cast %205 : i32 to index
      %c0_242 = arith.constant 0 : index
      %c0_243 = arith.constant 0 : index
      %207 = vector.load %arg11[%c0_241, %206, %c0_242, %c0_243] : memref<2x18x18x32xf32, #tpu.memory_space<vmem>>, vector<2x8x16x32xf32>
      %208 = vector.shape_cast %207 : vector<2x8x16x32xf32> to vector<256x32xf32>
      %c0_244 = arith.constant 0 : index
      %c0_245 = arith.constant 0 : index
      %c0_246 = arith.constant 0 : index
      %c0_247 = arith.constant 0 : index
      %209 = vector.load %arg4[%c0_244, %c0_245, %c0_246, %c0_247] : memref<1x9x32x64xf32, #tpu.memory_space<vmem>>, vector<1x1x32x64xf32>
      %210 = vector.shape_cast %209 : vector<1x1x32x64xf32> to vector<32x64xf32>
      %cst_248 = arith.constant dense<0.000000e+00> : vector<256x64xf32>
      %211 = tpu.matmul %208, %210, %cst_248 {dimension_numbers = #tpu.dot_dimension_numbers<[1], [0], [0], [1], [0, 0, 1, 1], [], []>} : vector<256x32xf32>, vector<32x64xf32>, vector<256x64xf32> -> vector<256x64xf32>
      %212 = arith.addf %204, %211 : vector<256x64xf32>
      %c0_i32_249 = arith.constant 0 : i32
      %213 = arith.addi %203, %c0_i32_249 : i32
      %c0_250 = arith.constant 0 : index
      %214 = arith.index_cast %213 : i32 to index
      %c1_251 = arith.constant 1 : index
      %c0_252 = arith.constant 0 : index
      %215 = vector.load %arg11[%c0_250, %214, %c1_251, %c0_252] : memref<2x18x18x32xf32, #tpu.memory_space<vmem>>, vector<2x8x16x32xf32>
      %216 = vector.shape_cast %215 : vector<2x8x16x32xf32> to vector<256x32xf32>
      %c0_253 = arith.constant 0 : index
      %c1_254 = arith.constant 1 : index
      %c0_255 = arith.constant 0 : index
      %c0_256 = arith.constant 0 : index
      %217 = vector.load %arg4[%c0_253, %c1_254, %c0_255, %c0_256] : memref<1x9x32x64xf32, #tpu.memory_space<vmem>>, vector<1x1x32x64xf32>
      %218 = vector.shape_cast %217 : vector<1x1x32x64xf32> to vector<32x64xf32>
      %cst_257 = arith.constant dense<0.000000e+00> : vector<256x64xf32>
      %219 = tpu.matmul %216, %218, %cst_257 {dimension_numbers = #tpu.dot_dimension_numbers<[1], [0], [0], [1], [0, 0, 1, 1], [], []>} : vector<256x32xf32>, vector<32x64xf32>, vector<256x64xf32> -> vector<256x64xf32>
      %220 = arith.addf %212, %219 : vector<256x64xf32>
      %c0_i32_258 = arith.constant 0 : i32
      %221 = arith.addi %203, %c0_i32_258 : i32
      %c0_259 = arith.constant 0 : index
      %222 = arith.index_cast %221 : i32 to index
      %c2_260 = arith.constant 2 : index
      %c0_261 = arith.constant 0 : index
      %223 = vector.load %arg11[%c0_259, %222, %c2_260, %c0_261] : memref<2x18x18x32xf32, #tpu.memory_space<vmem>>, vector<2x8x16x32xf32>
      %224 = vector.shape_cast %223 : vector<2x8x16x32xf32> to vector<256x32xf32>
      %c0_262 = arith.constant 0 : index
      %c2_263 = arith.constant 2 : index
      %c0_264 = arith.constant 0 : index
      %c0_265 = arith.constant 0 : index
      %225 = vector.load %arg4[%c0_262, %c2_263, %c0_264, %c0_265] : memref<1x9x32x64xf32, #tpu.memory_space<vmem>>, vector<1x1x32x64xf32>
      %226 = vector.shape_cast %225 : vector<1x1x32x64xf32> to vector<32x64xf32>
      %cst_266 = arith.constant dense<0.000000e+00> : vector<256x64xf32>
      %227 = tpu.matmul %224, %226, %cst_266 {dimension_numbers = #tpu.dot_dimension_numbers<[1], [0], [0], [1], [0, 0, 1, 1], [], []>} : vector<256x32xf32>, vector<32x64xf32>, vector<256x64xf32> -> vector<256x64xf32>
      %228 = arith.addf %220, %227 : vector<256x64xf32>
      %c1_i32_267 = arith.constant 1 : i32
      %229 = arith.addi %203, %c1_i32_267 : i32
      %c0_268 = arith.constant 0 : index
      %230 = arith.index_cast %229 : i32 to index
      %c0_269 = arith.constant 0 : index
      %c0_270 = arith.constant 0 : index
      %231 = vector.load %arg11[%c0_268, %230, %c0_269, %c0_270] : memref<2x18x18x32xf32, #tpu.memory_space<vmem>>, vector<2x8x16x32xf32>
      %232 = vector.shape_cast %231 : vector<2x8x16x32xf32> to vector<256x32xf32>
      %c0_271 = arith.constant 0 : index
      %c3_272 = arith.constant 3 : index
      %c0_273 = arith.constant 0 : index
      %c0_274 = arith.constant 0 : index
      %233 = vector.load %arg4[%c0_271, %c3_272, %c0_273, %c0_274] : memref<1x9x32x64xf32, #tpu.memory_space<vmem>>, vector<1x1x32x64xf32>
      %234 = vector.shape_cast %233 : vector<1x1x32x64xf32> to vector<32x64xf32>
      %cst_275 = arith.constant dense<0.000000e+00> : vector<256x64xf32>
      %235 = tpu.matmul %232, %234, %cst_275 {dimension_numbers = #tpu.dot_dimension_numbers<[1], [0], [0], [1], [0, 0, 1, 1], [], []>} : vector<256x32xf32>, vector<32x64xf32>, vector<256x64xf32> -> vector<256x64xf32>
      %236 = arith.addf %228, %235 : vector<256x64xf32>
      %c1_i32_276 = arith.constant 1 : i32
      %237 = arith.addi %203, %c1_i32_276 : i32
      %c0_277 = arith.constant 0 : index
      %238 = arith.index_cast %237 : i32 to index
      %c1_278 = arith.constant 1 : index
      %c0_279 = arith.constant 0 : index
      %239 = vector.load %arg11[%c0_277, %238, %c1_278, %c0_279] : memref<2x18x18x32xf32, #tpu.memory_space<vmem>>, vector<2x8x16x32xf32>
      %240 = vector.shape_cast %239 : vector<2x8x16x32xf32> to vector<256x32xf32>
      %c0_280 = arith.constant 0 : index
      %c4_281 = arith.constant 4 : index
      %c0_282 = arith.constant 0 : index
      %c0_283 = arith.constant 0 : index
      %241 = vector.load %arg4[%c0_280, %c4_281, %c0_282, %c0_283] : memref<1x9x32x64xf32, #tpu.memory_space<vmem>>, vector<1x1x32x64xf32>
      %242 = vector.shape_cast %241 : vector<1x1x32x64xf32> to vector<32x64xf32>
      %cst_284 = arith.constant dense<0.000000e+00> : vector<256x64xf32>
      %243 = tpu.matmul %240, %242, %cst_284 {dimension_numbers = #tpu.dot_dimension_numbers<[1], [0], [0], [1], [0, 0, 1, 1], [], []>} : vector<256x32xf32>, vector<32x64xf32>, vector<256x64xf32> -> vector<256x64xf32>
      %244 = arith.addf %236, %243 : vector<256x64xf32>
      %c1_i32_285 = arith.constant 1 : i32
      %245 = arith.addi %203, %c1_i32_285 : i32
      %c0_286 = arith.constant 0 : index
      %246 = arith.index_cast %245 : i32 to index
      %c2_287 = arith.constant 2 : index
      %c0_288 = arith.constant 0 : index
      %247 = vector.load %arg11[%c0_286, %246, %c2_287, %c0_288] : memref<2x18x18x32xf32, #tpu.memory_space<vmem>>, vector<2x8x16x32xf32>
      %248 = vector.shape_cast %247 : vector<2x8x16x32xf32> to vector<256x32xf32>
      %c0_289 = arith.constant 0 : index
      %c5_290 = arith.constant 5 : index
      %c0_291 = arith.constant 0 : index
      %c0_292 = arith.constant 0 : index
      %249 = vector.load %arg4[%c0_289, %c5_290, %c0_291, %c0_292] : memref<1x9x32x64xf32, #tpu.memory_space<vmem>>, vector<1x1x32x64xf32>
      %250 = vector.shape_cast %249 : vector<1x1x32x64xf32> to vector<32x64xf32>
      %cst_293 = arith.constant dense<0.000000e+00> : vector<256x64xf32>
      %251 = tpu.matmul %248, %250, %cst_293 {dimension_numbers = #tpu.dot_dimension_numbers<[1], [0], [0], [1], [0, 0, 1, 1], [], []>} : vector<256x32xf32>, vector<32x64xf32>, vector<256x64xf32> -> vector<256x64xf32>
      %252 = arith.addf %244, %251 : vector<256x64xf32>
      %c2_i32_294 = arith.constant 2 : i32
      %253 = arith.addi %203, %c2_i32_294 : i32
      %c0_295 = arith.constant 0 : index
      %254 = arith.index_cast %253 : i32 to index
      %c0_296 = arith.constant 0 : index
      %c0_297 = arith.constant 0 : index
      %255 = vector.load %arg11[%c0_295, %254, %c0_296, %c0_297] : memref<2x18x18x32xf32, #tpu.memory_space<vmem>>, vector<2x8x16x32xf32>
      %256 = vector.shape_cast %255 : vector<2x8x16x32xf32> to vector<256x32xf32>
      %c0_298 = arith.constant 0 : index
      %c6_299 = arith.constant 6 : index
      %c0_300 = arith.constant 0 : index
      %c0_301 = arith.constant 0 : index
      %257 = vector.load %arg4[%c0_298, %c6_299, %c0_300, %c0_301] : memref<1x9x32x64xf32, #tpu.memory_space<vmem>>, vector<1x1x32x64xf32>
      %258 = vector.shape_cast %257 : vector<1x1x32x64xf32> to vector<32x64xf32>
      %cst_302 = arith.constant dense<0.000000e+00> : vector<256x64xf32>
      %259 = tpu.matmul %256, %258, %cst_302 {dimension_numbers = #tpu.dot_dimension_numbers<[1], [0], [0], [1], [0, 0, 1, 1], [], []>} : vector<256x32xf32>, vector<32x64xf32>, vector<256x64xf32> -> vector<256x64xf32>
      %260 = arith.addf %252, %259 : vector<256x64xf32>
      %c2_i32_303 = arith.constant 2 : i32
      %261 = arith.addi %203, %c2_i32_303 : i32
      %c0_304 = arith.constant 0 : index
      %262 = arith.index_cast %261 : i32 to index
      %c1_305 = arith.constant 1 : index
      %c0_306 = arith.constant 0 : index
      %263 = vector.load %arg11[%c0_304, %262, %c1_305, %c0_306] : memref<2x18x18x32xf32, #tpu.memory_space<vmem>>, vector<2x8x16x32xf32>
      %264 = vector.shape_cast %263 : vector<2x8x16x32xf32> to vector<256x32xf32>
      %c0_307 = arith.constant 0 : index
      %c7_308 = arith.constant 7 : index
      %c0_309 = arith.constant 0 : index
      %c0_310 = arith.constant 0 : index
      %265 = vector.load %arg4[%c0_307, %c7_308, %c0_309, %c0_310] : memref<1x9x32x64xf32, #tpu.memory_space<vmem>>, vector<1x1x32x64xf32>
      %266 = vector.shape_cast %265 : vector<1x1x32x64xf32> to vector<32x64xf32>
      %cst_311 = arith.constant dense<0.000000e+00> : vector<256x64xf32>
      %267 = tpu.matmul %264, %266, %cst_311 {dimension_numbers = #tpu.dot_dimension_numbers<[1], [0], [0], [1], [0, 0, 1, 1], [], []>} : vector<256x32xf32>, vector<32x64xf32>, vector<256x64xf32> -> vector<256x64xf32>
      %268 = arith.addf %260, %267 : vector<256x64xf32>
      %c2_i32_312 = arith.constant 2 : i32
      %269 = arith.addi %203, %c2_i32_312 : i32
      %c0_313 = arith.constant 0 : index
      %270 = arith.index_cast %269 : i32 to index
      %c2_314 = arith.constant 2 : index
      %c0_315 = arith.constant 0 : index
      %271 = vector.load %arg11[%c0_313, %270, %c2_314, %c0_315] : memref<2x18x18x32xf32, #tpu.memory_space<vmem>>, vector<2x8x16x32xf32>
      %272 = vector.shape_cast %271 : vector<2x8x16x32xf32> to vector<256x32xf32>
      %c0_316 = arith.constant 0 : index
      %c8_317 = arith.constant 8 : index
      %c0_318 = arith.constant 0 : index
      %c0_319 = arith.constant 0 : index
      %273 = vector.load %arg4[%c0_316, %c8_317, %c0_318, %c0_319] : memref<1x9x32x64xf32, #tpu.memory_space<vmem>>, vector<1x1x32x64xf32>
      %274 = vector.shape_cast %273 : vector<1x1x32x64xf32> to vector<32x64xf32>
      %cst_320 = arith.constant dense<0.000000e+00> : vector<256x64xf32>
      %275 = tpu.matmul %272, %274, %cst_320 {dimension_numbers = #tpu.dot_dimension_numbers<[1], [0], [0], [1], [0, 0, 1, 1], [], []>} : vector<256x32xf32>, vector<32x64xf32>, vector<256x64xf32> -> vector<256x64xf32>
      %276 = arith.addf %268, %275 : vector<256x64xf32>
      %c0_321 = arith.constant 0 : index
      %c0_322 = arith.constant 0 : index
      %c0_323 = arith.constant 0 : index
      %277 = vector.load %arg5[%c0_321, %c0_322, %c0_323] : memref<1x1x64xf32, #tpu.memory_space<vmem>>, vector<1x1x64xf32>
      %278 = vector.shape_cast %277 : vector<1x1x64xf32> to vector<1x64xf32>
      %279 = vector.broadcast %278 : vector<1x64xf32> to vector<256x64xf32>
      %280 = arith.addf %276, %279 : vector<256x64xf32>
      %cst_324 = arith.constant 5.000000e-01 : f32
      %281 = vector.broadcast %cst_324 : f32 to vector<256x64xf32>
      %282 = arith.mulf %281, %280 : vector<256x64xf32>
      %cst_325 = arith.constant 0.707106769 : f32
      %283 = vector.broadcast %cst_325 : f32 to vector<256x64xf32>
      %284 = arith.mulf %280, %283 : vector<256x64xf32>
      %285 = math.erf %284 : vector<256x64xf32>
      %cst_326 = arith.constant 1.000000e+00 : f32
      %286 = vector.broadcast %cst_326 : f32 to vector<256x64xf32>
      %287 = arith.addf %286, %285 : vector<256x64xf32>
      %288 = arith.mulf %282, %287 : vector<256x64xf32>
      %289 = vector.shape_cast %288 : vector<256x64xf32> to vector<2x8x16x64xf32>
      %290 = vector.extract_strided_slice %289 {offsets = [0, 0, 0, 0], sizes = [2, 1, 16, 64], strides = [1, 1, 1, 1]} : vector<2x8x16x64xf32> to vector<2x1x16x64xf32>
      %291 = vector.shape_cast %290 : vector<2x1x16x64xf32> to vector<2x16x64xf32>
      %292 = vector.extract_strided_slice %289 {offsets = [0, 1, 0, 0], sizes = [2, 1, 16, 64], strides = [1, 1, 1, 1]} : vector<2x8x16x64xf32> to vector<2x1x16x64xf32>
      %293 = vector.shape_cast %292 : vector<2x1x16x64xf32> to vector<2x16x64xf32>
      %294 = arith.maximumf %291, %293 : vector<2x16x64xf32>
      %295 = vector.extract_strided_slice %289 {offsets = [0, 2, 0, 0], sizes = [2, 1, 16, 64], strides = [1, 1, 1, 1]} : vector<2x8x16x64xf32> to vector<2x1x16x64xf32>
      %296 = vector.shape_cast %295 : vector<2x1x16x64xf32> to vector<2x16x64xf32>
      %297 = vector.extract_strided_slice %289 {offsets = [0, 3, 0, 0], sizes = [2, 1, 16, 64], strides = [1, 1, 1, 1]} : vector<2x8x16x64xf32> to vector<2x1x16x64xf32>
      %298 = vector.shape_cast %297 : vector<2x1x16x64xf32> to vector<2x16x64xf32>
      %299 = arith.maximumf %296, %298 : vector<2x16x64xf32>
      %300 = vector.extract_strided_slice %289 {offsets = [0, 4, 0, 0], sizes = [2, 1, 16, 64], strides = [1, 1, 1, 1]} : vector<2x8x16x64xf32> to vector<2x1x16x64xf32>
      %301 = vector.shape_cast %300 : vector<2x1x16x64xf32> to vector<2x16x64xf32>
      %302 = vector.extract_strided_slice %289 {offsets = [0, 5, 0, 0], sizes = [2, 1, 16, 64], strides = [1, 1, 1, 1]} : vector<2x8x16x64xf32> to vector<2x1x16x64xf32>
      %303 = vector.shape_cast %302 : vector<2x1x16x64xf32> to vector<2x16x64xf32>
      %304 = arith.maximumf %301, %303 : vector<2x16x64xf32>
      %305 = vector.extract_strided_slice %289 {offsets = [0, 6, 0, 0], sizes = [2, 1, 16, 64], strides = [1, 1, 1, 1]} : vector<2x8x16x64xf32> to vector<2x1x16x64xf32>
      %306 = vector.shape_cast %305 : vector<2x1x16x64xf32> to vector<2x16x64xf32>
      %307 = vector.extract_strided_slice %289 {offsets = [0, 7, 0, 0], sizes = [2, 1, 16, 64], strides = [1, 1, 1, 1]} : vector<2x8x16x64xf32> to vector<2x1x16x64xf32>
      %308 = vector.shape_cast %307 : vector<2x1x16x64xf32> to vector<2x16x64xf32>
      %309 = arith.maximumf %306, %308 : vector<2x16x64xf32>
      %310 = vector.shape_cast %294 : vector<2x16x64xf32> to vector<2x1x16x64xf32>
      %311 = vector.shape_cast %299 : vector<2x16x64xf32> to vector<2x1x16x64xf32>
      %312 = vector.shape_cast %304 : vector<2x16x64xf32> to vector<2x1x16x64xf32>
      %313 = vector.shape_cast %309 : vector<2x16x64xf32> to vector<2x1x16x64xf32>
      %314 = tpu.concatenate %310, %311, %312, %313 in 1 : vector<2x1x16x64xf32>, vector<2x1x16x64xf32>, vector<2x1x16x64xf32>, vector<2x1x16x64xf32> -> vector<2x4x16x64xf32>
      %c0_327 = arith.constant 0 : index
      %c0_328 = arith.constant 0 : index
      %c0_329 = arith.constant 0 : index
      %c0_330 = arith.constant 0 : index
      %315 = vector.load %arg14[%c0_327, %c0_328, %c0_329, %c0_330] : memref<2x4x16x64xf32, #tpu.memory_space<vmem>>, vector<2x4x16x64xf32>
      tpu.vector_store %arg14[%c0_327, %c0_328, %c0_329, %c0_330], %314 {strides = array<i32>} : memref<2x4x16x64xf32, #tpu.memory_space<vmem>>, vector<2x4x16x64xf32>,
      %c0_331 = arith.constant 0 : index
      %c0_332 = arith.constant 0 : index
      %c0_333 = arith.constant 0 : index
      %c0_334 = arith.constant 0 : index
      %316 = tpu.strided_load %arg14[%c0_331, %c0_332, %c0_333, %c0_334] {strides = array<i32: 1, 1, 2, 1>} : memref<2x4x16x64xf32, #tpu.memory_space<vmem>>, vector<2x4x8x64xf32>
      %c0_335 = arith.constant 0 : index
      %c0_336 = arith.constant 0 : index
      %c1_337 = arith.constant 1 : index
      %c0_338 = arith.constant 0 : index
      %317 = tpu.strided_load %arg14[%c0_335, %c0_336, %c1_337, %c0_338] {strides = array<i32: 1, 1, 2, 1>} : memref<2x4x16x64xf32, #tpu.memory_space<vmem>>, vector<2x4x8x64xf32>
      %318 = arith.maximumf %316, %317 : vector<2x4x8x64xf32>
      %c4_i32_339 = arith.constant 4 : i32
      %319 = arith.muli %c4_i32_339, %201 : i32
      %c1_i32_340 = arith.constant 1 : i32
      %320 = arith.addi %c1_i32_340, %319 : i32
      %c0_341 = arith.constant 0 : index
      %321 = arith.index_cast %320 : i32 to index
      %c1_342 = arith.constant 1 : index
      %c0_343 = arith.constant 0 : index
      %322 = vector.load %arg12[%c0_341, %321, %c1_342, %c0_343] : memref<2x10x10x64xf32, #tpu.memory_space<vmem>>, vector<2x4x8x64xf32>
      tpu.vector_store %arg12[%c0_341, %321, %c1_342, %c0_343], %318 {strides = array<i32>} : memref<2x10x10x64xf32, #tpu.memory_space<vmem>>, vector<2x4x8x64xf32>,
    }
    %c2_i32_11 = arith.constant 2 : i32
    %cst_12 = arith.constant 0.000000e+00 : f32
    %6 = vector.broadcast %cst_12 : f32 to vector<128x128xf32>
    %c0_13 = arith.constant 0 : index
    %c0_14 = arith.constant 0 : index
    %c0_15 = arith.constant 0 : index
    %c0_16 = arith.constant 0 : index
    %7 = vector.load %arg12[%c0_13, %c0_14, %c0_15, %c0_16] : memref<2x10x10x64xf32, #tpu.memory_space<vmem>>, vector<2x8x8x64xf32>
    %8 = vector.shape_cast %7 : vector<2x8x8x64xf32> to vector<128x64xf32>
    %c0_17 = arith.constant 0 : index
    %c0_18 = arith.constant 0 : index
    %c0_19 = arith.constant 0 : index
    %c0_20 = arith.constant 0 : index
    %9 = vector.load %arg6[%c0_17, %c0_18, %c0_19, %c0_20] : memref<1x9x64x128xf32, #tpu.memory_space<vmem>>, vector<1x1x64x128xf32>
    %10 = vector.shape_cast %9 : vector<1x1x64x128xf32> to vector<64x128xf32>
    %cst_21 = arith.constant dense<0.000000e+00> : vector<128x128xf32>
    %11 = tpu.matmul %8, %10, %cst_21 {dimension_numbers = #tpu.dot_dimension_numbers<[1], [0], [0], [1], [0, 0, 1, 1], [], []>} : vector<128x64xf32>, vector<64x128xf32>, vector<128x128xf32> -> vector<128x128xf32>
    %12 = arith.addf %6, %11 : vector<128x128xf32>
    %c0_22 = arith.constant 0 : index
    %c0_23 = arith.constant 0 : index
    %c1 = arith.constant 1 : index
    %c0_24 = arith.constant 0 : index
    %13 = vector.load %arg12[%c0_22, %c0_23, %c1, %c0_24] : memref<2x10x10x64xf32, #tpu.memory_space<vmem>>, vector<2x8x8x64xf32>
    %14 = vector.shape_cast %13 : vector<2x8x8x64xf32> to vector<128x64xf32>
    %c0_25 = arith.constant 0 : index
    %c1_26 = arith.constant 1 : index
    %c0_27 = arith.constant 0 : index
    %c0_28 = arith.constant 0 : index
    %15 = vector.load %arg6[%c0_25, %c1_26, %c0_27, %c0_28] : memref<1x9x64x128xf32, #tpu.memory_space<vmem>>, vector<1x1x64x128xf32>
    %16 = vector.shape_cast %15 : vector<1x1x64x128xf32> to vector<64x128xf32>
    %cst_29 = arith.constant dense<0.000000e+00> : vector<128x128xf32>
    %17 = tpu.matmul %14, %16, %cst_29 {dimension_numbers = #tpu.dot_dimension_numbers<[1], [0], [0], [1], [0, 0, 1, 1], [], []>} : vector<128x64xf32>, vector<64x128xf32>, vector<128x128xf32> -> vector<128x128xf32>
    %18 = arith.addf %12, %17 : vector<128x128xf32>
    %c0_30 = arith.constant 0 : index
    %c0_31 = arith.constant 0 : index
    %c2 = arith.constant 2 : index
    %c0_32 = arith.constant 0 : index
    %19 = vector.load %arg12[%c0_30, %c0_31, %c2, %c0_32] : memref<2x10x10x64xf32, #tpu.memory_space<vmem>>, vector<2x8x8x64xf32>
    %20 = vector.shape_cast %19 : vector<2x8x8x64xf32> to vector<128x64xf32>
    %c0_33 = arith.constant 0 : index
    %c2_34 = arith.constant 2 : index
    %c0_35 = arith.constant 0 : index
    %c0_36 = arith.constant 0 : index
    %21 = vector.load %arg6[%c0_33, %c2_34, %c0_35, %c0_36] : memref<1x9x64x128xf32, #tpu.memory_space<vmem>>, vector<1x1x64x128xf32>
    %22 = vector.shape_cast %21 : vector<1x1x64x128xf32> to vector<64x128xf32>
    %cst_37 = arith.constant dense<0.000000e+00> : vector<128x128xf32>
    %23 = tpu.matmul %20, %22, %cst_37 {dimension_numbers = #tpu.dot_dimension_numbers<[1], [0], [0], [1], [0, 0, 1, 1], [], []>} : vector<128x64xf32>, vector<64x128xf32>, vector<128x128xf32> -> vector<128x128xf32>
    %24 = arith.addf %18, %23 : vector<128x128xf32>
    %c0_38 = arith.constant 0 : index
    %c1_39 = arith.constant 1 : index
    %c0_40 = arith.constant 0 : index
    %c0_41 = arith.constant 0 : index
    %25 = vector.load %arg12[%c0_38, %c1_39, %c0_40, %c0_41] : memref<2x10x10x64xf32, #tpu.memory_space<vmem>>, vector<2x8x8x64xf32>
    %26 = vector.shape_cast %25 : vector<2x8x8x64xf32> to vector<128x64xf32>
    %c0_42 = arith.constant 0 : index
    %c3 = arith.constant 3 : index
    %c0_43 = arith.constant 0 : index
    %c0_44 = arith.constant 0 : index
    %27 = vector.load %arg6[%c0_42, %c3, %c0_43, %c0_44] : memref<1x9x64x128xf32, #tpu.memory_space<vmem>>, vector<1x1x64x128xf32>
    %28 = vector.shape_cast %27 : vector<1x1x64x128xf32> to vector<64x128xf32>
    %cst_45 = arith.constant dense<0.000000e+00> : vector<128x128xf32>
    %29 = tpu.matmul %26, %28, %cst_45 {dimension_numbers = #tpu.dot_dimension_numbers<[1], [0], [0], [1], [0, 0, 1, 1], [], []>} : vector<128x64xf32>, vector<64x128xf32>, vector<128x128xf32> -> vector<128x128xf32>
    %30 = arith.addf %24, %29 : vector<128x128xf32>
    %c0_46 = arith.constant 0 : index
    %c1_47 = arith.constant 1 : index
    %c1_48 = arith.constant 1 : index
    %c0_49 = arith.constant 0 : index
    %31 = vector.load %arg12[%c0_46, %c1_47, %c1_48, %c0_49] : memref<2x10x10x64xf32, #tpu.memory_space<vmem>>, vector<2x8x8x64xf32>
    %32 = vector.shape_cast %31 : vector<2x8x8x64xf32> to vector<128x64xf32>
    %c0_50 = arith.constant 0 : index
    %c4 = arith.constant 4 : index
    %c0_51 = arith.constant 0 : index
    %c0_52 = arith.constant 0 : index
    %33 = vector.load %arg6[%c0_50, %c4, %c0_51, %c0_52] : memref<1x9x64x128xf32, #tpu.memory_space<vmem>>, vector<1x1x64x128xf32>
    %34 = vector.shape_cast %33 : vector<1x1x64x128xf32> to vector<64x128xf32>
    %cst_53 = arith.constant dense<0.000000e+00> : vector<128x128xf32>
    %35 = tpu.matmul %32, %34, %cst_53 {dimension_numbers = #tpu.dot_dimension_numbers<[1], [0], [0], [1], [0, 0, 1, 1], [], []>} : vector<128x64xf32>, vector<64x128xf32>, vector<128x128xf32> -> vector<128x128xf32>
    %36 = arith.addf %30, %35 : vector<128x128xf32>
    %c0_54 = arith.constant 0 : index
    %c1_55 = arith.constant 1 : index
    %c2_56 = arith.constant 2 : index
    %c0_57 = arith.constant 0 : index
    %37 = vector.load %arg12[%c0_54, %c1_55, %c2_56, %c0_57] : memref<2x10x10x64xf32, #tpu.memory_space<vmem>>, vector<2x8x8x64xf32>
    %38 = vector.shape_cast %37 : vector<2x8x8x64xf32> to vector<128x64xf32>
    %c0_58 = arith.constant 0 : index
    %c5 = arith.constant 5 : index
    %c0_59 = arith.constant 0 : index
    %c0_60 = arith.constant 0 : index
    %39 = vector.load %arg6[%c0_58, %c5, %c0_59, %c0_60] : memref<1x9x64x128xf32, #tpu.memory_space<vmem>>, vector<1x1x64x128xf32>
    %40 = vector.shape_cast %39 : vector<1x1x64x128xf32> to vector<64x128xf32>
    %cst_61 = arith.constant dense<0.000000e+00> : vector<128x128xf32>
    %41 = tpu.matmul %38, %40, %cst_61 {dimension_numbers = #tpu.dot_dimension_numbers<[1], [0], [0], [1], [0, 0, 1, 1], [], []>} : vector<128x64xf32>, vector<64x128xf32>, vector<128x128xf32> -> vector<128x128xf32>
    %42 = arith.addf %36, %41 : vector<128x128xf32>
    %c0_62 = arith.constant 0 : index
    %c2_63 = arith.constant 2 : index
    %c0_64 = arith.constant 0 : index
    %c0_65 = arith.constant 0 : index
    %43 = vector.load %arg12[%c0_62, %c2_63, %c0_64, %c0_65] : memref<2x10x10x64xf32, #tpu.memory_space<vmem>>, vector<2x8x8x64xf32>
    %44 = vector.shape_cast %43 : vector<2x8x8x64xf32> to vector<128x64xf32>
    %c0_66 = arith.constant 0 : index
    %c6 = arith.constant 6 : index
    %c0_67 = arith.constant 0 : index
    %c0_68 = arith.constant 0 : index
    %45 = vector.load %arg6[%c0_66, %c6, %c0_67, %c0_68] : memref<1x9x64x128xf32, #tpu.memory_space<vmem>>, vector<1x1x64x128xf32>
    %46 = vector.shape_cast %45 : vector<1x1x64x128xf32> to vector<64x128xf32>
    %cst_69 = arith.constant dense<0.000000e+00> : vector<128x128xf32>
    %47 = tpu.matmul %44, %46, %cst_69 {dimension_numbers = #tpu.dot_dimension_numbers<[1], [0], [0], [1], [0, 0, 1, 1], [], []>} : vector<128x64xf32>, vector<64x128xf32>, vector<128x128xf32> -> vector<128x128xf32>
    %48 = arith.addf %42, %47 : vector<128x128xf32>
    %c0_70 = arith.constant 0 : index
    %c2_71 = arith.constant 2 : index
    %c1_72 = arith.constant 1 : index
    %c0_73 = arith.constant 0 : index
    %49 = vector.load %arg12[%c0_70, %c2_71, %c1_72, %c0_73] : memref<2x10x10x64xf32, #tpu.memory_space<vmem>>, vector<2x8x8x64xf32>
    %50 = vector.shape_cast %49 : vector<2x8x8x64xf32> to vector<128x64xf32>
    %c0_74 = arith.constant 0 : index
    %c7 = arith.constant 7 : index
    %c0_75 = arith.constant 0 : index
    %c0_76 = arith.constant 0 : index
    %51 = vector.load %arg6[%c0_74, %c7, %c0_75, %c0_76] : memref<1x9x64x128xf32, #tpu.memory_space<vmem>>, vector<1x1x64x128xf32>
    %52 = vector.shape_cast %51 : vector<1x1x64x128xf32> to vector<64x128xf32>
    %cst_77 = arith.constant dense<0.000000e+00> : vector<128x128xf32>
    %53 = tpu.matmul %50, %52, %cst_77 {dimension_numbers = #tpu.dot_dimension_numbers<[1], [0], [0], [1], [0, 0, 1, 1], [], []>} : vector<128x64xf32>, vector<64x128xf32>, vector<128x128xf32> -> vector<128x128xf32>
    %54 = arith.addf %48, %53 : vector<128x128xf32>
    %c0_78 = arith.constant 0 : index
    %c2_79 = arith.constant 2 : index
    %c2_80 = arith.constant 2 : index
    %c0_81 = arith.constant 0 : index
    %55 = vector.load %arg12[%c0_78, %c2_79, %c2_80, %c0_81] : memref<2x10x10x64xf32, #tpu.memory_space<vmem>>, vector<2x8x8x64xf32>
    %56 = vector.shape_cast %55 : vector<2x8x8x64xf32> to vector<128x64xf32>
    %c0_82 = arith.constant 0 : index
    %c8 = arith.constant 8 : index
    %c0_83 = arith.constant 0 : index
    %c0_84 = arith.constant 0 : index
    %57 = vector.load %arg6[%c0_82, %c8, %c0_83, %c0_84] : memref<1x9x64x128xf32, #tpu.memory_space<vmem>>, vector<1x1x64x128xf32>
    %58 = vector.shape_cast %57 : vector<1x1x64x128xf32> to vector<64x128xf32>
    %cst_85 = arith.constant dense<0.000000e+00> : vector<128x128xf32>
    %59 = tpu.matmul %56, %58, %cst_85 {dimension_numbers = #tpu.dot_dimension_numbers<[1], [0], [0], [1], [0, 0, 1, 1], [], []>} : vector<128x64xf32>, vector<64x128xf32>, vector<128x128xf32> -> vector<128x128xf32>
    %60 = arith.addf %54, %59 : vector<128x128xf32>
    %c0_86 = arith.constant 0 : index
    %c0_87 = arith.constant 0 : index
    %c0_88 = arith.constant 0 : index
    %61 = vector.load %arg7[%c0_86, %c0_87, %c0_88] : memref<1x1x128xf32, #tpu.memory_space<vmem>>, vector<1x1x128xf32>
    %62 = vector.shape_cast %61 : vector<1x1x128xf32> to vector<1x128xf32>
    %63 = vector.broadcast %62 : vector<1x128xf32> to vector<128x128xf32>
    %64 = arith.addf %60, %63 : vector<128x128xf32>
    %cst_89 = arith.constant 5.000000e-01 : f32
    %65 = vector.broadcast %cst_89 : f32 to vector<128x128xf32>
    %66 = arith.mulf %65, %64 : vector<128x128xf32>
    %cst_90 = arith.constant 0.707106769 : f32
    %67 = vector.broadcast %cst_90 : f32 to vector<128x128xf32>
    %68 = arith.mulf %64, %67 : vector<128x128xf32>
    %69 = math.erf %68 : vector<128x128xf32>
    %cst_91 = arith.constant 1.000000e+00 : f32
    %70 = vector.broadcast %cst_91 : f32 to vector<128x128xf32>
    %71 = arith.addf %70, %69 : vector<128x128xf32>
    %72 = arith.mulf %66, %71 : vector<128x128xf32>
    %73 = vector.shape_cast %72 : vector<128x128xf32> to vector<2x8x8x128xf32>
    %74 = vector.extract_strided_slice %73 {offsets = [0, 0, 0, 0], sizes = [2, 1, 8, 128], strides = [1, 1, 1, 1]} : vector<2x8x8x128xf32> to vector<2x1x8x128xf32>
    %75 = vector.shape_cast %74 : vector<2x1x8x128xf32> to vector<2x8x128xf32>
    %76 = vector.extract_strided_slice %73 {offsets = [0, 1, 0, 0], sizes = [2, 1, 8, 128], strides = [1, 1, 1, 1]} : vector<2x8x8x128xf32> to vector<2x1x8x128xf32>
    %77 = vector.shape_cast %76 : vector<2x1x8x128xf32> to vector<2x8x128xf32>
    %78 = arith.maximumf %75, %77 : vector<2x8x128xf32>
    %79 = vector.extract_strided_slice %73 {offsets = [0, 2, 0, 0], sizes = [2, 1, 8, 128], strides = [1, 1, 1, 1]} : vector<2x8x8x128xf32> to vector<2x1x8x128xf32>
    %80 = vector.shape_cast %79 : vector<2x1x8x128xf32> to vector<2x8x128xf32>
    %81 = vector.extract_strided_slice %73 {offsets = [0, 3, 0, 0], sizes = [2, 1, 8, 128], strides = [1, 1, 1, 1]} : vector<2x8x8x128xf32> to vector<2x1x8x128xf32>
    %82 = vector.shape_cast %81 : vector<2x1x8x128xf32> to vector<2x8x128xf32>
    %83 = arith.maximumf %80, %82 : vector<2x8x128xf32>
    %84 = vector.extract_strided_slice %73 {offsets = [0, 4, 0, 0], sizes = [2, 1, 8, 128], strides = [1, 1, 1, 1]} : vector<2x8x8x128xf32> to vector<2x1x8x128xf32>
    %85 = vector.shape_cast %84 : vector<2x1x8x128xf32> to vector<2x8x128xf32>
    %86 = vector.extract_strided_slice %73 {offsets = [0, 5, 0, 0], sizes = [2, 1, 8, 128], strides = [1, 1, 1, 1]} : vector<2x8x8x128xf32> to vector<2x1x8x128xf32>
    %87 = vector.shape_cast %86 : vector<2x1x8x128xf32> to vector<2x8x128xf32>
    %88 = arith.maximumf %85, %87 : vector<2x8x128xf32>
    %89 = vector.extract_strided_slice %73 {offsets = [0, 6, 0, 0], sizes = [2, 1, 8, 128], strides = [1, 1, 1, 1]} : vector<2x8x8x128xf32> to vector<2x1x8x128xf32>
    %90 = vector.shape_cast %89 : vector<2x1x8x128xf32> to vector<2x8x128xf32>
    %91 = vector.extract_strided_slice %73 {offsets = [0, 7, 0, 0], sizes = [2, 1, 8, 128], strides = [1, 1, 1, 1]} : vector<2x8x8x128xf32> to vector<2x1x8x128xf32>
    %92 = vector.shape_cast %91 : vector<2x1x8x128xf32> to vector<2x8x128xf32>
    %93 = arith.maximumf %90, %92 : vector<2x8x128xf32>
    %94 = vector.shape_cast %78 : vector<2x8x128xf32> to vector<2x1x8x128xf32>
    %95 = vector.shape_cast %83 : vector<2x8x128xf32> to vector<2x1x8x128xf32>
    %96 = vector.shape_cast %88 : vector<2x8x128xf32> to vector<2x1x8x128xf32>
    %97 = vector.shape_cast %93 : vector<2x8x128xf32> to vector<2x1x8x128xf32>
    %98 = tpu.concatenate %94, %95, %96, %97 in 1 : vector<2x1x8x128xf32>, vector<2x1x8x128xf32>, vector<2x1x8x128xf32>, vector<2x1x8x128xf32> -> vector<2x4x8x128xf32>
    %c0_92 = arith.constant 0 : index
    %c0_93 = arith.constant 0 : index
    %c0_94 = arith.constant 0 : index
    %c0_95 = arith.constant 0 : index
    %99 = vector.load %arg15[%c0_92, %c0_93, %c0_94, %c0_95] : memref<2x4x8x128xf32, #tpu.memory_space<vmem>>, vector<2x4x8x128xf32>
    tpu.vector_store %arg15[%c0_92, %c0_93, %c0_94, %c0_95], %98 {strides = array<i32>} : memref<2x4x8x128xf32, #tpu.memory_space<vmem>>, vector<2x4x8x128xf32>,
    %c0_96 = arith.constant 0 : index
    %c0_97 = arith.constant 0 : index
    %c0_98 = arith.constant 0 : index
    %c0_99 = arith.constant 0 : index
    %100 = vector.load %arg15[%c0_96, %c0_97, %c0_98, %c0_99] : memref<2x4x8x128xf32, #tpu.memory_space<vmem>>, vector<2x1x1x128xf32>
    %101 = vector.shape_cast %100 : vector<2x1x1x128xf32> to vector<2x128xf32>
    %c0_100 = arith.constant 0 : index
    %c0_101 = arith.constant 0 : index
    %c1_102 = arith.constant 1 : index
    %c0_103 = arith.constant 0 : index
    %102 = vector.load %arg15[%c0_100, %c0_101, %c1_102, %c0_103] : memref<2x4x8x128xf32, #tpu.memory_space<vmem>>, vector<2x1x1x128xf32>
    %103 = vector.shape_cast %102 : vector<2x1x1x128xf32> to vector<2x128xf32>
    %104 = arith.maximumf %101, %103 : vector<2x128xf32>
    %c0_104 = arith.constant 0 : index
    %c0_105 = arith.constant 0 : index
    %c2_106 = arith.constant 2 : index
    %c0_107 = arith.constant 0 : index
    %105 = vector.load %arg15[%c0_104, %c0_105, %c2_106, %c0_107] : memref<2x4x8x128xf32, #tpu.memory_space<vmem>>, vector<2x1x1x128xf32>
    %106 = vector.shape_cast %105 : vector<2x1x1x128xf32> to vector<2x128xf32>
    %c0_108 = arith.constant 0 : index
    %c0_109 = arith.constant 0 : index
    %c3_110 = arith.constant 3 : index
    %c0_111 = arith.constant 0 : index
    %107 = vector.load %arg15[%c0_108, %c0_109, %c3_110, %c0_111] : memref<2x4x8x128xf32, #tpu.memory_space<vmem>>, vector<2x1x1x128xf32>
    %108 = vector.shape_cast %107 : vector<2x1x1x128xf32> to vector<2x128xf32>
    %109 = arith.maximumf %106, %108 : vector<2x128xf32>
    %c0_112 = arith.constant 0 : index
    %c0_113 = arith.constant 0 : index
    %c4_114 = arith.constant 4 : index
    %c0_115 = arith.constant 0 : index
    %110 = vector.load %arg15[%c0_112, %c0_113, %c4_114, %c0_115] : memref<2x4x8x128xf32, #tpu.memory_space<vmem>>, vector<2x1x1x128xf32>
    %111 = vector.shape_cast %110 : vector<2x1x1x128xf32> to vector<2x128xf32>
    %c0_116 = arith.constant 0 : index
    %c0_117 = arith.constant 0 : index
    %c5_118 = arith.constant 5 : index
    %c0_119 = arith.constant 0 : index
    %112 = vector.load %arg15[%c0_116, %c0_117, %c5_118, %c0_119] : memref<2x4x8x128xf32, #tpu.memory_space<vmem>>, vector<2x1x1x128xf32>
    %113 = vector.shape_cast %112 : vector<2x1x1x128xf32> to vector<2x128xf32>
    %114 = arith.maximumf %111, %113 : vector<2x128xf32>
    %c0_120 = arith.constant 0 : index
    %c0_121 = arith.constant 0 : index
    %c6_122 = arith.constant 6 : index
    %c0_123 = arith.constant 0 : index
    %115 = vector.load %arg15[%c0_120, %c0_121, %c6_122, %c0_123] : memref<2x4x8x128xf32, #tpu.memory_space<vmem>>, vector<2x1x1x128xf32>
    %116 = vector.shape_cast %115 : vector<2x1x1x128xf32> to vector<2x128xf32>
    %c0_124 = arith.constant 0 : index
    %c0_125 = arith.constant 0 : index
    %c7_126 = arith.constant 7 : index
    %c0_127 = arith.constant 0 : index
    %117 = vector.load %arg15[%c0_124, %c0_125, %c7_126, %c0_127] : memref<2x4x8x128xf32, #tpu.memory_space<vmem>>, vector<2x1x1x128xf32>
    %118 = vector.shape_cast %117 : vector<2x1x1x128xf32> to vector<2x128xf32>
    %119 = arith.maximumf %116, %118 : vector<2x128xf32>
    %c0_128 = arith.constant 0 : index
    %c1_129 = arith.constant 1 : index
    %c0_130 = arith.constant 0 : index
    %c0_131 = arith.constant 0 : index
    %120 = vector.load %arg15[%c0_128, %c1_129, %c0_130, %c0_131] : memref<2x4x8x128xf32, #tpu.memory_space<vmem>>, vector<2x1x1x128xf32>
    %121 = vector.shape_cast %120 : vector<2x1x1x128xf32> to vector<2x128xf32>
    %c0_132 = arith.constant 0 : index
    %c1_133 = arith.constant 1 : index
    %c1_134 = arith.constant 1 : index
    %c0_135 = arith.constant 0 : index
    %122 = vector.load %arg15[%c0_132, %c1_133, %c1_134, %c0_135] : memref<2x4x8x128xf32, #tpu.memory_space<vmem>>, vector<2x1x1x128xf32>
    %123 = vector.shape_cast %122 : vector<2x1x1x128xf32> to vector<2x128xf32>
    %124 = arith.maximumf %121, %123 : vector<2x128xf32>
    %c0_136 = arith.constant 0 : index
    %c1_137 = arith.constant 1 : index
    %c2_138 = arith.constant 2 : index
    %c0_139 = arith.constant 0 : index
    %125 = vector.load %arg15[%c0_136, %c1_137, %c2_138, %c0_139] : memref<2x4x8x128xf32, #tpu.memory_space<vmem>>, vector<2x1x1x128xf32>
    %126 = vector.shape_cast %125 : vector<2x1x1x128xf32> to vector<2x128xf32>
    %c0_140 = arith.constant 0 : index
    %c1_141 = arith.constant 1 : index
    %c3_142 = arith.constant 3 : index
    %c0_143 = arith.constant 0 : index
    %127 = vector.load %arg15[%c0_140, %c1_141, %c3_142, %c0_143] : memref<2x4x8x128xf32, #tpu.memory_space<vmem>>, vector<2x1x1x128xf32>
    %128 = vector.shape_cast %127 : vector<2x1x1x128xf32> to vector<2x128xf32>
    %129 = arith.maximumf %126, %128 : vector<2x128xf32>
    %c0_144 = arith.constant 0 : index
    %c1_145 = arith.constant 1 : index
    %c4_146 = arith.constant 4 : index
    %c0_147 = arith.constant 0 : index
    %130 = vector.load %arg15[%c0_144, %c1_145, %c4_146, %c0_147] : memref<2x4x8x128xf32, #tpu.memory_space<vmem>>, vector<2x1x1x128xf32>
    %131 = vector.shape_cast %130 : vector<2x1x1x128xf32> to vector<2x128xf32>
    %c0_148 = arith.constant 0 : index
    %c1_149 = arith.constant 1 : index
    %c5_150 = arith.constant 5 : index
    %c0_151 = arith.constant 0 : index
    %132 = vector.load %arg15[%c0_148, %c1_149, %c5_150, %c0_151] : memref<2x4x8x128xf32, #tpu.memory_space<vmem>>, vector<2x1x1x128xf32>
    %133 = vector.shape_cast %132 : vector<2x1x1x128xf32> to vector<2x128xf32>
    %134 = arith.maximumf %131, %133 : vector<2x128xf32>
    %c0_152 = arith.constant 0 : index
    %c1_153 = arith.constant 1 : index
    %c6_154 = arith.constant 6 : index
    %c0_155 = arith.constant 0 : index
    %135 = vector.load %arg15[%c0_152, %c1_153, %c6_154, %c0_155] : memref<2x4x8x128xf32, #tpu.memory_space<vmem>>, vector<2x1x1x128xf32>
    %136 = vector.shape_cast %135 : vector<2x1x1x128xf32> to vector<2x128xf32>
    %c0_156 = arith.constant 0 : index
    %c1_157 = arith.constant 1 : index
    %c7_158 = arith.constant 7 : index
    %c0_159 = arith.constant 0 : index
    %137 = vector.load %arg15[%c0_156, %c1_157, %c7_158, %c0_159] : memref<2x4x8x128xf32, #tpu.memory_space<vmem>>, vector<2x1x1x128xf32>
    %138 = vector.shape_cast %137 : vector<2x1x1x128xf32> to vector<2x128xf32>
    %139 = arith.maximumf %136, %138 : vector<2x128xf32>
    %c0_160 = arith.constant 0 : index
    %c2_161 = arith.constant 2 : index
    %c0_162 = arith.constant 0 : index
    %c0_163 = arith.constant 0 : index
    %140 = vector.load %arg15[%c0_160, %c2_161, %c0_162, %c0_163] : memref<2x4x8x128xf32, #tpu.memory_space<vmem>>, vector<2x1x1x128xf32>
    %141 = vector.shape_cast %140 : vector<2x1x1x128xf32> to vector<2x128xf32>
    %c0_164 = arith.constant 0 : index
    %c2_165 = arith.constant 2 : index
    %c1_166 = arith.constant 1 : index
    %c0_167 = arith.constant 0 : index
    %142 = vector.load %arg15[%c0_164, %c2_165, %c1_166, %c0_167] : memref<2x4x8x128xf32, #tpu.memory_space<vmem>>, vector<2x1x1x128xf32>
    %143 = vector.shape_cast %142 : vector<2x1x1x128xf32> to vector<2x128xf32>
    %144 = arith.maximumf %141, %143 : vector<2x128xf32>
    %c0_168 = arith.constant 0 : index
    %c2_169 = arith.constant 2 : index
    %c2_170 = arith.constant 2 : index
    %c0_171 = arith.constant 0 : index
    %145 = vector.load %arg15[%c0_168, %c2_169, %c2_170, %c0_171] : memref<2x4x8x128xf32, #tpu.memory_space<vmem>>, vector<2x1x1x128xf32>
    %146 = vector.shape_cast %145 : vector<2x1x1x128xf32> to vector<2x128xf32>
    %c0_172 = arith.constant 0 : index
    %c2_173 = arith.constant 2 : index
    %c3_174 = arith.constant 3 : index
    %c0_175 = arith.constant 0 : index
    %147 = vector.load %arg15[%c0_172, %c2_173, %c3_174, %c0_175] : memref<2x4x8x128xf32, #tpu.memory_space<vmem>>, vector<2x1x1x128xf32>
    %148 = vector.shape_cast %147 : vector<2x1x1x128xf32> to vector<2x128xf32>
    %149 = arith.maximumf %146, %148 : vector<2x128xf32>
    %c0_176 = arith.constant 0 : index
    %c2_177 = arith.constant 2 : index
    %c4_178 = arith.constant 4 : index
    %c0_179 = arith.constant 0 : index
    %150 = vector.load %arg15[%c0_176, %c2_177, %c4_178, %c0_179] : memref<2x4x8x128xf32, #tpu.memory_space<vmem>>, vector<2x1x1x128xf32>
    %151 = vector.shape_cast %150 : vector<2x1x1x128xf32> to vector<2x128xf32>
    %c0_180 = arith.constant 0 : index
    %c2_181 = arith.constant 2 : index
    %c5_182 = arith.constant 5 : index
    %c0_183 = arith.constant 0 : index
    %152 = vector.load %arg15[%c0_180, %c2_181, %c5_182, %c0_183] : memref<2x4x8x128xf32, #tpu.memory_space<vmem>>, vector<2x1x1x128xf32>
    %153 = vector.shape_cast %152 : vector<2x1x1x128xf32> to vector<2x128xf32>
    %154 = arith.maximumf %151, %153 : vector<2x128xf32>
    %c0_184 = arith.constant 0 : index
    %c2_185 = arith.constant 2 : index
    %c6_186 = arith.constant 6 : index
    %c0_187 = arith.constant 0 : index
    %155 = vector.load %arg15[%c0_184, %c2_185, %c6_186, %c0_187] : memref<2x4x8x128xf32, #tpu.memory_space<vmem>>, vector<2x1x1x128xf32>
    %156 = vector.shape_cast %155 : vector<2x1x1x128xf32> to vector<2x128xf32>
    %c0_188 = arith.constant 0 : index
    %c2_189 = arith.constant 2 : index
    %c7_190 = arith.constant 7 : index
    %c0_191 = arith.constant 0 : index
    %157 = vector.load %arg15[%c0_188, %c2_189, %c7_190, %c0_191] : memref<2x4x8x128xf32, #tpu.memory_space<vmem>>, vector<2x1x1x128xf32>
    %158 = vector.shape_cast %157 : vector<2x1x1x128xf32> to vector<2x128xf32>
    %159 = arith.maximumf %156, %158 : vector<2x128xf32>
    %c0_192 = arith.constant 0 : index
    %c3_193 = arith.constant 3 : index
    %c0_194 = arith.constant 0 : index
    %c0_195 = arith.constant 0 : index
    %160 = vector.load %arg15[%c0_192, %c3_193, %c0_194, %c0_195] : memref<2x4x8x128xf32, #tpu.memory_space<vmem>>, vector<2x1x1x128xf32>
    %161 = vector.shape_cast %160 : vector<2x1x1x128xf32> to vector<2x128xf32>
    %c0_196 = arith.constant 0 : index
    %c3_197 = arith.constant 3 : index
    %c1_198 = arith.constant 1 : index
    %c0_199 = arith.constant 0 : index
    %162 = vector.load %arg15[%c0_196, %c3_197, %c1_198, %c0_199] : memref<2x4x8x128xf32, #tpu.memory_space<vmem>>, vector<2x1x1x128xf32>
    %163 = vector.shape_cast %162 : vector<2x1x1x128xf32> to vector<2x128xf32>
    %164 = arith.maximumf %161, %163 : vector<2x128xf32>
    %c0_200 = arith.constant 0 : index
    %c3_201 = arith.constant 3 : index
    %c2_202 = arith.constant 2 : index
    %c0_203 = arith.constant 0 : index
    %165 = vector.load %arg15[%c0_200, %c3_201, %c2_202, %c0_203] : memref<2x4x8x128xf32, #tpu.memory_space<vmem>>, vector<2x1x1x128xf32>
    %166 = vector.shape_cast %165 : vector<2x1x1x128xf32> to vector<2x128xf32>
    %c0_204 = arith.constant 0 : index
    %c3_205 = arith.constant 3 : index
    %c3_206 = arith.constant 3 : index
    %c0_207 = arith.constant 0 : index
    %167 = vector.load %arg15[%c0_204, %c3_205, %c3_206, %c0_207] : memref<2x4x8x128xf32, #tpu.memory_space<vmem>>, vector<2x1x1x128xf32>
    %168 = vector.shape_cast %167 : vector<2x1x1x128xf32> to vector<2x128xf32>
    %169 = arith.maximumf %166, %168 : vector<2x128xf32>
    %c0_208 = arith.constant 0 : index
    %c3_209 = arith.constant 3 : index
    %c4_210 = arith.constant 4 : index
    %c0_211 = arith.constant 0 : index
    %170 = vector.load %arg15[%c0_208, %c3_209, %c4_210, %c0_211] : memref<2x4x8x128xf32, #tpu.memory_space<vmem>>, vector<2x1x1x128xf32>
    %171 = vector.shape_cast %170 : vector<2x1x1x128xf32> to vector<2x128xf32>
    %c0_212 = arith.constant 0 : index
    %c3_213 = arith.constant 3 : index
    %c5_214 = arith.constant 5 : index
    %c0_215 = arith.constant 0 : index
    %172 = vector.load %arg15[%c0_212, %c3_213, %c5_214, %c0_215] : memref<2x4x8x128xf32, #tpu.memory_space<vmem>>, vector<2x1x1x128xf32>
    %173 = vector.shape_cast %172 : vector<2x1x1x128xf32> to vector<2x128xf32>
    %174 = arith.maximumf %171, %173 : vector<2x128xf32>
    %c0_216 = arith.constant 0 : index
    %c3_217 = arith.constant 3 : index
    %c6_218 = arith.constant 6 : index
    %c0_219 = arith.constant 0 : index
    %175 = vector.load %arg15[%c0_216, %c3_217, %c6_218, %c0_219] : memref<2x4x8x128xf32, #tpu.memory_space<vmem>>, vector<2x1x1x128xf32>
    %176 = vector.shape_cast %175 : vector<2x1x1x128xf32> to vector<2x128xf32>
    %c0_220 = arith.constant 0 : index
    %c3_221 = arith.constant 3 : index
    %c7_222 = arith.constant 7 : index
    %c0_223 = arith.constant 0 : index
    %177 = vector.load %arg15[%c0_220, %c3_221, %c7_222, %c0_223] : memref<2x4x8x128xf32, #tpu.memory_space<vmem>>, vector<2x1x1x128xf32>
    %178 = vector.shape_cast %177 : vector<2x1x1x128xf32> to vector<2x128xf32>
    %179 = arith.maximumf %176, %178 : vector<2x128xf32>
    %180 = tpu.concatenate %104, %109, %114, %119, %124, %129, %134, %139, %144, %149, %154, %159, %164, %169, %174, %179 in 1 : vector<2x128xf32>, vector<2x128xf32>, vector<2x128xf32>, vector<2x128xf32>, vector<2x128xf32>, vector<2x128xf32>, vector<2x128xf32>, vector<2x128xf32>, vector<2x128xf32>, vector<2x128xf32>, vector<2x128xf32>, vector<2x128xf32>, vector<2x128xf32>, vector<2x128xf32>, vector<2x128xf32>, vector<2x128xf32> -> vector<2x2048xf32>
    %181 = arith.truncf %180 : vector<2x2048xf32> to vector<2x2048xbf16>
    %c0_224 = arith.constant 0 : index
    %c0_225 = arith.constant 0 : index
    %c0_226 = arith.constant 0 : index
    %182 = vector.load %arg8[%c0_224, %c0_225, %c0_226] : memref<1x2048x256xbf16, #tpu.memory_space<vmem>>, vector<1x2048x256xbf16>
    %183 = vector.shape_cast %182 : vector<1x2048x256xbf16> to vector<2048x256xbf16>
    %cst_227 = arith.constant dense<0.000000e+00> : vector<2x256xf32>
    %184 = tpu.matmul %181, %183, %cst_227 {dimension_numbers = #tpu.dot_dimension_numbers<[1], [0], [0], [1], [0, 0, 1, 1], [], []>} : vector<2x2048xbf16>, vector<2048x256xbf16>, vector<2x256xf32> -> vector<2x256xf32>
    %c0_228 = arith.constant 0 : index
    %c0_229 = arith.constant 0 : index
    %c0_230 = arith.constant 0 : index
    %185 = vector.load %arg9[%c0_228, %c0_229, %c0_230] : memref<1x1x256xf32, #tpu.memory_space<vmem>>, vector<1x1x256xf32>
    %186 = vector.shape_cast %185 : vector<1x1x256xf32> to vector<1x256xf32>
    %187 = vector.broadcast %186 : vector<1x256xf32> to vector<2x256xf32>
    %188 = arith.addf %184, %187 : vector<2x256xf32>
    %cst_231 = arith.constant 5.000000e-01 : f32
    %189 = vector.broadcast %cst_231 : f32 to vector<2x256xf32>
    %190 = arith.mulf %189, %188 : vector<2x256xf32>
    %cst_232 = arith.constant 0.707106769 : f32
    %191 = vector.broadcast %cst_232 : f32 to vector<2x256xf32>
    %192 = arith.mulf %188, %191 : vector<2x256xf32>
    %193 = math.erf %192 : vector<2x256xf32>
    %cst_233 = arith.constant 1.000000e+00 : f32
    %194 = vector.broadcast %cst_233 : f32 to vector<2x256xf32>
    %195 = arith.addf %194, %193 : vector<2x256xf32>
    %196 = arith.mulf %190, %195 : vector<2x256xf32>
    %c0_234 = arith.constant 0 : index
    %c0_235 = arith.constant 0 : index
    %c0_236 = arith.constant 0 : index
    %197 = vector.load %arg10[%c0_234, %c0_235, %c0_236] : memref<1x2x256xf32, #tpu.memory_space<vmem>>, vector<1x2x256xf32>
    %198 = vector.shape_cast %197 : vector<1x2x256xf32> to vector<2x256xf32>
    %199 = vector.shape_cast %196 : vector<2x256xf32> to vector<1x2x256xf32>
    tpu.vector_store %arg10[%c0_234, %c0_235, %c0_236], %199 {strides = array<i32>} : memref<1x2x256xf32, #tpu.memory_space<vmem>>, vector<1x2x256xf32>,
    return
  }
  func.func @transform_0(%arg0: i32) -> (i32, i32, i32, i32) {
    %c0_i32 = arith.constant 0 : i32
    %c0_i32_0 = arith.constant 0 : i32
    %c0_i32_1 = arith.constant 0 : i32
    %c0_i32_2 = arith.constant 0 : i32
    %c0_i32_3 = arith.constant 0 : i32
    return %c0_i32, %c0_i32_0, %c0_i32_1, %c0_i32_2 : i32, i32, i32, i32
  }
  func.func @transform_1(%arg0: i32) -> (i32, i32, i32) {
    %c0_i32 = arith.constant 0 : i32
    %c0_i32_0 = arith.constant 0 : i32
    %c0_i32_1 = arith.constant 0 : i32
    return %arg0, %c0_i32, %c0_i32_0 : i32, i32, i32
  }
  func.func @transform_2(%arg0: i32) -> (i32, i32, i32) {
    %c0_i32 = arith.constant 0 : i32
    %c0_i32_0 = arith.constant 0 : i32
    %c0_i32_1 = arith.constant 0 : i32
    return %arg0, %c0_i32, %c0_i32_0 : i32, i32, i32
  }
  func.func @transform_3(%arg0: i32) -> (i32, i32, i32, i32) {
    %c0_i32 = arith.constant 0 : i32
    %c0_i32_0 = arith.constant 0 : i32
    %c0_i32_1 = arith.constant 0 : i32
    %c0_i32_2 = arith.constant 0 : i32
    return %arg0, %c0_i32, %c0_i32_0, %c0_i32_1 : i32, i32, i32, i32
  }
  func.func @transform_4(%arg0: i32) -> (i32, i32, i32) {
    %c0_i32 = arith.constant 0 : i32
    %c0_i32_0 = arith.constant 0 : i32
    %c0_i32_1 = arith.constant 0 : i32
    return %arg0, %c0_i32, %c0_i32_0 : i32, i32, i32
  }
  func.func @transform_5(%arg0: i32) -> (i32, i32, i32, i32) {
    %c0_i32 = arith.constant 0 : i32
    %c0_i32_0 = arith.constant 0 : i32
    %c0_i32_1 = arith.constant 0 : i32
    %c0_i32_2 = arith.constant 0 : i32
    return %arg0, %c0_i32, %c0_i32_0, %c0_i32_1 : i32, i32, i32, i32
  }
  func.func @transform_6(%arg0: i32) -> (i32, i32, i32) {
    %c0_i32 = arith.constant 0 : i32
    %c0_i32_0 = arith.constant 0 : i32
    %c0_i32_1 = arith.constant 0 : i32
    return %arg0, %c0_i32, %c0_i32_0 : i32, i32, i32
  }
  func.func @transform_7(%arg0: i32) -> (i32, i32, i32) {
    %c0_i32 = arith.constant 0 : i32
    %c0_i32_0 = arith.constant 0 : i32
    %c0_i32_1 = arith.constant 0 : i32
    return %arg0, %c0_i32, %c0_i32_0 : i32, i32, i32
  }
  func.func @transform_8(%arg0: i32) -> (i32, i32, i32) {
    %c0_i32 = arith.constant 0 : i32
    %c0_i32_0 = arith.constant 0 : i32
    %c0_i32_1 = arith.constant 0 : i32
    return %arg0, %c0_i32, %c0_i32_0 : i32, i32, i32
  }
  func.func @transform_9(%arg0: i32) -> (i32, i32, i32) {
    %c0_i32 = arith.constant 0 : i32
    %c0_i32_0 = arith.constant 0 : i32
    %c0_i32_1 = arith.constant 0 : i32
    return %arg0, %c0_i32, %c0_i32_0 : i32, i32, i32
  }
}

module attributes {stable_mosaic.version = 11 : i64} {
  func.func @lstm_head_kernel(%arg0: memref<10x256xf32, #tpu.memory_space<vmem>>, %arg1: memref<256x512xf32, #tpu.memory_space<vmem>>, %arg2: memref<128x512xf32, #tpu.memory_space<vmem>>, %arg3: memref<1x512xf32, #tpu.memory_space<vmem>>, %arg4: memref<128x256xf32, #tpu.memory_space<vmem>>, %arg5: memref<1x256xf32, #tpu.memory_space<vmem>>, %arg6: memref<256x10xf32, #tpu.memory_space<vmem>>, %arg7: memref<1x10xf32, #tpu.memory_space<vmem>>, %arg8: memref<2x10xf32, #tpu.memory_space<vmem>>) attributes {dimension_semantics = [], scalar_prefetch = 0 : i64, scratch_operands = 0 : i64, tpu.core_type = #tpu.core_type<tc>} {
    %c0 = arith.constant 0 : index
    %c0_0 = arith.constant 0 : index
    %0 = vector.load %arg0[%c0, %c0_0] : memref<10x256xf32, #tpu.memory_space<vmem>>, vector<10x256xf32>
    %c0_1 = arith.constant 0 : index
    %c0_2 = arith.constant 0 : index
    %1 = vector.load %arg1[%c0_1, %c0_2] : memref<256x512xf32, #tpu.memory_space<vmem>>, vector<256x512xf32>
    %cst = arith.constant dense<0.000000e+00> : vector<10x512xf32>
    %2 = tpu.matmul %0, %1, %cst {dimension_numbers = #tpu.dot_dimension_numbers<[1], [0], [0], [1], [0, 0, 1, 1], [], []>} : vector<10x256xf32>, vector<256x512xf32>, vector<10x512xf32> -> vector<10x512xf32>
    %c0_3 = arith.constant 0 : index
    %c0_4 = arith.constant 0 : index
    %3 = vector.load %arg3[%c0_3, %c0_4] : memref<1x512xf32, #tpu.memory_space<vmem>>, vector<1x512xf32>
    %4 = vector.broadcast %3 : vector<1x512xf32> to vector<10x512xf32>
    %5 = arith.addf %2, %4 : vector<10x512xf32>
    %cst_5 = arith.constant 0.000000e+00 : f32
    %6 = vector.broadcast %cst_5 : f32 to vector<2x128xf32>
    %cst_6 = arith.constant 0.000000e+00 : f32
    %7 = vector.broadcast %cst_6 : f32 to vector<2x128xf32>
    %8 = vector.extract_strided_slice %5 {offsets = [0, 0], sizes = [2, 512], strides = [1, 1]} : vector<10x512xf32> to vector<2x512xf32>
    %c0_7 = arith.constant 0 : index
    %c0_8 = arith.constant 0 : index
    %9 = vector.load %arg2[%c0_7, %c0_8] : memref<128x512xf32, #tpu.memory_space<vmem>>, vector<128x512xf32>
    %cst_9 = arith.constant dense<0.000000e+00> : vector<2x512xf32>
    %10 = tpu.matmul %6, %9, %cst_9 {dimension_numbers = #tpu.dot_dimension_numbers<[1], [0], [0], [1], [0, 0, 1, 1], [], []>} : vector<2x128xf32>, vector<128x512xf32>, vector<2x512xf32> -> vector<2x512xf32>
    %11 = arith.addf %8, %10 : vector<2x512xf32>
    %12 = vector.extract_strided_slice %11 {offsets = [0, 0], sizes = [2, 128], strides = [1, 1]} : vector<2x512xf32> to vector<2x128xf32>
    %13 = arith.negf %12 : vector<2x128xf32>
    %14 = math.exp %13 : vector<2x128xf32>
    %cst_10 = arith.constant 1.000000e+00 : f32
    %15 = vector.broadcast %cst_10 : f32 to vector<2x128xf32>
    %16 = arith.addf %15, %14 : vector<2x128xf32>
    %17 = arith.divf %15, %16 : vector<2x128xf32>
    %18 = vector.extract_strided_slice %11 {offsets = [0, 128], sizes = [2, 128], strides = [1, 1]} : vector<2x512xf32> to vector<2x128xf32>
    %19 = arith.negf %18 : vector<2x128xf32>
    %20 = math.exp %19 : vector<2x128xf32>
    %cst_11 = arith.constant 1.000000e+00 : f32
    %21 = vector.broadcast %cst_11 : f32 to vector<2x128xf32>
    %22 = arith.addf %21, %20 : vector<2x128xf32>
    %23 = arith.divf %21, %22 : vector<2x128xf32>
    %24 = vector.extract_strided_slice %11 {offsets = [0, 256], sizes = [2, 128], strides = [1, 1]} : vector<2x512xf32> to vector<2x128xf32>
    %25 = math.tanh %24 : vector<2x128xf32>
    %26 = vector.extract_strided_slice %11 {offsets = [0, 384], sizes = [2, 128], strides = [1, 1]} : vector<2x512xf32> to vector<2x128xf32>
    %27 = arith.negf %26 : vector<2x128xf32>
    %28 = math.exp %27 : vector<2x128xf32>
    %cst_12 = arith.constant 1.000000e+00 : f32
    %29 = vector.broadcast %cst_12 : f32 to vector<2x128xf32>
    %30 = arith.addf %29, %28 : vector<2x128xf32>
    %31 = arith.divf %29, %30 : vector<2x128xf32>
    %32 = arith.mulf %23, %7 : vector<2x128xf32>
    %33 = arith.mulf %17, %25 : vector<2x128xf32>
    %34 = arith.addf %32, %33 : vector<2x128xf32>
    %35 = math.tanh %34 : vector<2x128xf32>
    %36 = arith.mulf %31, %35 : vector<2x128xf32>
    %37 = vector.extract_strided_slice %5 {offsets = [2, 0], sizes = [2, 512], strides = [1, 1]} : vector<10x512xf32> to vector<2x512xf32>
    %c0_13 = arith.constant 0 : index
    %c0_14 = arith.constant 0 : index
    %38 = vector.load %arg2[%c0_13, %c0_14] : memref<128x512xf32, #tpu.memory_space<vmem>>, vector<128x512xf32>
    %cst_15 = arith.constant dense<0.000000e+00> : vector<2x512xf32>
    %39 = tpu.matmul %36, %38, %cst_15 {dimension_numbers = #tpu.dot_dimension_numbers<[1], [0], [0], [1], [0, 0, 1, 1], [], []>} : vector<2x128xf32>, vector<128x512xf32>, vector<2x512xf32> -> vector<2x512xf32>
    %40 = arith.addf %37, %39 : vector<2x512xf32>
    %41 = vector.extract_strided_slice %40 {offsets = [0, 0], sizes = [2, 128], strides = [1, 1]} : vector<2x512xf32> to vector<2x128xf32>
    %42 = arith.negf %41 : vector<2x128xf32>
    %43 = math.exp %42 : vector<2x128xf32>
    %cst_16 = arith.constant 1.000000e+00 : f32
    %44 = vector.broadcast %cst_16 : f32 to vector<2x128xf32>
    %45 = arith.addf %44, %43 : vector<2x128xf32>
    %46 = arith.divf %44, %45 : vector<2x128xf32>
    %47 = vector.extract_strided_slice %40 {offsets = [0, 128], sizes = [2, 128], strides = [1, 1]} : vector<2x512xf32> to vector<2x128xf32>
    %48 = arith.negf %47 : vector<2x128xf32>
    %49 = math.exp %48 : vector<2x128xf32>
    %cst_17 = arith.constant 1.000000e+00 : f32
    %50 = vector.broadcast %cst_17 : f32 to vector<2x128xf32>
    %51 = arith.addf %50, %49 : vector<2x128xf32>
    %52 = arith.divf %50, %51 : vector<2x128xf32>
    %53 = vector.extract_strided_slice %40 {offsets = [0, 256], sizes = [2, 128], strides = [1, 1]} : vector<2x512xf32> to vector<2x128xf32>
    %54 = math.tanh %53 : vector<2x128xf32>
    %55 = vector.extract_strided_slice %40 {offsets = [0, 384], sizes = [2, 128], strides = [1, 1]} : vector<2x512xf32> to vector<2x128xf32>
    %56 = arith.negf %55 : vector<2x128xf32>
    %57 = math.exp %56 : vector<2x128xf32>
    %cst_18 = arith.constant 1.000000e+00 : f32
    %58 = vector.broadcast %cst_18 : f32 to vector<2x128xf32>
    %59 = arith.addf %58, %57 : vector<2x128xf32>
    %60 = arith.divf %58, %59 : vector<2x128xf32>
    %61 = arith.mulf %52, %34 : vector<2x128xf32>
    %62 = arith.mulf %46, %54 : vector<2x128xf32>
    %63 = arith.addf %61, %62 : vector<2x128xf32>
    %64 = math.tanh %63 : vector<2x128xf32>
    %65 = arith.mulf %60, %64 : vector<2x128xf32>
    %66 = vector.extract_strided_slice %5 {offsets = [4, 0], sizes = [2, 512], strides = [1, 1]} : vector<10x512xf32> to vector<2x512xf32>
    %c0_19 = arith.constant 0 : index
    %c0_20 = arith.constant 0 : index
    %67 = vector.load %arg2[%c0_19, %c0_20] : memref<128x512xf32, #tpu.memory_space<vmem>>, vector<128x512xf32>
    %cst_21 = arith.constant dense<0.000000e+00> : vector<2x512xf32>
    %68 = tpu.matmul %65, %67, %cst_21 {dimension_numbers = #tpu.dot_dimension_numbers<[1], [0], [0], [1], [0, 0, 1, 1], [], []>} : vector<2x128xf32>, vector<128x512xf32>, vector<2x512xf32> -> vector<2x512xf32>
    %69 = arith.addf %66, %68 : vector<2x512xf32>
    %70 = vector.extract_strided_slice %69 {offsets = [0, 0], sizes = [2, 128], strides = [1, 1]} : vector<2x512xf32> to vector<2x128xf32>
    %71 = arith.negf %70 : vector<2x128xf32>
    %72 = math.exp %71 : vector<2x128xf32>
    %cst_22 = arith.constant 1.000000e+00 : f32
    %73 = vector.broadcast %cst_22 : f32 to vector<2x128xf32>
    %74 = arith.addf %73, %72 : vector<2x128xf32>
    %75 = arith.divf %73, %74 : vector<2x128xf32>
    %76 = vector.extract_strided_slice %69 {offsets = [0, 128], sizes = [2, 128], strides = [1, 1]} : vector<2x512xf32> to vector<2x128xf32>
    %77 = arith.negf %76 : vector<2x128xf32>
    %78 = math.exp %77 : vector<2x128xf32>
    %cst_23 = arith.constant 1.000000e+00 : f32
    %79 = vector.broadcast %cst_23 : f32 to vector<2x128xf32>
    %80 = arith.addf %79, %78 : vector<2x128xf32>
    %81 = arith.divf %79, %80 : vector<2x128xf32>
    %82 = vector.extract_strided_slice %69 {offsets = [0, 256], sizes = [2, 128], strides = [1, 1]} : vector<2x512xf32> to vector<2x128xf32>
    %83 = math.tanh %82 : vector<2x128xf32>
    %84 = vector.extract_strided_slice %69 {offsets = [0, 384], sizes = [2, 128], strides = [1, 1]} : vector<2x512xf32> to vector<2x128xf32>
    %85 = arith.negf %84 : vector<2x128xf32>
    %86 = math.exp %85 : vector<2x128xf32>
    %cst_24 = arith.constant 1.000000e+00 : f32
    %87 = vector.broadcast %cst_24 : f32 to vector<2x128xf32>
    %88 = arith.addf %87, %86 : vector<2x128xf32>
    %89 = arith.divf %87, %88 : vector<2x128xf32>
    %90 = arith.mulf %81, %63 : vector<2x128xf32>
    %91 = arith.mulf %75, %83 : vector<2x128xf32>
    %92 = arith.addf %90, %91 : vector<2x128xf32>
    %93 = math.tanh %92 : vector<2x128xf32>
    %94 = arith.mulf %89, %93 : vector<2x128xf32>
    %95 = vector.extract_strided_slice %5 {offsets = [6, 0], sizes = [2, 512], strides = [1, 1]} : vector<10x512xf32> to vector<2x512xf32>
    %c0_25 = arith.constant 0 : index
    %c0_26 = arith.constant 0 : index
    %96 = vector.load %arg2[%c0_25, %c0_26] : memref<128x512xf32, #tpu.memory_space<vmem>>, vector<128x512xf32>
    %cst_27 = arith.constant dense<0.000000e+00> : vector<2x512xf32>
    %97 = tpu.matmul %94, %96, %cst_27 {dimension_numbers = #tpu.dot_dimension_numbers<[1], [0], [0], [1], [0, 0, 1, 1], [], []>} : vector<2x128xf32>, vector<128x512xf32>, vector<2x512xf32> -> vector<2x512xf32>
    %98 = arith.addf %95, %97 : vector<2x512xf32>
    %99 = vector.extract_strided_slice %98 {offsets = [0, 0], sizes = [2, 128], strides = [1, 1]} : vector<2x512xf32> to vector<2x128xf32>
    %100 = arith.negf %99 : vector<2x128xf32>
    %101 = math.exp %100 : vector<2x128xf32>
    %cst_28 = arith.constant 1.000000e+00 : f32
    %102 = vector.broadcast %cst_28 : f32 to vector<2x128xf32>
    %103 = arith.addf %102, %101 : vector<2x128xf32>
    %104 = arith.divf %102, %103 : vector<2x128xf32>
    %105 = vector.extract_strided_slice %98 {offsets = [0, 128], sizes = [2, 128], strides = [1, 1]} : vector<2x512xf32> to vector<2x128xf32>
    %106 = arith.negf %105 : vector<2x128xf32>
    %107 = math.exp %106 : vector<2x128xf32>
    %cst_29 = arith.constant 1.000000e+00 : f32
    %108 = vector.broadcast %cst_29 : f32 to vector<2x128xf32>
    %109 = arith.addf %108, %107 : vector<2x128xf32>
    %110 = arith.divf %108, %109 : vector<2x128xf32>
    %111 = vector.extract_strided_slice %98 {offsets = [0, 256], sizes = [2, 128], strides = [1, 1]} : vector<2x512xf32> to vector<2x128xf32>
    %112 = math.tanh %111 : vector<2x128xf32>
    %113 = vector.extract_strided_slice %98 {offsets = [0, 384], sizes = [2, 128], strides = [1, 1]} : vector<2x512xf32> to vector<2x128xf32>
    %114 = arith.negf %113 : vector<2x128xf32>
    %115 = math.exp %114 : vector<2x128xf32>
    %cst_30 = arith.constant 1.000000e+00 : f32
    %116 = vector.broadcast %cst_30 : f32 to vector<2x128xf32>
    %117 = arith.addf %116, %115 : vector<2x128xf32>
    %118 = arith.divf %116, %117 : vector<2x128xf32>
    %119 = arith.mulf %110, %92 : vector<2x128xf32>
    %120 = arith.mulf %104, %112 : vector<2x128xf32>
    %121 = arith.addf %119, %120 : vector<2x128xf32>
    %122 = math.tanh %121 : vector<2x128xf32>
    %123 = arith.mulf %118, %122 : vector<2x128xf32>
    %124 = vector.extract_strided_slice %5 {offsets = [8, 0], sizes = [2, 512], strides = [1, 1]} : vector<10x512xf32> to vector<2x512xf32>
    %c0_31 = arith.constant 0 : index
    %c0_32 = arith.constant 0 : index
    %125 = vector.load %arg2[%c0_31, %c0_32] : memref<128x512xf32, #tpu.memory_space<vmem>>, vector<128x512xf32>
    %cst_33 = arith.constant dense<0.000000e+00> : vector<2x512xf32>
    %126 = tpu.matmul %123, %125, %cst_33 {dimension_numbers = #tpu.dot_dimension_numbers<[1], [0], [0], [1], [0, 0, 1, 1], [], []>} : vector<2x128xf32>, vector<128x512xf32>, vector<2x512xf32> -> vector<2x512xf32>
    %127 = arith.addf %124, %126 : vector<2x512xf32>
    %128 = vector.extract_strided_slice %127 {offsets = [0, 0], sizes = [2, 128], strides = [1, 1]} : vector<2x512xf32> to vector<2x128xf32>
    %129 = arith.negf %128 : vector<2x128xf32>
    %130 = math.exp %129 : vector<2x128xf32>
    %cst_34 = arith.constant 1.000000e+00 : f32
    %131 = vector.broadcast %cst_34 : f32 to vector<2x128xf32>
    %132 = arith.addf %131, %130 : vector<2x128xf32>
    %133 = arith.divf %131, %132 : vector<2x128xf32>
    %134 = vector.extract_strided_slice %127 {offsets = [0, 128], sizes = [2, 128], strides = [1, 1]} : vector<2x512xf32> to vector<2x128xf32>
    %135 = arith.negf %134 : vector<2x128xf32>
    %136 = math.exp %135 : vector<2x128xf32>
    %cst_35 = arith.constant 1.000000e+00 : f32
    %137 = vector.broadcast %cst_35 : f32 to vector<2x128xf32>
    %138 = arith.addf %137, %136 : vector<2x128xf32>
    %139 = arith.divf %137, %138 : vector<2x128xf32>
    %140 = vector.extract_strided_slice %127 {offsets = [0, 256], sizes = [2, 128], strides = [1, 1]} : vector<2x512xf32> to vector<2x128xf32>
    %141 = math.tanh %140 : vector<2x128xf32>
    %142 = vector.extract_strided_slice %127 {offsets = [0, 384], sizes = [2, 128], strides = [1, 1]} : vector<2x512xf32> to vector<2x128xf32>
    %143 = arith.negf %142 : vector<2x128xf32>
    %144 = math.exp %143 : vector<2x128xf32>
    %cst_36 = arith.constant 1.000000e+00 : f32
    %145 = vector.broadcast %cst_36 : f32 to vector<2x128xf32>
    %146 = arith.addf %145, %144 : vector<2x128xf32>
    %147 = arith.divf %145, %146 : vector<2x128xf32>
    %148 = arith.mulf %139, %121 : vector<2x128xf32>
    %149 = arith.mulf %133, %141 : vector<2x128xf32>
    %150 = arith.addf %148, %149 : vector<2x128xf32>
    %151 = math.tanh %150 : vector<2x128xf32>
    %152 = arith.mulf %147, %151 : vector<2x128xf32>
    %c0_37 = arith.constant 0 : index
    %c0_38 = arith.constant 0 : index
    %153 = vector.load %arg4[%c0_37, %c0_38] : memref<128x256xf32, #tpu.memory_space<vmem>>, vector<128x256xf32>
    %cst_39 = arith.constant dense<0.000000e+00> : vector<2x256xf32>
    %154 = tpu.matmul %152, %153, %cst_39 {dimension_numbers = #tpu.dot_dimension_numbers<[1], [0], [0], [1], [0, 0, 1, 1], [], []>} : vector<2x128xf32>, vector<128x256xf32>, vector<2x256xf32> -> vector<2x256xf32>
    %c0_40 = arith.constant 0 : index
    %c0_41 = arith.constant 0 : index
    %155 = vector.load %arg5[%c0_40, %c0_41] : memref<1x256xf32, #tpu.memory_space<vmem>>, vector<1x256xf32>
    %156 = vector.broadcast %155 : vector<1x256xf32> to vector<2x256xf32>
    %157 = arith.addf %154, %156 : vector<2x256xf32>
    %cst_42 = arith.constant 0.000000e+00 : f32
    %158 = vector.broadcast %cst_42 : f32 to vector<2x256xf32>
    %159 = arith.maximumf %157, %158 : vector<2x256xf32>
    %c0_43 = arith.constant 0 : index
    %c0_44 = arith.constant 0 : index
    %160 = vector.load %arg6[%c0_43, %c0_44] : memref<256x10xf32, #tpu.memory_space<vmem>>, vector<256x10xf32>
    %cst_45 = arith.constant dense<0.000000e+00> : vector<2x10xf32>
    %161 = tpu.matmul %159, %160, %cst_45 {dimension_numbers = #tpu.dot_dimension_numbers<[1], [0], [0], [1], [0, 0, 1, 1], [], []>} : vector<2x256xf32>, vector<256x10xf32>, vector<2x10xf32> -> vector<2x10xf32>
    %c0_46 = arith.constant 0 : index
    %c0_47 = arith.constant 0 : index
    %162 = vector.load %arg7[%c0_46, %c0_47] : memref<1x10xf32, #tpu.memory_space<vmem>>, vector<1x10xf32>
    %163 = vector.broadcast %162 : vector<1x10xf32> to vector<2x10xf32>
    %164 = arith.addf %161, %163 : vector<2x10xf32>
    %c0_48 = arith.constant 0 : index
    %c0_49 = arith.constant 0 : index
    %165 = vector.load %arg8[%c0_48, %c0_49] : memref<2x10xf32, #tpu.memory_space<vmem>>, vector<2x10xf32>
    tpu.vector_store %arg8[%c0_48, %c0_49], %164 {strides = array<i32>} : memref<2x10xf32, #tpu.memory_space<vmem>>, vector<2x10xf32>,
    return
  }
}

</mosaic_0001>

<bundles_post_ra>
// kernel: multi_fashion_expert_forward.3
= control target key start
LH: loop header
LB: loop body
LE: loop exit
PB: predicated region body
PF: predicated region fallthrough
CT: control target
= control target key end

     0   :  { %s3072_s0 = inlined_call_operand.vmem [shape: f32[10,256], index: 0, kind: input, shape index: {}]   ;;  %s3073_s1 = inlined_call_operand.vmem [shape: f32[256,512], index: 1, kind: input, shape index: {}]   ;;  %s3074_s2 = inlined_call_operand.vmem [shape: f32[128,512], index: 2, kind: input, shape index: {}]   ;;  %s3075_s3 = inlined_call_operand.vmem [shape: f32[1,512], index: 3, kind: input, shape index: {}]   ;;  %s3076_s4 = inlined_call_operand.vmem [shape: f32[128,256], index: 4, kind: input, shape index: {}]   ;;  %s3077_s5 = inlined_call_operand.vmem [shape: f32[1,256], index: 5, kind: input, shape index: {}]   ;;  %s3078_s6 = inlined_call_operand.vmem [shape: f32[256,10], index: 6, kind: input, shape index: {}]   ;;  %s3079_s7 = inlined_call_operand.vmem [shape: f32[1,10], index: 7, kind: input, shape index: {}]   ;;  %s3080_s8 = inlined_call_operand.hbm [shape: f32[2,10], index: 8, kind: output, shape index: {}]  }
   0x1   :  { %v95_v0 = vld [vmem:[%s3073_s1 + $0x1e8] sm:$0xff]  ;;  %v97_v1 = vld [vmem:[%s3073_s1 + $0x1f8] sm:$0xff]  ;;  %v94_v2 = vld [vmem:[%s3073_s1 + $0x1e0] sm:$0xff] }
   0x2   :  { %184 = vmatprep.subr.mxu0 %v95_v0  ;;  %261 = vmatprep.subr.mxu1 %v97_v1  ;;  %v96_v3 = vld [vmem:[%s3073_s1 + $0x1f0] sm:$0xff]  ;;  %v91_v4 = vld [vmem:[%s3073_s1 + $0x1c8] sm:$0xff]  ;;  %v93_v5 = vld [vmem:[%s3073_s1 + $0x1d8] sm:$0xff] }
   0x3   :  { %185 = vmatpush1.msra.mxu0 %v94_v2  ;;  %262 = vmatpush1.msra.mxu1 %v96_v3  ;;  %v90_v6 = vld [vmem:[%s3073_s1 + $0x1c0] sm:$0xff]  ;;  %v92_v7 = vld [vmem:[%s3073_s1 + $0x1d0] sm:$0xff]  ;;  %v87_v8 = vld [vmem:[%s3073_s1 + $0x1a8] sm:$0xff] }
   0x4   :  { %186 = vmatprep.subr.mxu0 %v91_v4  ;;  %263 = vmatprep.subr.mxu1 %v93_v5  ;;  %v89_v9 = vld [vmem:[%s3073_s1 + $0x1b8] sm:$0xff]  ;;  %v86_v10 = vld [vmem:[%s3073_s1 + $0x1a0] sm:$0xff]  ;;  %v88_v11 = vld [vmem:[%s3073_s1 + $0x1b0] sm:$0xff] }
   0x5   :  { %187 = vmatpush1.msra.mxu0 %v90_v6  ;;  %264 = vmatpush1.msra.mxu1 %v92_v7  ;;  %v83_v12 = vld [vmem:[%s3073_s1 + $0x188] sm:$0xff]  ;;  %v85_v13 = vld [vmem:[%s3073_s1 + $0x198] sm:$0xff]  ;;  %v82_v14 = vld [vmem:[%s3073_s1 + $0x180] sm:$0xff] }
   0x6   :  { %188 = vmatprep.subr.mxu0 %v87_v8  ;;  %265 = vmatprep.subr.mxu1 %v89_v9  ;;  %v84_v15 = vld [vmem:[%s3073_s1 + $0x190] sm:$0xff]  ;;  %v79_v16 = vld [vmem:[%s3073_s1 + $0x168] sm:$0xff]  ;;  %v81_v17 = vld [vmem:[%s3073_s1 + $0x178] sm:$0xff] }
   0x7   :  { %189 = vmatpush1.msra.mxu0 %v86_v10  ;;  %266 = vmatpush1.msra.mxu1 %v88_v11  ;;  %v78_v18 = vld [vmem:[%s3073_s1 + $0x160] sm:$0xff]  ;;  %v80_v19 = vld [vmem:[%s3073_s1 + $0x170] sm:$0xff]  ;;  %v75_v20 = vld [vmem:[%s3073_s1 + $0x148] sm:$0xff] }
   0x8   :  { %190 = vmatprep.subr.mxu0 %v83_v12  ;;  %267 = vmatprep.subr.mxu1 %v85_v13  ;;  %v77_v21 = vld [vmem:[%s3073_s1 + $0x158] sm:$0xff]  ;;  %v74_v22 = vld [vmem:[%s3073_s1 + $0x140] sm:$0xff]  ;;  %v76_v23 = vld [vmem:[%s3073_s1 + $0x150] sm:$0xff] }
   0x9   :  { %191 = vmatpush1.msra.mxu0 %v82_v14  ;;  %268 = vmatpush1.msra.mxu1 %v84_v15  ;;  %v71_v24 = vld [vmem:[%s3073_s1 + $0x128] sm:$0xff]  ;;  %v73_v25 = vld [vmem:[%s3073_s1 + $0x138] sm:$0xff]  ;;  %v70_v26 = vld [vmem:[%s3073_s1 + $0x120] sm:$0xff] }
   0xa   :  { %192 = vmatprep.subr.mxu0 %v79_v16  ;;  %269 = vmatprep.subr.mxu1 %v81_v17  ;;  %v72_v27 = vld [vmem:[%s3073_s1 + $0x130] sm:$0xff]  ;;  %v67_v28 = vld [vmem:[%s3073_s1 + $0x108] sm:$0xff]  ;;  %v69_v29 = vld [vmem:[%s3073_s1 + $0x118] sm:$0xff] }
   0xb   :  { %193 = vmatpush1.msra.mxu0 %v78_v18  ;;  %270 = vmatpush1.msra.mxu1 %v80_v19  ;;  %v66_v30 = vld [vmem:[%s3073_s1 + $0x100] sm:$0xff]  ;;  %v68_v31 = vld [vmem:[%s3073_s1 + $0x110] sm:$0xff]  ;;  %v63_v32 = vld [vmem:[%s3073_s1 + $0xe8] sm:$0xff] }
   0xc   :  { %194 = vmatprep.subr.mxu0 %v75_v20  ;;  %271 = vmatprep.subr.mxu1 %v77_v21  ;;  %v65_v33 = vld [vmem:[%s3073_s1 + $0xf8] sm:$0xff]  ;;  %v62_v34 = vld [vmem:[%s3073_s1 + $0xe0] sm:$0xff]  ;;  %v64_v35 = vld [vmem:[%s3073_s1 + $0xf0] sm:$0xff] }
   0xd   :  { %195 = vmatpush1.msra.mxu0 %v74_v22  ;;  %272 = vmatpush1.msra.mxu1 %v76_v23  ;;  %v59_v36 = vld [vmem:[%s3073_s1 + $0xc8] sm:$0xff]  ;;  %v61_v37 = vld [vmem:[%s3073_s1 + $0xd8] sm:$0xff]  ;;  %v58_v38 = vld [vmem:[%s3073_s1 + $0xc0] sm:$0xff] }
   0xe   :  { %196 = vmatprep.subr.mxu0 %v71_v24  ;;  %273 = vmatprep.subr.mxu1 %v73_v25  ;;  %v60_v39 = vld [vmem:[%s3073_s1 + $0xd0] sm:$0xff]  ;;  %v55_v40 = vld [vmem:[%s3073_s1 + $0xa8] sm:$0xff]  ;;  %v57_v41 = vld [vmem:[%s3073_s1 + $0xb8] sm:$0xff] }
   0xf   :  { %197 = vmatpush1.msra.mxu0 %v70_v26  ;;  %274 = vmatpush1.msra.mxu1 %v72_v27  ;;  %v54_v42 = vld [vmem:[%s3073_s1 + $0xa0] sm:$0xff]  ;;  %v56_v43 = vld [vmem:[%s3073_s1 + $0xb0] sm:$0xff]  ;;  %v51_v44 = vld [vmem:[%s3073_s1 + $0x88] sm:$0xff] }
  0x10   :  { %198 = vmatprep.subr.mxu0 %v67_v28  ;;  %275 = vmatprep.subr.mxu1 %v69_v29  ;;  %v53_v45 = vld [vmem:[%s3073_s1 + $0x98] sm:$0xff]  ;;  %v50_v46 = vld [vmem:[%s3073_s1 + $0x80] sm:$0xff]  ;;  %v52_v47 = vld [vmem:[%s3073_s1 + $0x90] sm:$0xff] }
  0x11   :  { %199 = vmatpush1.msra.mxu0 %v66_v30  ;;  %276 = vmatpush1.msra.mxu1 %v68_v31  ;;  %v47_v48 = vld [vmem:[%s3073_s1 + $0x68] sm:$0xff]  ;;  %v49_v49 = vld [vmem:[%s3073_s1 + $0x78] sm:$0xff]  ;;  %v46_v50 = vld [vmem:[%s3073_s1 + $0x60] sm:$0xff] }
  0x12   :  { %200 = vmatprep.subr.mxu0 %v63_v32  ;;  %277 = vmatprep.subr.mxu1 %v65_v33  ;;  %v48_v51 = vld [vmem:[%s3073_s1 + $0x70] sm:$0xff]  ;;  %v43_v52 = vld [vmem:[%s3073_s1 + $0x48] sm:$0xff]  ;;  %v45_v53 = vld [vmem:[%s3073_s1 + $0x58] sm:$0xff] }
  0x13   :  { %201 = vmatpush1.msra.mxu0 %v62_v34  ;;  %278 = vmatpush1.msra.mxu1 %v64_v35  ;;  %v42_v54 = vld [vmem:[%s3073_s1 + $0x40] sm:$0xff]  ;;  %v44_v55 = vld [vmem:[%s3073_s1 + $0x50] sm:$0xff]  ;;  %v39_v56 = vld [vmem:[%s3073_s1 + $0x28] sm:$0xff] }
  0x14   :  { %202 = vmatprep.subr.mxu0 %v59_v36  ;;  %279 = vmatprep.subr.mxu1 %v61_v37  ;;  %v41_v57 = vld [vmem:[%s3073_s1 + $0x38] sm:$0xff]  ;;  %v38_v58 = vld [vmem:[%s3073_s1 + $0x20] sm:$0xff]  ;;  %v40_v59 = vld [vmem:[%s3073_s1 + $0x30] sm:$0xff] }
  0x15   :  { %203 = vmatpush1.msra.mxu0 %v58_v38  ;;  %280 = vmatpush1.msra.mxu1 %v60_v39  ;;  %v35_v60 = vld [vmem:[%s3073_s1 + $0x8] sm:$0xff]  ;;  %v37_v61 = vld [vmem:[%s3073_s1 + $0x18] sm:$0xff]  ;;  %v34_v62 = vld [vmem:[%s3073_s1] sm:$0xff] }
  0x16   :  { %204 = vmatprep.subr.mxu0 %v55_v40  ;;  %281 = vmatprep.subr.mxu1 %v57_v41  ;;  %v36_v63 = vld [vmem:[%s3073_s1 + $0x10] sm:$0xff]  ;;  %v159_v0 = vld [vmem:[%s3073_s1 + $0x3e8] sm:$0xff]  ;;  %v161_v1 = vld [vmem:[%s3073_s1 + $0x3f8] sm:$0xff] }
  0x17   :  { %205 = vmatpush1.msra.mxu0 %v54_v42  ;;  %282 = vmatpush1.msra.mxu1 %v56_v43  ;;  %v158_v2 = vld [vmem:[%s3073_s1 + $0x3e0] sm:$0xff]  ;;  %v160_v3 = vld [vmem:[%s3073_s1 + $0x3f0] sm:$0xff]  ;;  %v155_v4 = vld [vmem:[%s3073_s1 + $0x3c8] sm:$0xff] }
  0x18   :  { %206 = vmatprep.subr.mxu0 %v51_v44  ;;  %283 = vmatprep.subr.mxu1 %v53_v45  ;;  %v157_v5 = vld [vmem:[%s3073_s1 + $0x3d8] sm:$0xff]  ;;  %v154_v6 = vld [vmem:[%s3073_s1 + $0x3c0] sm:$0xff]  ;;  %v156_v7 = vld [vmem:[%s3073_s1 + $0x3d0] sm:$0xff] }
  0x19   :  { %207 = vmatpush1.msra.mxu0 %v50_v46  ;;  %284 = vmatpush1.msra.mxu1 %v52_v47  ;;  %v151_v8 = vld [vmem:[%s3073_s1 + $0x3a8] sm:$0xff]  ;;  %v153_v9 = vld [vmem:[%s3073_s1 + $0x3b8] sm:$0xff]  ;;  %v150_v10 = vld [vmem:[%s3073_s1 + $0x3a0] sm:$0xff] }
  0x1a   :  { %208 = vmatprep.subr.mxu0 %v47_v48  ;;  %285 = vmatprep.subr.mxu1 %v49_v49  ;;  %v152_v11 = vld [vmem:[%s3073_s1 + $0x3b0] sm:$0xff]  ;;  %v147_v12 = vld [vmem:[%s3073_s1 + $0x388] sm:$0xff]  ;;  %v149_v13 = vld [vmem:[%s3073_s1 + $0x398] sm:$0xff] }
  0x1b   :  { %209 = vmatpush1.msra.mxu0 %v46_v50  ;;  %286 = vmatpush1.msra.mxu1 %v48_v51  ;;  %v146_v14 = vld [vmem:[%s3073_s1 + $0x380] sm:$0xff]  ;;  %v148_v15 = vld [vmem:[%s3073_s1 + $0x390] sm:$0xff]  ;;  %v143_v16 = vld [vmem:[%s3073_s1 + $0x368] sm:$0xff] }
  0x1c   :  { %210 = vmatprep.subr.mxu0 %v43_v52  ;;  %287 = vmatprep.subr.mxu1 %v45_v53  ;;  %v145_v17 = vld [vmem:[%s3073_s1 + $0x378] sm:$0xff]  ;;  %v142_v18 = vld [vmem:[%s3073_s1 + $0x360] sm:$0xff]  ;;  %v144_v19 = vld [vmem:[%s3073_s1 + $0x370] sm:$0xff] }
  0x1d   :  { %211 = vmatpush1.msra.mxu0 %v42_v54  ;;  %288 = vmatpush1.msra.mxu1 %v44_v55  ;;  %v139_v20 = vld [vmem:[%s3073_s1 + $0x348] sm:$0xff]  ;;  %v141_v21 = vld [vmem:[%s3073_s1 + $0x358] sm:$0xff]  ;;  %v138_v22 = vld [vmem:[%s3073_s1 + $0x340] sm:$0xff] }
  0x1e   :  { %212 = vmatprep.subr.mxu0 %v39_v56  ;;  %289 = vmatprep.subr.mxu1 %v41_v57  ;;  %v140_v23 = vld [vmem:[%s3073_s1 + $0x350] sm:$0xff]  ;;  %v135_v24 = vld [vmem:[%s3073_s1 + $0x328] sm:$0xff]  ;;  %v137_v25 = vld [vmem:[%s3073_s1 + $0x338] sm:$0xff] }
  0x1f   :  { %213 = vmatpush1.msra.mxu0 %v38_v58  ;;  %290 = vmatpush1.msra.mxu1 %v40_v59  ;;  %v134_v26 = vld [vmem:[%s3073_s1 + $0x320] sm:$0xff]  ;;  %v136_v27 = vld [vmem:[%s3073_s1 + $0x330] sm:$0xff]  ;;  %v131_v28 = vld [vmem:[%s3073_s1 + $0x308] sm:$0xff] }
  0x20   :  { %214 = vmatprep.subr.mxu0 %v35_v60  ;;  %291 = vmatprep.subr.mxu1 %v37_v61  ;;  %v133_v29 = vld [vmem:[%s3073_s1 + $0x318] sm:$0xff]  ;;  %v130_v30 = vld [vmem:[%s3073_s1 + $0x300] sm:$0xff]  ;;  %v132_v31 = vld [vmem:[%s3073_s1 + $0x310] sm:$0xff] }
  0x21   :  { %215 = vmatpush1.msra.mxu0 %v34_v62  ;;  %292 = vmatpush1.msra.mxu1 %v36_v63  ;;  %v127_v32 = vld [vmem:[%s3073_s1 + $0x2e8] sm:$0xff]  ;;  %v129_v33 = vld [vmem:[%s3073_s1 + $0x2f8] sm:$0xff]  ;;  %v126_v34 = vld [vmem:[%s3073_s1 + $0x2e0] sm:$0xff] }
  0x22   :  { %216 = vmatprep.subr.mxu0 %v159_v0  ;;  %293 = vmatprep.subr.mxu1 %v161_v1  ;;  %v128_v35 = vld [vmem:[%s3073_s1 + $0x2f0] sm:$0xff]  ;;  %v123_v36 = vld [vmem:[%s3073_s1 + $0x2c8] sm:$0xff]  ;;  %v125_v37 = vld [vmem:[%s3073_s1 + $0x2d8] sm:$0xff] }
  0x23   :  { %217 = vmatpush2.msra.mxu0 %v158_v2  ;;  %294 = vmatpush2.msra.mxu1 %v160_v3  ;;  %v122_v38 = vld [vmem:[%s3073_s1 + $0x2c0] sm:$0xff]  ;;  %v124_v39 = vld [vmem:[%s3073_s1 + $0x2d0] sm:$0xff]  ;;  %v119_v40 = vld [vmem:[%s3073_s1 + $0x2a8] sm:$0xff] }
  0x24   :  { %218 = vmatprep.subr.mxu0 %v155_v4  ;;  %295 = vmatprep.subr.mxu1 %v157_v5  ;;  %v121_v41 = vld [vmem:[%s3073_s1 + $0x2b8] sm:$0xff]  ;;  %v118_v42 = vld [vmem:[%s3073_s1 + $0x2a0] sm:$0xff]  ;;  %v120_v43 = vld [vmem:[%s3073_s1 + $0x2b0] sm:$0xff] }
  0x25   :  { %219 = vmatpush2.msra.mxu0 %v154_v6  ;;  %296 = vmatpush2.msra.mxu1 %v156_v7  ;;  %v115_v44 = vld [vmem:[%s3073_s1 + $0x288] sm:$0xff]  ;;  %v117_v45 = vld [vmem:[%s3073_s1 + $0x298] sm:$0xff]  ;;  %v114_v46 = vld [vmem:[%s3073_s1 + $0x280] sm:$0xff] }
  0x26   :  { %220 = vmatprep.subr.mxu0 %v151_v8  ;;  %297 = vmatprep.subr.mxu1 %v153_v9  ;;  %v116_v47 = vld [vmem:[%s3073_s1 + $0x290] sm:$0xff]  ;;  %v111_v48 = vld [vmem:[%s3073_s1 + $0x268] sm:$0xff]  ;;  %v113_v49 = vld [vmem:[%s3073_s1 + $0x278] sm:$0xff] }
  0x27   :  { %221 = vmatpush2.msra.mxu0 %v150_v10  ;;  %298 = vmatpush2.msra.mxu1 %v152_v11  ;;  %v110_v50 = vld [vmem:[%s3073_s1 + $0x260] sm:$0xff]  ;;  %v112_v51 = vld [vmem:[%s3073_s1 + $0x270] sm:$0xff]  ;;  %v107_v52 = vld [vmem:[%s3073_s1 + $0x248] sm:$0xff] }
  0x28   :  { %222 = vmatprep.subr.mxu0 %v147_v12  ;;  %299 = vmatprep.subr.mxu1 %v149_v13  ;;  %v109_v53 = vld [vmem:[%s3073_s1 + $0x258] sm:$0xff]  ;;  %v106_v54 = vld [vmem:[%s3073_s1 + $0x240] sm:$0xff]  ;;  %v108_v55 = vld [vmem:[%s3073_s1 + $0x250] sm:$0xff] }
  0x29   :  { %223 = vmatpush2.msra.mxu0 %v146_v14  ;;  %300 = vmatpush2.msra.mxu1 %v148_v15  ;;  %v103_v56 = vld [vmem:[%s3073_s1 + $0x228] sm:$0xff]  ;;  %v105_v57 = vld [vmem:[%s3073_s1 + $0x238] sm:$0xff]  ;;  %v102_v58 = vld [vmem:[%s3073_s1 + $0x220] sm:$0xff] }
  0x2a   :  { %224 = vmatprep.subr.mxu0 %v143_v16  ;;  %301 = vmatprep.subr.mxu1 %v145_v17  ;;  %v104_v59 = vld [vmem:[%s3073_s1 + $0x230] sm:$0xff]  ;;  %v99_v60 = vld [vmem:[%s3073_s1 + $0x208] sm:$0xff]  ;;  %v101_v61 = vld [vmem:[%s3073_s1 + $0x218] sm:$0xff] }
  0x2b   :  { %225 = vmatpush2.msra.mxu0 %v142_v18  ;;  %302 = vmatpush2.msra.mxu1 %v144_v19  ;;  %v98_v62 = vld [vmem:[%s3073_s1 + $0x200] sm:$0xff]  ;;  %v31_v63 = vld [vmem:[%s3072_s0 + $0x8] sm:$0xff]  ;;  %v100_v0 = vld [vmem:[%s3073_s1 + $0x210] sm:$0xff] }
  0x2c   :  { %226 = vmatprep.subr.mxu0 %v139_v20  ;;  %303 = vmatprep.subr.mxu1 %v141_v21  ;;  %v30_v1 = vld [vmem:[%s3072_s0] sm:$0xff]  ;;  %v2146_v2 = vld [vmem:[%s3074_s2 + $0x1e8] sm:$0xff]  ;;  %v2151_v3 = vld [vmem:[%s3074_s2 + $0x1f8] sm:$0xff] }
  0x2d   :  { %227 = vmatpush2.msra.mxu0 %v138_v22  ;;  %304 = vmatpush2.msra.mxu1 %v140_v23  ;;  %3136 = vst [vmem:[#allocation5_spill] sm:$0xff] %v2146_v2  ;;  %3137 = vst [vmem:[#allocation6_spill] sm:$0xff] %v2151_v3  ;;  %v2156_v4 = vld [vmem:[%s3074_s2 + $0x1e0] sm:$0xff]  ;;  %v2161_v5 = vld [vmem:[%s3074_s2 + $0x1f0] sm:$0xff] }
  0x2e   :  { %228 = vmatprep.subr.mxu0 %v135_v24  ;;  %305 = vmatprep.subr.mxu1 %v137_v25 }
  0x2f   :  { %229 = vmatpush2.msra.mxu0 %v134_v26  ;;  %306 = vmatpush2.msra.mxu1 %v136_v27 }
  0x30   :  { %230 = vmatprep.subr.mxu0 %v131_v28  ;;  %307 = vmatprep.subr.mxu1 %v133_v29 }
  0x31   :  { %231 = vmatpush2.msra.mxu0 %v130_v30  ;;  %308 = vmatpush2.msra.mxu1 %v132_v31 }
  0x32   :  { %232 = vmatprep.subr.mxu0 %v127_v32  ;;  %309 = vmatprep.subr.mxu1 %v129_v33 }
  0x33   :  { %233 = vmatpush2.msra.mxu0 %v126_v34  ;;  %310 = vmatpush2.msra.mxu1 %v128_v35 }
  0x34   :  { %234 = vmatprep.subr.mxu0 %v123_v36  ;;  %311 = vmatprep.subr.mxu1 %v125_v37 }
  0x35   :  { %235 = vmatpush2.msra.mxu0 %v122_v38  ;;  %312 = vmatpush2.msra.mxu1 %v124_v39 }
  0x36   :  { %236 = vmatprep.subr.mxu0 %v119_v40  ;;  %313 = vmatprep.subr.mxu1 %v121_v41 }
  0x37   :  { %237 = vmatpush2.msra.mxu0 %v118_v42  ;;  %314 = vmatpush2.msra.mxu1 %v120_v43 }
  0x38   :  { %238 = vmatprep.subr.mxu0 %v115_v44  ;;  %315 = vmatprep.subr.mxu1 %v117_v45 }
  0x39   :  { %239 = vmatpush2.msra.mxu0 %v114_v46  ;;  %316 = vmatpush2.msra.mxu1 %v116_v47 }
  0x3a   :  { %240 = vmatprep.subr.mxu0 %v111_v48  ;;  %317 = vmatprep.subr.mxu1 %v113_v49 }
  0x3b   :  { %241 = vmatpush2.msra.mxu0 %v110_v50  ;;  %318 = vmatpush2.msra.mxu1 %v112_v51 }
  0x3c   :  { %242 = vmatprep.subr.mxu0 %v107_v52  ;;  %319 = vmatprep.subr.mxu1 %v109_v53 }
  0x3d   :  { %243 = vmatpush2.msra.mxu0 %v106_v54  ;;  %320 = vmatpush2.msra.mxu1 %v108_v55 }
  0x3e   :  { %244 = vmatprep.subr.mxu0 %v103_v56  ;;  %321 = vmatprep.subr.mxu1 %v105_v57 }
  0x3f   :  { %245 = vmatpush2.msra.mxu0 %v102_v58  ;;  %322 = vmatpush2.msra.mxu1 %v104_v59 }
  0x40   :  { %246 = vmatprep.subr.mxu0 %v99_v60  ;;  %323 = vmatprep.subr.mxu1 %v101_v61 }
  0x41   :  { %247 = vmatpush2.msra.mxu0 %v98_v62  ;;  %248 = vmatprep.mubr.f32.mxu0 %v31_v63 }
  0x42   :  { %324 = vmatpush2.msra.mxu1 %v100_v0  ;;  %249 = vmatmul.mubr.f32.vlgmr.msra.gmra.mxu0 %v30_v1 }
  0x43   :  { %13 = vsyncpa [#allocation3], 0  ;;  %325 = vmatprep.mubr.f32.mxu1 %v31_v63  ;;  %402 = vmatprep.subr.mxu0 %v2146_v2  ;;  %v2167_v6 = vld [vmem:[%s3074_s2 + $0x1c8] sm:$0xff]  ;;  %v2172_v7 = vld [vmem:[%s3074_s2 + $0x1d8] sm:$0xff]  ;;  %vm1535_vm0 = vcmask 74752  }
  0x44   :  { %473 = vmatprep.subr.mxu1 %v2151_v3  ;;  %326 = vmatmul.mubr.f32.vlgmr.msra.gmra.mxu1 %v30_v1  ;;  %v2178_v8 = vld [vmem:[%s3074_s2 + $0x1c0] sm:$0xff]  ;;  %v2183_v9 = vld [vmem:[%s3074_s2 + $0x1d0] sm:$0xff]  ;;  %v2190_v10 = vld [vmem:[%s3074_s2 + $0x1a8] sm:$0xff] }
  0x45   :  { %403 = vmatpush1.msra.mxu0 %v2156_v4  ;;  %474 = vmatpush1.msra.mxu1 %v2161_v5  ;;  %v2195_v11 = vld [vmem:[%s3074_s2 + $0x1b8] sm:$0xff]  ;;  %v2202_v12 = vld [vmem:[%s3074_s2 + $0x1a0] sm:$0xff]  ;;  %v2207_v13 = vld [vmem:[%s3074_s2 + $0x1b0] sm:$0xff] }
  0x46   :  { %404 = vmatprep.subr.mxu0 %v2167_v6  ;;  %475 = vmatprep.subr.mxu1 %v2172_v7  ;;  %v2214_v14 = vld [vmem:[%s3074_s2 + $0x188] sm:$0xff]  ;;  %v2219_v15 = vld [vmem:[%s3074_s2 + $0x198] sm:$0xff]  ;;  %v2226_v16 = vld [vmem:[%s3074_s2 + $0x180] sm:$0xff] }
  0x47   :  { %405 = vmatpush1.msra.mxu0 %v2178_v8  ;;  %476 = vmatpush1.msra.mxu1 %v2183_v9  ;;  %v2231_v17 = vld [vmem:[%s3074_s2 + $0x190] sm:$0xff]  ;;  %v2238_v18 = vld [vmem:[%s3074_s2 + $0x168] sm:$0xff]  ;;  %v2243_v19 = vld [vmem:[%s3074_s2 + $0x178] sm:$0xff] }
  0x48   :  { %406 = vmatprep.subr.mxu0 %v2190_v10  ;;  %477 = vmatprep.subr.mxu1 %v2195_v11  ;;  %v2250_v20 = vld [vmem:[%s3074_s2 + $0x160] sm:$0xff]  ;;  %v2255_v21 = vld [vmem:[%s3074_s2 + $0x170] sm:$0xff]  ;;  %v2262_v22 = vld [vmem:[%s3074_s2 + $0x148] sm:$0xff] }
  0x49   :  { %407 = vmatpush1.msra.mxu0 %v2202_v12  ;;  %478 = vmatpush1.msra.mxu1 %v2207_v13  ;;  %v2267_v23 = vld [vmem:[%s3074_s2 + $0x158] sm:$0xff]  ;;  %v2274_v24 = vld [vmem:[%s3074_s2 + $0x140] sm:$0xff]  ;;  %v2279_v25 = vld [vmem:[%s3074_s2 + $0x150] sm:$0xff] }
  0x4a   :  { %408 = vmatprep.subr.mxu0 %v2214_v14  ;;  %479 = vmatprep.subr.mxu1 %v2219_v15  ;;  %v2286_v26 = vld [vmem:[%s3074_s2 + $0x128] sm:$0xff]  ;;  %v2291_v27 = vld [vmem:[%s3074_s2 + $0x138] sm:$0xff]  ;;  %v2298_v28 = vld [vmem:[%s3074_s2 + $0x120] sm:$0xff] }
  0x4b   :  { %409 = vmatpush1.msra.mxu0 %v2226_v16  ;;  %480 = vmatpush1.msra.mxu1 %v2231_v17  ;;  %v2303_v29 = vld [vmem:[%s3074_s2 + $0x130] sm:$0xff]  ;;  %v2310_v30 = vld [vmem:[%s3074_s2 + $0x108] sm:$0xff]  ;;  %v2315_v31 = vld [vmem:[%s3074_s2 + $0x118] sm:$0xff] }
  0x4c   :  { %410 = vmatprep.subr.mxu0 %v2238_v18  ;;  %481 = vmatprep.subr.mxu1 %v2243_v19  ;;  %v2322_v32 = vld [vmem:[%s3074_s2 + $0x100] sm:$0xff]  ;;  %v2327_v33 = vld [vmem:[%s3074_s2 + $0x110] sm:$0xff]  ;;  %v2334_v34 = vld [vmem:[%s3074_s2 + $0xe8] sm:$0xff] }
  0x4d   :  { %411 = vmatpush1.msra.mxu0 %v2250_v20  ;;  %482 = vmatpush1.msra.mxu1 %v2255_v21  ;;  %v2339_v35 = vld [vmem:[%s3074_s2 + $0xf8] sm:$0xff]  ;;  %v2346_v36 = vld [vmem:[%s3074_s2 + $0xe0] sm:$0xff]  ;;  %v2351_v37 = vld [vmem:[%s3074_s2 + $0xf0] sm:$0xff] }
  0x4e   :  { %412 = vmatprep.subr.mxu0 %v2262_v22  ;;  %483 = vmatprep.subr.mxu1 %v2267_v23  ;;  %v2358_v38 = vld [vmem:[%s3074_s2 + $0xc8] sm:$0xff]  ;;  %v2363_v39 = vld [vmem:[%s3074_s2 + $0xd8] sm:$0xff]  ;;  %v2370_v40 = vld [vmem:[%s3074_s2 + $0xc0] sm:$0xff] }
  0x4f   :  { %413 = vmatpush1.msra.mxu0 %v2274_v24  ;;  %484 = vmatpush1.msra.mxu1 %v2279_v25  ;;  %v2375_v41 = vld [vmem:[%s3074_s2 + $0xd0] sm:$0xff]  ;;  %v2382_v42 = vld [vmem:[%s3074_s2 + $0xa8] sm:$0xff]  ;;  %v2387_v43 = vld [vmem:[%s3074_s2 + $0xb8] sm:$0xff] }
  0x50   :  { %414 = vmatprep.subr.mxu0 %v2286_v26  ;;  %485 = vmatprep.subr.mxu1 %v2291_v27  ;;  %v2394_v44 = vld [vmem:[%s3074_s2 + $0xa0] sm:$0xff]  ;;  %v2399_v45 = vld [vmem:[%s3074_s2 + $0xb0] sm:$0xff]  ;;  %v2406_v46 = vld [vmem:[%s3074_s2 + $0x88] sm:$0xff] }
  0x51   :  { %415 = vmatpush1.msra.mxu0 %v2298_v28  ;;  %486 = vmatpush1.msra.mxu1 %v2303_v29  ;;  %3138 = vst [vmem:[#allocation7_spill] sm:$0xff] %v2399_v45  ;;  %3139 = vst [vmem:[#allocation8_spill] sm:$0xff] %v2406_v46  ;;  %v2411_v47 = vld [vmem:[%s3074_s2 + $0x98] sm:$0xff]  ;;  %v2418_v48 = vld [vmem:[%s3074_s2 + $0x80] sm:$0xff] }
  0x52   :  { %416 = vmatprep.subr.mxu0 %v2310_v30  ;;  %487 = vmatprep.subr.mxu1 %v2315_v31  ;;  %3140 = vst [vmem:[#allocation9_spill] sm:$0xff] %v2411_v47  ;;  %3141 = vst [vmem:[#allocation10_spill] sm:$0xff] %v2418_v48  ;;  %v2423_v49 = vld [vmem:[%s3074_s2 + $0x90] sm:$0xff]  ;;  %v2430_v50 = vld [vmem:[%s3074_s2 + $0x68] sm:$0xff] }
  0x53   :  { %417 = vmatpush1.msra.mxu0 %v2322_v32  ;;  %488 = vmatpush1.msra.mxu1 %v2327_v33  ;;  %3142 = vst [vmem:[#allocation11_spill] sm:$0xff] %v2423_v49  ;;  %3143 = vst [vmem:[#allocation12_spill] sm:$0xff] %v2430_v50  ;;  %v2435_v51 = vld [vmem:[%s3074_s2 + $0x78] sm:$0xff]  ;;  %v2445_v53 = vld [vmem:[%s3074_s2 + $0x60] sm:$0xff] }
  0x54   :  { %418 = vmatprep.subr.mxu0 %v2334_v34  ;;  %489 = vmatprep.subr.mxu1 %v2339_v35  ;;  %3144 = vst [vmem:[#allocation13_spill] sm:$0xff] %v2435_v51  ;;  %v33_v52 = vld [vmem:[%s3072_s0 + $0x18] sm:$0x3]  ;;  %3145 = vst [vmem:[#allocation14_spill] sm:$0xff] %v2445_v53  ;;  %v2452_v54 = vld [vmem:[%s3074_s2 + $0x70] sm:$0xff] }
  0x55   :  { %419 = vmatpush1.msra.mxu0 %v2346_v36  ;;  %490 = vmatpush1.msra.mxu1 %v2351_v37  ;;  %3146 = vst [vmem:[#allocation15_spill] sm:$0xff] %v2452_v54  ;;  %v32_v55 = vld [vmem:[%s3072_s0 + $0x10] sm:$0x3]  ;;  %v2462_v56 = vld [vmem:[%s3074_s2 + $0x48] sm:$0xff]  ;;  %v2467_v57 = vld [vmem:[%s3074_s2 + $0x58] sm:$0xff] }
  0x56   :  { %420 = vmatprep.subr.mxu0 %v2358_v38  ;;  %491 = vmatprep.subr.mxu1 %v2363_v39  ;;  %3147 = vst [vmem:[#allocation16_spill] sm:$0xff] %v2462_v56  ;;  %3148 = vst [vmem:[#allocation17_spill] sm:$0xff] %v2467_v57  ;;  %v2473_v58 = vld [vmem:[%s3074_s2 + $0x40] sm:$0xff]  ;;  %v2479_v59 = vld [vmem:[%s3074_s2 + $0x50] sm:$0xff] }
  0x57   :  { %421 = vmatpush1.msra.mxu0 %v2370_v40  ;;  %492 = vmatpush1.msra.mxu1 %v2375_v41  ;;  %3149 = vst [vmem:[#allocation18_spill] sm:$0xff] %v2473_v58  ;;  %3150 = vst [vmem:[#allocation19_spill] sm:$0xff] %v2479_v59  ;;  %v2484_v60 = vld [vmem:[%s3074_s2 + $0x28] sm:$0xff]  ;;  %v2491_v61 = vld [vmem:[%s3074_s2 + $0x38] sm:$0xff] }
  0x58   :  { %422 = vmatprep.subr.mxu0 %v2382_v42  ;;  %493 = vmatprep.subr.mxu1 %v2387_v43  ;;  %3151 = vst [vmem:[#allocation20_spill] sm:$0xff] %v2484_v60  ;;  %3152 = vst [vmem:[#allocation21_spill] sm:$0xff] %v2491_v61  ;;  %v2497_v62 = vld [vmem:[%s3074_s2 + $0x20] sm:$0xff]  ;;  %v2502_v63 = vld [vmem:[%s3074_s2 + $0x30] sm:$0xff] }
  0x59   :  { %423 = vmatpush1.msra.mxu0 %v2394_v44  ;;  %494 = vmatpush1.msra.mxu1 %v2399_v45  ;;  %3153 = vst [vmem:[#allocation22_spill] sm:$0xff] %v2497_v62  ;;  %3154 = vst [vmem:[#allocation23_spill] sm:$0xff] %v2502_v63  ;;  %v2509_v0 = vld [vmem:[%s3074_s2 + $0x8] sm:$0xff]  ;;  %v2514_v1 = vld [vmem:[%s3074_s2 + $0x18] sm:$0xff] }
  0x5a   :  { %424 = vmatprep.subr.mxu0 %v2406_v46  ;;  %495 = vmatprep.subr.mxu1 %v2411_v47  ;;  %3155 = vst [vmem:[#allocation24_spill] sm:$0xff] %v2509_v0  ;;  %3156 = vst [vmem:[#allocation25_spill] sm:$0xff] %v2514_v1 }
  0x5b   :  { %425 = vmatpush1.msra.mxu0 %v2418_v48  ;;  %496 = vmatpush1.msra.mxu1 %v2423_v49 }
  0x5c   :  { %426 = vmatprep.subr.mxu0 %v2430_v50  ;;  %497 = vmatprep.subr.mxu1 %v2435_v51 }
  0x5d   :  { %254 = vmatprep.mubr.f32.mxu0 %v33_v52  ;;  %427 = vmatpush1.msra.mxu0 %v2445_v53 }
  0x5e   :  { %498 = vmatpush1.msra.mxu1 %v2452_v54  ;;  %255 = vmatmul.mubr.f32.gmra.mxu0 %v32_v55 }
  0x5f   :  { %428 = vmatprep.subr.mxu0 %v2462_v56  ;;  %499 = vmatprep.subr.mxu1 %v2467_v57 }
  0x60   :  { %331 = vmatprep.mubr.f32.mxu1 %v33_v52  ;;  %429 = vmatpush1.msra.mxu0 %v2473_v58  ;;  %v2520_v52 = vld [vmem:[%s3074_s2] sm:$0xff] }
  0x61   :  { %500 = vmatpush1.msra.mxu1 %v2479_v59  ;;  %430 = vmatprep.subr.mxu0 %v2484_v60  ;;  %3157 = vst [vmem:[#allocation26_spill] sm:$0xff] %v2520_v52  ;;  %v2527_v60 = vld [vmem:[%s3074_s2 + $0x10] sm:$0xff] }
  0x62   :  { %332 = vmatmul.mubr.f32.gmra.mxu1 %v32_v55  ;;  %501 = vmatprep.subr.mxu1 %v2491_v61  ;;  %3158 = vst [vmem:[#allocation27_spill] sm:$0xff] %v2527_v60  ;;  %v3083_v55 = vmov 0.0  }
  0x63   :  { %431 = vmatpush1.msra.mxu0 %v2497_v62  ;;  %502 = vmatpush1.msra.mxu1 %v2502_v63 }
  0x64   :  { %432 = vmatprep.subr.mxu0 %v2509_v0  ;;  %503 = vmatprep.subr.mxu1 %v2514_v1 }
  0x65   :  { %433 = vmatpush1.msra.mxu0 %v2520_v52  ;;  %466 = vmatprep.mubr.f32.mxu0 %v3083_v55 }
  0x66   :  { %504 = vmatpush1.msra.mxu1 %v2527_v60  ;;  %537 = vmatprep.mubr.f32.mxu1 %v3083_v55 }
  0x67   :  { %467 = vmatmul.mubr.f32.vlgmr.msra.gmra.mxu0 %v3083_v55  ;;  %538 = vmatmul.mubr.f32.vlgmr.msra.gmra.mxu1 %v3083_v55  ;;  %v3159_v55 = vld [vmem:[#allocation20_spill] sm:$0xff] }
  0x68   :  { %572 = vmatprep.subr.mxu0 %v2146_v2  ;;  %643 = vmatprep.subr.mxu1 %v2151_v3 }
  0x69   :  { %573 = vmatpush1.msra.mxu0 %v2156_v4  ;;  %644 = vmatpush1.msra.mxu1 %v2161_v5 }
  0x6a   :  { %574 = vmatprep.subr.mxu0 %v2167_v6  ;;  %645 = vmatprep.subr.mxu1 %v2172_v7 }
  0x6b   :  { %575 = vmatpush1.msra.mxu0 %v2178_v8  ;;  %646 = vmatpush1.msra.mxu1 %v2183_v9 }
  0x6c   :  { %576 = vmatprep.subr.mxu0 %v2190_v10  ;;  %647 = vmatprep.subr.mxu1 %v2195_v11 }
  0x6d   :  { %577 = vmatpush1.msra.mxu0 %v2202_v12  ;;  %648 = vmatpush1.msra.mxu1 %v2207_v13 }
  0x6e   :  { %578 = vmatprep.subr.mxu0 %v2214_v14  ;;  %649 = vmatprep.subr.mxu1 %v2219_v15 }
  0x6f   :  { %579 = vmatpush1.msra.mxu0 %v2226_v16  ;;  %650 = vmatpush1.msra.mxu1 %v2231_v17 }
  0x70   :  { %580 = vmatprep.subr.mxu0 %v2238_v18  ;;  %651 = vmatprep.subr.mxu1 %v2243_v19 }
  0x71   :  { %581 = vmatpush1.msra.mxu0 %v2250_v20  ;;  %652 = vmatpush1.msra.mxu1 %v2255_v21 }
  0x72   :  { %582 = vmatprep.subr.mxu0 %v2262_v22  ;;  %653 = vmatprep.subr.mxu1 %v2267_v23 }
  0x73   :  { %583 = vmatpush1.msra.mxu0 %v2274_v24  ;;  %654 = vmatpush1.msra.mxu1 %v2279_v25 }
  0x74   :  { %584 = vmatprep.subr.mxu0 %v2286_v26  ;;  %655 = vmatprep.subr.mxu1 %v2291_v27 }
  0x75   :  { %585 = vmatpush1.msra.mxu0 %v2298_v28  ;;  %656 = vmatpush1.msra.mxu1 %v2303_v29 }
  0x76   :  { %586 = vmatprep.subr.mxu0 %v2310_v30  ;;  %657 = vmatprep.subr.mxu1 %v2315_v31 }
  0x77   :  { %587 = vmatpush1.msra.mxu0 %v2322_v32  ;;  %658 = vmatpush1.msra.mxu1 %v2327_v33 }
  0x78   :  { %588 = vmatprep.subr.mxu0 %v2334_v34  ;;  %659 = vmatprep.subr.mxu1 %v2339_v35 }
  0x79   :  { %589 = vmatpush1.msra.mxu0 %v2346_v36  ;;  %660 = vmatpush1.msra.mxu1 %v2351_v37 }
  0x7a   :  { %590 = vmatprep.subr.mxu0 %v2358_v38  ;;  %661 = vmatprep.subr.mxu1 %v2363_v39 }
  0x7b   :  { %591 = vmatpush1.msra.mxu0 %v2370_v40  ;;  %662 = vmatpush1.msra.mxu1 %v2375_v41 }
  0x7c   :  { %592 = vmatprep.subr.mxu0 %v2382_v42  ;;  %663 = vmatprep.subr.mxu1 %v2387_v43 }
  0x7d   :  { %593 = vmatpush1.msra.mxu0 %v2394_v44  ;;  %664 = vmatpush1.msra.mxu1 %v2399_v45 }
  0x7e   :  { %594 = vmatprep.subr.mxu0 %v2406_v46  ;;  %665 = vmatprep.subr.mxu1 %v2411_v47 }
  0x7f   :  { %595 = vmatpush1.msra.mxu0 %v2418_v48  ;;  %666 = vmatpush1.msra.mxu1 %v2423_v49 }
  0x80   :  { %596 = vmatprep.subr.mxu0 %v2430_v50  ;;  %667 = vmatprep.subr.mxu1 %v2435_v51 }
  0x81   :  { %597 = vmatpush1.msra.mxu0 %v2445_v53  ;;  %668 = vmatpush1.msra.mxu1 %v2452_v54 }
  0x82   :  { %598 = vmatprep.subr.mxu0 %v2462_v56  ;;  %669 = vmatprep.subr.mxu1 %v2467_v57  ;;  %v3160_v56 = vmov 0.0  }
  0x83   :  { %599 = vmatpush1.msra.mxu0 %v2473_v58  ;;  %670 = vmatpush1.msra.mxu1 %v2479_v59 }
  0x84   :  { %600 = vmatprep.subr.mxu0 %v3159_v55  ;;  %671 = vmatprep.subr.mxu1 %v2491_v61  ;;  %v164_v61 = vlaneseq }
  0x85   :  { %601 = vmatpush1.msra.mxu0 %v2497_v62  ;;  %672 = vmatpush1.msra.mxu1 %v2502_v63 }
  0x86   :  { %602 = vmatprep.subr.mxu0 %v2509_v0  ;;  %673 = vmatprep.subr.mxu1 %v2514_v1  ;;  %v2605_v62 = vshrl.u32 %v164_v61, 7 }
  0x87   :  { %603 = vmatpush1.msra.mxu0 %v2520_v52  ;;  %636 = vmatprep.mubr.f32.mxu0 %v3160_v56  ;;  %v162_v52 = vld [vmem:[%s3075_s3] sm:$0xf] }
  0x88   :  { %674 = vmatpush1.msra.mxu1 %v2527_v60  ;;  %707 = vmatprep.mubr.f32.mxu1 %v3160_v56  ;;  %3161 = vst [vmem:[#allocation28_spill] sm:$0xff] %v2605_v62  ;;  %v3124_v0 = vsub.s32 0, %v2605_v62  ;;  %v3131_v1 = vsub.s32 1, %v2605_v62  ;;  %v178_v59 = vsub.s32 3, %v2605_v62 }
  0x89   :  { %760 = vmatprep.subr.mxu0 %v2146_v2  ;;  %831 = vmatprep.subr.mxu1 %v2151_v3  ;;  %v174_v2 = vsub.s32 2, %v2605_v62 }
  0x8a   :  { %v167_v56 = vrot.slane %v162_v52, %v3124_v0  ;;  %v171_v61 = vrot.slane %v162_v52, %v3131_v1  ;;  %v179_v49 = vrot.slane %v162_v52, %v178_v59 }
  0x8b   :  { %v175_v53 = vrot.slane %v162_v52, %v174_v2 }
 0x102   :  { %v250_v63 = vpop.f32.mrf.mxu0 }
 0x103   :  { %v2626_v46 = vadd.f32 %v250_v63, %v167_v56 }
 0x104   :  { %v252_v55 = vpop.f32.mrf.mxu0  ;;  %v327_v60 = vpop.f32.mrf.mxu1 }
 0x105   :  { %v2628_v1 = vadd.f32 %v252_v55, %v171_v61 }
 0x106   :  { %v329_v57 = vpop.f32.mrf.mxu1 }
 0x107   :  { %v2632_v59 = vadd.f32 %v329_v57, %v179_v49 }
 0x11e   :  { %v256_v3 = vpop.f32.mrf.mxu0 }
 0x11f   :  { %v2618_v58 = vadd.f32 %v256_v3, %v167_v56  ;;  %v2635_v56 = vadd.f32 %v327_v60, %v175_v53 }
 0x120   :  { %v258_v54 = vpop.f32.mrf.mxu0 }
 0x121   :  { %3162 = vst [vmem:[#allocation29_spill] sm:$0xff] %v2618_v58  ;;  %v2620_v51 = vadd.f32 %v258_v54, %v171_v61 }
 0x122   :  { %v333_v50 = vpop.f32.mrf.mxu1 }
 0x123   :  { %3163 = vst [vmem:[#allocation30_spill] sm:$0xff] %v2620_v51  ;;  %v2622_v48 = vadd.f32 %v333_v50, %v175_v53 }
 0x124   :  { %v335_v0 = vpop.f32.mrf.mxu1 }
 0x125   :  { %3164 = vst [vmem:[#allocation31_spill] sm:$0xff] %v2622_v48  ;;  %v2624_v47 = vadd.f32 %v335_v0, %v179_v49  ;;  %v3182_v48 = vld [vmem:[#allocation23_spill] sm:$0xff] }
 0x127   :  { %3165 = vst [vmem:[#allocation32_spill] sm:$0xff] %v2624_v47  ;;  %v468_v45 = vpop.f32.mrf.mxu0  ;;  %v539_v54 = vpop.f32.mrf.mxu1  ;;  %v3183_v47 = vld [vmem:[#allocation24_spill] sm:$0xff] }
 0x128   :  { %v544_v3 = vadd.f32 %v468_v45, %v2626_v46  ;;  %v546_v55 = vadd.f32 %v539_v54, %v2635_v56 }
 0x129   :  { %v470_v62 = vpop.f32.mrf.mxu0  ;;  %v541_v50 = vpop.f32.mrf.mxu1 }
 0x12a   :  { %v1551_v58 = vmul.f32 -1.442695, %v544_v3  ;;  %v545_v2 = vadd.f32 %v470_v62, %v2628_v1  ;;  %v547_v0 = vadd.f32 %v541_v50, %v2632_v59 }
 0x12c   :  { %1604 = vpow2.f32 %v1551_v58  ;;  %v1552_v51 = vmul.f32 -1.442695, %v545_v2  ;;  %v1553_v63 = vmul.f32 -1.442695, %v547_v0 }
 0x12e   :  { %1606 = vpow2.f32 %v1552_v51 }
 0x12f   :  { %1608 = vpow2.f32 %v1553_v63  ;;  %v3166_v63 = vld [vmem:[#allocation7_spill] sm:$0xff] }
 0x139   :  { %v1605_v52 = vpop.eup %1604 }
 0x13a   :  { %v551_v45 = vadd.f32 1.0, %v1605_v52  ;;  %v3167_v52 = vld [vmem:[#allocation8_spill] sm:$0xff] }
 0x13b   :  { %v1607_v61 = vpop.eup %1606 }
 0x13c   :  { %1610 = vrcp.f32 %v551_v45  ;;  %v557_v62 = vadd.f32 1.0, %v1607_v61  ;;  %v1609_v58 = vpop.eup %1608  ;;  %v3169_v45 = vld [vmem:[#allocation10_spill] sm:$0xff]  ;;  %v3170_v61 = vld [vmem:[#allocation11_spill] sm:$0xff] }
 0x13d   :  { %1612 = vtanh.f32 %v546_v55  ;;  %v564_v57 = vadd.f32 1.0, %v1609_v58  ;;  %v3168_v55 = vld [vmem:[#allocation9_spill] sm:$0xff] }
 0x13e   :  { %1614 = vrcp.f32 %v557_v62  ;;  %v3171_v62 = vld [vmem:[#allocation12_spill] sm:$0xff]  ;;  %v3172_v58 = vld [vmem:[#allocation13_spill] sm:$0xff] }
 0x13f   :  { %1616 = vrcp.f32 %v564_v57  ;;  %v3176_v57 = vld [vmem:[#allocation17_spill] sm:$0xff] }
 0x149   :  { %v1611_v51 = vpop.eup %1610 }
 0x14a   :  { %v1613_v3 = vpop.eup %1612 }
 0x14b   :  { %v1615_v49 = vpop.eup %1614  ;;  %v568_v50 = vmul.f32 %v1613_v3, %v1611_v51  ;;  %v3173_v51 = vld [vmem:[#allocation14_spill] sm:$0xff]  ;;  %v3174_v3 = vld [vmem:[#allocation15_spill] sm:$0xff] }
 0x14c   :  { %v567_v2 = vmul.f32 0.0, %v1615_v49  ;;  %v1617_v60 = vpop.eup %1616  ;;  %v3175_v49 = vld [vmem:[#allocation16_spill] sm:$0xff] }
 0x14e   :  { %v2638_v53 = vadd.f32 %v568_v50, %v567_v2  ;;  %v3177_v2 = vld [vmem:[#allocation18_spill] sm:$0xff]  ;;  %v3178_v50 = vld [vmem:[#allocation19_spill] sm:$0xff] }
 0x150   :  { %1618 = vtanh.f32 %v2638_v53 }
 0x15d   :  { %v1619_v54 = vpop.eup %1618 }
 0x15e   :  { %v571_v0 = vmul.f32 %v1619_v54, %v1617_v60  ;;  %v3179_v60 = vld [vmem:[#allocation20_spill] sm:$0xff]  ;;  %v3180_v54 = vld [vmem:[#allocation21_spill] sm:$0xff] }
 0x160   :  { %637 = vmatmul.mubr.f32.vlgmr.msra.gmra.mxu0 %v571_v0  ;;  %708 = vmatmul.mubr.f32.vlgmr.msra.gmra.mxu1 %v571_v0  ;;  %v3181_v0 = vld [vmem:[#allocation22_spill] sm:$0xff] }
 0x161   :  { %761 = vmatpush1.msra.mxu0 %v2156_v4  ;;  %832 = vmatpush1.msra.mxu1 %v2161_v5 }
 0x162   :  { %762 = vmatprep.subr.mxu0 %v2167_v6  ;;  %833 = vmatprep.subr.mxu1 %v2172_v7 }
 0x163   :  { %763 = vmatpush1.msra.mxu0 %v2178_v8  ;;  %834 = vmatpush1.msra.mxu1 %v2183_v9 }
 0x164   :  { %764 = vmatprep.subr.mxu0 %v2190_v10  ;;  %835 = vmatprep.subr.mxu1 %v2195_v11 }
 0x165   :  { %765 = vmatpush1.msra.mxu0 %v2202_v12  ;;  %836 = vmatpush1.msra.mxu1 %v2207_v13 }
 0x166   :  { %766 = vmatprep.subr.mxu0 %v2214_v14  ;;  %837 = vmatprep.subr.mxu1 %v2219_v15 }
 0x167   :  { %767 = vmatpush1.msra.mxu0 %v2226_v16  ;;  %838 = vmatpush1.msra.mxu1 %v2231_v17 }
 0x168   :  { %768 = vmatprep.subr.mxu0 %v2238_v18  ;;  %839 = vmatprep.subr.mxu1 %v2243_v19 }
 0x169   :  { %769 = vmatpush1.msra.mxu0 %v2250_v20  ;;  %840 = vmatpush1.msra.mxu1 %v2255_v21 }
 0x16a   :  { %770 = vmatprep.subr.mxu0 %v2262_v22  ;;  %841 = vmatprep.subr.mxu1 %v2267_v23 }
 0x16b   :  { %771 = vmatpush1.msra.mxu0 %v2274_v24  ;;  %842 = vmatpush1.msra.mxu1 %v2279_v25 }
 0x16c   :  { %772 = vmatprep.subr.mxu0 %v2286_v26  ;;  %843 = vmatprep.subr.mxu1 %v2291_v27 }
 0x16d   :  { %773 = vmatpush1.msra.mxu0 %v2298_v28  ;;  %844 = vmatpush1.msra.mxu1 %v2303_v29 }
 0x16e   :  { %774 = vmatprep.subr.mxu0 %v2310_v30  ;;  %845 = vmatprep.subr.mxu1 %v2315_v31 }
 0x16f   :  { %775 = vmatpush1.msra.mxu0 %v2322_v32  ;;  %846 = vmatpush1.msra.mxu1 %v2327_v33 }
 0x170   :  { %776 = vmatprep.subr.mxu0 %v2334_v34  ;;  %847 = vmatprep.subr.mxu1 %v2339_v35 }
 0x171   :  { %777 = vmatpush1.msra.mxu0 %v2346_v36  ;;  %848 = vmatpush1.msra.mxu1 %v2351_v37 }
 0x172   :  { %778 = vmatprep.subr.mxu0 %v2358_v38  ;;  %849 = vmatprep.subr.mxu1 %v2363_v39 }
 0x173   :  { %779 = vmatpush1.msra.mxu0 %v2370_v40  ;;  %850 = vmatpush1.msra.mxu1 %v2375_v41 }
 0x174   :  { %780 = vmatprep.subr.mxu0 %v2382_v42  ;;  %851 = vmatprep.subr.mxu1 %v2387_v43 }
 0x175   :  { %781 = vmatpush1.msra.mxu0 %v2394_v44  ;;  %852 = vmatpush1.msra.mxu1 %v3166_v63 }
 0x176   :  { %782 = vmatprep.subr.mxu0 %v3167_v52  ;;  %853 = vmatprep.subr.mxu1 %v3168_v55 }
 0x177   :  { %783 = vmatpush1.msra.mxu0 %v3169_v45  ;;  %854 = vmatpush1.msra.mxu1 %v3170_v61 }
 0x178   :  { %784 = vmatprep.subr.mxu0 %v3171_v62  ;;  %855 = vmatprep.subr.mxu1 %v3172_v58 }
 0x179   :  { %785 = vmatpush1.msra.mxu0 %v3173_v51  ;;  %856 = vmatpush1.msra.mxu1 %v3174_v3  ;;  %v3184_v51 = vld [vmem:[#allocation25_spill] sm:$0xff]  ;;  %v3185_v3 = vld [vmem:[#allocation26_spill] sm:$0xff] }
 0x17a   :  { %786 = vmatprep.subr.mxu0 %v3175_v49  ;;  %857 = vmatprep.subr.mxu1 %v3176_v57  ;;  %v3186_v49 = vmov 0.0   ;;  %v3187_v57 = vld [vmem:[#allocation27_spill] sm:$0xff] }
 0x17b   :  { %787 = vmatpush1.msra.mxu0 %v3177_v2  ;;  %858 = vmatpush1.msra.mxu1 %v3178_v50  ;;  %v3188_v50 = vld [vmem:[#allocation5_spill] sm:$0xff] }
 0x17c   :  { %788 = vmatprep.subr.mxu0 %v3179_v60  ;;  %859 = vmatprep.subr.mxu1 %v3180_v54  ;;  %v3189_v60 = vld [vmem:[#allocation6_spill] sm:$0xff] }
 0x17d   :  { %789 = vmatpush1.msra.mxu0 %v3181_v0  ;;  %860 = vmatpush1.msra.mxu1 %v3182_v48 }
 0x17e   :  { %790 = vmatprep.subr.mxu0 %v3183_v47  ;;  %861 = vmatprep.subr.mxu1 %v3184_v51 }
 0x17f   :  { %791 = vmatpush1.msra.mxu0 %v3185_v3  ;;  %824 = vmatprep.mubr.f32.mxu0 %v3186_v49 }
 0x180   :  { %862 = vmatpush1.msra.mxu1 %v3187_v57  ;;  %895 = vmatprep.mubr.f32.mxu1 %v3186_v49 }
 0x181   :  { %948 = vmatprep.subr.mxu0 %v3188_v50  ;;  %1019 = vmatprep.subr.mxu1 %v3189_v60 }
 0x220   :  { %v638_v54 = vpop.f32.mrf.mxu0  ;;  %v709_v47 = vpop.f32.mrf.mxu1 }
 0x221   :  { %v718_v0 = vrot.slane %v638_v54, 6  ;;  %v720_v50 = vrot.slane %v709_v47, 6 }
 0x222   :  { %v640_v2 = vpop.f32.mrf.mxu0  ;;  %v711_v61 = vpop.f32.mrf.mxu1 }
 0x223   :  { %v726_v48 = vadd.f32 %v718_v0, %v2626_v46  ;;  %v719_v58 = vrot.slane %v640_v2, 6  ;;  %v721_v57 = vrot.slane %v711_v61, 6  ;;  %v728_v54 = vadd.f32 %v720_v50, %v2635_v56  ;;  %v3192_v0 = vld [vmem:[#allocation10_spill] sm:$0xff] }
 0x225   :  { %v1554_v51 = vmul.f32 -1.442695, %v726_v48  ;;  %v727_v3 = vadd.f32 %v719_v58, %v2628_v1  ;;  %v729_v49 = vadd.f32 %v721_v57, %v2632_v59 }
 0x227   :  { %1620 = vpow2.f32 %v1554_v51  ;;  %v1555_v62 = vmul.f32 -1.442695, %v727_v3  ;;  %v1556_v45 = vmul.f32 -1.442695, %v729_v49 }
 0x229   :  { %1622 = vpow2.f32 %v1555_v62  ;;  %v750_v62 = vrot.slane %v2638_v53, 6  ;;  %v3190_v53 = vld [vmem:[#allocation8_spill] sm:$0xff] }
 0x22a   :  { %1624 = vpow2.f32 %v1556_v45 }
 0x234   :  { %v1621_v60 = vpop.eup %1620 }
 0x235   :  { %v733_v55 = vadd.f32 1.0, %v1621_v60  ;;  %v3191_v60 = vld [vmem:[#allocation9_spill] sm:$0xff] }
 0x236   :  { %v1623_v52 = vpop.eup %1622 }
 0x237   :  { %1626 = vrcp.f32 %v733_v55  ;;  %v739_v2 = vadd.f32 1.0, %v1623_v52  ;;  %v1625_v48 = vpop.eup %1624 }
 0x238   :  { %1628 = vtanh.f32 %v728_v54  ;;  %v746_v3 = vadd.f32 1.0, %v1625_v48  ;;  %v3193_v54 = vld [vmem:[#allocation11_spill] sm:$0xff]  ;;  %v3195_v48 = vld [vmem:[#allocation13_spill] sm:$0xff] }
 0x239   :  { %1630 = vrcp.f32 %v739_v2  ;;  %v3194_v2 = vld [vmem:[#allocation12_spill] sm:$0xff] }
 0x23a   :  { %1632 = vrcp.f32 %v746_v3  ;;  %v3200_v3 = vld [vmem:[#allocation18_spill] sm:$0xff] }
 0x244   :  { %v1627_v58 = vpop.eup %1626 }
 0x245   :  { %v1629_v51 = vpop.eup %1628 }
 0x246   :  { %v1631_v61 = vpop.eup %1630  ;;  %v753_v57 = vmul.f32 %v1629_v51, %v1627_v58  ;;  %v3196_v58 = vld [vmem:[#allocation14_spill] sm:$0xff]  ;;  %v3197_v51 = vld [vmem:[#allocation15_spill] sm:$0xff] }
 0x247   :  { %v752_v47 = vmul.f32 %v1631_v61, %v750_v62  ;;  %v1633_v50 = vpop.eup %1632  ;;  %v3198_v62 = vld [vmem:[#allocation16_spill] sm:$0xff]  ;;  %v3199_v61 = vld [vmem:[#allocation17_spill] sm:$0xff] }
 0x249   :  { %v2712_v49 = vadd.f32 %v753_v57, %v752_v47  ;;  %v3201_v57 = vld [vmem:[#allocation19_spill] sm:$0xff]  ;;  %v3202_v47 = vld [vmem:[#allocation20_spill] sm:$0xff] }
 0x24b   :  { %1634 = vtanh.f32 %v2712_v49 }
 0x258   :  { %v1635_v45 = vpop.eup %1634 }
 0x259   :  { %v756_v55 = vmul.f32 %v1635_v45, %v1633_v50  ;;  %v3203_v50 = vld [vmem:[#allocation21_spill] sm:$0xff]  ;;  %v3204_v45 = vld [vmem:[#allocation22_spill] sm:$0xff] }
 0x25b   :  { %v758_v52 = vrot.slane %v756_v55, 2  ;;  %v3205_v55 = vld [vmem:[#allocation23_spill] sm:$0xff] }
 0x25d   :  { %825 = vmatmul.mubr.f32.vlgmr.msra.gmra.mxu0 %v758_v52  ;;  %896 = vmatmul.mubr.f32.vlgmr.msra.gmra.mxu1 %v758_v52  ;;  %v3206_v52 = vld [vmem:[#allocation24_spill] sm:$0xff] }
 0x25e   :  { %949 = vmatpush1.msra.mxu0 %v2156_v4  ;;  %1020 = vmatpush1.msra.mxu1 %v2161_v5 }
 0x25f   :  { %950 = vmatprep.subr.mxu0 %v2167_v6  ;;  %1021 = vmatprep.subr.mxu1 %v2172_v7 }
 0x260   :  { %951 = vmatpush1.msra.mxu0 %v2178_v8  ;;  %1022 = vmatpush1.msra.mxu1 %v2183_v9 }
 0x261   :  { %952 = vmatprep.subr.mxu0 %v2190_v10  ;;  %1023 = vmatprep.subr.mxu1 %v2195_v11 }
 0x262   :  { %953 = vmatpush1.msra.mxu0 %v2202_v12  ;;  %1024 = vmatpush1.msra.mxu1 %v2207_v13 }
 0x263   :  { %954 = vmatprep.subr.mxu0 %v2214_v14  ;;  %1025 = vmatprep.subr.mxu1 %v2219_v15 }
 0x264   :  { %955 = vmatpush1.msra.mxu0 %v2226_v16  ;;  %1026 = vmatpush1.msra.mxu1 %v2231_v17 }
 0x265   :  { %956 = vmatprep.subr.mxu0 %v2238_v18  ;;  %1027 = vmatprep.subr.mxu1 %v2243_v19 }
 0x266   :  { %957 = vmatpush1.msra.mxu0 %v2250_v20  ;;  %1028 = vmatpush1.msra.mxu1 %v2255_v21 }
 0x267   :  { %958 = vmatprep.subr.mxu0 %v2262_v22  ;;  %1029 = vmatprep.subr.mxu1 %v2267_v23 }
 0x268   :  { %959 = vmatpush1.msra.mxu0 %v2274_v24  ;;  %1030 = vmatpush1.msra.mxu1 %v2279_v25 }
 0x269   :  { %960 = vmatprep.subr.mxu0 %v2286_v26  ;;  %1031 = vmatprep.subr.mxu1 %v2291_v27 }
 0x26a   :  { %961 = vmatpush1.msra.mxu0 %v2298_v28  ;;  %1032 = vmatpush1.msra.mxu1 %v2303_v29 }
 0x26b   :  { %962 = vmatprep.subr.mxu0 %v2310_v30  ;;  %1033 = vmatprep.subr.mxu1 %v2315_v31 }
 0x26c   :  { %963 = vmatpush1.msra.mxu0 %v2322_v32  ;;  %1034 = vmatpush1.msra.mxu1 %v2327_v33 }
 0x26d   :  { %964 = vmatprep.subr.mxu0 %v2334_v34  ;;  %1035 = vmatprep.subr.mxu1 %v2339_v35 }
 0x26e   :  { %965 = vmatpush1.msra.mxu0 %v2346_v36  ;;  %1036 = vmatpush1.msra.mxu1 %v2351_v37 }
 0x26f   :  { %966 = vmatprep.subr.mxu0 %v2358_v38  ;;  %1037 = vmatprep.subr.mxu1 %v2363_v39 }
 0x270   :  { %967 = vmatpush1.msra.mxu0 %v2370_v40  ;;  %1038 = vmatpush1.msra.mxu1 %v2375_v41 }
 0x271   :  { %968 = vmatprep.subr.mxu0 %v2382_v42  ;;  %1039 = vmatprep.subr.mxu1 %v2387_v43 }
 0x272   :  { %969 = vmatpush1.msra.mxu0 %v2394_v44  ;;  %1040 = vmatpush1.msra.mxu1 %v3166_v63 }
 0x273   :  { %970 = vmatprep.subr.mxu0 %v3190_v53  ;;  %1041 = vmatprep.subr.mxu1 %v3191_v60 }
 0x274   :  { %971 = vmatpush1.msra.mxu0 %v3192_v0  ;;  %1042 = vmatpush1.msra.mxu1 %v3193_v54 }
 0x275   :  { %972 = vmatprep.subr.mxu0 %v3194_v2  ;;  %1043 = vmatprep.subr.mxu1 %v3195_v48 }
 0x276   :  { %973 = vmatpush1.msra.mxu0 %v3196_v58  ;;  %1044 = vmatpush1.msra.mxu1 %v3197_v51  ;;  %v3207_v58 = vld [vmem:[#allocation25_spill] sm:$0xff]  ;;  %v3208_v51 = vld [vmem:[#allocation26_spill] sm:$0xff] }
 0x277   :  { %974 = vmatprep.subr.mxu0 %v3198_v62  ;;  %1045 = vmatprep.subr.mxu1 %v3199_v61  ;;  %v3209_v62 = vmov 0.0   ;;  %v3210_v61 = vld [vmem:[#allocation27_spill] sm:$0xff] }
 0x278   :  { %975 = vmatpush1.msra.mxu0 %v3200_v3  ;;  %1046 = vmatpush1.msra.mxu1 %v3201_v57  ;;  %v3211_v57 = vld [vmem:[#allocation5_spill] sm:$0xff] }
 0x279   :  { %976 = vmatprep.subr.mxu0 %v3202_v47  ;;  %1047 = vmatprep.subr.mxu1 %v3203_v50  ;;  %v3212_v47 = vld [vmem:[#allocation6_spill] sm:$0xff] }
 0x27a   :  { %977 = vmatpush1.msra.mxu0 %v3204_v45  ;;  %1048 = vmatpush1.msra.mxu1 %v3205_v55 }
 0x27b   :  { %978 = vmatprep.subr.mxu0 %v3206_v52  ;;  %1049 = vmatprep.subr.mxu1 %v3207_v58 }
 0x27c   :  { %979 = vmatpush1.msra.mxu0 %v3208_v51  ;;  %1012 = vmatprep.mubr.f32.mxu0 %v3209_v62 }
 0x27d   :  { %1050 = vmatpush1.msra.mxu1 %v3210_v61  ;;  %1083 = vmatprep.mubr.f32.mxu1 %v3209_v62 }
 0x27e   :  { %1136 = vmatprep.subr.mxu0 %v3211_v57  ;;  %1207 = vmatprep.subr.mxu1 %v3212_v47 }
 0x31d   :  { %v826_v50 = vpop.f32.mrf.mxu0  ;;  %v897_v52 = vpop.f32.mrf.mxu1 }
 0x31e   :  { %v906_v45 = vrot.slane %v826_v50, 4  ;;  %v908_v57 = vrot.slane %v897_v52, 4 }
 0x31f   :  { %v828_v3 = vpop.f32.mrf.mxu0  ;;  %v899_v54 = vpop.f32.mrf.mxu1 }
 0x320   :  { %v914_v55 = vadd.f32 %v906_v45, %v2626_v46  ;;  %v907_v48 = vrot.slane %v828_v3, 4  ;;  %v909_v61 = vrot.slane %v899_v54, 4  ;;  %v916_v50 = vadd.f32 %v908_v57, %v2635_v56 }
 0x322   :  { %v1557_v58 = vmul.f32 -1.442695, %v914_v55  ;;  %v915_v51 = vadd.f32 %v907_v48, %v2628_v1  ;;  %v917_v62 = vadd.f32 %v909_v61, %v2632_v59 }
 0x324   :  { %1636 = vpow2.f32 %v1557_v58  ;;  %v1558_v2 = vmul.f32 -1.442695, %v915_v51  ;;  %v1559_v0 = vmul.f32 -1.442695, %v917_v62 }
 0x326   :  { %1638 = vpow2.f32 %v1558_v2  ;;  %v938_v2 = vrot.slane %v2712_v49, 6 }
 0x327   :  { %1640 = vpow2.f32 %v1559_v0 }
 0x331   :  { %v1637_v47 = vpop.eup %1636 }
 0x332   :  { %v921_v60 = vadd.f32 1.0, %v1637_v47 }
 0x333   :  { %v1639_v53 = vpop.eup %1638 }
 0x334   :  { %1642 = vrcp.f32 %v921_v60  ;;  %v927_v3 = vadd.f32 1.0, %v1639_v53  ;;  %v1641_v48 = vpop.eup %1640 }
 0x335   :  { %1644 = vtanh.f32 %v916_v50  ;;  %v934_v45 = vadd.f32 1.0, %v1641_v48 }
 0x336   :  { %1646 = vrcp.f32 %v927_v3 }
 0x337   :  { %1648 = vrcp.f32 %v934_v45  ;;  %v1337_v45 = vld [vmem:[%s3076_s4 + $0xe0] sm:$0xff] }
 0x341   :  { %v1643_v58 = vpop.eup %1642 }
 0x342   :  { %v1645_v51 = vpop.eup %1644 }
 0x343   :  { %v1647_v54 = vpop.eup %1646  ;;  %v941_v61 = vmul.f32 %v1645_v51, %v1643_v58  ;;  %v1340_v51 = vld [vmem:[%s3076_s4 + $0xf8] sm:$0xff] }
 0x344   :  { %v940_v55 = vmul.f32 %v1647_v54, %v938_v2  ;;  %v1649_v52 = vpop.eup %1648  ;;  %v1339_v2 = vld [vmem:[%s3076_s4 + $0xf0] sm:$0xff]  ;;  %v1338_v54 = vld [vmem:[%s3076_s4 + $0xe8] sm:$0xff] }
 0x346   :  { %v2786_v62 = vadd.f32 %v941_v61, %v940_v55  ;;  %v1336_v61 = vld [vmem:[%s3076_s4 + $0xd8] sm:$0xff]  ;;  %v1335_v55 = vld [vmem:[%s3076_s4 + $0xd0] sm:$0xff] }
 0x348   :  { %1650 = vtanh.f32 %v2786_v62 }
 0x355   :  { %v1651_v0 = vpop.eup %1650 }
 0x356   :  { %v944_v60 = vmul.f32 %v1651_v0, %v1649_v52  ;;  %v1333_v52 = vld [vmem:[%s3076_s4 + $0xc0] sm:$0xff]  ;;  %v1332_v0 = vld [vmem:[%s3076_s4 + $0xb8] sm:$0xff] }
 0x358   :  { %v946_v53 = vrot.slane %v944_v60, 4  ;;  %v1331_v60 = vld [vmem:[%s3076_s4 + $0xb0] sm:$0xff] }
 0x35a   :  { %1013 = vmatmul.mubr.f32.vlgmr.msra.gmra.mxu0 %v946_v53  ;;  %1084 = vmatmul.mubr.f32.vlgmr.msra.gmra.mxu1 %v946_v53  ;;  %v1330_v53 = vld [vmem:[%s3076_s4 + $0xa8] sm:$0xff] }
 0x35b   :  { %1137 = vmatpush1.msra.mxu0 %v2156_v4  ;;  %1208 = vmatpush1.msra.mxu1 %v2161_v5  ;;  %v3213_v4 = vld [vmem:[#allocation8_spill] sm:$0xff]  ;;  %v3214_v5 = vld [vmem:[#allocation9_spill] sm:$0xff] }
 0x35c   :  { %1138 = vmatprep.subr.mxu0 %v2167_v6  ;;  %1209 = vmatprep.subr.mxu1 %v2172_v7  ;;  %v3215_v6 = vld [vmem:[#allocation10_spill] sm:$0xff]  ;;  %v3216_v7 = vld [vmem:[#allocation11_spill] sm:$0xff] }
 0x35d   :  { %1139 = vmatpush1.msra.mxu0 %v2178_v8  ;;  %1210 = vmatpush1.msra.mxu1 %v2183_v9  ;;  %v3217_v8 = vld [vmem:[#allocation12_spill] sm:$0xff]  ;;  %v3218_v9 = vld [vmem:[#allocation13_spill] sm:$0xff] }
 0x35e   :  { %1140 = vmatprep.subr.mxu0 %v2190_v10  ;;  %1211 = vmatprep.subr.mxu1 %v2195_v11  ;;  %v3219_v10 = vld [vmem:[#allocation14_spill] sm:$0xff]  ;;  %v3220_v11 = vld [vmem:[#allocation15_spill] sm:$0xff] }
 0x35f   :  { %1141 = vmatpush1.msra.mxu0 %v2202_v12  ;;  %1212 = vmatpush1.msra.mxu1 %v2207_v13  ;;  %v3221_v12 = vld [vmem:[#allocation16_spill] sm:$0xff]  ;;  %v3222_v13 = vld [vmem:[#allocation17_spill] sm:$0xff] }
 0x360   :  { %1142 = vmatprep.subr.mxu0 %v2214_v14  ;;  %1213 = vmatprep.subr.mxu1 %v2219_v15  ;;  %v3223_v14 = vld [vmem:[#allocation18_spill] sm:$0xff]  ;;  %v3224_v15 = vld [vmem:[#allocation19_spill] sm:$0xff] }
 0x361   :  { %1143 = vmatpush1.msra.mxu0 %v2226_v16  ;;  %1214 = vmatpush1.msra.mxu1 %v2231_v17  ;;  %v3225_v16 = vld [vmem:[#allocation20_spill] sm:$0xff]  ;;  %v3226_v17 = vld [vmem:[#allocation21_spill] sm:$0xff] }
 0x362   :  { %1144 = vmatprep.subr.mxu0 %v2238_v18  ;;  %1215 = vmatprep.subr.mxu1 %v2243_v19  ;;  %v3227_v18 = vld [vmem:[#allocation22_spill] sm:$0xff]  ;;  %v3228_v19 = vld [vmem:[#allocation23_spill] sm:$0xff] }
 0x363   :  { %1145 = vmatpush1.msra.mxu0 %v2250_v20  ;;  %1216 = vmatpush1.msra.mxu1 %v2255_v21  ;;  %v3229_v20 = vld [vmem:[#allocation24_spill] sm:$0xff]  ;;  %v3230_v21 = vld [vmem:[#allocation25_spill] sm:$0xff] }
 0x364   :  { %1146 = vmatprep.subr.mxu0 %v2262_v22  ;;  %1217 = vmatprep.subr.mxu1 %v2267_v23  ;;  %v3231_v22 = vld [vmem:[#allocation26_spill] sm:$0xff]  ;;  %v3232_v23 = vmov 0.0  }
 0x365   :  { %1147 = vmatpush1.msra.mxu0 %v2274_v24  ;;  %1218 = vmatpush1.msra.mxu1 %v2279_v25  ;;  %v3233_v24 = vld [vmem:[#allocation27_spill] sm:$0xff] }
 0x366   :  { %1148 = vmatprep.subr.mxu0 %v2286_v26  ;;  %1219 = vmatprep.subr.mxu1 %v2291_v27 }
 0x367   :  { %1149 = vmatpush1.msra.mxu0 %v2298_v28  ;;  %1220 = vmatpush1.msra.mxu1 %v2303_v29 }
 0x368   :  { %1150 = vmatprep.subr.mxu0 %v2310_v30  ;;  %1221 = vmatprep.subr.mxu1 %v2315_v31 }
 0x369   :  { %1151 = vmatpush1.msra.mxu0 %v2322_v32  ;;  %1222 = vmatpush1.msra.mxu1 %v2327_v33 }
 0x36a   :  { %1152 = vmatprep.subr.mxu0 %v2334_v34  ;;  %1223 = vmatprep.subr.mxu1 %v2339_v35 }
 0x36b   :  { %1153 = vmatpush1.msra.mxu0 %v2346_v36  ;;  %1224 = vmatpush1.msra.mxu1 %v2351_v37 }
 0x36c   :  { %1154 = vmatprep.subr.mxu0 %v2358_v38  ;;  %1225 = vmatprep.subr.mxu1 %v2363_v39 }
 0x36d   :  { %1155 = vmatpush1.msra.mxu0 %v2370_v40  ;;  %1226 = vmatpush1.msra.mxu1 %v2375_v41 }
 0x36e   :  { %1156 = vmatprep.subr.mxu0 %v2382_v42  ;;  %1227 = vmatprep.subr.mxu1 %v2387_v43 }
 0x36f   :  { %1157 = vmatpush1.msra.mxu0 %v2394_v44  ;;  %1228 = vmatpush1.msra.mxu1 %v3166_v63  ;;  %v1126_v63 = vrot.slane %v2786_v62, 6  ;;  %v1334_v62 = vld [vmem:[%s3076_s4 + $0xc8] sm:$0xff] }
 0x370   :  { %1158 = vmatprep.subr.mxu0 %v3213_v4  ;;  %1229 = vmatprep.subr.mxu1 %v3214_v5  ;;  %v1329_v4 = vld [vmem:[%s3076_s4 + $0xa0] sm:$0xff]  ;;  %v1328_v5 = vld [vmem:[%s3076_s4 + $0x98] sm:$0xff] }
 0x371   :  { %1159 = vmatpush1.msra.mxu0 %v3215_v6  ;;  %1230 = vmatpush1.msra.mxu1 %v3216_v7  ;;  %v1327_v6 = vld [vmem:[%s3076_s4 + $0x90] sm:$0xff]  ;;  %v1326_v7 = vld [vmem:[%s3076_s4 + $0x88] sm:$0xff] }
 0x372   :  { %1160 = vmatprep.subr.mxu0 %v3217_v8  ;;  %1231 = vmatprep.subr.mxu1 %v3218_v9  ;;  %v1325_v8 = vld [vmem:[%s3076_s4 + $0x80] sm:$0xff]  ;;  %v1324_v9 = vld [vmem:[%s3076_s4 + $0x78] sm:$0xff] }
 0x373   :  { %1161 = vmatpush1.msra.mxu0 %v3219_v10  ;;  %1232 = vmatpush1.msra.mxu1 %v3220_v11  ;;  %v1323_v10 = vld [vmem:[%s3076_s4 + $0x70] sm:$0xff]  ;;  %v1322_v11 = vld [vmem:[%s3076_s4 + $0x68] sm:$0xff] }
 0x374   :  { %1162 = vmatprep.subr.mxu0 %v3221_v12  ;;  %1233 = vmatprep.subr.mxu1 %v3222_v13  ;;  %v1321_v12 = vld [vmem:[%s3076_s4 + $0x60] sm:$0xff]  ;;  %v1320_v13 = vld [vmem:[%s3076_s4 + $0x58] sm:$0xff] }
 0x375   :  { %1163 = vmatpush1.msra.mxu0 %v3223_v14  ;;  %1234 = vmatpush1.msra.mxu1 %v3224_v15  ;;  %v1319_v14 = vld [vmem:[%s3076_s4 + $0x50] sm:$0xff]  ;;  %v1318_v15 = vld [vmem:[%s3076_s4 + $0x48] sm:$0xff] }
 0x376   :  { %1164 = vmatprep.subr.mxu0 %v3225_v16  ;;  %1235 = vmatprep.subr.mxu1 %v3226_v17  ;;  %v1317_v16 = vld [vmem:[%s3076_s4 + $0x40] sm:$0xff]  ;;  %v1316_v17 = vld [vmem:[%s3076_s4 + $0x38] sm:$0xff] }
 0x377   :  { %1165 = vmatpush1.msra.mxu0 %v3227_v18  ;;  %1236 = vmatpush1.msra.mxu1 %v3228_v19  ;;  %v1315_v18 = vld [vmem:[%s3076_s4 + $0x30] sm:$0xff]  ;;  %v1314_v19 = vld [vmem:[%s3076_s4 + $0x28] sm:$0xff] }
 0x378   :  { %1166 = vmatprep.subr.mxu0 %v3229_v20  ;;  %1237 = vmatprep.subr.mxu1 %v3230_v21  ;;  %v1313_v20 = vld [vmem:[%s3076_s4 + $0x20] sm:$0xff]  ;;  %v1312_v21 = vld [vmem:[%s3076_s4 + $0x18] sm:$0xff] }
 0x379   :  { %1167 = vmatpush1.msra.mxu0 %v3231_v22  ;;  %1200 = vmatprep.mubr.f32.mxu0 %v3232_v23  ;;  %v1311_v22 = vld [vmem:[%s3076_s4 + $0x10] sm:$0xff] }
 0x37a   :  { %1238 = vmatpush1.msra.mxu1 %v3233_v24  ;;  %1271 = vmatprep.mubr.f32.mxu1 %v3232_v23  ;;  %v1309_v24 = vld [vmem:[%s3076_s4] sm:$0xff] }
 0x37b   :  { %1353 = vmatprep.subr.mxu0 %v1340_v51 }
 0x41a   :  { %v1014_v25 = vpop.f32.mrf.mxu0  ;;  %v1085_v29 = vpop.f32.mrf.mxu1 }
 0x41b   :  { %v1094_v26 = vrot.slane %v1014_v25, 2  ;;  %v1096_v37 = vrot.slane %v1085_v29, 2  ;;  %v1457_v25 = vld [vmem:[%s3078_s6 + $0xf8] sm:$0xff]  ;;  %v1455_v29 = vld [vmem:[%s3078_s6 + $0xe8] sm:$0xff] }
 0x41c   :  { %v1016_v27 = vpop.f32.mrf.mxu0  ;;  %v1087_v34 = vpop.f32.mrf.mxu1  ;;  %1567 = vmatprep.subr.mxu1 %v1457_v25  ;;  %v3238_v25 = vld [vmem:[#allocation28_spill] sm:$0xff] }
 0x41d   :  { %v1102_v28 = vadd.f32 %v1094_v26, %v2626_v46  ;;  %v1095_v30 = vrot.slane %v1016_v27, 2  ;;  %v1097_v35 = vrot.slane %v1087_v34, 2  ;;  %v1104_v40 = vadd.f32 %v1096_v37, %v2635_v56  ;;  %v1441_v26 = vld [vmem:[%s3078_s6 + $0x78] sm:$0xff]  ;;  %v1456_v27 = vld [vmem:[%s3078_s6 + $0xf0] sm:$0xff]  ;;  %v1451_v37 = vld [vmem:[%s3078_s6 + $0xc8] sm:$0xff] }
 0x41e   :  { %v1437_v34 = vld [vmem:[%s3078_s6 + $0x58] sm:$0xff] }
 0x41f   :  { %v1560_v31 = vmul.f32 -1.442695, %v1102_v28  ;;  %v1103_v32 = vadd.f32 %v1095_v30, %v2628_v1  ;;  %v1105_v36 = vadd.f32 %v1097_v35, %v2632_v59  ;;  %v1440_v28 = vld [vmem:[%s3078_s6 + $0x70] sm:$0xff]  ;;  %v1439_v30 = vld [vmem:[%s3078_s6 + $0x68] sm:$0xff] }
 0x420   :  { %v1452_v35 = vld [vmem:[%s3078_s6 + $0xd0] sm:$0xff] }
 0x421   :  { %1652 = vpow2.f32 %v1560_v31  ;;  %v1561_v33 = vmul.f32 -1.442695, %v1103_v32  ;;  %v1562_v38 = vmul.f32 -1.442695, %v1105_v36  ;;  %v1454_v31 = vld [vmem:[%s3078_s6 + $0xe0] sm:$0xff]  ;;  %v1436_v36 = vld [vmem:[%s3078_s6 + $0x50] sm:$0xff] }
 0x422   :  { %v1438_v32 = vld [vmem:[%s3078_s6 + $0x60] sm:$0xff] }
 0x423   :  { %1654 = vpow2.f32 %v1561_v33  ;;  %v1453_v33 = vld [vmem:[%s3078_s6 + $0xd8] sm:$0xff] }
 0x424   :  { %1656 = vpow2.f32 %v1562_v38  ;;  %v1435_v38 = vld [vmem:[%s3078_s6 + $0x48] sm:$0xff] }
 0x42e   :  { %v1653_v39 = vpop.eup %1652 }
 0x42f   :  { %v1109_v41 = vadd.f32 1.0, %v1653_v39  ;;  %v1450_v39 = vld [vmem:[%s3078_s6 + $0xc0] sm:$0xff] }
 0x430   :  { %v1655_v42 = vpop.eup %1654 }
 0x431   :  { %1658 = vrcp.f32 %v1109_v41  ;;  %v1115_v43 = vadd.f32 1.0, %v1655_v42  ;;  %v1657_v44 = vpop.eup %1656  ;;  %v1449_v41 = vld [vmem:[%s3078_s6 + $0xb8] sm:$0xff] }
 0x432   :  { %1660 = vtanh.f32 %v1104_v40  ;;  %v1122_v57 = vadd.f32 1.0, %v1657_v44  ;;  %v1434_v40 = vld [vmem:[%s3078_s6 + $0x40] sm:$0xff]  ;;  %v1433_v42 = vld [vmem:[%s3078_s6 + $0x38] sm:$0xff]  ;;  %v1432_v44 = vld [vmem:[%s3078_s6 + $0x30] sm:$0xff] }
 0x433   :  { %1662 = vrcp.f32 %v1115_v43  ;;  %v1448_v43 = vld [vmem:[%s3078_s6 + $0xb0] sm:$0xff] }
 0x434   :  { %1664 = vrcp.f32 %v1122_v57 }
 0x43e   :  { %v1659_v46 = vpop.eup %1658 }
 0x43f   :  { %v1661_v1 = vpop.eup %1660 }
 0x440   :  { %v1663_v49 = vpop.eup %1662  ;;  %v1129_v59 = vmul.f32 %v1661_v1, %v1659_v46  ;;  %v1447_v46 = vld [vmem:[%s3078_s6 + $0xa8] sm:$0xff] }
 0x441   :  { %v1128_v47 = vmul.f32 %v1663_v49, %v1126_v63  ;;  %v1665_v56 = vpop.eup %1664  ;;  %v1431_v1 = vld [vmem:[%s3078_s6 + $0x28] sm:$0xff]  ;;  %v1446_v63 = vld [vmem:[%s3078_s6 + $0xa0] sm:$0xff] }
 0x442   :  { %v1430_v49 = vld [vmem:[%s3078_s6 + $0x20] sm:$0xff] }
 0x443   :  { %v2858_v50 = vadd.f32 %v1129_v59, %v1128_v47  ;;  %v3234_v59 = vld [vmem:[#allocation29_spill] sm:$0xff] }
 0x445   :  { %1666 = vtanh.f32 %v2858_v50 }
 0x452   :  { %v1667_v3 = vpop.eup %1666 }
 0x453   :  { %v1132_v48 = vmul.f32 %v1667_v3, %v1665_v56 }
 0x455   :  { %v1134_v58 = vrot.slane %v1132_v48, 6  ;;  %v3235_v48 = vld [vmem:[#allocation30_spill] sm:$0xff] }
 0x457   :  { %1201 = vmatmul.mubr.f32.vlgmr.msra.gmra.mxu0 %v1134_v58  ;;  %1272 = vmatmul.mubr.f32.vlgmr.msra.gmra.mxu1 %v1134_v58 }
 0x458   :  { %1417 = vmatprep.mubr.f32.mxu0 %v3232_v23  ;;  %1354 = vmatpush1.msra.mxu0 %v1339_v2  ;;  %v1310_v23 = vld [vmem:[%s3076_s4 + $0x8] sm:$0xff] }
 0x459   :  { %1355 = vmatprep.subr.mxu0 %v1338_v54  ;;  %1568 = vmatpush3.msra.mxu1 %v1441_v26  ;;  %v3239_v26 = vsub.s32 0, %v3238_v25 }
 0x45a   :  { %1356 = vmatpush1.msra.mxu0 %v1337_v45  ;;  %1569 = vmatprep.subr.mxu1 %v1456_v27  ;;  %v3236_v45 = vld [vmem:[#allocation32_spill] sm:$0xff] }
 0x45b   :  { %1357 = vmatprep.subr.mxu0 %v1336_v61  ;;  %1570 = vmatpush3.msra.mxu1 %v1440_v28  ;;  %v3240_v28 = vsub.s32 1, %v3238_v25 }
 0x45c   :  { %1358 = vmatpush1.msra.mxu0 %v1335_v55  ;;  %1571 = vmatprep.subr.mxu1 %v1455_v29  ;;  %v3237_v55 = vld [vmem:[#allocation31_spill] sm:$0xff] }
 0x45d   :  { %1359 = vmatprep.subr.mxu0 %v1334_v62  ;;  %1572 = vmatpush3.msra.mxu1 %v1439_v30 }
 0x45e   :  { %1360 = vmatpush1.msra.mxu0 %v1333_v52  ;;  %1573 = vmatprep.subr.mxu1 %v1454_v31 }
 0x45f   :  { %1361 = vmatprep.subr.mxu0 %v1332_v0  ;;  %1574 = vmatpush3.msra.mxu1 %v1438_v32 }
 0x460   :  { %1362 = vmatpush1.msra.mxu0 %v1331_v60  ;;  %1575 = vmatprep.subr.mxu1 %v1453_v33 }
 0x461   :  { %1363 = vmatprep.subr.mxu0 %v1330_v53  ;;  %1576 = vmatpush3.msra.mxu1 %v1437_v34 }
 0x462   :  { %1364 = vmatpush1.msra.mxu0 %v1329_v4  ;;  %1577 = vmatprep.subr.mxu1 %v1452_v35 }
 0x463   :  { %1365 = vmatprep.subr.mxu0 %v1328_v5  ;;  %1578 = vmatpush3.msra.mxu1 %v1436_v36 }
 0x464   :  { %1366 = vmatpush1.msra.mxu0 %v1327_v6  ;;  %1579 = vmatprep.subr.mxu1 %v1451_v37  ;;  %v1566_v37 = vld [vmem:[%s3079_s7] ss:$0 sm:$0xff] }
 0x465   :  { %1367 = vmatprep.subr.mxu0 %v1326_v7  ;;  %1580 = vmatpush3.msra.mxu1 %v1435_v38 }
 0x466   :  { %1368 = vmatpush1.msra.mxu0 %v1325_v8  ;;  %1581 = vmatprep.subr.mxu1 %v1450_v39 }
 0x467   :  { %1369 = vmatprep.subr.mxu0 %v1324_v9  ;;  %1582 = vmatpush3.msra.mxu1 %v1434_v40  ;;  %v1302_v9 = vrot.slane %v2858_v50, 6  ;;  %v1444_v50 = vld [vmem:[%s3078_s6 + $0x90] sm:$0xff] }
 0x468   :  { %1370 = vmatpush1.msra.mxu0 %v1323_v10  ;;  %1583 = vmatprep.subr.mxu1 %v1449_v41 }
 0x469   :  { %1371 = vmatprep.subr.mxu0 %v1322_v11  ;;  %1584 = vmatpush3.msra.mxu1 %v1433_v42 }
 0x46a   :  { %1372 = vmatpush1.msra.mxu0 %v1321_v12  ;;  %1585 = vmatprep.subr.mxu1 %v1448_v43 }
 0x46b   :  { %1373 = vmatprep.subr.mxu0 %v1320_v13  ;;  %1586 = vmatpush3.msra.mxu1 %v1432_v44 }
 0x46c   :  { %1374 = vmatpush1.msra.mxu0 %v1319_v14  ;;  %1587 = vmatprep.subr.mxu1 %v1447_v46 }
 0x46d   :  { %1375 = vmatprep.subr.mxu0 %v1318_v15  ;;  %1588 = vmatpush3.msra.mxu1 %v1431_v1 }
 0x46e   :  { %1376 = vmatpush1.msra.mxu0 %v1317_v16  ;;  %1589 = vmatprep.subr.mxu1 %v1446_v63 }
 0x46f   :  { %1377 = vmatprep.subr.mxu0 %v1316_v17  ;;  %1590 = vmatpush3.msra.mxu1 %v1430_v49  ;;  %v1445_v17 = vld [vmem:[%s3078_s6 + $0x98] sm:$0xff] }
 0x470   :  { %1378 = vmatpush1.msra.mxu0 %v1315_v18  ;;  %1591 = vmatprep.subr.mxu1 %v1445_v17  ;;  %v1429_v18 = vld [vmem:[%s3078_s6 + $0x18] sm:$0xff] }
 0x471   :  { %1379 = vmatprep.subr.mxu0 %v1314_v19  ;;  %1592 = vmatpush3.msra.mxu1 %v1429_v18  ;;  %v1428_v19 = vld [vmem:[%s3078_s6 + $0x10] sm:$0xff] }
 0x472   :  { %1380 = vmatpush1.msra.mxu0 %v1313_v20  ;;  %1593 = vmatprep.subr.mxu1 %v1444_v50  ;;  %v1443_v20 = vld [vmem:[%s3078_s6 + $0x88] sm:$0xff] }
 0x473   :  { %1381 = vmatprep.subr.mxu0 %v1312_v21  ;;  %1594 = vmatpush3.msra.mxu1 %v1428_v19  ;;  %v1427_v21 = vld [vmem:[%s3078_s6 + $0x8] sm:$0xff] }
 0x474   :  { %1382 = vmatpush1.msra.mxu0 %v1311_v22  ;;  %1595 = vmatprep.subr.mxu1 %v1443_v20  ;;  %v1442_v22 = vld [vmem:[%s3078_s6 + $0x80] sm:$0xff] }
 0x475   :  { %1383 = vmatprep.subr.mxu0 %v1310_v23  ;;  %v1426_v23 = vld [vmem:[%s3078_s6] sm:$0xff]  ;;  %1596 = vmatpush3.msra.mxu1 %v1427_v21 }
 0x476   :  { %1384 = vmatpush1.msra.mxu0 %v1309_v24  ;;  %1597 = vmatprep.subr.mxu1 %v1442_v22  ;;  %v1341_v24 = vld [vmem:[%s3077_s5] sm:$0x3]  ;;  %s1707_s5 = smov [#allocation2]  }
 0x477   :  { %1598 = vmatpush3.msra.mxu1 %v1426_v23  ;;  %v1346_v27 = vrot.slane %v1341_v24, %v3239_v26  ;;  %v1350_v29 = vrot.slane %v1341_v24, %v3240_v28  ;;  %s1543_s2 = sshll.u32 %s1707_s5, 4  ;;  %s1544_s2 = int_to_ptr.vmem [resolvable:$true] %s1543_s2 }
 0x478   :  { %s1684_s16 = scalar_lea.vmem %s1544_s2, 32  ;;  %p1689_p1 = scmp.lt.s32.totalorder %s1544_s2, %s1544_s2 }
 0x479   :  { %p1685_p0 = scmp.ne.s32.totalorder %s1544_s2, %s1684_s16  ;;  %p1690_p2 = scmp.lt.s32.totalorder %s1684_s16, %s1684_s16 }
 0x47b   :  { %p1691_p3 = por %p1690_p2, %p1689_p1 }
 0x47d   :  { %p1692_p4 = pnand %p1691_p3, %p1685_p0 }
 0x517   :  { %v1202_v57 = vpop.f32.mrf.mxu0  ;;  %v1273_v51 = vpop.f32.mrf.mxu1 }
 0x518   :  { %v1278_v47 = vadd.f32 %v1202_v57, %v3234_v59  ;;  %v1280_v62 = vadd.f32 %v1273_v51, %v3237_v55 }
 0x519   :  { %v1204_v56 = vpop.f32.mrf.mxu0  ;;  %v1275_v54 = vpop.f32.mrf.mxu1 }
 0x51a   :  { %v1563_v3 = vmul.f32 -1.442695, %v1278_v47  ;;  %v1279_v58 = vadd.f32 %v1204_v56, %v3235_v48  ;;  %v1281_v61 = vadd.f32 %v1275_v54, %v3236_v45 }
 0x51c   :  { %1668 = vpow2.f32 %v1563_v3  ;;  %v1564_v2 = vmul.f32 -1.442695, %v1279_v58  ;;  %v1565_v52 = vmul.f32 -1.442695, %v1281_v61 }
 0x51e   :  { %1670 = vpow2.f32 %v1564_v2 }
 0x51f   :  { %1672 = vtanh.f32 %v1280_v62 }
 0x520   :  { %1674 = vpow2.f32 %v1565_v52 }
 0x529   :  { %v1669_v0 = vpop.eup %1668 }
 0x52a   :  { %v1285_v60 = vadd.f32 1.0, %v1669_v0 }
 0x52b   :  { %v1671_v53 = vpop.eup %1670 }
 0x52c   :  { %1676 = vrcp.f32 %v1285_v60  ;;  %v1291_v4 = vadd.f32 1.0, %v1671_v53  ;;  %v1673_v5 = vpop.eup %1672 }
 0x52d   :  { %v1675_v6 = vpop.eup %1674 }
 0x52e   :  { %1678 = vrcp.f32 %v1291_v4  ;;  %v1298_v11 = vadd.f32 1.0, %v1675_v6 }
 0x530   :  { %1680 = vrcp.f32 %v1298_v11 }
 0x539   :  { %v1677_v7 = vpop.eup %1676 }
 0x53a   :  { %v1305_v8 = vmul.f32 %v1677_v7, %v1673_v5 }
 0x53b   :  { %v1679_v10 = vpop.eup %1678 }
 0x53c   :  { %v1304_v12 = vmul.f32 %v1679_v10, %v1302_v9 }
 0x53d   :  { %v1681_v14 = vpop.eup %1680 }
 0x53e   :  { %v1306_v13 = vadd.f32 %v1305_v8, %v1304_v12 }
 0x540   :  { %1682 = vtanh.f32 %v1306_v13 }
 0x54d   :  { %v1683_v15 = vpop.eup %1682 }
 0x54e   :  { %v1308_v16 = vmul.f32 %v1683_v15, %v1681_v14 }
 0x550   :  { %1418 = vmatmul.mubr.f32.vlgmr.msra.gmra.mxu0 %v1308_v16 }
 0x610   :  { %v1419_v30 = vpop.f32.mrf.mxu0 }
 0x611   :  { %v1420_v31 = vadd.f32 %v1419_v30, %v1346_v27 }
 0x612   :  { %v1421_v32 = vpop.f32.mrf.mxu0 }
 0x613   :  { %v1422_v33 = vadd.f32 %v1421_v32, %v1350_v29  ;;  %v1424_v35 = vmax.f32 %v1420_v31, 0.0 }
 0x615   :  { %v1425_v34 = vmax.f32 %v1422_v33, 0.0 }
 0x617   :  { %1529 = vmatprep.mubr.f32.mxu1 %v1425_v34 }
 0x618   :  { %1530 = vmatmul.mubr.f32.vlgmr.msra.gmra.mxu1 %v1424_v35 }
 0x6d8   :  { %v1599_v36 = vpop.f32.mrf.mxu1 }
 0x6da   :  { %v1600_v38 = vpop.f32.mrf.mxu1 }
 0x6db   :  { %v1601_v39 = vadd.f32 %v1600_v38, %v1599_v36 }
 0x6dd   :  { %v1532_v40 = vadd.f32 %v1601_v39, %v1566_v37 }
 0x6df   :  { %1536 = vst.msk [vmem:[#allocation2] sm:$0x3] %vm1535_vm0, %v1532_v40 }
 0x6e0   :  { %1695 = shalt.err (!%p1692_p4)
}
 0x6e1   :  { %1546 = dma.vmem_to_hbm [thread:$0]  %s1544_s2, 32, %s3080_s8, [#allocation3]  }
 0x6e2   :  { %1704 = dma.done.wait [#allocation3], 32  }
 0x6e3   :  { %1705 = vsyncadd [#allocation3], 4294967264 }
 0x6e4   :  { %1550 = vsyncpa [#allocation3], 1 }

// kernel: multi_fashion_expert_forward.2
= control target key start
LH: loop header
LB: loop body
LE: loop exit
PB: predicated region body
PF: predicated region fallthrough
CT: control target
= control target key end

     0   :  { %s13371_s30 = smov 0   ;;  %s16834_s0 = inlined_call_operand.vmem [shape: f32[2,32,32,9], index: 0, kind: input, shape index: {}]   ;;  %s16835_s1 = inlined_call_operand.vmem [shape: f32[5,9,32], index: 1, kind: input, shape index: {}]   ;;  %s16836_s2 = inlined_call_operand.vmem [shape: f32[5,1,32], index: 2, kind: input, shape index: {}]   ;;  %s16837_s3 = inlined_call_operand.vmem [shape: f32[5,9,32,64], index: 3, kind: input, shape index: {}]   ;;  %s16838_s4 = inlined_call_operand.vmem [shape: f32[5,1,64], index: 4, kind: input, shape index: {}]   ;;  %s16839_s5 = inlined_call_operand.vmem [shape: f32[5,9,64,128], index: 5, kind: input, shape index: {}]   ;;  %s16840_s6 = inlined_call_operand.vmem [shape: f32[5,1,128], index: 6, kind: input, shape index: {}]   ;;  %s16841_s7 = inlined_call_operand.vmem [shape: bf16[5,2048,256], index: 7, kind: input, shape index: {}]   ;;  %s16842_s8 = inlined_call_operand.vmem [shape: f32[5,1,256], index: 8, kind: input, shape index: {}]   ;;  %s16843_s9 = inlined_call_operand.vmem [shape: f32[5,2,256], index: 9, kind: output, shape index: {}]  }
   0x1 LB: > { %s9941_s10 = sadd.s32 4294967295, %s13310_s30   ;;  %p9945_p0 = scmp.ge.s32.totalorder %s13310_s30, 1  ;;  %s13310_s30 = sphi %s13371_s30, %s19_s30  }
   0x2   : > { %p350_p1 = scmp.lt.s32.totalorder %s13310_s30, 6 }
   0x4   : > { %p351_p2 = pnand %p9945_p0, %p350_p1 }
   0x6   : > { %354 = sbr.rel (%p351_p2) target bundleno = 1744 (0x6d0), region = 56 }
   0xb   : > { %p13381_p3 = scmp.lt.s32.totalorder %s9941_s10, 4  ;;  %vm452_vm0 = vcmask 261120   ;;  %vm455_vm1 = vcmask 254976   ;;  %vm562_vm2 = vcmask 523264   ;;  %v13320_v0 = vmov 0.0  }
   0xc   : > { %453 = vst.msk [vmem:[#allocation2] sm:$0xff] %vm452_vm0, %v13320_v0  ;;  %454 = vst.msk [vmem:[#allocation2 + $0x8] sm:$0xff] %vm452_vm0, %v13320_v0  ;;  %vm564_vm3 = vcmask 517120  }
   0xd   : > { %457 = vst.msk [vmem:[#allocation2 + $0x18] sm:$0xff] %vm452_vm0, %v13320_v0  ;;  %458 = vst.msk [vmem:[#allocation2 + $0x20] sm:$0xff] %vm452_vm0, %v13320_v0  ;;  %s16979_s10 = smov (!%p13381_p3, %s9941_s10), 4 }
   0xe   : > { %460 = vst.msk [vmem:[#allocation2 + $0x30] sm:$0xff] %vm452_vm0, %v13320_v0  ;;  %461 = vst.msk [vmem:[#allocation2 + $0x38] sm:$0xff] %vm452_vm0, %v13320_v0  ;;  %s11038_s12 = sshll.u32 %s16979_s10, 4  ;;  %s13692_s15 = scalar_lea.vmem %s16836_s2, %s16979_s10 }
   0xf   : > { %463 = vst.msk [vmem:[#allocation2 + $0x48] sm:$0xff] %vm452_vm0, %v13320_v0  ;;  %464 = vst.msk [vmem:[#allocation2 + $0x50] sm:$0xff] %vm452_vm0, %v13320_v0  ;;  %s13697_s18 = scalar_lea.vmem %s16835_s1, %s11038_s12  ;;  %s12641_s19 = smul.u32 288, %s16979_s10 }
  0x10   : > { %466 = vst.msk [vmem:[#allocation2 + $0x60] sm:$0xff] %vm452_vm0, %v13320_v0  ;;  %467 = vst.msk [vmem:[#allocation2 + $0x68] sm:$0xff] %vm452_vm0, %v13320_v0  ;;  %s12642_s23 = smul.u32 576, %s16979_s10  ;;  %s11039_s14 = sshll.u32 %s16979_s10, 11 }
  0x11   : > { %469 = vst.msk [vmem:[#allocation2 + $0x78] sm:$0xff] %vm452_vm0, %v13320_v0  ;;  %470 = vst.msk [vmem:[#allocation2 + $0x80] sm:$0xff] %vm452_vm0, %v13320_v0  ;;  %s13708_s26 = scalar_lea.vmem %s16837_s3, %s12641_s19  ;;  %s13723_s20 = scalar_lea.vmem %s16841_s7, %s11039_s14 }
  0x12   : > { %472 = vst.msk [vmem:[#allocation2 + $0x90] sm:$0xff] %vm452_vm0, %v13320_v0  ;;  %473 = vst.msk [vmem:[#allocation2 + $0x98] sm:$0xff] %vm452_vm0, %v13320_v0  ;;  %s13717_s12 = scalar_lea.vmem %s16839_s5, %s12642_s23  ;;  %s9952_s21 = sshll.u32 %s16979_s10, 1 }
  0x13   : > { %475 = vst.msk [vmem:[#allocation2 + $0xa8] sm:$0xff] %vm452_vm0, %v13320_v0  ;;  %476 = vst.msk [vmem:[#allocation2 + $0xb0] sm:$0xff] %vm452_vm0, %v13320_v0  ;;  %s13729_s19 = scalar_lea.vmem %s16842_s8, %s9952_s21  ;;  %s11040_s25 = sshll.u32 %s16979_s10, 2 }
  0x14   : > { %478 = vst.msk [vmem:[#allocation2 + $0xc0] sm:$0xff] %vm452_vm0, %v13320_v0  ;;  %479 = vst.msk [vmem:[#allocation2 + $0xc8] sm:$0xff] %vm452_vm0, %v13320_v0  ;;  %s13735_s29 = scalar_lea.vmem %s16843_s9, %s11040_s25  ;;  %s13737_s23 = smov 0  }
  0x15   : > { %481 = vst.msk [vmem:[#allocation2 + $0xd8] sm:$0xff] %vm452_vm0, %v13320_v0  ;;  %482 = vst.msk [vmem:[#allocation2 + $0xe0] sm:$0xff] %vm452_vm0, %v13320_v0 }
  0x16   : > { %484 = vst.msk [vmem:[#allocation2 + $0xf0] sm:$0xff] %vm452_vm0, %v13320_v0  ;;  %485 = vst.msk [vmem:[#allocation2 + $0xf8] sm:$0xff] %vm452_vm0, %v13320_v0 }
  0x17   : > { %487 = vst.msk [vmem:[#allocation2 + $0x108] sm:$0xff] %vm452_vm0, %v13320_v0  ;;  %488 = vst.msk [vmem:[#allocation2 + $0x110] sm:$0xff] %vm452_vm0, %v13320_v0 }
  0x18   : > { %490 = vst.msk [vmem:[#allocation2 + $0x120] sm:$0xff] %vm452_vm0, %v13320_v0  ;;  %491 = vst.msk [vmem:[#allocation2 + $0x128] sm:$0xff] %vm452_vm0, %v13320_v0 }
  0x19   : > { %493 = vst.msk [vmem:[#allocation2 + $0x138] sm:$0xff] %vm452_vm0, %v13320_v0  ;;  %494 = vst.msk [vmem:[#allocation2 + $0x140] sm:$0xff] %vm452_vm0, %v13320_v0 }
  0x1a   : > { %496 = vst.msk [vmem:[#allocation2 + $0x150] sm:$0xff] %vm452_vm0, %v13320_v0  ;;  %497 = vst.msk [vmem:[#allocation2 + $0x158] sm:$0xff] %vm452_vm0, %v13320_v0 }
  0x1b   : > { %499 = vst.msk [vmem:[#allocation2 + $0x168] sm:$0xff] %vm452_vm0, %v13320_v0  ;;  %500 = vst.msk [vmem:[#allocation2 + $0x170] sm:$0xff] %vm452_vm0, %v13320_v0 }
  0x1c   : > { %502 = vst.msk [vmem:[#allocation2 + $0x180] sm:$0xff] %vm452_vm0, %v13320_v0  ;;  %503 = vst.msk [vmem:[#allocation2 + $0x188] sm:$0xff] %vm452_vm0, %v13320_v0 }
  0x1d   : > { %505 = vst.msk [vmem:[#allocation2 + $0x198] sm:$0xff] %vm452_vm0, %v13320_v0  ;;  %506 = vst.msk [vmem:[#allocation2 + $0x1a0] sm:$0xff] %vm452_vm0, %v13320_v0 }
  0x1e   : > { %508 = vst.msk [vmem:[#allocation2 + $0x1b0] sm:$0xff] %vm452_vm0, %v13320_v0  ;;  %509 = vst.msk [vmem:[#allocation2 + $0x1b8] sm:$0xff] %vm452_vm0, %v13320_v0 }
  0x1f   : > { %511 = vst.msk [vmem:[#allocation2 + $0x1c8] sm:$0xff] %vm452_vm0, %v13320_v0  ;;  %512 = vst.msk [vmem:[#allocation2 + $0x1d0] sm:$0xff] %vm452_vm0, %v13320_v0 }
  0x20   : > { %514 = vst.msk [vmem:[#allocation2 + $0x1e0] sm:$0xff] %vm452_vm0, %v13320_v0  ;;  %515 = vst.msk [vmem:[#allocation2 + $0x1e8] sm:$0xff] %vm452_vm0, %v13320_v0 }
  0x21   : > { %517 = vst.msk [vmem:[#allocation2 + $0x1f8] sm:$0xff] %vm452_vm0, %v13320_v0  ;;  %518 = vst.msk [vmem:[#allocation2 + $0x200] sm:$0xff] %vm452_vm0, %v13320_v0 }
  0x22   : > { %520 = vst.msk [vmem:[#allocation2 + $0x210] sm:$0xff] %vm452_vm0, %v13320_v0  ;;  %521 = vst.msk [vmem:[#allocation2 + $0x218] sm:$0xff] %vm452_vm0, %v13320_v0 }
  0x23   : > { %523 = vst.msk [vmem:[#allocation2 + $0x228] sm:$0xff] %vm452_vm0, %v13320_v0  ;;  %524 = vst.msk [vmem:[#allocation2 + $0x230] sm:$0xff] %vm452_vm0, %v13320_v0 }
  0x24   : > { %526 = vst.msk [vmem:[#allocation2 + $0x240] sm:$0xff] %vm452_vm0, %v13320_v0  ;;  %527 = vst.msk [vmem:[#allocation2 + $0x248] sm:$0xff] %vm452_vm0, %v13320_v0 }
  0x25   : > { %529 = vst.msk [vmem:[#allocation2 + $0x258] sm:$0xff] %vm452_vm0, %v13320_v0  ;;  %530 = vst.msk [vmem:[#allocation2 + $0x260] sm:$0xff] %vm452_vm0, %v13320_v0 }
  0x26   : > { %532 = vst.msk [vmem:[#allocation2 + $0x270] sm:$0xff] %vm452_vm0, %v13320_v0  ;;  %533 = vst.msk [vmem:[#allocation2 + $0x278] sm:$0xff] %vm452_vm0, %v13320_v0 }
  0x27   : > { %535 = vst.msk [vmem:[#allocation2 + $0x288] sm:$0xff] %vm452_vm0, %v13320_v0  ;;  %536 = vst.msk [vmem:[#allocation2 + $0x290] sm:$0xff] %vm452_vm0, %v13320_v0 }
  0x28   : > { %538 = vst.msk [vmem:[#allocation2 + $0x2a0] sm:$0xff] %vm452_vm0, %v13320_v0  ;;  %539 = vst.msk [vmem:[#allocation2 + $0x2a8] sm:$0xff] %vm452_vm0, %v13320_v0 }
  0x29   : > { %541 = vst.msk [vmem:[#allocation2 + $0x2b8] sm:$0xff] %vm452_vm0, %v13320_v0  ;;  %542 = vst.msk [vmem:[#allocation2 + $0x2c0] sm:$0xff] %vm452_vm0, %v13320_v0 }
  0x2a   : > { %544 = vst.msk [vmem:[#allocation2 + $0x2d0] sm:$0xff] %vm452_vm0, %v13320_v0  ;;  %545 = vst.msk [vmem:[#allocation2 + $0x2d8] sm:$0xff] %vm452_vm0, %v13320_v0 }
  0x2b   : > { %547 = vst.msk [vmem:[#allocation2 + $0x2e8] sm:$0xff] %vm452_vm0, %v13320_v0  ;;  %548 = vst.msk [vmem:[#allocation2 + $0x2f0] sm:$0xff] %vm452_vm0, %v13320_v0 }
  0x2c   : > { %550 = vst.msk [vmem:[#allocation2 + $0x300] sm:$0xff] %vm452_vm0, %v13320_v0  ;;  %551 = vst.msk [vmem:[#allocation2 + $0x308] sm:$0xff] %vm452_vm0, %v13320_v0 }
  0x2d   : > { %553 = vst.msk [vmem:[#allocation2 + $0x318] sm:$0xff] %vm452_vm0, %v13320_v0  ;;  %554 = vst.msk [vmem:[#allocation2 + $0x320] sm:$0xff] %vm452_vm0, %v13320_v0 }
  0x2e   : > { %556 = vst.msk [vmem:[#allocation2 + $0x330] sm:$0xff] %vm452_vm0, %v13320_v0  ;;  %557 = vst.msk [vmem:[#allocation2 + $0x338] sm:$0xff] %vm452_vm0, %v13320_v0 }
  0x2f   : > { %559 = vst.msk [vmem:[#allocation2 + $0x348] sm:$0xff] %vm452_vm0, %v13320_v0  ;;  %560 = vst.msk [vmem:[#allocation2 + $0x350] sm:$0xff] %vm452_vm0, %v13320_v0 }
  0x30   : > { %456 = vst.msk [vmem:[#allocation2 + $0x10] sm:$0x3] %vm455_vm1, %v13320_v0  ;;  %459 = vst.msk [vmem:[#allocation2 + $0x28] sm:$0x3] %vm455_vm1, %v13320_v0 }
  0x31   : > { %462 = vst.msk [vmem:[#allocation2 + $0x40] sm:$0x3] %vm455_vm1, %v13320_v0  ;;  %465 = vst.msk [vmem:[#allocation2 + $0x58] sm:$0x3] %vm455_vm1, %v13320_v0 }
  0x32   : > { %468 = vst.msk [vmem:[#allocation2 + $0x70] sm:$0x3] %vm455_vm1, %v13320_v0  ;;  %471 = vst.msk [vmem:[#allocation2 + $0x88] sm:$0x3] %vm455_vm1, %v13320_v0 }
  0x33   : > { %474 = vst.msk [vmem:[#allocation2 + $0xa0] sm:$0x3] %vm455_vm1, %v13320_v0  ;;  %477 = vst.msk [vmem:[#allocation2 + $0xb8] sm:$0x3] %vm455_vm1, %v13320_v0 }
  0x34   : > { %480 = vst.msk [vmem:[#allocation2 + $0xd0] sm:$0x3] %vm455_vm1, %v13320_v0  ;;  %483 = vst.msk [vmem:[#allocation2 + $0xe8] sm:$0x3] %vm455_vm1, %v13320_v0 }
  0x35   : > { %486 = vst.msk [vmem:[#allocation2 + $0x100] sm:$0x3] %vm455_vm1, %v13320_v0  ;;  %489 = vst.msk [vmem:[#allocation2 + $0x118] sm:$0x3] %vm455_vm1, %v13320_v0 }
  0x36   : > { %492 = vst.msk [vmem:[#allocation2 + $0x130] sm:$0x3] %vm455_vm1, %v13320_v0  ;;  %495 = vst.msk [vmem:[#allocation2 + $0x148] sm:$0x3] %vm455_vm1, %v13320_v0 }
  0x37   : > { %498 = vst.msk [vmem:[#allocation2 + $0x160] sm:$0x3] %vm455_vm1, %v13320_v0  ;;  %501 = vst.msk [vmem:[#allocation2 + $0x178] sm:$0x3] %vm455_vm1, %v13320_v0 }
  0x38   : > { %504 = vst.msk [vmem:[#allocation2 + $0x190] sm:$0x3] %vm455_vm1, %v13320_v0  ;;  %507 = vst.msk [vmem:[#allocation2 + $0x1a8] sm:$0x3] %vm455_vm1, %v13320_v0 }
  0x39   : > { %510 = vst.msk [vmem:[#allocation2 + $0x1c0] sm:$0x3] %vm455_vm1, %v13320_v0  ;;  %513 = vst.msk [vmem:[#allocation2 + $0x1d8] sm:$0x3] %vm455_vm1, %v13320_v0 }
  0x3a   : > { %516 = vst.msk [vmem:[#allocation2 + $0x1f0] sm:$0x3] %vm455_vm1, %v13320_v0  ;;  %519 = vst.msk [vmem:[#allocation2 + $0x208] sm:$0x3] %vm455_vm1, %v13320_v0 }
  0x3b   : > { %522 = vst.msk [vmem:[#allocation2 + $0x220] sm:$0x3] %vm455_vm1, %v13320_v0  ;;  %525 = vst.msk [vmem:[#allocation2 + $0x238] sm:$0x3] %vm455_vm1, %v13320_v0 }
  0x3c   : > { %528 = vst.msk [vmem:[#allocation2 + $0x250] sm:$0x3] %vm455_vm1, %v13320_v0  ;;  %531 = vst.msk [vmem:[#allocation2 + $0x268] sm:$0x3] %vm455_vm1, %v13320_v0 }
  0x3d   : > { %534 = vst.msk [vmem:[#allocation2 + $0x280] sm:$0x3] %vm455_vm1, %v13320_v0  ;;  %537 = vst.msk [vmem:[#allocation2 + $0x298] sm:$0x3] %vm455_vm1, %v13320_v0 }
  0x3e   : > { %540 = vst.msk [vmem:[#allocation2 + $0x2b0] sm:$0x3] %vm455_vm1, %v13320_v0  ;;  %543 = vst.msk [vmem:[#allocation2 + $0x2c8] sm:$0x3] %vm455_vm1, %v13320_v0 }
  0x3f   : > { %546 = vst.msk [vmem:[#allocation2 + $0x2e0] sm:$0x3] %vm455_vm1, %v13320_v0  ;;  %549 = vst.msk [vmem:[#allocation2 + $0x2f8] sm:$0x3] %vm455_vm1, %v13320_v0 }
  0x40   : > { %552 = vst.msk [vmem:[#allocation2 + $0x310] sm:$0x3] %vm455_vm1, %v13320_v0  ;;  %555 = vst.msk [vmem:[#allocation2 + $0x328] sm:$0x3] %vm455_vm1, %v13320_v0 }
  0x41   : > { %558 = vst.msk [vmem:[#allocation2 + $0x340] sm:$0x3] %vm455_vm1, %v13320_v0  ;;  %561 = vst.msk [vmem:[#allocation2 + $0x358] sm:$0x3] %vm455_vm1, %v13320_v0 }
  0x42   : > { %563 = vst.msk [vmem:[#allocation3] sm:$0xff] %vm562_vm2, %v13320_v0  ;;  %566 = vst.msk [vmem:[#allocation3 + $0x10] sm:$0xff] %vm562_vm2, %v13320_v0 }
  0x43   : > { %568 = vst.msk [vmem:[#allocation3 + $0x20] sm:$0xff] %vm562_vm2, %v13320_v0  ;;  %570 = vst.msk [vmem:[#allocation3 + $0x30] sm:$0xff] %vm562_vm2, %v13320_v0 }
  0x44   : > { %572 = vst.msk [vmem:[#allocation3 + $0x40] sm:$0xff] %vm562_vm2, %v13320_v0  ;;  %574 = vst.msk [vmem:[#allocation3 + $0x50] sm:$0xff] %vm562_vm2, %v13320_v0 }
  0x45   : > { %576 = vst.msk [vmem:[#allocation3 + $0x60] sm:$0xff] %vm562_vm2, %v13320_v0  ;;  %578 = vst.msk [vmem:[#allocation3 + $0x70] sm:$0xff] %vm562_vm2, %v13320_v0 }
  0x46   : > { %580 = vst.msk [vmem:[#allocation3 + $0x80] sm:$0xff] %vm562_vm2, %v13320_v0  ;;  %582 = vst.msk [vmem:[#allocation3 + $0x90] sm:$0xff] %vm562_vm2, %v13320_v0 }
  0x47   : > { %584 = vst.msk [vmem:[#allocation3 + $0xa0] sm:$0xff] %vm562_vm2, %v13320_v0  ;;  %586 = vst.msk [vmem:[#allocation3 + $0xb0] sm:$0xff] %vm562_vm2, %v13320_v0 }
  0x48   : > { %588 = vst.msk [vmem:[#allocation3 + $0xc0] sm:$0xff] %vm562_vm2, %v13320_v0  ;;  %590 = vst.msk [vmem:[#allocation3 + $0xd0] sm:$0xff] %vm562_vm2, %v13320_v0 }
  0x49   : > { %592 = vst.msk [vmem:[#allocation3 + $0xe0] sm:$0xff] %vm562_vm2, %v13320_v0  ;;  %594 = vst.msk [vmem:[#allocation3 + $0xf0] sm:$0xff] %vm562_vm2, %v13320_v0 }
  0x4a   : > { %596 = vst.msk [vmem:[#allocation3 + $0x100] sm:$0xff] %vm562_vm2, %v13320_v0  ;;  %598 = vst.msk [vmem:[#allocation3 + $0x110] sm:$0xff] %vm562_vm2, %v13320_v0 }
  0x4b   : > { %600 = vst.msk [vmem:[#allocation3 + $0x120] sm:$0xff] %vm562_vm2, %v13320_v0  ;;  %602 = vst.msk [vmem:[#allocation3 + $0x130] sm:$0xff] %vm562_vm2, %v13320_v0 }
  0x4c   : > { %565 = vst.msk [vmem:[#allocation3 + $0x8] sm:$0x3] %vm564_vm3, %v13320_v0  ;;  %567 = vst.msk [vmem:[#allocation3 + $0x18] sm:$0x3] %vm564_vm3, %v13320_v0 }
  0x4d   : > { %569 = vst.msk [vmem:[#allocation3 + $0x28] sm:$0x3] %vm564_vm3, %v13320_v0  ;;  %571 = vst.msk [vmem:[#allocation3 + $0x38] sm:$0x3] %vm564_vm3, %v13320_v0 }
  0x4e   : > { %573 = vst.msk [vmem:[#allocation3 + $0x48] sm:$0x3] %vm564_vm3, %v13320_v0  ;;  %575 = vst.msk [vmem:[#allocation3 + $0x58] sm:$0x3] %vm564_vm3, %v13320_v0 }
  0x4f   : > { %577 = vst.msk [vmem:[#allocation3 + $0x68] sm:$0x3] %vm564_vm3, %v13320_v0  ;;  %579 = vst.msk [vmem:[#allocation3 + $0x78] sm:$0x3] %vm564_vm3, %v13320_v0 }
  0x50   : > { %581 = vst.msk [vmem:[#allocation3 + $0x88] sm:$0x3] %vm564_vm3, %v13320_v0  ;;  %583 = vst.msk [vmem:[#allocation3 + $0x98] sm:$0x3] %vm564_vm3, %v13320_v0 }
  0x51   : > { %585 = vst.msk [vmem:[#allocation3 + $0xa8] sm:$0x3] %vm564_vm3, %v13320_v0  ;;  %587 = vst.msk [vmem:[#allocation3 + $0xb8] sm:$0x3] %vm564_vm3, %v13320_v0 }
  0x52   : > { %589 = vst.msk [vmem:[#allocation3 + $0xc8] sm:$0x3] %vm564_vm3, %v13320_v0  ;;  %591 = vst.msk [vmem:[#allocation3 + $0xd8] sm:$0x3] %vm564_vm3, %v13320_v0 }
  0x53   : > { %593 = vst.msk [vmem:[#allocation3 + $0xe8] sm:$0x3] %vm564_vm3, %v13320_v0  ;;  %595 = vst.msk [vmem:[#allocation3 + $0xf8] sm:$0x3] %vm564_vm3, %v13320_v0 }
  0x54   : > { %597 = vst.msk [vmem:[#allocation3 + $0x108] sm:$0x3] %vm564_vm3, %v13320_v0  ;;  %599 = vst.msk [vmem:[#allocation3 + $0x118] sm:$0x3] %vm564_vm3, %v13320_v0 }
  0x55   : > { %601 = vst.msk [vmem:[#allocation3 + $0x128] sm:$0x3] %vm564_vm3, %v13320_v0  ;;  %603 = vst.msk [vmem:[#allocation3 + $0x138] sm:$0x3] %vm564_vm3, %v13320_v0 }
  0x56 LB: >> { %v678_v1 = vld [vmem:[%s13697_s18 + $0x8] sm:$0x1]  ;;  %vm879_vm4 = vcmask 1040384   ;;  %v677_v2 = vld [vmem:[%s13697_s18] sm:$0xff]  ;;  %s11041_s22 = sshll.u32 %s13314_s23, 8  ;;  %vm686_vm5 = vcmask 72704   ;;  %s13314_s23 = sphi %s13737_s23, %s609_s23  }
  0x57   : >> { %11649 = vmatprep.subr.msk.mxu0 %vm879_vm4, %v678_v1  ;;  %12613 = vmatprep.subr.msk.mxu1 %vm879_vm4, %v678_v1  ;;  %s13748_s14 = scalar_lea.vmem %s16834_s0, %s11041_s22  ;;  %s10024_s16 = smul.u32 96, %s13314_s23 }
  0x58   : >> { %11650 = vmatpush3.msk.msra.mxu0 %vm879_vm4, %v678_v1  ;;  %12615 = vmatpush3.msk.msra.mxu1 %vm879_vm4, %v678_v1  ;;  %v613_v3 = vld [vmem:[%s13748_s14] sm:$0xff]  ;;  %v614_v5 = vld [vmem:[%s13748_s14 + $0x8] sm:$0xff]  ;;  %v615_v7 = vld [vmem:[%s13748_s14 + $0x10] sm:$0xff]  ;;  %s609_s23 = sadd.s32 1, %s13314_s23  }
  0x59   : >> { %11651 = vmatprep.subr.mxu0 %v677_v2  ;;  %12614 = vmatprep.subr.mxu1 %v677_v2  ;;  %v645_v4 = vld [vmem:[%s13748_s14 + $0x400] sm:$0xff]  ;;  %v646_v6 = vld [vmem:[%s13748_s14 + $0x408] sm:$0xff]  ;;  %v647_v8 = vld [vmem:[%s13748_s14 + $0x410] sm:$0xff]  ;;  %s14028_s17 = scalar_lea.vmem [#allocation2], %s10024_s16  ;;  %p606_p4 = scmp.ge.s32.totalorder %s609_s23, 4  }
  0x5a   : >> { %11652 = vmatpush3.msra.mxu0 %v677_v2  ;;  %12616 = vmatpush3.msra.mxu1 %v677_v2  ;;  %v616_v9 = vld [vmem:[%s13748_s14 + $0x18] sm:$0xff]  ;;  %v617_v11 = vld [vmem:[%s13748_s14 + $0x20] sm:$0xff]  ;;  %v618_v13 = vld [vmem:[%s13748_s14 + $0x28] sm:$0xff]  ;;  %s14297_s21 = smov (%p606_p4), 0  }
  0x5b   : >> { %11653 = vmatprep.mubr.msk.f32.mxu0 %vm686_vm5, %v613_v3  ;;  %11701 = vmatprep.mubr.msk.f32.mxu1 %vm686_vm5, %v645_v4  ;;  %v648_v10 = vld [vmem:[%s13748_s14 + $0x418] sm:$0xff]  ;;  %v649_v12 = vld [vmem:[%s13748_s14 + $0x420] sm:$0xff]  ;;  %v650_v14 = vld [vmem:[%s13748_s14 + $0x428] sm:$0xff] }
  0x5c   : >> { %11654 = vmatmul.mubr.msk.f32.vlgmr.msra.gmra.mxu0 %vm686_vm5, %v614_v5  ;;  %11702 = vmatmul.mubr.msk.f32.vlgmr.msra.gmra.mxu1 %vm686_vm5, %v646_v6  ;;  %v619_v15 = vld [vmem:[%s13748_s14 + $0x30] sm:$0xff]  ;;  %v620_v17 = vld [vmem:[%s13748_s14 + $0x38] sm:$0xff]  ;;  %v621_v19 = vld [vmem:[%s13748_s14 + $0x40] sm:$0xff] }
  0x5d   : >> { %11656 = vmatprep.mubr.msk.f32.mxu0 %vm686_vm5, %v615_v7  ;;  %11704 = vmatprep.mubr.msk.f32.mxu1 %vm686_vm5, %v647_v8  ;;  %v651_v16 = vld [vmem:[%s13748_s14 + $0x430] sm:$0xff]  ;;  %v652_v18 = vld [vmem:[%s13748_s14 + $0x438] sm:$0xff]  ;;  %v653_v20 = vld [vmem:[%s13748_s14 + $0x440] sm:$0xff] }
  0x5e   : >> { %v622_v21 = vld [vmem:[%s13748_s14 + $0x48] sm:$0xff]  ;;  %v623_v23 = vld [vmem:[%s13748_s14 + $0x50] sm:$0xff]  ;;  %v624_v25 = vld [vmem:[%s13748_s14 + $0x58] sm:$0xff] }
  0x5f   : >> { %v654_v22 = vld [vmem:[%s13748_s14 + $0x448] sm:$0xff]  ;;  %v655_v24 = vld [vmem:[%s13748_s14 + $0x450] sm:$0xff]  ;;  %v656_v26 = vld [vmem:[%s13748_s14 + $0x458] sm:$0xff] }
  0x60   : >> { %11657 = vmatmul.mubr.msk.f32.gmra.mxu0 %vm686_vm5, %v616_v9  ;;  %11705 = vmatmul.mubr.msk.f32.gmra.mxu1 %vm686_vm5, %v648_v10  ;;  %v625_v27 = vld [vmem:[%s13748_s14 + $0x60] sm:$0xff]  ;;  %v626_v29 = vld [vmem:[%s13748_s14 + $0x68] sm:$0xff]  ;;  %v627_v31 = vld [vmem:[%s13748_s14 + $0x70] sm:$0xff] }
  0x61   : >> { %11659 = vmatprep.mubr.msk.f32.mxu0 %vm686_vm5, %v617_v11  ;;  %11707 = vmatprep.mubr.msk.f32.mxu1 %vm686_vm5, %v649_v12  ;;  %v657_v28 = vld [vmem:[%s13748_s14 + $0x460] sm:$0xff]  ;;  %v658_v30 = vld [vmem:[%s13748_s14 + $0x468] sm:$0xff]  ;;  %v659_v32 = vld [vmem:[%s13748_s14 + $0x470] sm:$0xff] }
  0x62   : >> { %v628_v33 = vld [vmem:[%s13748_s14 + $0x78] sm:$0xff]  ;;  %v629_v35 = vld [vmem:[%s13748_s14 + $0x80] sm:$0xff]  ;;  %v630_v37 = vld [vmem:[%s13748_s14 + $0x88] sm:$0xff] }
  0x63   : >> { %v660_v34 = vld [vmem:[%s13748_s14 + $0x478] sm:$0xff]  ;;  %v661_v36 = vld [vmem:[%s13748_s14 + $0x480] sm:$0xff]  ;;  %v662_v38 = vld [vmem:[%s13748_s14 + $0x488] sm:$0xff] }
  0x64   : >> { %11660 = vmatmul.mubr.msk.f32.gmra.mxu0 %vm686_vm5, %v618_v13  ;;  %11708 = vmatmul.mubr.msk.f32.gmra.mxu1 %vm686_vm5, %v650_v14  ;;  %v631_v39 = vld [vmem:[%s13748_s14 + $0x90] sm:$0xff]  ;;  %v632_v41 = vld [vmem:[%s13748_s14 + $0x98] sm:$0xff]  ;;  %v633_v43 = vld [vmem:[%s13748_s14 + $0xa0] sm:$0xff] }
  0x65   : >> { %11662 = vmatprep.mubr.msk.f32.mxu0 %vm686_vm5, %v619_v15  ;;  %11710 = vmatprep.mubr.msk.f32.mxu1 %vm686_vm5, %v651_v16  ;;  %v663_v40 = vld [vmem:[%s13748_s14 + $0x490] sm:$0xff]  ;;  %v664_v42 = vld [vmem:[%s13748_s14 + $0x498] sm:$0xff]  ;;  %v665_v44 = vld [vmem:[%s13748_s14 + $0x4a0] sm:$0xff] }
  0x66   : >> { %v634_v45 = vld [vmem:[%s13748_s14 + $0xa8] sm:$0xff]  ;;  %v635_v47 = vld [vmem:[%s13748_s14 + $0xb0] sm:$0xff]  ;;  %v636_v49 = vld [vmem:[%s13748_s14 + $0xb8] sm:$0xff] }
  0x67   : >> { %v666_v46 = vld [vmem:[%s13748_s14 + $0x4a8] sm:$0xff]  ;;  %v667_v48 = vld [vmem:[%s13748_s14 + $0x4b0] sm:$0xff]  ;;  %v668_v50 = vld [vmem:[%s13748_s14 + $0x4b8] sm:$0xff] }
  0x68   : >> { %11663 = vmatmul.mubr.msk.f32.gmra.mxu0 %vm686_vm5, %v620_v17  ;;  %11711 = vmatmul.mubr.msk.f32.gmra.mxu1 %vm686_vm5, %v652_v18  ;;  %v637_v51 = vld [vmem:[%s13748_s14 + $0xc0] sm:$0xff]  ;;  %v638_v53 = vld [vmem:[%s13748_s14 + $0xc8] sm:$0xff]  ;;  %v639_v55 = vld [vmem:[%s13748_s14 + $0xd0] sm:$0xff] }
  0x69   : >> { %11665 = vmatprep.mubr.msk.f32.mxu0 %vm686_vm5, %v621_v19  ;;  %11713 = vmatprep.mubr.msk.f32.mxu1 %vm686_vm5, %v653_v20  ;;  %v669_v52 = vld [vmem:[%s13748_s14 + $0x4c0] sm:$0xff]  ;;  %v670_v54 = vld [vmem:[%s13748_s14 + $0x4c8] sm:$0xff]  ;;  %v671_v56 = vld [vmem:[%s13748_s14 + $0x4d0] sm:$0xff] }
  0x6a   : >> { %v640_v57 = vld [vmem:[%s13748_s14 + $0xd8] sm:$0xff]  ;;  %v641_v59 = vld [vmem:[%s13748_s14 + $0xe0] sm:$0xff]  ;;  %v642_v61 = vld [vmem:[%s13748_s14 + $0xe8] sm:$0xff] }
  0x6b   : >> { %v672_v58 = vld [vmem:[%s13748_s14 + $0x4d8] sm:$0xff]  ;;  %v673_v60 = vld [vmem:[%s13748_s14 + $0x4e0] sm:$0xff]  ;;  %v674_v62 = vld [vmem:[%s13748_s14 + $0x4e8] sm:$0xff] }
  0x6c   : >> { %11666 = vmatmul.mubr.msk.f32.gmra.mxu0 %vm686_vm5, %v622_v21  ;;  %11714 = vmatmul.mubr.msk.f32.gmra.mxu1 %vm686_vm5, %v654_v22  ;;  %v643_v63 = vld [vmem:[%s13748_s14 + $0xf0] sm:$0xff]  ;;  %v644_v1 = vld [vmem:[%s13748_s14 + $0xf8] sm:$0xff]  ;;  %v13879_v3 = vld [vmem:[%s13692_s15] ss:$0 sm:$0xff] }
  0x6d   : >> { %11668 = vmatprep.mubr.msk.f32.mxu0 %vm686_vm5, %v623_v23  ;;  %11716 = vmatprep.mubr.msk.f32.mxu1 %vm686_vm5, %v655_v24  ;;  %v675_v0 = vld [vmem:[%s13748_s14 + $0x4f0] sm:$0xff]  ;;  %v676_v2 = vld [vmem:[%s13748_s14 + $0x4f8] sm:$0xff] }
  0x70   : >> { %11669 = vmatmul.mubr.msk.f32.gmra.mxu0 %vm686_vm5, %v624_v25  ;;  %11717 = vmatmul.mubr.msk.f32.gmra.mxu1 %vm686_vm5, %v656_v26 }
  0x71   : >> { %11671 = vmatprep.mubr.msk.f32.mxu0 %vm686_vm5, %v625_v27  ;;  %11719 = vmatprep.mubr.msk.f32.mxu1 %vm686_vm5, %v657_v28 }
  0x74   : >> { %11672 = vmatmul.mubr.msk.f32.gmra.mxu0 %vm686_vm5, %v626_v29  ;;  %11720 = vmatmul.mubr.msk.f32.gmra.mxu1 %vm686_vm5, %v658_v30 }
  0x75   : >> { %11674 = vmatprep.mubr.msk.f32.mxu0 %vm686_vm5, %v627_v31  ;;  %11722 = vmatprep.mubr.msk.f32.mxu1 %vm686_vm5, %v659_v32 }
  0x78   : >> { %11675 = vmatmul.mubr.msk.f32.gmra.mxu0 %vm686_vm5, %v628_v33  ;;  %11723 = vmatmul.mubr.msk.f32.gmra.mxu1 %vm686_vm5, %v660_v34 }
  0x79   : >> { %11677 = vmatprep.mubr.msk.f32.mxu0 %vm686_vm5, %v629_v35  ;;  %11725 = vmatprep.mubr.msk.f32.mxu1 %vm686_vm5, %v661_v36 }
  0x7c   : >> { %11678 = vmatmul.mubr.msk.f32.gmra.mxu0 %vm686_vm5, %v630_v37  ;;  %11726 = vmatmul.mubr.msk.f32.gmra.mxu1 %vm686_vm5, %v662_v38 }
  0x7d   : >> { %11680 = vmatprep.mubr.msk.f32.mxu0 %vm686_vm5, %v631_v39  ;;  %11728 = vmatprep.mubr.msk.f32.mxu1 %vm686_vm5, %v663_v40 }
  0x80   : >> { %11681 = vmatmul.mubr.msk.f32.gmra.mxu0 %vm686_vm5, %v632_v41  ;;  %11729 = vmatmul.mubr.msk.f32.gmra.mxu1 %vm686_vm5, %v664_v42 }
  0x81   : >> { %11683 = vmatprep.mubr.msk.f32.mxu0 %vm686_vm5, %v633_v43  ;;  %11731 = vmatprep.mubr.msk.f32.mxu1 %vm686_vm5, %v665_v44 }
  0x84   : >> { %11684 = vmatmul.mubr.msk.f32.gmra.mxu0 %vm686_vm5, %v634_v45  ;;  %11732 = vmatmul.mubr.msk.f32.gmra.mxu1 %vm686_vm5, %v666_v46 }
  0x85   : >> { %11686 = vmatprep.mubr.msk.f32.mxu0 %vm686_vm5, %v635_v47  ;;  %11734 = vmatprep.mubr.msk.f32.mxu1 %vm686_vm5, %v667_v48 }
  0x88   : >> { %11687 = vmatmul.mubr.msk.f32.gmra.mxu0 %vm686_vm5, %v636_v49  ;;  %11735 = vmatmul.mubr.msk.f32.gmra.mxu1 %vm686_vm5, %v668_v50 }
  0x89   : >> { %11689 = vmatprep.mubr.msk.f32.mxu0 %vm686_vm5, %v637_v51  ;;  %11737 = vmatprep.mubr.msk.f32.mxu1 %vm686_vm5, %v669_v52 }
  0x8c   : >> { %11690 = vmatmul.mubr.msk.f32.gmra.mxu0 %vm686_vm5, %v638_v53  ;;  %11738 = vmatmul.mubr.msk.f32.gmra.mxu1 %vm686_vm5, %v670_v54 }
  0x8d   : >> { %11692 = vmatprep.mubr.msk.f32.mxu0 %vm686_vm5, %v639_v55  ;;  %11740 = vmatprep.mubr.msk.f32.mxu1 %vm686_vm5, %v671_v56 }
  0x90   : >> { %11693 = vmatmul.mubr.msk.f32.gmra.mxu0 %vm686_vm5, %v640_v57  ;;  %11741 = vmatmul.mubr.msk.f32.gmra.mxu1 %vm686_vm5, %v672_v58 }
  0x91   : >> { %11695 = vmatprep.mubr.msk.f32.mxu0 %vm686_vm5, %v641_v59  ;;  %11743 = vmatprep.mubr.msk.f32.mxu1 %vm686_vm5, %v673_v60 }
  0x94   : >> { %11696 = vmatmul.mubr.msk.f32.gmra.mxu0 %vm686_vm5, %v642_v61  ;;  %11744 = vmatmul.mubr.msk.f32.gmra.mxu1 %vm686_vm5, %v674_v62 }
  0x95   : >> { %11698 = vmatprep.mubr.msk.f32.mxu0 %vm686_vm5, %v643_v63  ;;  %11746 = vmatprep.mubr.msk.f32.mxu1 %vm686_vm5, %v675_v0 }
  0x98   : >> { %11699 = vmatmul.mubr.msk.f32.gmra.mxu0 %vm686_vm5, %v644_v1  ;;  %11747 = vmatmul.mubr.msk.f32.gmra.mxu1 %vm686_vm5, %v676_v2 }
 0x11c   : >> { %v11655_v4 = vpop.f32.mrf.mxu0  ;;  %v11703_v5 = vpop.f32.mrf.mxu1 }
 0x11d   : >> { %v955_v6 = vadd.f32 %v11655_v4, %v13879_v3  ;;  %v1115_v7 = vadd.f32 %v11703_v5, %v13879_v3 }
 0x11e   : >> { %v949_v8 = vpop.f32.mrf.mxu0  ;;  %v1109_v9 = vpop.f32.mrf.mxu1 }
 0x11f   : >> { %v1333_v10 = vmul.f32 0.70710677, %v955_v6  ;;  %v1365_v11 = vmul.f32 0.70710677, %v1115_v7  ;;  %v950_v12 = vadd.f32 %v13879_v3, %v949_v8  ;;  %v1110_v13 = vadd.f32 %v13879_v3, %v1109_v9 }
 0x120   : >> { %v11658_v14 = vpop.f32.mrf.mxu0  ;;  %v11706_v15 = vpop.f32.mrf.mxu1  ;;  %v1269_v53 = vmul.f32 0.5, %v955_v6  ;;  %v1301_v54 = vmul.f32 0.5, %v1115_v7 }
 0x121   : >> { %12668 = verf.f32 %v1333_v10  ;;  %v965_v16 = vadd.f32 %v11658_v14, %v13879_v3  ;;  %v1125_v17 = vadd.f32 %v11706_v15, %v13879_v3  ;;  %v1332_v18 = vmul.f32 0.70710677, %v950_v12 }
 0x122   : >> { %12670 = verf.f32 %v1365_v11  ;;  %v959_v19 = vpop.f32.mrf.mxu0  ;;  %v1119_v20 = vpop.f32.mrf.mxu1  ;;  %v1364_v21 = vmul.f32 0.70710677, %v1110_v13  ;;  %v1268_v55 = vmul.f32 0.5, %v950_v12  ;;  %v1300_v59 = vmul.f32 0.5, %v1110_v13 }
 0x123   : >> { %v1335_v22 = vmul.f32 0.70710677, %v965_v16  ;;  %12672 = verf.f32 %v1332_v18  ;;  %v1367_v23 = vmul.f32 0.70710677, %v1125_v17  ;;  %v960_v24 = vadd.f32 %v13879_v3, %v959_v19 }
 0x124   : >> { %v1120_v25 = vadd.f32 %v13879_v3, %v1119_v20  ;;  %v11661_v26 = vpop.f32.mrf.mxu0  ;;  %v11709_v27 = vpop.f32.mrf.mxu1  ;;  %12674 = verf.f32 %v1364_v21  ;;  %v1271_v62 = vmul.f32 0.5, %v965_v16  ;;  %v13900_v63 = vmul.f32 0.5, %v1125_v17 }
 0x125   : >> { %v975_v28 = vadd.f32 %v11661_v26, %v13879_v3  ;;  %v1135_v29 = vadd.f32 %v11709_v27, %v13879_v3  ;;  %12676 = verf.f32 %v1335_v22  ;;  %v1334_v30 = vmul.f32 0.70710677, %v960_v24 }
 0x126   : >> { %v969_v31 = vpop.f32.mrf.mxu0  ;;  %v1129_v32 = vpop.f32.mrf.mxu1  ;;  %12678 = verf.f32 %v1367_v23  ;;  %v1366_v33 = vmul.f32 0.70710677, %v1120_v25  ;;  %v13905_v6 = vmul.f32 0.5, %v960_v24  ;;  %v13907_v7 = vmul.f32 0.5, %v1120_v25 }
 0x127   : >> { %v1337_v34 = vmul.f32 0.70710677, %v975_v28  ;;  %12680 = verf.f32 %v1334_v30  ;;  %v1369_v35 = vmul.f32 0.70710677, %v1135_v29  ;;  %v970_v36 = vadd.f32 %v13879_v3, %v969_v31 }
 0x128   : >> { %v11664_v37 = vpop.f32.mrf.mxu0  ;;  %v11712_v38 = vpop.f32.mrf.mxu1  ;;  %12682 = verf.f32 %v1366_v33  ;;  %v1130_v39 = vadd.f32 %v13879_v3, %v1129_v32  ;;  %v1273_v8 = vmul.f32 0.5, %v975_v28  ;;  %v1305_v12 = vmul.f32 0.5, %v1135_v29 }
 0x129   : >> { %v985_v40 = vadd.f32 %v11664_v37, %v13879_v3  ;;  %v1145_v41 = vadd.f32 %v11712_v38, %v13879_v3  ;;  %12684 = verf.f32 %v1337_v34  ;;  %v1336_v42 = vmul.f32 0.70710677, %v970_v36 }
 0x12a   : >> { %v979_v43 = vpop.f32.mrf.mxu0  ;;  %v1139_v44 = vpop.f32.mrf.mxu1  ;;  %12686 = verf.f32 %v1369_v35  ;;  %v1368_v45 = vmul.f32 0.70710677, %v1130_v39  ;;  %v1272_v22 = vmul.f32 0.5, %v970_v36  ;;  %v1304_v23 = vmul.f32 0.5, %v1130_v39 }
 0x12b   : >> { %12688 = verf.f32 %v1336_v42  ;;  %v1339_v46 = vmul.f32 0.70710677, %v985_v40  ;;  %v1371_v47 = vmul.f32 0.70710677, %v1145_v41  ;;  %v980_v50 = vadd.f32 %v13879_v3, %v979_v43 }
 0x12c   : >> { %v11667_v48 = vpop.f32.mrf.mxu0  ;;  %v11715_v49 = vpop.f32.mrf.mxu1  ;;  %12690 = verf.f32 %v1368_v45  ;;  %v1140_v51 = vadd.f32 %v13879_v3, %v1139_v44  ;;  %v1275_v29 = vmul.f32 0.5, %v985_v40  ;;  %v1307_v30 = vmul.f32 0.5, %v1145_v41 }
 0x12d   : >> { %12692 = verf.f32 %v1339_v46  ;;  %v1338_v60 = vmul.f32 0.70710677, %v980_v50  ;;  %v13898_v61 = vadd.f32 %v11667_v48, %v13879_v3  ;;  %v13903_v1 = vadd.f32 %v11715_v49, %v13879_v3 }
 0x12e   : >> { %v12669_v52 = vpop.eup %12668  ;;  %v989_v56 = vpop.f32.mrf.mxu0  ;;  %12694 = verf.f32 %v1371_v47  ;;  %v1370_v0 = vmul.f32 0.70710677, %v1140_v51  ;;  %v13923_v31 = vmul.f32 0.5, %v980_v50  ;;  %v13925_v34 = vmul.f32 0.5, %v1140_v51 }
 0x12f   : >> { %v1149_v57 = vpop.f32.mrf.mxu1  ;;  %v12671_v58 = vpop.eup %12670  ;;  %12696 = verf.f32 %v1338_v60  ;;  %v1461_v10 = vadd.f32 1.0, %v12669_v52  ;;  %v1341_v17 = vmul.f32 0.70710677, %v13898_v61  ;;  %v13913_v18 = vadd.f32 %v13879_v3, %v989_v56 }
 0x130   : >> { %v11670_v2 = vpop.f32.mrf.mxu0  ;;  %v12673_v5 = vpop.eup %12672  ;;  %v1493_v11 = vadd.f32 1.0, %v12671_v58  ;;  %12698 = verf.f32 %v1370_v0  ;;  %v13916_v19 = vadd.f32 %v13879_v3, %v1149_v57  ;;  %v1373_v24 = vmul.f32 0.70710677, %v13903_v1 }
 0x131   : >> { %v11718_v4 = vpop.f32.mrf.mxu1  ;;  %v12675_v9 = vpop.eup %12674  ;;  %v1460_v16 = vadd.f32 1.0, %v12673_v5  ;;  %v1525_v33 = vmul.f32 %v1461_v10, %v1269_v53  ;;  %v1340_v35 = vmul.f32 0.70710677, %v13913_v18  ;;  %v13929_v36 = vadd.f32 %v11670_v2, %v13879_v3 }
 0x132   : >> { %v999_v13 = vpop.f32.mrf.mxu0  ;;  %v12677_v15 = vpop.eup %12676  ;;  %v1492_v21 = vadd.f32 1.0, %v12675_v9  ;;  %v1557_v42 = vmul.f32 %v1493_v11, %v1301_v54  ;;  %12700 = verf.f32 %v1341_v17  ;;  %v1372_v40 = vmul.f32 0.70710677, %v13916_v19 }
 0x133   : >> { %v13909_v14 = vpop.f32.mrf.mxu1  ;;  %v12679_v20 = vpop.eup %12678  ;;  %v1463_v28 = vadd.f32 1.0, %v12677_v15  ;;  %v1524_v43 = vmul.f32 %v1460_v16, %v1268_v55  ;;  %12702 = verf.f32 %v1373_v24  ;;  %v13939_v52 = vadd.f32 %v11718_v4, %v13879_v3 }
 0x134   : >> { %v13919_v25 = vpop.f32.mrf.mxu0  ;;  %v12681_v27 = vpop.eup %12680  ;;  %v1556_v44 = vmul.f32 %v1492_v21, %v1300_v59  ;;  %v1495_v45 = vadd.f32 1.0, %v12679_v20  ;;  %12704 = verf.f32 %v1340_v35  ;;  %v1343_v57 = vmul.f32 0.70710677, %v13929_v36 }
 0x135   : >> { %v13921_v26 = vpop.f32.mrf.mxu1  ;;  %v12683_v32 = vpop.eup %12682  ;;  %v1527_v49 = vmul.f32 %v1463_v28, %v1271_v62  ;;  %v1462_v50 = vadd.f32 1.0, %v12681_v27  ;;  %12706 = verf.f32 %v1372_v40  ;;  %v13947_v10 = vadd.f32 %v13879_v3, %v999_v13 }
 0x136   : >> { %v13931_v37 = vpop.f32.mrf.mxu0  ;;  %v12685_v39 = vpop.eup %12684  ;;  %v1494_v59 = vadd.f32 1.0, %v12683_v32  ;;  %v1375_v16 = vmul.f32 0.70710677, %v13939_v52  ;;  %12708 = verf.f32 %v1343_v57  ;;  %v1559_v13 = vmul.f32 %v1495_v45, %v13900_v63 }
 0x137   : >> { %v13933_v38 = vpop.f32.mrf.mxu1  ;;  %v12687_v41 = vpop.eup %12686  ;;  %v1465_v46 = vadd.f32 1.0, %v12685_v39 }
 0x138   : >> { %v13936_v47 = vpop.f32.mrf.mxu0  ;;  %v12689_v48 = vpop.eup %12688  ;;  %v1497_v51 = vadd.f32 1.0, %v12687_v41  ;;  %12710 = verf.f32 %v1375_v16 }
 0x139   : >> { %v13941_v53 = vpop.f32.mrf.mxu1  ;;  %v12691_v54 = vpop.eup %12690  ;;  %v1529_v55 = vmul.f32 %v1465_v46, %v1273_v8  ;;  %v1464_v56 = vadd.f32 1.0, %v12689_v48  ;;  %v13990_v48 = vadd.f32 %v13879_v3, %v13933_v38  ;;  %v14011_v57 = vadd.f32 %v13936_v47, %v13879_v3 }
 0x13a   : >> { %v12693_v58 = vpop.eup %12692  ;;  %v1561_v60 = vmul.f32 %v1497_v51, %v1305_v12  ;;  %v1496_v0 = vadd.f32 1.0, %v12691_v54  ;;  %v13944_v2 = vpop.f32.mrf.mxu0 }
 0x13b   : >> { %v12695_v62 = vpop.eup %12694  ;;  %v1589_v5 = vmax.f32 %v1525_v33, %v1529_v55  ;;  %v1528_v9 = vmul.f32 %v1464_v56, %v1272_v22  ;;  %v1467_v4 = vadd.f32 1.0, %v12693_v58  ;;  %v13950_v17 = vpop.f32.mrf.mxu1  ;;  %v13955_v22 = vadd.f32 %v13879_v3, %v13909_v14 }
 0x13c   : >> { %v1593_v11 = vmax.f32 %v1557_v42, %v1561_v60  ;;  %v1560_v8 = vmul.f32 %v1496_v0, %v1304_v23  ;;  %v1499_v15 = vadd.f32 1.0, %v12695_v62  ;;  %v12697_v20 = vpop.eup %12696  ;;  %v13959_v32 = vpop.f32.mrf.mxu0  ;;  %v1526_v33 = vmul.f32 %v1462_v50, %v13905_v6 }
 0x13d   : >> { %1621 = vst.msk [vmem:[#allocation4 + $0x8] sm:$0xff] %vm452_vm0, %v1589_v5  ;;  %v1588_v12 = vmax.f32 %v1524_v43, %v1528_v9  ;;  %v1531_v21 = vmul.f32 %v1467_v4, %v1275_v29  ;;  %v12699_v24 = vpop.eup %12698  ;;  %v1466_v28 = vadd.f32 1.0, %v12697_v20  ;;  %v13965_v14 = vadd.f32 %v13919_v25, %v13879_v3  ;;  %v13970_v42 = vpop.f32.mrf.mxu1 }
 0x13e   : >> { %1637 = vst.msk [vmem:[#allocation4 + $0x88] sm:$0xff] %vm452_vm0, %v1593_v11  ;;  %v1592_v23 = vmax.f32 %v1556_v44, %v1560_v8  ;;  %v1563_v27 = vmul.f32 %v1499_v15, %v1307_v30  ;;  %v1498_v35 = vadd.f32 1.0, %v12699_v24  ;;  %v1342_v30 = vmul.f32 0.70710677, %v13947_v10 }
 0x13f   : >> { %1620 = vst.msk [vmem:[#allocation4] sm:$0xff] %vm452_vm0, %v1588_v12  ;;  %v1591_v29 = vmax.f32 %v1527_v49, %v1531_v21  ;;  %v1530_v39 = vmul.f32 %v1466_v28, %v13923_v31  ;;  %v1558_v6 = vmul.f32 %v1494_v59, %v13907_v7  ;;  %v1374_v40 = vmul.f32 0.70710677, %v13955_v22  ;;  %v1029_v7 = vpop.f32.mrf.mxu0  ;;  %v12701_v45 = vpop.eup %12700 }
 0x140   : >> { %1636 = vst.msk [vmem:[#allocation4 + $0x80] sm:$0xff] %vm452_vm0, %v1592_v23  ;;  %v1595_v63 = vmax.f32 %v1559_v13, %v1563_v27  ;;  %v1562_v43 = vmul.f32 %v1498_v35, %v13925_v34  ;;  %v1345_v25 = vmul.f32 0.70710677, %v13965_v14  ;;  %v13981_v31 = vadd.f32 %v13921_v26, %v13879_v3  ;;  %v12703_v49 = vpop.eup %12702  ;;  %v13998_v51 = vpop.f32.mrf.mxu1 }
 0x141   : >> { %1623 = vst.msk [vmem:[#allocation4 + $0x18] sm:$0xff] %vm452_vm0, %v1591_v29  ;;  %v1590_v41 = vmax.f32 %v1526_v33, %v1530_v39  ;;  %v13985_v44 = vadd.f32 %v13879_v3, %v13931_v37  ;;  %v1277_v34 = vmul.f32 0.5, %v13898_v61  ;;  %v1309_v26 = vmul.f32 0.5, %v13903_v1  ;;  %v12705_v55 = vpop.eup %12704  ;;  %v14017_v58 = vpop.f32.mrf.mxu0 }
 0x142   : >> { %1639 = vst.msk [vmem:[#allocation4 + $0x98] sm:$0xff] %vm452_vm0, %v1595_v63  ;;  %v1594_v46 = vmax.f32 %v1558_v6, %v1562_v43  ;;  %12712 = verf.f32 %v1345_v25  ;;  %v13995_v50 = vmul.f32 0.5, %v13913_v18  ;;  %v1377_v37 = vmul.f32 0.70710677, %v13981_v31  ;;  %v12707_v59 = vpop.eup %12706 }
 0x143   : >> { %1622 = vst.msk [vmem:[#allocation4 + $0x10] sm:$0xff] %vm452_vm0, %v1590_v41  ;;  %12714 = verf.f32 %v1342_v30  ;;  %v14002_v61 = vmul.f32 0.5, %v13916_v19  ;;  %v1344_v38 = vmul.f32 0.70710677, %v13985_v44  ;;  %v1376_v54 = vmul.f32 0.70710677, %v13990_v48  ;;  %v12709_v15 = vpop.eup %12708  ;;  %v1039_v21 = vpop.f32.mrf.mxu0 }
 0x144   : >> { %1638 = vst.msk [vmem:[#allocation4 + $0x90] sm:$0xff] %vm452_vm0, %v1594_v46  ;;  %12716 = verf.f32 %v1374_v40  ;;  %v14007_v18 = vmul.f32 0.5, %v13929_v36  ;;  %v14015_v19 = vadd.f32 %v13941_v53, %v13879_v3  ;;  %v14020_v5 = vmul.f32 0.5, %v13939_v52  ;;  %v11730_v53 = vpop.f32.mrf.mxu1 }
 0x145   : >> { %12718 = verf.f32 %v1377_v37  ;;  %v14023_v36 = vmul.f32 0.5, %v13947_v10  ;;  %v1469_v47 = vadd.f32 1.0, %v12701_v45  ;;  %v1347_v4 = vmul.f32 0.70710677, %v14011_v57  ;;  %v11685_v25 = vpop.f32.mrf.mxu0 }
 0x146   : >> { %v1652_v1 = vld [vmem:[#allocation4] ss:$2 sm:$0xff]  ;;  %v1684_v56 = vld [vmem:[#allocation4 + $0x1] ss:$2 sm:$0xff]  ;;  %12720 = verf.f32 %v1344_v38  ;;  %v1501_v11 = vadd.f32 1.0, %v12703_v49  ;;  %v14033_v52 = vmul.f32 0.5, %v13955_v22  ;;  %v1020_v8 = vadd.f32 %v13879_v3, %v13944_v2  ;;  %v1199_v35 = vpop.f32.mrf.mxu1 }
 0x147   : >> { %v1715_v60 = vmax.f32 %v1652_v1, %v1684_v56  ;;  %v1668_v0 = vld [vmem:[#allocation4 + $0x80] ss:$2 sm:$0xff]  ;;  %v1700_v62 = vld [vmem:[#allocation4 + $0x81] ss:$2 sm:$0xff]  ;;  %12722 = verf.f32 %v1376_v54  ;;  %v1379_v10 = vmul.f32 0.70710677, %v14015_v19  ;;  %v14043_v20 = vadd.f32 %v13879_v3, %v13950_v17  ;;  %v1049_v56 = vpop.f32.mrf.mxu0 }
 0x148   : >> { %v1723_v9 = vmax.f32 %v1668_v0, %v1700_v62  ;;  %v1281_v16 = vmul.f32 0.5, %v13965_v14  ;;  %12724 = verf.f32 %v1347_v4  ;;  %v14047_v12 = vadd.f32 %v13959_v32, %v13879_v3  ;;  %v12711_v14 = vpop.eup %12710 }
 0x149   : >> { %10025 = vst.msk [vmem:[%s14028_s17 + $0x19] sm:$0xff] %vm452_vm0, %v1715_v60  ;;  %v1468_v13 = vadd.f32 1.0, %v12705_v55  ;;  %v1500_v2 = vadd.f32 1.0, %v12707_v59  ;;  %12726 = verf.f32 %v1379_v10  ;;  %v14051_v23 = vadd.f32 %v13970_v42, %v13879_v3 }
 0x14a   : >> { %10033 = vst.msk [vmem:[%s14028_s17 + $0x1c9] sm:$0xff] %vm452_vm0, %v1723_v9  ;;  %v1654_v22 = vld [vmem:[#allocation4 + $0x10] ss:$2 sm:$0xff]  ;;  %v1686_v24 = vld [vmem:[#allocation4 + $0x11] ss:$2 sm:$0xff]  ;;  %v1533_v17 = vmul.f32 %v1469_v47, %v1277_v34  ;;  %v14054_v32 = vadd.f32 %v13879_v3, %v1029_v7  ;;  %v14056_v39 = vmul.f32 %v1501_v11, %v1309_v26  ;;  %v1471_v30 = vadd.f32 1.0, %v12709_v15  ;;  %v11733_v26 = vpop.f32.mrf.mxu1 }
 0x14b   : >> { %v1716_v27 = vmax.f32 %v1654_v22, %v1686_v24  ;;  %v1670_v28 = vld [vmem:[#allocation4 + $0x90] ss:$2 sm:$0xff]  ;;  %v1702_v33 = vld [vmem:[#allocation4 + $0x91] ss:$2 sm:$0xff]  ;;  %v1346_v29 = vmul.f32 0.70710677, %v1020_v8  ;;  %v14070_v45 = vadd.f32 %v13879_v3, %v13998_v51  ;;  %v14099_v10 = vadd.f32 %v13879_v3, %v1199_v35 }
 0x14c   : >> { %v1724_v63 = vmax.f32 %v1670_v28, %v1702_v33  ;;  %v1378_v6 = vmul.f32 0.70710677, %v14043_v20  ;;  %v1313_v42 = vmul.f32 0.5, %v13981_v31  ;;  %v1280_v43 = vmul.f32 0.5, %v13985_v44  ;;  %v1209_v9 = vpop.f32.mrf.mxu1 }
 0x14d   : >> { %10026 = vst.msk [vmem:[%s14028_s17 + $0x21] sm:$0xff] %vm452_vm0, %v1716_v27  ;;  %12728 = verf.f32 %v1346_v29  ;;  %v1349_v40 = vmul.f32 0.70710677, %v14047_v12  ;;  %v1312_v41 = vmul.f32 0.5, %v13990_v48  ;;  %v1381_v7 = vmul.f32 0.70710677, %v14051_v23 }
 0x14e   : >> { %10034 = vst.msk [vmem:[%s14028_s17 + $0x1d1] sm:$0xff] %vm452_vm0, %v1724_v63  ;;  %12730 = verf.f32 %v1378_v6  ;;  %v1532_v31 = vmul.f32 %v1468_v13, %v13995_v50  ;;  %v14074_v44 = vmul.f32 %v1500_v2, %v14002_v61  ;;  %v1503_v34 = vadd.f32 1.0, %v12711_v14  ;;  %v11736_v29 = vpop.f32.mrf.mxu1 }
 0x14f   : >> { %v12713_v46 = vpop.eup %12712  ;;  %v1348_v49 = vmul.f32 0.70710677, %v14054_v32  ;;  %v14078_v48 = vmul.f32 %v1471_v30, %v14007_v18  ;;  %v1283_v54 = vmul.f32 0.5, %v14011_v57  ;;  %v1315_v51 = vmul.f32 0.5, %v14015_v19 }
 0x150   : >> { %v12715_v37 = vpop.eup %12714  ;;  %v1473_v38 = vadd.f32 1.0, %v12713_v46  ;;  %v14082_v1 = vmul.f32 0.5, %v1020_v8  ;;  %12732 = verf.f32 %v1349_v40  ;;  %v14086_v50 = vadd.f32 %v14017_v58, %v13879_v3 }
 0x151   : >> { %v12717_v55 = vpop.eup %12716  ;;  %v14089_v61 = vadd.f32 %v11730_v53, %v13879_v3  ;;  %12734 = verf.f32 %v1381_v7  ;;  %v1380_v60 = vmul.f32 0.70710677, %v14070_v45  ;;  %v14093_v57 = vadd.f32 %v13879_v3, %v1039_v21 }
 0x152   : >> { %v12719_v59 = vpop.eup %12718  ;;  %v1537_v18 = vmul.f32 %v1473_v38, %v1281_v16  ;;  %v1567_v0 = vmul.f32 %v1503_v34, %v14020_v5  ;;  %12736 = verf.f32 %v1348_v49  ;;  %v1351_v58 = vmul.f32 0.70710677, %v14086_v50  ;;  %v11688_v5 = vpop.f32.mrf.mxu0 }
 0x153   : >> { %v12721_v19 = vpop.eup %12720  ;;  %v1505_v62 = vadd.f32 1.0, %v12719_v59  ;;  %v1383_v11 = vmul.f32 0.70710677, %v14089_v61  ;;  %v1470_v8 = vadd.f32 1.0, %v12715_v37  ;;  %v14102_v21 = vadd.f32 %v11685_v25, %v13879_v3  ;;  %v1219_v49 = vpop.f32.mrf.mxu1 }
 0x154   : >> { %v12723_v47 = vpop.eup %12722  ;;  %v1597_v4 = vmax.f32 %v1533_v17, %v1537_v18  ;;  %v1472_v53 = vadd.f32 1.0, %v12721_v19  ;;  %v1502_v24 = vadd.f32 1.0, %v12717_v55  ;;  %12738 = verf.f32 %v1380_v60 }
 0x155   : >> { %v1569_v15 = vmul.f32 %v1505_v62, %v1313_v42  ;;  %v1504_v16 = vadd.f32 1.0, %v12723_v47  ;;  %v12725_v22 = vpop.eup %12724  ;;  %v1350_v2 = vmul.f32 0.70710677, %v14093_v57  ;;  %12740 = verf.f32 %v1351_v58 }
 0x156   : >> { %1625 = vst.msk [vmem:[#allocation4 + $0x28] sm:$0xff] %vm452_vm0, %v1597_v4  ;;  %v1536_v13 = vmul.f32 %v1472_v53, %v1280_v43  ;;  %v12727_v27 = vpop.eup %12726  ;;  %v1475_v17 = vadd.f32 1.0, %v12725_v22  ;;  %12742 = verf.f32 %v1383_v11  ;;  %v1382_v63 = vmul.f32 0.70710677, %v14099_v10 }
 0x157   : >> { %v1601_v28 = vmax.f32 %v14056_v39, %v1569_v15  ;;  %v1568_v33 = vmul.f32 %v1504_v16, %v1312_v41  ;;  %v1507_v14 = vadd.f32 1.0, %v12727_v27  ;;  %v1353_v42 = vmul.f32 0.70710677, %v14102_v21  ;;  %v1059_v39 = vpop.f32.mrf.mxu0 }
 0x158   : >> { %v1596_v35 = vmax.f32 %v1532_v31, %v1536_v13  ;;  %v1539_v6 = vmul.f32 %v1475_v17, %v1283_v54  ;;  %v14112_v43 = vadd.f32 %v11733_v26, %v13879_v3  ;;  %12744 = verf.f32 %v1350_v2 }
 0x159   : >> { %1641 = vst.msk [vmem:[#allocation4 + $0xa8] sm:$0xff] %vm452_vm0, %v1601_v28  ;;  %v1600_v30 = vmax.f32 %v14074_v44, %v1568_v33  ;;  %v1571_v25 = vmul.f32 %v1507_v14, %v1315_v51  ;;  %v14116_v41 = vadd.f32 %v13879_v3, %v1049_v56  ;;  %v14119_v7 = vadd.f32 %v13879_v3, %v1209_v9  ;;  %v14130_v56 = vpop.f32.mrf.mxu0 }
 0x15a   : >> { %v12729_v40 = vpop.eup %12728  ;;  %1624 = vst.msk [vmem:[#allocation4 + $0x20] sm:$0xff] %vm452_vm0, %v1596_v35  ;;  %v1599_v31 = vmax.f32 %v14078_v48, %v1539_v6  ;;  %v1314_v34 = vmul.f32 0.5, %v14043_v20  ;;  %12746 = verf.f32 %v1353_v42  ;;  %v1534_v26 = vmul.f32 %v1470_v8, %v14023_v36 }
 0x15b   : >> { %v12731_v46 = vpop.eup %12730  ;;  %1640 = vst.msk [vmem:[#allocation4 + $0xa0] sm:$0xff] %vm452_vm0, %v1600_v30  ;;  %v1474_v44 = vadd.f32 1.0, %v12729_v40  ;;  %v1603_v37 = vmax.f32 %v1567_v0, %v1571_v25  ;;  %v1385_v54 = vmul.f32 0.70710677, %v14112_v43  ;;  %v1566_v51 = vmul.f32 %v1502_v24, %v14033_v52  ;;  %v1069_v15 = vpop.f32.mrf.mxu0 }
 0x15c   : >> { %v1506_v38 = vadd.f32 1.0, %v12731_v46  ;;  %1627 = vst.msk [vmem:[#allocation4 + $0x38] sm:$0xff] %vm452_vm0, %v1599_v31  ;;  %12748 = verf.f32 %v1382_v63  ;;  %v1352_v48 = vmul.f32 0.70710677, %v14116_v41  ;;  %v1384_v36 = vmul.f32 0.70710677, %v14119_v7 }
 0x15d   : >> { %v1538_v55 = vmul.f32 %v1474_v44, %v14082_v1  ;;  %v12733_v20 = vpop.eup %12732  ;;  %1643 = vst.msk [vmem:[#allocation4 + $0xb8] sm:$0xff] %vm452_vm0, %v1603_v37  ;;  %12750 = verf.f32 %v1385_v54  ;;  %v14135_v18 = vadd.f32 %v11688_v5, %v13879_v3  ;;  %v1285_v19 = vmul.f32 0.5, %v14047_v12  ;;  %v11739_v1 = vpop.f32.mrf.mxu1 }
 0x15e   : >> { %v1570_v59 = vmul.f32 %v1506_v38, %v1314_v34  ;;  %v12735_v52 = vpop.eup %12734  ;;  %12752 = verf.f32 %v1352_v48  ;;  %v1317_v58 = vmul.f32 0.5, %v14051_v23  ;;  %v1284_v9 = vmul.f32 0.5, %v14054_v32  ;;  %v11694_v6 = vpop.f32.mrf.mxu0 }
 0x15f   : >> { %v1598_v60 = vmax.f32 %v1534_v26, %v1538_v55  ;;  %v12737_v0 = vpop.eup %12736  ;;  %12754 = verf.f32 %v1384_v36  ;;  %v1316_v53 = vmul.f32 0.5, %v14070_v45  ;;  %v14143_v11 = vmul.f32 0.5, %v14086_v50  ;;  %v1229_v27 = vpop.f32.mrf.mxu1 }
 0x160   : >> { %v1602_v62 = vmax.f32 %v1566_v51, %v1570_v59  ;;  %v1225_v12 = vadd.f32 %v11736_v29, %v13879_v3  ;;  %v1060_v8 = vadd.f32 %v13879_v3, %v1059_v39  ;;  %v1355_v32 = vmul.f32 0.70710677, %v14135_v18  ;;  %v1079_v55 = vpop.f32.mrf.mxu0 }
 0x161   : >> { %v1656_v47 = vld [vmem:[#allocation4 + $0x20] ss:$2 sm:$0xff]  ;;  %v1688_v4 = vld [vmem:[#allocation4 + $0x21] ss:$2 sm:$0xff]  ;;  %1626 = vst.msk [vmem:[#allocation4 + $0x30] sm:$0xff] %vm452_vm0, %v1598_v60  ;;  %v14150_v22 = vadd.f32 %v13879_v3, %v1219_v49  ;;  %v12739_v45 = vpop.eup %12738  ;;  %v1477_v24 = vadd.f32 1.0, %v12733_v20 }
 0x162   : >> { %v1717_v16 = vmax.f32 %v1656_v47, %v1688_v4  ;;  %v1672_v23 = vld [vmem:[#allocation4 + $0xa0] ss:$2 sm:$0xff]  ;;  %v1704_v5 = vld [vmem:[#allocation4 + $0xa1] ss:$2 sm:$0xff]  ;;  %1642 = vst.msk [vmem:[#allocation4 + $0xb0] sm:$0xff] %vm452_vm0, %v1602_v62  ;;  %v1509_v13 = vadd.f32 1.0, %v12735_v52  ;;  %v12741_v28 = vpop.eup %12740  ;;  %12756 = verf.f32 %v1355_v32  ;;  %v14179_v52 = vadd.f32 %v13879_v3, %v1069_v15 }
 0x163   : >> { %v1725_v50 = vmax.f32 %v1672_v23, %v1704_v5  ;;  %v1387_v2 = vmul.f32 0.70710677, %v1225_v12  ;;  %v1476_v33 = vadd.f32 1.0, %v12737_v0  ;;  %v1319_v17 = vmul.f32 0.5, %v14089_v61  ;;  %v12743_v35 = vpop.eup %12742 }
 0x164   : >> { %10027 = vst.msk [vmem:[%s14028_s17 + $0x31] sm:$0xff] %vm452_vm0, %v1717_v16  ;;  %v1354_v29 = vmul.f32 0.70710677, %v1060_v8  ;;  %v1286_v14 = vmul.f32 0.5, %v14093_v57  ;;  %v14159_v63 = vmul.f32 0.5, %v14099_v10  ;;  %v1289_v30 = vmul.f32 0.5, %v14102_v21  ;;  %v11742_v10 = vpop.f32.mrf.mxu1 }
 0x165   : >> { %10035 = vst.msk [vmem:[%s14028_s17 + $0x1e1] sm:$0xff] %vm452_vm0, %v1725_v50  ;;  %12758 = verf.f32 %v1387_v2  ;;  %v1508_v42 = vadd.f32 1.0, %v12739_v45  ;;  %v1321_v39 = vmul.f32 0.5, %v14112_v43  ;;  %v1386_v61 = vmul.f32 0.70710677, %v14150_v22  ;;  %v12745_v40 = vpop.eup %12744 }
 0x166   : >> { %12760 = verf.f32 %v1354_v29  ;;  %v1541_v25 = vmul.f32 %v1477_v24, %v1285_v19  ;;  %v14164_v46 = vmul.f32 %v1509_v13, %v1317_v58  ;;  %v1288_v31 = vmul.f32 0.5, %v14116_v41 }
 0x167   : >> { %v1320_v57 = vmul.f32 0.5, %v14119_v7  ;;  %v12747_v44 = vpop.eup %12746  ;;  %v14168_v49 = vmul.f32 %v1476_v33, %v1284_v9  ;;  %v1479_v26 = vadd.f32 1.0, %v12741_v28  ;;  %12762 = verf.f32 %v1386_v61 }
 0x168   : >> { %v1658_v34 = vld [vmem:[#allocation4 + $0x30] ss:$2 sm:$0xff]  ;;  %v1690_v21 = vld [vmem:[#allocation4 + $0x31] ss:$2 sm:$0xff]  ;;  %v14172_v43 = vadd.f32 %v14130_v56, %v13879_v3  ;;  %v1481_v51 = vadd.f32 1.0, %v12747_v44  ;;  %v1291_v41 = vmul.f32 0.5, %v14135_v18  ;;  %v14176_v7 = vadd.f32 %v11739_v1, %v13879_v3  ;;  %v1239_v18 = vpop.f32.mrf.mxu1 }
 0x169   : >> { %v1718_v37 = vmax.f32 %v1658_v34, %v1690_v21  ;;  %v1674_v38 = vld [vmem:[#allocation4 + $0xb0] ss:$2 sm:$0xff]  ;;  %v1706_v54 = vld [vmem:[#allocation4 + $0xb1] ss:$2 sm:$0xff]  ;;  %v12749_v48 = vpop.eup %12748  ;;  %v1572_v59 = vmul.f32 %v1508_v42, %v1316_v53  ;;  %v1323_v36 = vmul.f32 0.5, %v1225_v12  ;;  %v1511_v60 = vadd.f32 1.0, %v12743_v35 }
 0x16a   : >> { %v1726_v20 = vmax.f32 %v1674_v38, %v1706_v54  ;;  %v12751_v56 = vpop.eup %12750  ;;  %v1478_v19 = vadd.f32 1.0, %v12745_v40  ;;  %v1545_v0 = vmul.f32 %v1481_v51, %v1289_v30  ;;  %v1290_v62 = vmul.f32 0.5, %v1060_v8  ;;  %v11697_v8 = vpop.f32.mrf.mxu0 }
 0x16b   : >> { %10028 = vst.msk [vmem:[%s14028_s17 + $0x39] sm:$0xff] %vm452_vm0, %v1718_v37  ;;  %v12753_v58 = vpop.eup %12752  ;;  %v14186_v1 = vmul.f32 %v1479_v26, %v14143_v11  ;;  %v1513_v9 = vadd.f32 1.0, %v12751_v56  ;;  %v1357_v47 = vmul.f32 0.70710677, %v14172_v43  ;;  %v14190_v4 = vadd.f32 %v13879_v3, %v1229_v27  ;;  %v11745_v27 = vpop.f32.mrf.mxu1 }
 0x16c   : >> { %10036 = vst.msk [vmem:[%s14028_s17 + $0x1e9] sm:$0xff] %vm452_vm0, %v1726_v20  ;;  %v12755_v53 = vpop.eup %12754  ;;  %v1510_v12 = vadd.f32 1.0, %v12749_v48  ;;  %v1605_v15 = vmax.f32 %v1541_v25, %v1545_v0  ;;  %v1480_v16 = vadd.f32 1.0, %v12753_v58  ;;  %v1389_v23 = vmul.f32 0.70710677, %v14176_v7 }
 0x16d   : >> { %v1577_v5 = vmul.f32 %v1513_v9, %v1321_v39  ;;  %v1512_v32 = vadd.f32 1.0, %v12755_v53  ;;  %v1356_v45 = vmul.f32 0.70710677, %v14179_v52  ;;  %v14195_v11 = vadd.f32 %v11694_v6, %v13879_v3  ;;  %v12796_v53 = vld [vmem:[%s13692_s15] ss:$0 sm:$0xff] }
 0x16e   : >> { %v1575_v50 = vmul.f32 %v1511_v60, %v1319_v17  ;;  %v1542_v24 = vmul.f32 %v1478_v19, %v1286_v14  ;;  %1629 = vst.msk [vmem:[#allocation4 + $0x48] sm:$0xff] %vm452_vm0, %v1605_v15  ;;  %v1544_v13 = vmul.f32 %v1480_v16, %v1288_v31  ;;  %v1322_v2 = vmul.f32 0.5, %v14150_v22  ;;  %v1089_v14 = vpop.f32.mrf.mxu0 }
 0x16f   : >> { %v1609_v28 = vmax.f32 %v14164_v46, %v1577_v5  ;;  %v1576_v33 = vmul.f32 %v1512_v32, %v1320_v57  ;;  %12764 = verf.f32 %v1357_v47  ;;  %v1388_v29 = vmul.f32 0.70710677, %v14190_v4  ;;  %v12757_v35 = vpop.eup %12756  ;;  %v1249_v57 = vpop.f32.mrf.mxu1 }
 0x170   : >> { %v1574_v30 = vmul.f32 %v1510_v12, %v14159_v63  ;;  %v1604_v6 = vmax.f32 %v14168_v49, %v1544_v13  ;;  %12766 = verf.f32 %v1389_v23  ;;  %v14204_v17 = vadd.f32 %v11742_v10, %v13879_v3  ;;  %v11700_v54 = vpop.f32.mrf.mxu0 }
 0x171   : >> { %1645 = vst.msk [vmem:[#allocation4 + $0xc8] sm:$0xff] %vm452_vm0, %v1609_v28  ;;  %v1608_v22 = vmax.f32 %v1572_v59, %v1576_v33  ;;  %v1483_v39 = vadd.f32 1.0, %v12757_v35  ;;  %12768 = verf.f32 %v1356_v45  ;;  %v1359_v61 = vmul.f32 0.70710677, %v14195_v11  ;;  %v11748_v56 = vpop.f32.mrf.mxu1 }
 0x172   : >> { %v12759_v42 = vpop.eup %12758  ;;  %1628 = vst.msk [vmem:[#allocation4 + $0x40] sm:$0xff] %vm452_vm0, %v1604_v6  ;;  %v14210_v63 = vadd.f32 %v13879_v3, %v1079_v55  ;;  %v14213_v46 = vadd.f32 %v11697_v8, %v13879_v3  ;;  %v14216_v31 = vadd.f32 %v11745_v27, %v13879_v3  ;;  %12770 = verf.f32 %v1388_v29  ;;  %v1099_v58 = vpop.f32.mrf.mxu0 }
 0x173   : >> { %v12761_v40 = vpop.eup %12760  ;;  %v1515_v25 = vadd.f32 1.0, %v12759_v42  ;;  %1644 = vst.msk [vmem:[#allocation4 + $0xc0] sm:$0xff] %vm452_vm0, %v1608_v22  ;;  %v1547_v10 = vmul.f32 %v1483_v39, %v1291_v41  ;;  %v14220_v34 = vadd.f32 %v13879_v3, %v1089_v14  ;;  %v1391_v26 = vmul.f32 0.70710677, %v14204_v17  ;;  %v1259_v8 = vpop.f32.mrf.mxu1 }
 0x174   : >> { %v1482_v44 = vadd.f32 1.0, %v12761_v40  ;;  %v12763_v21 = vpop.eup %12762  ;;  %v14224_v37 = vadd.f32 %v13879_v3, %v1239_v18  ;;  %v1361_v38 = vmul.f32 0.70710677, %v14213_v46  ;;  %v1393_v41 = vmul.f32 0.70710677, %v14216_v31 }
 0x175   : >> { %v1579_v49 = vmul.f32 %v1515_v25, %v1323_v36  ;;  %v1607_v51 = vmax.f32 %v14186_v1, %v1547_v10  ;;  %v1514_v48 = vadd.f32 1.0, %v12763_v21  ;;  %v1358_v59 = vmul.f32 0.70710677, %v14210_v63 }
 0x176   : >> { %v1546_v55 = vmul.f32 %v1482_v44, %v1290_v62  ;;  %12772 = verf.f32 %v1361_v38  ;;  %v1360_v36 = vmul.f32 0.70710677, %v14220_v34  ;;  %v14233_v0 = vadd.f32 %v13879_v3, %v1249_v57 }
 0x177   : >> { %v1611_v20 = vmax.f32 %v1575_v50, %v1579_v49  ;;  %1631 = vst.msk [vmem:[#allocation4 + $0x58] sm:$0xff] %vm452_vm0, %v1607_v51  ;;  %v1578_v19 = vmul.f32 %v1514_v48, %v1322_v2  ;;  %12774 = verf.f32 %v1393_v41  ;;  %v1390_v62 = vmul.f32 0.70710677, %v14224_v37 }
 0x178   : >> { %v1606_v60 = vmax.f32 %v1542_v24, %v1546_v55  ;;  %12776 = verf.f32 %v1360_v36  ;;  %v14238_v18 = vadd.f32 %v11700_v54, %v13879_v3  ;;  %v14242_v12 = vadd.f32 %v12796_v53, %v11748_v56 }
 0x179   : >> { %1647 = vst.msk [vmem:[#allocation4 + $0xd8] sm:$0xff] %vm452_vm0, %v1611_v20  ;;  %v1660_v1 = vld [vmem:[#allocation4 + $0x40] ss:$2 sm:$0xff]  ;;  %v1692_v9 = vld [vmem:[#allocation4 + $0x41] ss:$2 sm:$0xff]  ;;  %v1610_v47 = vmax.f32 %v1574_v30, %v1578_v19  ;;  %12778 = verf.f32 %v1359_v61  ;;  %v14246_v32 = vadd.f32 %v12796_v53, %v1099_v58  ;;  %v14254_v2 = vadd.f32 %v12796_v53, %v1259_v8 }
 0x17a   : >> { %1630 = vst.msk [vmem:[#allocation4 + $0x50] sm:$0xff] %vm452_vm0, %v1606_v60  ;;  %v1719_v15 = vmax.f32 %v1660_v1, %v1692_v9  ;;  %v1676_v16 = vld [vmem:[#allocation4 + $0xc0] ss:$2 sm:$0xff]  ;;  %v1708_v23 = vld [vmem:[#allocation4 + $0xc1] ss:$2 sm:$0xff]  ;;  %12780 = verf.f32 %v1391_v26  ;;  %v1293_v57 = vmul.f32 0.5, %v14172_v43 }
 0x17b   : >> { %v1727_v5 = vmax.f32 %v1676_v16, %v1708_v23  ;;  %1646 = vst.msk [vmem:[#allocation4 + $0xd0] sm:$0xff] %vm452_vm0, %v1610_v47  ;;  %12782 = verf.f32 %v1358_v59  ;;  %v1392_v3 = vmul.f32 0.70710677, %v14233_v0  ;;  %v1363_v50 = vmul.f32 0.70710677, %v14238_v18 }
 0x17c   : >> { %v12765_v45 = vpop.eup %12764  ;;  %10029 = vst.msk [vmem:[%s14028_s17 + $0x49] sm:$0xff] %vm452_vm0, %v1719_v15  ;;  %12784 = verf.f32 %v1390_v62  ;;  %v1395_v13 = vmul.f32 0.70710677, %v14242_v12  ;;  %v1362_v28 = vmul.f32 0.70710677, %v14246_v32  ;;  %v1297_v44 = vmul.f32 0.5, %v14213_v46 }
 0x17d   : >> { %v12767_v24 = vpop.eup %12766  ;;  %10037 = vst.msk [vmem:[%s14028_s17 + $0x1f9] sm:$0xff] %vm452_vm0, %v1727_v5  ;;  %12786 = verf.f32 %v1392_v3  ;;  %v1394_v6 = vmul.f32 0.70710677, %v14254_v2  ;;  %v1485_v22 = vadd.f32 1.0, %v12765_v45  ;;  %v1325_v26 = vmul.f32 0.5, %v14176_v7 }
 0x17e   : >> { %v12769_v27 = vpop.eup %12768  ;;  %12788 = verf.f32 %v1363_v50  ;;  %v1517_v40 = vadd.f32 1.0, %v12767_v24  ;;  %v1292_v38 = vmul.f32 0.5, %v14179_v52  ;;  %v1329_v54 = vmul.f32 0.5, %v14216_v31 }
 0x17f   : >> { %12790 = verf.f32 %v1395_v13  ;;  %v12771_v33 = vpop.eup %12770  ;;  %v1484_v10 = vadd.f32 1.0, %v12769_v27  ;;  %v1549_v48 = vmul.f32 %v1485_v22, %v1293_v57  ;;  %v1296_v20 = vmul.f32 0.5, %v14220_v34 }
 0x180   : >> { %12792 = verf.f32 %v1362_v28  ;;  %v1581_v36 = vmul.f32 %v1517_v40, %v1325_v26  ;;  %v1516_v7 = vadd.f32 1.0, %v12771_v33  ;;  %v1324_v31 = vmul.f32 0.5, %v14190_v4 }
 0x181   : >> { %v1662_v29 = vld [vmem:[#allocation4 + $0x50] ss:$2 sm:$0xff]  ;;  %v1694_v35 = vld [vmem:[#allocation4 + $0x51] ss:$2 sm:$0xff]  ;;  %12794 = verf.f32 %v1394_v6  ;;  %v1548_v60 = vmul.f32 %v1484_v10, %v1292_v38  ;;  %v1295_v15 = vmul.f32 0.5, %v14195_v11  ;;  %v1327_v16 = vmul.f32 0.5, %v14204_v17 }
 0x182   : >> { %v1720_v30 = vmax.f32 %v1662_v29, %v1694_v35  ;;  %v1678_v14 = vld [vmem:[#allocation4 + $0xd0] ss:$2 sm:$0xff]  ;;  %v1710_v42 = vld [vmem:[#allocation4 + $0xd1] ss:$2 sm:$0xff]  ;;  %v1328_v23 = vmul.f32 0.5, %v14233_v0  ;;  %v1294_v3 = vmul.f32 0.5, %v14210_v63  ;;  %v1580_v24 = vmul.f32 %v1516_v7, %v1324_v31 }
 0x183   : >> { %v12773_v39 = vpop.eup %12772  ;;  %v1728_v61 = vmax.f32 %v1678_v14, %v1710_v42  ;;  %v1299_v4 = vmul.f32 0.5, %v14238_v18  ;;  %v1331_v50 = vmul.f32 0.5, %v14242_v12  ;;  %v1298_v0 = vmul.f32 0.5, %v14246_v32 }
 0x184   : >> { %10030 = vst.msk [vmem:[%s14028_s17 + $0x51] sm:$0xff] %vm452_vm0, %v1720_v30  ;;  %v12775_v25 = vpop.eup %12774  ;;  %v1489_v21 = vadd.f32 1.0, %v12773_v39  ;;  %v1326_v18 = vmul.f32 0.5, %v14224_v37  ;;  %v1330_v12 = vmul.f32 0.5, %v14254_v2 }
 0x185   : >> { %v12777_v49 = vpop.eup %12776  ;;  %10038 = vst.msk [vmem:[%s14028_s17 + $0x201] sm:$0xff] %vm452_vm0, %v1728_v61  ;;  %v1521_v51 = vadd.f32 1.0, %v12775_v25 }
 0x186   : >> { %v12779_v55 = vpop.eup %12778  ;;  %v1553_v41 = vmul.f32 %v1489_v21, %v1297_v44  ;;  %v1488_v43 = vadd.f32 1.0, %v12777_v49 }
 0x187   : >> { %v12781_v59 = vpop.eup %12780  ;;  %v1585_v46 = vmul.f32 %v1521_v51, %v1329_v54  ;;  %v1487_v9 = vadd.f32 1.0, %v12779_v55 }
 0x188   : >> { %v12783_v56 = vpop.eup %12782  ;;  %v1613_v19 = vmax.f32 %v1549_v48, %v1553_v41  ;;  %v1552_v62 = vmul.f32 %v1488_v43, %v1296_v20  ;;  %v1519_v47 = vadd.f32 1.0, %v12781_v59 }
 0x189   : >> { %v12785_v58 = vpop.eup %12784  ;;  %v1617_v1 = vmax.f32 %v1581_v36, %v1585_v46  ;;  %v1486_v13 = vadd.f32 1.0, %v12783_v56  ;;  %v1551_v28 = vmul.f32 %v1487_v9, %v1295_v15 }
 0x18a   : >> { %v12787_v52 = vpop.eup %12786  ;;  %1633 = vst.msk [vmem:[#allocation4 + $0x68] sm:$0xff] %vm452_vm0, %v1613_v19  ;;  %v1612_v53 = vmax.f32 %v1548_v60, %v1552_v62  ;;  %v1583_v33 = vmul.f32 %v1519_v47, %v1327_v16  ;;  %v1518_v35 = vadd.f32 1.0, %v12785_v58 }
 0x18b   : >> { %v12789_v34 = vpop.eup %12788  ;;  %1649 = vst.msk [vmem:[#allocation4 + $0xe8] sm:$0xff] %vm452_vm0, %v1617_v1  ;;  %v1520_v8 = vadd.f32 1.0, %v12787_v52  ;;  %v1550_v22 = vmul.f32 %v1486_v13, %v1294_v3 }
 0x18c   : >> { %v12791_v5 = vpop.eup %12790  ;;  %1632 = vst.msk [vmem:[#allocation4 + $0x60] sm:$0xff] %vm452_vm0, %v1612_v53  ;;  %v1491_v45 = vadd.f32 1.0, %v12789_v34  ;;  %v1582_v32 = vmul.f32 %v1518_v35, %v1326_v18 }
 0x18d   : >> { %v1584_v11 = vmul.f32 %v1520_v8, %v1328_v23  ;;  %v1523_v27 = vadd.f32 1.0, %v12791_v5  ;;  %v12793_v17 = vpop.eup %12792 }
 0x18e   : >> { %v1555_v29 = vmul.f32 %v1491_v45, %v1299_v4  ;;  %v1490_v6 = vadd.f32 1.0, %v12793_v17  ;;  %v12795_v14 = vpop.eup %12794 }
 0x18f   : >> { %v1616_v30 = vmax.f32 %v1580_v24, %v1584_v11  ;;  %v1587_v63 = vmul.f32 %v1523_v27, %v1331_v50  ;;  %v1522_v40 = vadd.f32 1.0, %v12795_v14 }
 0x190   : >> { %v1615_v42 = vmax.f32 %v1551_v28, %v1555_v29  ;;  %v1554_v61 = vmul.f32 %v1490_v6, %v1298_v0 }
 0x191   : >> { %1648 = vst.msk [vmem:[#allocation4 + $0xe0] sm:$0xff] %vm452_vm0, %v1616_v30  ;;  %v1619_v39 = vmax.f32 %v1583_v33, %v1587_v63  ;;  %v1586_v37 = vmul.f32 %v1522_v40, %v1330_v12 }
 0x192   : >> { %1635 = vst.msk [vmem:[#allocation4 + $0x78] sm:$0xff] %vm452_vm0, %v1615_v42  ;;  %v1614_v10 = vmax.f32 %v1550_v22, %v1554_v61 }
 0x193   : >> { %v1664_v25 = vld [vmem:[#allocation4 + $0x60] ss:$2 sm:$0xff]  ;;  %v1696_v57 = vld [vmem:[#allocation4 + $0x61] ss:$2 sm:$0xff]  ;;  %1651 = vst.msk [vmem:[#allocation4 + $0xf8] sm:$0xff] %vm452_vm0, %v1619_v39  ;;  %v1618_v2 = vmax.f32 %v1582_v32, %v1586_v37 }
 0x194   : >> { %v1721_v44 = vmax.f32 %v1664_v25, %v1696_v57  ;;  %1634 = vst.msk [vmem:[#allocation4 + $0x70] sm:$0xff] %vm452_vm0, %v1614_v10 }
 0x195   : >> { %1650 = vst.msk [vmem:[#allocation4 + $0xf0] sm:$0xff] %vm452_vm0, %v1618_v2 }
 0x196   : >> { %10031 = vst.msk [vmem:[%s14028_s17 + $0x61] sm:$0xff] %vm452_vm0, %v1721_v44 }
 0x198   : >> { %v1680_v21 = vld [vmem:[#allocation4 + $0xe0] ss:$2 sm:$0xff]  ;;  %v1712_v49 = vld [vmem:[#allocation4 + $0xe1] ss:$2 sm:$0xff] }
 0x199   : >> { %v1729_v26 = vmax.f32 %v1680_v21, %v1712_v49 }
 0x19b   : >> { %10039 = vst.msk [vmem:[%s14028_s17 + $0x211] sm:$0xff] %vm452_vm0, %v1729_v26  ;;  %v1666_v38 = vld [vmem:[#allocation4 + $0x70] ss:$2 sm:$0xff]  ;;  %v1698_v54 = vld [vmem:[#allocation4 + $0x71] ss:$2 sm:$0xff]  ;;  %608 = sbr.rel (!%p606_p4) target bundleno = 86 (0x56), region = 194 }
 0x19c   : >> { %v1722_v51 = vmax.f32 %v1666_v38, %v1698_v54  ;;  %v1682_v55 = vld [vmem:[#allocation4 + $0xf0] ss:$2 sm:$0xff]  ;;  %v1714_v48 = vld [vmem:[#allocation4 + $0xf1] ss:$2 sm:$0xff] }
 0x19d   : >> { %v1730_v41 = vmax.f32 %v1682_v55, %v1714_v48 }
 0x19e   : >> { %10032 = vst.msk [vmem:[%s14028_s17 + $0x69] sm:$0xff] %vm452_vm0, %v1722_v51 }
 0x19f   : >> { %10040 = vst.msk [vmem:[%s14028_s17 + $0x219] sm:$0xff] %vm452_vm0, %v1730_v41 }
 0x1a0 LB: >> { %v10046_v20 = vld [vmem:[%s13708_s26 + $0x38] sm:$0xff]  ;;  %v10045_v43 = vld [vmem:[%s13708_s26 + $0x30] sm:$0xff]  ;;  %v10044_v59 = vld [vmem:[%s13708_s26 + $0x28] sm:$0xff]  ;;  %s10042_s24 = smul.u32 192, %s13318_s21  ;;  %s16933_s27 = scalar_lea.vmem %s16838_s4, %s16979_s10  ;;  %s13318_s21 = sphi %s14297_s21, %s1756_s21  }
 0x1a1   : >> { %12617 = vmatprep.subr.mxu1 %v10046_v20  ;;  %11749 = vmatprep.subr.mxu0 %v10046_v20  ;;  %v10043_v36 = vld [vmem:[%s13708_s26 + $0x20] sm:$0xff]  ;;  %v1795_v19 = vld [vmem:[%s13708_s26 + $0x18] sm:$0xff]  ;;  %v1794_v31 = vld [vmem:[%s13708_s26 + $0x10] sm:$0xff]  ;;  %s11042_s28 = sshll.u32 %s13318_s21, 6  ;;  %s1756_s21 = sadd.s32 1, %s13318_s21  }
 0x1a2   : >> { %12621 = vmatpush3.msra.mxu1 %v10046_v20  ;;  %11750 = vmatpush3.msra.mxu0 %v10046_v20  ;;  %s14307_s15 = scalar_lea.vmem [#allocation2], %s10042_s24  ;;  %v10114_v58 = vld [vmem:[%s13708_s26 + $0x58] sm:$0xff]  ;;  %v10113_v34 = vld [vmem:[%s13708_s26 + $0x50] sm:$0xff]  ;;  %v1793_v15 = vld [vmem:[%s13708_s26 + $0x8] sm:$0xff]  ;;  %s15742_s23 = scalar_lea.vmem [#allocation3], %s11042_s28 }
 0x1a3   : >> { %12618 = vmatprep.subr.mxu1 %v10045_v43  ;;  %11751 = vmatprep.subr.mxu0 %v10045_v43  ;;  %v10112_v3 = vld [vmem:[%s13708_s26 + $0x48] sm:$0xff]  ;;  %v1792_v4 = vld [vmem:[%s13708_s26] sm:$0xff]  ;;  %v10184_v27 = vld [vmem:[%s13708_s26 + $0x78] sm:$0xff]  ;;  %p1753_p5 = scmp.ge.s32.totalorder %s1756_s21, 2  }
 0x1a4   : >> { %12622 = vmatpush3.msra.mxu1 %v10045_v43  ;;  %11752 = vmatpush3.msra.mxu0 %v10045_v43  ;;  %v10111_v11 = vld [vmem:[%s13708_s26 + $0x40] sm:$0xff]  ;;  %v10252_v0 = vld [vmem:[%s13708_s26 + $0x98] sm:$0xff]  ;;  %v10183_v37 = vld [vmem:[%s13708_s26 + $0x70] sm:$0xff]  ;;  %s16958_s22 = scalar_lea.vmem (%p1753_p5), %s16840_s6, %s16979_s10  ;;  %vm7789_vm6 = vcmask (%p1753_p5), 1041409  }
 0x1a5   : >> { %12619 = vmatprep.subr.mxu1 %v10044_v59  ;;  %11753 = vmatprep.subr.mxu0 %v10044_v59  ;;  %v10251_v2 = vld [vmem:[%s13708_s26 + $0x90] sm:$0xff]  ;;  %v10182_v38 = vld [vmem:[%s13708_s26 + $0x68] sm:$0xff]  ;;  %v10181_v20 = vld [vmem:[%s13708_s26 + $0x60] sm:$0xff] }
 0x1a6   : >> { %v1812_v46 = vld [vmem:[%s14307_s15 + $0x1b1] sm:$0xff]  ;;  %12623 = vmatpush3.msra.mxu1 %v10044_v59  ;;  %11754 = vmatpush3.msra.mxu0 %v10044_v59  ;;  %v1796_v56 = vld [vmem:[%s14307_s15 + $0x1] sm:$0xff]  ;;  %v1813_v60 = vld [vmem:[%s14307_s15 + $0x1b9] sm:$0xff] }
 0x1a7   : >> { %12620 = vmatprep.subr.mxu1 %v10043_v36  ;;  %11755 = vmatprep.subr.mxu0 %v10043_v36  ;;  %v1797_v62 = vld [vmem:[%s14307_s15 + $0x9] sm:$0xff]  ;;  %v14322_v1 = vld [vmem:[%s14307_s15 + $0x19] sm:$0xff]  ;;  %v14326_v52 = vld [vmem:[%s14307_s15 + $0x1d1] sm:$0xff] }
 0x1a8   : >> { %12624 = vmatpush3.msra.mxu1 %v10043_v36  ;;  %11781 = vmatprep.mubr.msk.f32.mxu1 %vm452_vm0, %v1812_v46  ;;  %v14318_v7 = vld [vmem:[%s14307_s15 + $0x1c9] sm:$0xff]  ;;  %v14332_v9 = vld [vmem:[%s14307_s15 + $0x21] sm:$0xff]  ;;  %v14340_v53 = vld [vmem:[%s14307_s15 + $0x31] sm:$0xff] }
 0x1a9   : >> { %11756 = vmatpush3.msra.mxu0 %v10043_v36  ;;  %11757 = vmatprep.mubr.msk.f32.mxu0 %vm452_vm0, %v1796_v56  ;;  %v14335_v47 = vld [vmem:[%s14307_s15 + $0x1e1] sm:$0xff]  ;;  %v14351_v16 = vld [vmem:[%s14307_s15 + $0x1e9] sm:$0xff]  ;;  %v14356_v23 = vld [vmem:[%s14307_s15 + $0x39] sm:$0xff] }
 0x1aa   : >> { %11782 = vmatmul.mubr.msk.f32.vlgmr.msra.gmra.mxu1 %vm452_vm0, %v1813_v60  ;;  %11805 = vmatprep.subr.mxu1 %v1795_v19  ;;  %v14359_v8 = vld [vmem:[%s14307_s15 + $0x1f9] sm:$0xff]  ;;  %v14362_v5 = vld [vmem:[%s14307_s15 + $0x49] sm:$0xff]  ;;  %v14373_v45 = vld [vmem:[%s14307_s15 + $0x201] sm:$0xff] }
 0x1ab   : >> { %11758 = vmatmul.mubr.msk.f32.vlgmr.msra.gmra.mxu0 %vm452_vm0, %v1797_v62  ;;  %11806 = vmatpush3.msra.mxu1 %v1795_v19  ;;  %v14378_v50 = vld [vmem:[%s14307_s15 + $0x51] sm:$0xff]  ;;  %v14384_v13 = vld [vmem:[%s14307_s15 + $0x61] sm:$0xff]  ;;  %v14395_v17 = vld [vmem:[%s14307_s15 + $0x219] sm:$0xff] }
 0x1ac   : >> { %11861 = vmatprep.subr.mxu0 %v10114_v58  ;;  %11784 = vmatprep.mubr.msk.f32.mxu1 %vm452_vm0, %v14318_v7  ;;  %v14381_v24 = vld [vmem:[%s14307_s15 + $0x211] sm:$0xff]  ;;  %v14400_v28 = vld [vmem:[%s14307_s15 + $0x69] sm:$0xff]  ;;  %v14406_v29 = vld [vmem:[%s14307_s15 + $0x79] sm:$0xff] }
 0x1ad   : >> { %11862 = vmatpush3.msra.mxu0 %v10114_v58  ;;  %11760 = vmatprep.mubr.msk.f32.mxu0 %vm452_vm0, %v14322_v1  ;;  %v14403_v33 = vld [vmem:[%s14307_s15 + $0x229] sm:$0xff]  ;;  %v14416_v35 = vld [vmem:[%s14307_s15 + $0x231] sm:$0xff]  ;;  %v14421_v30 = vld [vmem:[%s14307_s15 + $0x81] sm:$0xff] }
 0x1ae   : >> { %11785 = vmatmul.mubr.msk.f32.gmra.mxu1 %vm452_vm0, %v14326_v52  ;;  %11807 = vmatprep.subr.mxu1 %v1794_v31  ;;  %v14424_v63 = vld [vmem:[%s14307_s15 + $0x241] sm:$0xff]  ;;  %v14427_v6 = vld [vmem:[%s14307_s15 + $0x91] sm:$0xff]  ;;  %v14436_v14 = vld [vmem:[%s14307_s15 + $0x249] sm:$0xff] }
 0x1af   : >> { %11761 = vmatmul.mubr.msk.f32.gmra.mxu0 %vm452_vm0, %v14332_v9  ;;  %11787 = vmatprep.mubr.msk.f32.mxu1 %vm452_vm0, %v14335_v47  ;;  %v14441_v18 = vld [vmem:[%s14307_s15 + $0x99] sm:$0xff]  ;;  %v14447_v12 = vld [vmem:[%s14307_s15 + $0xa9] sm:$0xff]  ;;  %v14456_v22 = vld [vmem:[%s14307_s15 + $0x261] sm:$0xff] }
 0x1b0   : >> { %11763 = vmatprep.mubr.msk.f32.mxu0 %vm452_vm0, %v14340_v53  ;;  %11808 = vmatpush3.msra.mxu1 %v1794_v31  ;;  %v14444_v42 = vld [vmem:[%s14307_s15 + $0x259] sm:$0xff]  ;;  %v14461_v39 = vld [vmem:[%s14307_s15 + $0xb1] sm:$0xff]  ;;  %v2475_v40 = vld [vmem:[%s14307_s15 + $0x2] sm:$0xff] }
 0x1b1   : >> { %11863 = vmatprep.subr.mxu0 %v10113_v34  ;;  %11809 = vmatprep.subr.mxu1 %v1793_v15  ;;  %v1760_v61 = vld [vmem:[%s14307_s15] sm:$0xff]  ;;  %v1761_v32 = vld [vmem:[%s14307_s15 + $0x8] sm:$0xff]  ;;  %v14474_v57 = vld [vmem:[%s14307_s15 + $0x18] sm:$0xff] }
 0x1b2   : >> { %11788 = vmatmul.mubr.msk.f32.gmra.mxu1 %vm452_vm0, %v14351_v16  ;;  %11864 = vmatpush3.msra.mxu0 %v10113_v34  ;;  %v2476_v25 = vld [vmem:[%s14307_s15 + $0xa] sm:$0xff]  ;;  %v14478_v10 = vld [vmem:[%s14307_s15 + $0x1a] sm:$0xff]  ;;  %v14489_v21 = vld [vmem:[%s14307_s15 + $0x22] sm:$0xff] }
 0x1b3   : >> { %11764 = vmatmul.mubr.msk.f32.gmra.mxu0 %vm452_vm0, %v14356_v23  ;;  %11790 = vmatprep.mubr.msk.f32.mxu1 %vm452_vm0, %v14359_v8  ;;  %v14483_v44 = vld [vmem:[%s14307_s15 + $0x20] sm:$0xff]  ;;  %v14492_v49 = vld [vmem:[%s14307_s15 + $0x30] sm:$0xff]  ;;  %v14507_v54 = vld [vmem:[%s14307_s15 + $0x38] sm:$0xff] }
 0x1b4   : >> { %11766 = vmatprep.mubr.msk.f32.mxu0 %vm452_vm0, %v14362_v5  ;;  %11810 = vmatpush3.msra.mxu1 %v1793_v15  ;;  %v14497_v26 = vld [vmem:[%s14307_s15 + $0x32] sm:$0xff]  ;;  %v10250_v51 = vld [vmem:[%s13708_s26 + $0x88] sm:$0xff]  ;;  %v14513_v55 = vld [vmem:[%s14307_s15 + $0x3a] sm:$0xff] }
 0x1b5   : >> { %11865 = vmatprep.subr.mxu0 %v10112_v3  ;;  %11811 = vmatprep.subr.mxu1 %v1792_v4  ;;  %16880 = vst [vmem:[#allocation7_spill] sm:$0xff] %v14513_v55  ;;  %v14516_v48 = vld [vmem:[%s14307_s15 + $0x48] sm:$0xff]  ;;  %v14529_v43 = vld [vmem:[%s14307_s15 + $0x50] sm:$0xff]  ;;  %v10249_v59 = vld [vmem:[%s13708_s26 + $0x80] sm:$0xff] }
 0x1b6   : >> { %11791 = vmatmul.mubr.msk.f32.gmra.mxu1 %vm452_vm0, %v14373_v45  ;;  %11866 = vmatpush3.msra.mxu0 %v10112_v3  ;;  %v14519_v41 = vld [vmem:[%s14307_s15 + $0x4a] sm:$0xff]  ;;  %v14535_v36 = vld [vmem:[%s14307_s15 + $0x52] sm:$0xff]  ;;  %v14538_v46 = vld [vmem:[%s14307_s15 + $0x60] sm:$0xff] }
 0x1b7   : >> { %11767 = vmatmul.mubr.msk.f32.gmra.mxu0 %vm452_vm0, %v14378_v50  ;;  %11793 = vmatprep.mubr.msk.f32.mxu1 %vm452_vm0, %v14381_v24  ;;  %16881 = vst [vmem:[#allocation8_spill] sm:$0xff] %v14519_v41  ;;  %16882 = vst [vmem:[#allocation9_spill] sm:$0xff] %v14535_v36  ;;  %v14541_v56 = vld [vmem:[%s14307_s15 + $0x62] sm:$0xff]  ;;  %v14546_v60 = vld [vmem:[%s13708_s26 + $0xb8] sm:$0xff] }
 0x1b8   : >> { %11769 = vmatprep.mubr.msk.f32.mxu0 %vm452_vm0, %v14384_v13  ;;  %11812 = vmatpush3.msra.mxu1 %v1792_v4  ;;  %16883 = vst [vmem:[#allocation10_spill] sm:$0xff] %v14541_v56  ;;  %v14553_v19 = vld [vmem:[%s14307_s15 + $0x68] sm:$0xff]  ;;  %v14556_v62 = vld [vmem:[%s13708_s26 + $0xd8] sm:$0xff]  ;;  %v14578_v15 = vld [vmem:[%s14307_s15 + $0x80] sm:$0xff] }
 0x1b9   : >> { %11867 = vmatprep.subr.mxu0 %v10111_v11  ;;  %11917 = vmatprep.subr.mxu1 %v10184_v27  ;;  %v14561_v58 = vld [vmem:[%s14307_s15 + $0x6a] sm:$0xff]  ;;  %v14564_v31 = vld [vmem:[%s14307_s15 + $0x78] sm:$0xff]  ;;  %v14583_v3 = vld [vmem:[%s14307_s15 + $0x82] sm:$0xff] }
 0x1ba   : >> { %11794 = vmatmul.mubr.msk.f32.gmra.mxu1 %vm452_vm0, %v14395_v17  ;;  %11868 = vmatpush3.msra.mxu0 %v10111_v11  ;;  %16884 = vst [vmem:[#allocation11_spill] sm:$0xff] %v14561_v58  ;;  %v14567_v34 = vld [vmem:[%s14307_s15 + $0x7a] sm:$0xff]  ;;  %16886 = vst [vmem:[#allocation13_spill] sm:$0xff] %v14583_v3  ;;  %v14586_v4 = vld [vmem:[%s14307_s15 + $0x90] sm:$0xff] }
 0x1bb   : >> { %11770 = vmatmul.mubr.msk.f32.gmra.mxu0 %vm452_vm0, %v14400_v28  ;;  %11796 = vmatprep.mubr.msk.f32.mxu1 %vm452_vm0, %v14403_v33  ;;  %16885 = vst [vmem:[#allocation12_spill] sm:$0xff] %v14567_v34  ;;  %v14589_v11 = vld [vmem:[%s14307_s15 + $0x92] sm:$0xff] }
 0x1bc   : >> { %11772 = vmatprep.mubr.msk.f32.mxu0 %vm452_vm0, %v14406_v29  ;;  %11973 = vmatprep.subr.mxu0 %v10252_v0  ;;  %16887 = vst [vmem:[#allocation14_spill] sm:$0xff] %v14589_v11 }
 0x1be   : >> { %11797 = vmatmul.mubr.msk.f32.gmra.mxu1 %vm452_vm0, %v14416_v35 }
 0x1bf   : >> { %11773 = vmatmul.mubr.msk.f32.gmra.mxu0 %vm452_vm0, %v14421_v30  ;;  %11799 = vmatprep.mubr.msk.f32.mxu1 %vm452_vm0, %v14424_v63 }
 0x1c0   : >> { %11775 = vmatprep.mubr.msk.f32.mxu0 %vm452_vm0, %v14427_v6 }
 0x1c2   : >> { %11800 = vmatmul.mubr.msk.f32.gmra.mxu1 %vm452_vm0, %v14436_v14 }
 0x1c3   : >> { %11776 = vmatmul.mubr.msk.f32.gmra.mxu0 %vm452_vm0, %v14441_v18  ;;  %11802 = vmatprep.mubr.msk.f32.mxu1 %vm452_vm0, %v14444_v42 }
 0x1c4   : >> { %11778 = vmatprep.mubr.msk.f32.mxu0 %vm452_vm0, %v14447_v12 }
 0x1c6   : >> { %11803 = vmatmul.mubr.msk.f32.gmra.mxu1 %vm452_vm0, %v14456_v22 }
 0x1c7   : >> { %11779 = vmatmul.mubr.msk.f32.gmra.mxu0 %vm452_vm0, %v14461_v39  ;;  %11813 = vmatprep.mubr.msk.f32.mxu1 %vm452_vm0, %v1760_v61  ;;  %v14606_v61 = vld [vmem:[%s14307_s15 + $0xa8] sm:$0xff] }
 0x1c8   : >> { %11869 = vmatprep.mubr.msk.f32.mxu0 %vm452_vm0, %v2475_v40  ;;  %v14609_v40 = vld [vmem:[%s14307_s15 + $0xaa] sm:$0xff] }
 0x1c9   : >> { %16889 = vst [vmem:[#allocation16_spill] sm:$0xff] %v14609_v40 }
 0x1ca   : >> { %11814 = vmatmul.mubr.msk.f32.vlgmr.msra.gmra.mxu1 %vm452_vm0, %v1761_v32  ;;  %v14618_v32 = vld [vmem:[%s14307_s15 + $0xb0] sm:$0xff] }
 0x1cb   : >> { %11870 = vmatmul.mubr.msk.f32.vlgmr.msra.gmra.mxu0 %vm452_vm0, %v2476_v25  ;;  %11918 = vmatpush3.msra.mxu1 %v10184_v27  ;;  %v14598_v27 = vld [vmem:[%s14307_s15 + $0x98] sm:$0xff] }
 0x1cc   : >> { %11816 = vmatprep.mubr.msk.f32.mxu1 %vm452_vm0, %v14474_v57  ;;  %11974 = vmatpush3.msra.mxu0 %v10252_v0  ;;  %v14603_v0 = vld [vmem:[%s14307_s15 + $0x9a] sm:$0xff]  ;;  %v14623_v25 = vld [vmem:[%s14307_s15 + $0xb2] sm:$0xff] }
 0x1cd   : >> { %11872 = vmatprep.mubr.msk.f32.mxu0 %vm452_vm0, %v14478_v10  ;;  %11919 = vmatprep.subr.mxu1 %v10183_v37  ;;  %16888 = vst [vmem:[#allocation15_spill] sm:$0xff] %v14603_v0  ;;  %16890 = vst [vmem:[#allocation17_spill] sm:$0xff] %v14623_v25 }
 0x1ce   : >> { %11817 = vmatmul.mubr.msk.f32.gmra.mxu1 %vm452_vm0, %v14483_v44  ;;  %11975 = vmatprep.subr.mxu0 %v10251_v2 }
 0x1cf   : >> { %11873 = vmatmul.mubr.msk.f32.gmra.mxu0 %vm452_vm0, %v14489_v21  ;;  %11819 = vmatprep.mubr.msk.f32.mxu1 %vm452_vm0, %v14492_v49 }
 0x1d0   : >> { %11875 = vmatprep.mubr.msk.f32.mxu0 %vm452_vm0, %v14497_v26  ;;  %11920 = vmatpush3.msra.mxu1 %v10183_v37  ;;  %v1776_v37 = vld [vmem:[%s14307_s15 + $0x1b0] sm:$0xff] }
 0x1d1   : >> { %11976 = vmatpush3.msra.mxu0 %v10251_v2  ;;  %11921 = vmatprep.subr.mxu1 %v10182_v38  ;;  %v2491_v2 = vld [vmem:[%s14307_s15 + $0x1b2] sm:$0xff] }
 0x1d2   : >> { %11820 = vmatmul.mubr.msk.f32.gmra.mxu1 %vm452_vm0, %v14507_v54  ;;  %11977 = vmatprep.subr.mxu0 %v10250_v51 }
 0x1d3   : >> { %11876 = vmatmul.mubr.msk.f32.gmra.mxu0 %vm452_vm0, %v14513_v55  ;;  %11822 = vmatprep.mubr.msk.f32.mxu1 %vm452_vm0, %v14516_v48  ;;  %v14757_v55 = vld [vmem:[%s14307_s15 + $0x25a] sm:$0xff] }
 0x1d4   : >> { %11878 = vmatprep.mubr.msk.f32.mxu0 %vm452_vm0, %v14519_v41  ;;  %11922 = vmatpush3.msra.mxu1 %v10182_v38  ;;  %v1777_v38 = vld [vmem:[%s14307_s15 + $0x1b8] sm:$0xff]  ;;  %16903 = vst [vmem:[#allocation30_spill] sm:$0xff] %v14757_v55 }
 0x1d5   : >> { %11978 = vmatpush3.msra.mxu0 %v10250_v51  ;;  %11923 = vmatprep.subr.mxu1 %v10181_v20  ;;  %v2492_v51 = vld [vmem:[%s14307_s15 + $0x1ba] sm:$0xff] }
 0x1d6   : >> { %11823 = vmatmul.mubr.msk.f32.gmra.mxu1 %vm452_vm0, %v14529_v43  ;;  %11979 = vmatprep.subr.mxu0 %v10249_v59  ;;  %v14754_v41 = vld [vmem:[%s14307_s15 + $0x258] sm:$0xff] }
 0x1d7   : >> { %11879 = vmatmul.mubr.msk.f32.gmra.mxu0 %vm452_vm0, %v14535_v36  ;;  %11825 = vmatprep.mubr.msk.f32.mxu1 %vm452_vm0, %v14538_v46  ;;  %v14737_v36 = vld [vmem:[%s14307_s15 + $0x242] sm:$0xff] }
 0x1d8   : >> { %11881 = vmatprep.mubr.msk.f32.mxu0 %vm452_vm0, %v14541_v56  ;;  %11924 = vmatpush3.msra.mxu1 %v10181_v20  ;;  %v14636_v20 = vld [vmem:[%s14307_s15 + $0x1c8] sm:$0xff]  ;;  %v14734_v56 = vld [vmem:[%s14307_s15 + $0x240] sm:$0xff]  ;;  %16901 = vst [vmem:[#allocation28_spill] sm:$0xff] %v14737_v36 }
 0x1d9   : >> { %11980 = vmatpush3.msra.mxu0 %v10249_v59  ;;  %12029 = vmatprep.subr.mxu1 %v14546_v60  ;;  %v14639_v59 = vld [vmem:[%s14307_s15 + $0x1ca] sm:$0xff] }
 0x1da   : >> { %11826 = vmatmul.mubr.msk.f32.gmra.mxu1 %vm452_vm0, %v14553_v19  ;;  %12085 = vmatprep.subr.mxu0 %v14556_v62  ;;  %16891 = vst [vmem:[#allocation18_spill] sm:$0xff] %v14639_v59 }
 0x1db   : >> { %11882 = vmatmul.mubr.msk.f32.gmra.mxu0 %vm452_vm0, %v14561_v58  ;;  %11828 = vmatprep.mubr.msk.f32.mxu1 %vm452_vm0, %v14564_v31  ;;  %v14717_v58 = vld [vmem:[%s14307_s15 + $0x22a] sm:$0xff] }
 0x1dc   : >> { %11884 = vmatprep.mubr.msk.f32.mxu0 %vm452_vm0, %v14567_v34  ;;  %v14714_v34 = vld [vmem:[%s14307_s15 + $0x228] sm:$0xff]  ;;  %16899 = vst [vmem:[#allocation26_spill] sm:$0xff] %v14717_v58 }
 0x1de   : >> { %11829 = vmatmul.mubr.msk.f32.gmra.mxu1 %vm452_vm0, %v14578_v15 }
 0x1df   : >> { %11885 = vmatmul.mubr.msk.f32.gmra.mxu0 %vm452_vm0, %v14583_v3  ;;  %11831 = vmatprep.mubr.msk.f32.mxu1 %vm452_vm0, %v14586_v4  ;;  %v14697_v3 = vld [vmem:[%s14307_s15 + $0x212] sm:$0xff] }
 0x1e0   : >> { %11887 = vmatprep.mubr.msk.f32.mxu0 %vm452_vm0, %v14589_v11  ;;  %v14694_v11 = vld [vmem:[%s14307_s15 + $0x210] sm:$0xff]  ;;  %16897 = vst [vmem:[#allocation24_spill] sm:$0xff] %v14697_v3 }
 0x1e2   : >> { %11832 = vmatmul.mubr.msk.f32.gmra.mxu1 %vm452_vm0, %v14598_v27 }
 0x1e3   : >> { %11888 = vmatmul.mubr.msk.f32.gmra.mxu0 %vm452_vm0, %v14603_v0  ;;  %11834 = vmatprep.mubr.msk.f32.mxu1 %vm452_vm0, %v14606_v61  ;;  %v14677_v0 = vld [vmem:[%s14307_s15 + $0x1fa] sm:$0xff] }
 0x1e4   : >> { %11890 = vmatprep.mubr.msk.f32.mxu0 %vm452_vm0, %v14609_v40  ;;  %v14657_v40 = vld [vmem:[%s14307_s15 + $0x1e2] sm:$0xff]  ;;  %16895 = vst [vmem:[#allocation22_spill] sm:$0xff] %v14677_v0 }
 0x1e5   : >> { %16893 = vst [vmem:[#allocation20_spill] sm:$0xff] %v14657_v40 }
 0x1e6   : >> { %11835 = vmatmul.mubr.msk.f32.gmra.mxu1 %vm452_vm0, %v14618_v32 }
 0x1e7   : >> { %11891 = vmatmul.mubr.msk.f32.gmra.mxu0 %vm452_vm0, %v14623_v25  ;;  %11837 = vmatprep.mubr.msk.f32.mxu1 %vm452_vm0, %v1776_v37  ;;  %v14646_v37 = vld [vmem:[%s14307_s15 + $0x1d0] sm:$0xff]  ;;  %v14654_v25 = vld [vmem:[%s14307_s15 + $0x1e0] sm:$0xff] }
 0x1e8   : >> { %11893 = vmatprep.mubr.msk.f32.mxu0 %vm452_vm0, %v2491_v2  ;;  %v14651_v2 = vld [vmem:[%s14307_s15 + $0x1d2] sm:$0xff] }
 0x1e9   : >> { %16892 = vst [vmem:[#allocation19_spill] sm:$0xff] %v14651_v2 }
 0x1ea   : >> { %11838 = vmatmul.mubr.msk.f32.gmra.mxu1 %vm452_vm0, %v1777_v38  ;;  %v14666_v38 = vld [vmem:[%s14307_s15 + $0x1e8] sm:$0xff] }
 0x1eb   : >> { %11894 = vmatmul.mubr.msk.f32.gmra.mxu0 %vm452_vm0, %v2492_v51  ;;  %11840 = vmatprep.mubr.msk.f32.mxu1 %vm452_vm0, %v14636_v20  ;;  %v14671_v51 = vld [vmem:[%s14307_s15 + $0x1ea] sm:$0xff] }
 0x1ec   : >> { %11896 = vmatprep.mubr.msk.f32.mxu0 %vm452_vm0, %v14639_v59  ;;  %16894 = vst [vmem:[#allocation21_spill] sm:$0xff] %v14671_v51  ;;  %v14674_v59 = vld [vmem:[%s14307_s15 + $0x1f8] sm:$0xff] }
 0x1ee   : >> { %11841 = vmatmul.mubr.msk.f32.gmra.mxu1 %vm452_vm0, %v14646_v37 }
 0x1ef   : >> { %11897 = vmatmul.mubr.msk.f32.gmra.mxu0 %vm452_vm0, %v14651_v2  ;;  %11843 = vmatprep.mubr.msk.f32.mxu1 %vm452_vm0, %v14654_v25  ;;  %v14686_v2 = vld [vmem:[%s14307_s15 + $0x200] sm:$0xff] }
 0x1f0   : >> { %11899 = vmatprep.mubr.msk.f32.mxu0 %vm452_vm0, %v14657_v40  ;;  %v14691_v40 = vld [vmem:[%s14307_s15 + $0x202] sm:$0xff] }
 0x1f1   : >> { %16896 = vst [vmem:[#allocation23_spill] sm:$0xff] %v14691_v40 }
 0x1f2   : >> { %11844 = vmatmul.mubr.msk.f32.gmra.mxu1 %vm452_vm0, %v14666_v38 }
 0x1f3   : >> { %11900 = vmatmul.mubr.msk.f32.gmra.mxu0 %vm452_vm0, %v14671_v51  ;;  %11846 = vmatprep.mubr.msk.f32.mxu1 %vm452_vm0, %v14674_v59  ;;  %v14706_v51 = vld [vmem:[%s14307_s15 + $0x218] sm:$0xff] }
 0x1f4   : >> { %11902 = vmatprep.mubr.msk.f32.mxu0 %vm452_vm0, %v14677_v0  ;;  %v14711_v0 = vld [vmem:[%s14307_s15 + $0x21a] sm:$0xff] }
 0x1f5   : >> { %16898 = vst [vmem:[#allocation25_spill] sm:$0xff] %v14711_v0 }
 0x1f6   : >> { %11847 = vmatmul.mubr.msk.f32.gmra.mxu1 %vm452_vm0, %v14686_v2 }
 0x1f7   : >> { %11903 = vmatmul.mubr.msk.f32.gmra.mxu0 %vm452_vm0, %v14691_v40  ;;  %11849 = vmatprep.mubr.msk.f32.mxu1 %vm452_vm0, %v14694_v11  ;;  %v14726_v40 = vld [vmem:[%s14307_s15 + $0x230] sm:$0xff] }
 0x1f8   : >> { %11905 = vmatprep.mubr.msk.f32.mxu0 %vm452_vm0, %v14697_v3  ;;  %v14731_v3 = vld [vmem:[%s14307_s15 + $0x232] sm:$0xff] }
 0x1f9   : >> { %16900 = vst [vmem:[#allocation27_spill] sm:$0xff] %v14731_v3 }
 0x1fa   : >> { %11850 = vmatmul.mubr.msk.f32.gmra.mxu1 %vm452_vm0, %v14706_v51 }
 0x1fb   : >> { %11906 = vmatmul.mubr.msk.f32.gmra.mxu0 %vm452_vm0, %v14711_v0  ;;  %11852 = vmatprep.mubr.msk.f32.mxu1 %vm452_vm0, %v14714_v34  ;;  %v14746_v0 = vld [vmem:[%s14307_s15 + $0x248] sm:$0xff] }
 0x1fc   : >> { %11908 = vmatprep.mubr.msk.f32.mxu0 %vm452_vm0, %v14717_v58  ;;  %v14751_v58 = vld [vmem:[%s14307_s15 + $0x24a] sm:$0xff] }
 0x1fd   : >> { %16902 = vst [vmem:[#allocation29_spill] sm:$0xff] %v14751_v58 }
 0x1fe   : >> { %11853 = vmatmul.mubr.msk.f32.gmra.mxu1 %vm452_vm0, %v14726_v40 }
 0x1ff   : >> { %11909 = vmatmul.mubr.msk.f32.gmra.mxu0 %vm452_vm0, %v14731_v3  ;;  %11855 = vmatprep.mubr.msk.f32.mxu1 %vm452_vm0, %v14734_v56  ;;  %v14766_v3 = vld [vmem:[%s14307_s15 + $0x260] sm:$0xff] }
 0x200   : >> { %11911 = vmatprep.mubr.msk.f32.mxu0 %vm452_vm0, %v14737_v36  ;;  %v14771_v36 = vld [vmem:[%s14307_s15 + $0x262] sm:$0xff] }
 0x202   : >> { %11856 = vmatmul.mubr.msk.f32.gmra.mxu1 %vm452_vm0, %v14746_v0 }
 0x203   : >> { %11912 = vmatmul.mubr.msk.f32.gmra.mxu0 %vm452_vm0, %v14751_v58  ;;  %11858 = vmatprep.mubr.msk.f32.mxu1 %vm452_vm0, %v14754_v41  ;;  %v10389_v58 = vld [vmem:[%s13708_s26 + $0xd0] sm:$0xff] }
 0x204   : >> { %11914 = vmatprep.mubr.msk.f32.mxu0 %vm452_vm0, %v14757_v55  ;;  %v10319_v55 = vld [vmem:[%s13708_s26 + $0xb0] sm:$0xff] }
 0x206   : >> { %11859 = vmatmul.mubr.msk.f32.gmra.mxu1 %vm452_vm0, %v14766_v3 }
 0x207   : >> { %11915 = vmatmul.mubr.msk.f32.gmra.mxu0 %vm452_vm0, %v14771_v36  ;;  %11925 = vmatprep.mubr.msk.f32.mxu1 %vm452_vm0, %v14474_v57  ;;  %v16912_v57 = vld [vmem:[#allocation15_spill] sm:$0xff] }
 0x208   : >> { %11981 = vmatprep.mubr.msk.f32.mxu0 %vm452_vm0, %v14322_v1  ;;  %v10318_v1 = vld [vmem:[%s13708_s26 + $0xa8] sm:$0xff] }
 0x20a   : >> { %11926 = vmatmul.mubr.msk.f32.vlgmr.msra.gmra.mxu1 %vm452_vm0, %v14483_v44  ;;  %v15006_v44 = vld [vmem:[%s14307_s15 + $0xc2] sm:$0xff] }
 0x20b   : >> { %11982 = vmatmul.mubr.msk.f32.vlgmr.msra.gmra.mxu0 %vm452_vm0, %v14332_v9  ;;  %12030 = vmatpush3.msra.mxu1 %v14546_v60  ;;  %v10388_v9 = vld [vmem:[%s13708_s26 + $0xc8] sm:$0xff] }
 0x20c   : >> { %11928 = vmatprep.mubr.msk.f32.mxu1 %vm452_vm0, %v14492_v49  ;;  %12086 = vmatpush3.msra.mxu0 %v14556_v62 }
 0x20d   : >> { %11984 = vmatprep.mubr.msk.f32.mxu0 %vm452_vm0, %v14340_v53  ;;  %12031 = vmatprep.subr.mxu1 %v10319_v55  ;;  %v10317_v53 = vld [vmem:[%s13708_s26 + $0xa0] sm:$0xff] }
 0x20e   : >> { %11929 = vmatmul.mubr.msk.f32.gmra.mxu1 %vm452_vm0, %v14507_v54  ;;  %12087 = vmatprep.subr.mxu0 %v10389_v58 }
 0x20f   : >> { %11985 = vmatmul.mubr.msk.f32.gmra.mxu0 %vm452_vm0, %v14356_v23  ;;  %11931 = vmatprep.mubr.msk.f32.mxu1 %vm452_vm0, %v14516_v48  ;;  %v10387_v23 = vld [vmem:[%s13708_s26 + $0xc0] sm:$0xff] }
 0x210   : >> { %11987 = vmatprep.mubr.msk.f32.mxu0 %vm452_vm0, %v14362_v5  ;;  %12032 = vmatpush3.msra.mxu1 %v10319_v55  ;;  %v14816_v5 = vld [vmem:[%s13708_s26 + $0xf8] sm:$0xff]  ;;  %v10370_v55 = vld [vmem:[%s14307_s15 + $0xe0] sm:$0xff] }
 0x211   : >> { %12088 = vmatpush3.msra.mxu0 %v10389_v58  ;;  %12033 = vmatprep.subr.mxu1 %v10318_v1 }
 0x212   : >> { %11932 = vmatmul.mubr.msk.f32.gmra.mxu1 %vm452_vm0, %v14529_v43  ;;  %12089 = vmatprep.subr.mxu0 %v10388_v9 }
 0x213   : >> { %11988 = vmatmul.mubr.msk.f32.gmra.mxu0 %vm452_vm0, %v14378_v50  ;;  %11934 = vmatprep.mubr.msk.f32.mxu1 %vm452_vm0, %v14538_v46  ;;  %v14823_v50 = vld [vmem:[%s13708_s26 + $0x118] sm:$0xff] }
 0x214   : >> { %11990 = vmatprep.mubr.msk.f32.mxu0 %vm452_vm0, %v14384_v13  ;;  %12034 = vmatpush3.msra.mxu1 %v10318_v1  ;;  %v14846_v13 = vld [vmem:[%s14307_s15 + $0xc0] sm:$0xff]  ;;  %v16922_v1 = vld [vmem:[#allocation25_spill] sm:$0xff] }
 0x215   : >> { %12090 = vmatpush3.msra.mxu0 %v10388_v9  ;;  %12035 = vmatprep.subr.mxu1 %v10317_v53 }
 0x216   : >> { %11935 = vmatmul.mubr.msk.f32.gmra.mxu1 %vm452_vm0, %v14553_v19  ;;  %12091 = vmatprep.subr.mxu0 %v10387_v23 }
 0x217   : >> { %11991 = vmatmul.mubr.msk.f32.gmra.mxu0 %vm452_vm0, %v14400_v28  ;;  %11937 = vmatprep.mubr.msk.f32.mxu1 %vm452_vm0, %v14564_v31  ;;  %v14849_v28 = vld [vmem:[%s14307_s15 + $0xc1] sm:$0xff] }
 0x218   : >> { %11993 = vmatprep.mubr.msk.f32.mxu0 %vm452_vm0, %v14406_v29  ;;  %12036 = vmatpush3.msra.mxu1 %v10317_v53  ;;  %v14858_v29 = vld [vmem:[%s14307_s15 + $0xc8] sm:$0xff] }
 0x219   : >> { %12092 = vmatpush3.msra.mxu0 %v10387_v23  ;;  %12141 = vmatprep.subr.mxu1 %v14816_v5 }
 0x21a   : >> { %11938 = vmatmul.mubr.msk.f32.gmra.mxu1 %vm452_vm0, %v14578_v15  ;;  %12197 = vmatprep.subr.mxu0 %v14823_v50 }
 0x21b   : >> { %11994 = vmatmul.mubr.msk.f32.gmra.mxu0 %vm452_vm0, %v14421_v30  ;;  %11940 = vmatprep.mubr.msk.f32.mxu1 %vm452_vm0, %v14586_v4  ;;  %v14863_v30 = vld [vmem:[%s14307_s15 + $0xc9] sm:$0xff] }
 0x21c   : >> { %11996 = vmatprep.mubr.msk.f32.mxu0 %vm452_vm0, %v14427_v6  ;;  %v10455_v6 = vld [vmem:[%s13708_s26 + $0xe0] sm:$0xff] }
 0x21e   : >> { %11941 = vmatmul.mubr.msk.f32.gmra.mxu1 %vm452_vm0, %v14598_v27 }
 0x21f   : >> { %11997 = vmatmul.mubr.msk.f32.gmra.mxu0 %vm452_vm0, %v14441_v18  ;;  %11943 = vmatprep.mubr.msk.f32.mxu1 %vm452_vm0, %v14606_v61  ;;  %v10523_v18 = vld [vmem:[%s13708_s26 + $0x100] sm:$0xff] }
 0x220   : >> { %11999 = vmatprep.mubr.msk.f32.mxu0 %vm452_vm0, %v14447_v12  ;;  %v16909_v12 = vld [vmem:[#allocation12_spill] sm:$0xff] }
 0x222   : >> { %11944 = vmatmul.mubr.msk.f32.gmra.mxu1 %vm452_vm0, %v14618_v32 }
 0x223   : >> { %12000 = vmatmul.mubr.msk.f32.gmra.mxu0 %vm452_vm0, %v14461_v39  ;;  %11946 = vmatprep.mubr.msk.f32.mxu1 %vm452_vm0, %v14846_v13  ;;  %v16911_v39 = vld [vmem:[#allocation14_spill] sm:$0xff] }
 0x224   : >> { %12002 = vmatprep.mubr.msk.f32.mxu0 %vm452_vm0, %v14849_v28 }
 0x226   : >> { %11947 = vmatmul.mubr.msk.f32.gmra.mxu1 %vm452_vm0, %v14858_v29 }
 0x227   : >> { %12003 = vmatmul.mubr.msk.f32.gmra.mxu0 %vm452_vm0, %v14863_v30  ;;  %11949 = vmatprep.mubr.msk.f32.mxu1 %vm452_vm0, %v14636_v20  ;;  %v16920_v20 = vld [vmem:[#allocation23_spill] sm:$0xff] }
 0x228   : >> { %12005 = vmatprep.mubr.msk.f32.mxu0 %vm452_vm0, %v14318_v7  ;;  %v14922_v7 = vld [vmem:[%s14307_s15 + $0x270] sm:$0xff] }
 0x22a   : >> { %11950 = vmatmul.mubr.msk.f32.gmra.mxu1 %vm452_vm0, %v14646_v37  ;;  %v16921_v37 = vld [vmem:[#allocation24_spill] sm:$0xff] }
 0x22b   : >> { %12006 = vmatmul.mubr.msk.f32.gmra.mxu0 %vm452_vm0, %v14326_v52  ;;  %11952 = vmatprep.mubr.msk.f32.mxu1 %vm452_vm0, %v14654_v25  ;;  %v14925_v52 = vld [vmem:[%s14307_s15 + $0x271] sm:$0xff] }
 0x22c   : >> { %12008 = vmatprep.mubr.msk.f32.mxu0 %vm452_vm0, %v14335_v47  ;;  %v14934_v47 = vld [vmem:[%s14307_s15 + $0x278] sm:$0xff] }
 0x22e   : >> { %11953 = vmatmul.mubr.msk.f32.gmra.mxu1 %vm452_vm0, %v14666_v38 }
 0x22f   : >> { %12009 = vmatmul.mubr.msk.f32.gmra.mxu0 %vm452_vm0, %v14351_v16  ;;  %11955 = vmatprep.mubr.msk.f32.mxu1 %vm452_vm0, %v14674_v59  ;;  %v14939_v16 = vld [vmem:[%s14307_s15 + $0x279] sm:$0xff] }
 0x230   : >> { %12011 = vmatprep.mubr.msk.f32.mxu0 %vm452_vm0, %v14359_v8  ;;  %v10457_v8 = vld [vmem:[%s13708_s26 + $0xf0] sm:$0xff] }
 0x232   : >> { %11956 = vmatmul.mubr.msk.f32.gmra.mxu1 %vm452_vm0, %v14686_v2 }
 0x233   : >> { %12012 = vmatmul.mubr.msk.f32.gmra.mxu0 %vm452_vm0, %v14373_v45  ;;  %11958 = vmatprep.mubr.msk.f32.mxu1 %vm452_vm0, %v14694_v11  ;;  %v10525_v45 = vld [vmem:[%s13708_s26 + $0x110] sm:$0xff] }
 0x234   : >> { %12014 = vmatprep.mubr.msk.f32.mxu0 %vm452_vm0, %v14381_v24  ;;  %v16904_v24 = vld [vmem:[#allocation7_spill] sm:$0xff] }
 0x236   : >> { %11959 = vmatmul.mubr.msk.f32.gmra.mxu1 %vm452_vm0, %v14706_v51 }
 0x237   : >> { %12015 = vmatmul.mubr.msk.f32.gmra.mxu0 %vm452_vm0, %v14395_v17  ;;  %11961 = vmatprep.mubr.msk.f32.mxu1 %vm452_vm0, %v14714_v34  ;;  %v10456_v17 = vld [vmem:[%s13708_s26 + $0xe8] sm:$0xff] }
 0x238   : >> { %12017 = vmatprep.mubr.msk.f32.mxu0 %vm452_vm0, %v14403_v33  ;;  %v16905_v33 = vld [vmem:[#allocation8_spill] sm:$0xff] }
 0x23a   : >> { %11962 = vmatmul.mubr.msk.f32.gmra.mxu1 %vm452_vm0, %v14726_v40 }
 0x23b   : >> { %12018 = vmatmul.mubr.msk.f32.gmra.mxu0 %vm452_vm0, %v14416_v35  ;;  %11964 = vmatprep.mubr.msk.f32.mxu1 %vm452_vm0, %v14734_v56  ;;  %v10524_v35 = vld [vmem:[%s13708_s26 + $0x108] sm:$0xff] }
 0x23c   : >> { %12020 = vmatprep.mubr.msk.f32.mxu0 %vm452_vm0, %v14424_v63  ;;  %v16906_v63 = vld [vmem:[#allocation9_spill] sm:$0xff] }
 0x23e   : >> { %11965 = vmatmul.mubr.msk.f32.gmra.mxu1 %vm452_vm0, %v14746_v0 }
 0x23f   : >> { %12021 = vmatmul.mubr.msk.f32.gmra.mxu0 %vm452_vm0, %v14436_v14  ;;  %11967 = vmatprep.mubr.msk.f32.mxu1 %vm452_vm0, %v14754_v41  ;;  %v16907_v14 = vld [vmem:[#allocation10_spill] sm:$0xff] }
 0x240   : >> { %12023 = vmatprep.mubr.msk.f32.mxu0 %vm452_vm0, %v14444_v42  ;;  %v16908_v42 = vld [vmem:[#allocation11_spill] sm:$0xff] }
 0x242   : >> { %11968 = vmatmul.mubr.msk.f32.gmra.mxu1 %vm452_vm0, %v14766_v3 }
 0x243   : >> { %12024 = vmatmul.mubr.msk.f32.gmra.mxu0 %vm452_vm0, %v14456_v22  ;;  %11970 = vmatprep.mubr.msk.f32.mxu1 %vm452_vm0, %v14922_v7  ;;  %v16910_v22 = vld [vmem:[#allocation13_spill] sm:$0xff] }
 0x244   : >> { %12026 = vmatprep.mubr.msk.f32.mxu0 %vm452_vm0, %v14925_v52 }
 0x246   : >> { %11971 = vmatmul.mubr.msk.f32.gmra.mxu1 %vm452_vm0, %v14934_v47 }
 0x247   : >> { %12027 = vmatmul.mubr.msk.f32.gmra.mxu0 %vm452_vm0, %v14939_v16  ;;  %12037 = vmatprep.mubr.msk.f32.mxu1 %vm452_vm0, %v14478_v10  ;;  %v16913_v10 = vld [vmem:[#allocation16_spill] sm:$0xff] }
 0x248   : >> { %12093 = vmatprep.mubr.msk.f32.mxu0 %vm452_vm0, %v14492_v49  ;;  %v16914_v49 = vld [vmem:[#allocation17_spill] sm:$0xff] }
 0x24a   : >> { %12038 = vmatmul.mubr.msk.f32.vlgmr.msra.gmra.mxu1 %vm452_vm0, %v14489_v21  ;;  %v10369_v21 = vld [vmem:[%s14307_s15 + $0xd8] sm:$0xff] }
 0x24b   : >> { %12094 = vmatmul.mubr.msk.f32.vlgmr.msra.gmra.mxu0 %vm452_vm0, %v14507_v54  ;;  %12142 = vmatpush3.msra.mxu1 %v14816_v5  ;;  %v15016_v54 = vld [vmem:[%s14307_s15 + $0xca] sm:$0xff]  ;;  %v16924_v5 = vld [vmem:[#allocation27_spill] sm:$0xff] }
 0x24c   : >> { %12040 = vmatprep.mubr.msk.f32.mxu1 %vm452_vm0, %v14497_v26  ;;  %12198 = vmatpush3.msra.mxu0 %v14823_v50 }
 0x24d   : >> { %12096 = vmatprep.mubr.msk.f32.mxu0 %vm452_vm0, %v14516_v48  ;;  %12143 = vmatprep.subr.mxu1 %v10457_v8  ;;  %v16915_v48 = vld [vmem:[#allocation18_spill] sm:$0xff] }
 0x24e   : >> { %12041 = vmatmul.mubr.msk.f32.gmra.mxu1 %vm452_vm0, %v16904_v24  ;;  %12199 = vmatprep.subr.mxu0 %v10525_v45 }
 0x24f   : >> { %12097 = vmatmul.mubr.msk.f32.gmra.mxu0 %vm452_vm0, %v14529_v43  ;;  %12043 = vmatprep.mubr.msk.f32.mxu1 %vm452_vm0, %v16905_v33 }
 0x250   : >> { %12099 = vmatprep.mubr.msk.f32.mxu0 %vm452_vm0, %v14538_v46  ;;  %12144 = vmatpush3.msra.mxu1 %v10457_v8  ;;  %v16916_v46 = vld [vmem:[#allocation19_spill] sm:$0xff]  ;;  %v16926_v8 = vld [vmem:[#allocation29_spill] sm:$0xff] }
 0x251   : >> { %12200 = vmatpush3.msra.mxu0 %v10525_v45  ;;  %12145 = vmatprep.subr.mxu1 %v10456_v17 }
 0x252   : >> { %12044 = vmatmul.mubr.msk.f32.gmra.mxu1 %vm452_vm0, %v16906_v63  ;;  %12201 = vmatprep.subr.mxu0 %v10524_v35 }
 0x253   : >> { %12100 = vmatmul.mubr.msk.f32.gmra.mxu0 %vm452_vm0, %v14553_v19  ;;  %12046 = vmatprep.mubr.msk.f32.mxu1 %vm452_vm0, %v16907_v14  ;;  %v16917_v19 = vld [vmem:[#allocation20_spill] sm:$0xff] }
 0x254   : >> { %12102 = vmatprep.mubr.msk.f32.mxu0 %vm452_vm0, %v14564_v31  ;;  %12146 = vmatpush3.msra.mxu1 %v10456_v17 }
 0x255   : >> { %12202 = vmatpush3.msra.mxu0 %v10524_v35  ;;  %12147 = vmatprep.subr.mxu1 %v10455_v6 }
 0x256   : >> { %12047 = vmatmul.mubr.msk.f32.gmra.mxu1 %vm452_vm0, %v16908_v42  ;;  %12203 = vmatprep.subr.mxu0 %v10523_v18 }
 0x257   : >> { %12103 = vmatmul.mubr.msk.f32.gmra.mxu0 %vm452_vm0, %v14578_v15  ;;  %12049 = vmatprep.mubr.msk.f32.mxu1 %vm452_vm0, %v16909_v12  ;;  %v16918_v15 = vld [vmem:[#allocation21_spill] sm:$0xff] }
 0x258   : >> { %12105 = vmatprep.mubr.msk.f32.mxu0 %vm452_vm0, %v14586_v4  ;;  %12148 = vmatpush3.msra.mxu1 %v10455_v6  ;;  %v10385_v6 = vld [vmem:[%s14307_s15 + $0x288] sm:$0xff] }
 0x259   : >> { %12204 = vmatpush3.msra.mxu0 %v10523_v18 }
 0x25a   : >> { %12050 = vmatmul.mubr.msk.f32.gmra.mxu1 %vm452_vm0, %v16910_v22 }
 0x25b   : >> { %12106 = vmatmul.mubr.msk.f32.gmra.mxu0 %vm452_vm0, %v14598_v27  ;;  %12052 = vmatprep.mubr.msk.f32.mxu1 %vm452_vm0, %v16911_v39  ;;  %v16919_v27 = vld [vmem:[#allocation22_spill] sm:$0xff] }
 0x25c   : >> { %12108 = vmatprep.mubr.msk.f32.mxu0 %vm452_vm0, %v14606_v61 }
 0x25e   : >> { %12053 = vmatmul.mubr.msk.f32.gmra.mxu1 %vm452_vm0, %v16912_v57 }
 0x25f   : >> { %12109 = vmatmul.mubr.msk.f32.gmra.mxu0 %vm452_vm0, %v14618_v32  ;;  %12055 = vmatprep.mubr.msk.f32.mxu1 %vm452_vm0, %v16913_v10 }
 0x260   : >> { %12111 = vmatprep.mubr.msk.f32.mxu0 %vm452_vm0, %v14846_v13 }
 0x262   : >> { %12056 = vmatmul.mubr.msk.f32.gmra.mxu1 %vm452_vm0, %v16914_v49 }
 0x263   : >> { %12112 = vmatmul.mubr.msk.f32.gmra.mxu0 %vm452_vm0, %v14858_v29  ;;  %12058 = vmatprep.mubr.msk.f32.mxu1 %vm452_vm0, %v15006_v44 }
 0x264   : >> { %12114 = vmatprep.mubr.msk.f32.mxu0 %vm452_vm0, %v10369_v21 }
 0x266   : >> { %12059 = vmatmul.mubr.msk.f32.gmra.mxu1 %vm452_vm0, %v15016_v54 }
 0x267   : >> { %12115 = vmatmul.mubr.msk.f32.gmra.mxu0 %vm452_vm0, %v10370_v55  ;;  %12061 = vmatprep.mubr.msk.f32.mxu1 %vm452_vm0, %v16915_v48  ;;  %v10386_v55 = vld [vmem:[%s14307_s15 + $0x290] sm:$0xff] }
 0x268   : >> { %12117 = vmatprep.mubr.msk.f32.mxu0 %vm452_vm0, %v14654_v25  ;;  %v10423_v48 = vld [vmem:[%s14307_s15 + $0x31] sm:$0xff] }
 0x26a   : >> { %v15027_v43 = vpop.f32.mrf.mxu1  ;;  %12062 = vmatmul.mubr.msk.f32.gmra.mxu1 %vm452_vm0, %v16916_v46 }
 0x26b   : >> { %v15031_v60 = vpop.f32.mrf.mxu0  ;;  %12118 = vmatmul.mubr.msk.f32.gmra.mxu0 %vm452_vm0, %v14666_v38  ;;  %12064 = vmatprep.mubr.msk.f32.mxu1 %vm452_vm0, %v16917_v19  ;;  %v10424_v19 = vld [vmem:[%s14307_s15 + $0x39] sm:$0xff] }
 0x26c   : >> { %v15037_v62 = vpop.f32.mrf.mxu1  ;;  %12120 = vmatprep.mubr.msk.f32.mxu0 %vm452_vm0, %v14674_v59 }
 0x26d   : >> { %v15041_v58 = vpop.f32.mrf.mxu0 }
 0x26e   : >> { %v15043_v31 = vpop.f32.mrf.mxu1  ;;  %12065 = vmatmul.mubr.msk.f32.gmra.mxu1 %vm452_vm0, %v16918_v15 }
 0x26f   : >> { %v15047_v4 = vpop.f32.mrf.mxu0  ;;  %12121 = vmatmul.mubr.msk.f32.gmra.mxu0 %vm452_vm0, %v14686_v2  ;;  %12067 = vmatprep.mubr.msk.f32.mxu1 %vm452_vm0, %v16919_v27  ;;  %v10425_v27 = vld [vmem:[%s14307_s15 + $0x49] sm:$0xff] }
 0x270   : >> { %v15053_v61 = vpop.f32.mrf.mxu1  ;;  %12123 = vmatprep.mubr.msk.f32.mxu0 %vm452_vm0, %v14694_v11 }
 0x271   : >> { %v15057_v32 = vpop.f32.mrf.mxu0 }
 0x272   : >> { %v15059_v25 = vpop.f32.mrf.mxu1  ;;  %12068 = vmatmul.mubr.msk.f32.gmra.mxu1 %vm452_vm0, %v16920_v20 }
 0x273   : >> { %v15063_v59 = vpop.f32.mrf.mxu0  ;;  %12124 = vmatmul.mubr.msk.f32.gmra.mxu0 %vm452_vm0, %v14706_v51  ;;  %12070 = vmatprep.mubr.msk.f32.mxu1 %vm452_vm0, %v16921_v37  ;;  %v16923_v51 = vld [vmem:[#allocation26_spill] sm:$0xff] }
 0x274   : >> { %v15069_v2 = vpop.f32.mrf.mxu1  ;;  %12126 = vmatprep.mubr.msk.f32.mxu0 %vm452_vm0, %v14714_v34 }
 0x275   : >> { %v15073_v11 = vpop.f32.mrf.mxu0 }
 0x276   : >> { %v15075_v38 = vpop.f32.mrf.mxu1  ;;  %12071 = vmatmul.mubr.msk.f32.gmra.mxu1 %vm452_vm0, %v16922_v1 }
 0x277   : >> { %v15079_v9 = vpop.f32.mrf.mxu0  ;;  %12127 = vmatmul.mubr.msk.f32.gmra.mxu0 %vm452_vm0, %v14726_v40  ;;  %12073 = vmatprep.mubr.msk.f32.mxu1 %vm452_vm0, %v16923_v51  ;;  %v16925_v40 = vld [vmem:[#allocation28_spill] sm:$0xff] }
 0x278   : >> { %v15085_v53 = vpop.f32.mrf.mxu1  ;;  %12129 = vmatprep.mubr.msk.f32.mxu0 %vm452_vm0, %v14734_v56 }
 0x279   : >> { %v15089_v34 = vpop.f32.mrf.mxu0 }
 0x27a   : >> { %v15091_v23 = vpop.f32.mrf.mxu1  ;;  %12074 = vmatmul.mubr.msk.f32.gmra.mxu1 %vm452_vm0, %v16924_v5  ;;  %v10426_v5 = vld [vmem:[%s14307_s15 + $0x51] sm:$0xff] }
 0x27b   : >> { %v15095_v50 = vpop.f32.mrf.mxu0  ;;  %12130 = vmatmul.mubr.msk.f32.gmra.mxu0 %vm452_vm0, %v14746_v0  ;;  %12076 = vmatprep.mubr.msk.f32.mxu1 %vm452_vm0, %v16925_v40  ;;  %v16927_v0 = vld [vmem:[#allocation30_spill] sm:$0xff] }
 0x27c   : >> { %v15101_v13 = vpop.f32.mrf.mxu1  ;;  %12132 = vmatprep.mubr.msk.f32.mxu0 %vm452_vm0, %v14754_v41  ;;  %v15122_v41 = vld [vmem:[%s14307_s15 + $0x272] sm:$0xff] }
 0x27d   : >> { %v15105_v56 = vpop.f32.mrf.mxu0 }
 0x27e   : >> { %v15107_v29 = vpop.f32.mrf.mxu1  ;;  %12077 = vmatmul.mubr.msk.f32.gmra.mxu1 %vm452_vm0, %v16926_v8 }
 0x27f   : >> { %v15111_v45 = vpop.f32.mrf.mxu0  ;;  %12133 = vmatmul.mubr.msk.f32.gmra.mxu0 %vm452_vm0, %v14766_v3  ;;  %12079 = vmatprep.mubr.msk.f32.mxu1 %vm452_vm0, %v16927_v0 }
 0x280   : >> { %v15117_v17 = vpop.f32.mrf.mxu1  ;;  %12135 = vmatprep.mubr.msk.f32.mxu0 %vm452_vm0, %v14922_v7  ;;  %v15138_v7 = vld [vmem:[%s14307_s15 + $0x27a] sm:$0xff] }
 0x281   : >> { %v15124_v35 = vpop.f32.mrf.mxu0 }
 0x282   : >> { %v15127_v18 = vpop.f32.mrf.mxu1  ;;  %12080 = vmatmul.mubr.msk.f32.gmra.mxu1 %vm452_vm0, %v14771_v36 }
 0x283   : >> { %v15131_v3 = vpop.f32.mrf.mxu0  ;;  %12136 = vmatmul.mubr.msk.f32.gmra.mxu0 %vm452_vm0, %v14934_v47  ;;  %12082 = vmatprep.mubr.msk.f32.mxu1 %vm452_vm0, %v15122_v41 }
 0x284   : >> { %v15140_v21 = vpop.f32.mrf.mxu1  ;;  %12138 = vmatprep.mubr.msk.f32.mxu0 %vm452_vm0, %v10385_v6 }
 0x285   : >> { %v15145_v46 = vpop.f32.mrf.mxu0 }
 0x286   : >> { %v15147_v36 = vpop.f32.mrf.mxu1  ;;  %12083 = vmatmul.mubr.msk.f32.gmra.mxu1 %vm452_vm0, %v15138_v7 }
 0x287   : >> { %v15151_v47 = vpop.f32.mrf.mxu0  ;;  %12139 = vmatmul.mubr.msk.f32.gmra.mxu0 %vm452_vm0, %v10386_v55  ;;  %12149 = vmatprep.mubr.msk.f32.mxu1 %vm452_vm0, %v10423_v48 }
 0x288   : >> { %v15156_v15 = vpop.f32.mrf.mxu1  ;;  %12205 = vmatprep.mubr.msk.f32.mxu0 %vm452_vm0, %v14497_v26  ;;  %v10427_v26 = vld [vmem:[%s14307_s15 + $0x61] sm:$0xff] }
 0x289   : >> { %v15161_v20 = vpop.f32.mrf.mxu0 }
 0x28a   : >> { %v11815_v37 = vpop.f32.mrf.mxu1  ;;  %12150 = vmatmul.mubr.msk.f32.vlgmr.msra.gmra.mxu1 %vm452_vm0, %v10424_v19 }
 0x28b   : >> { %v2322_v1 = vadd.f32 %v11815_v37, %v15031_v60  ;;  %v11871_v51 = vpop.f32.mrf.mxu0  ;;  %12206 = vmatmul.mubr.msk.f32.vlgmr.msra.gmra.mxu0 %vm452_vm0, %v16904_v24  ;;  %12152 = vmatprep.mubr.msk.f32.mxu1 %vm452_vm0, %v10425_v27 }
 0x28c   : >> { %v2316_v40 = vpop.f32.mrf.mxu1  ;;  %12208 = vmatprep.mubr.msk.f32.mxu0 %vm452_vm0, %v16905_v33  ;;  %v10428_v33 = vld [vmem:[%s14307_s15 + $0x69] sm:$0xff] }
 0x28d   : >> { %v15172_v8 = vadd.f32 %v11871_v51, %v2322_v1  ;;  %v2317_v0 = vadd.f32 %v2316_v40, %v15041_v58  ;;  %v2674_v6 = vpop.f32.mrf.mxu0  ;;  %v10429_v58 = vld [vmem:[%s14307_s15 + $0x79] sm:$0xff] }
 0x28e   : >> { %v11818_v60 = vpop.f32.mrf.mxu1  ;;  %12153 = vmatmul.mubr.msk.f32.gmra.mxu1 %vm452_vm0, %v10426_v5 }
 0x28f   : >> { %v15176_v55 = vadd.f32 %v2674_v6, %v2317_v0  ;;  %v2332_v24 = vadd.f32 %v11818_v60, %v15047_v4  ;;  %v11874_v48 = vpop.f32.mrf.mxu0  ;;  %12209 = vmatmul.mubr.msk.f32.gmra.mxu0 %vm452_vm0, %v16906_v63  ;;  %12155 = vmatprep.mubr.msk.f32.mxu1 %vm452_vm0, %v10427_v26 }
 0x290   : >> { %v2326_v19 = vpop.f32.mrf.mxu1  ;;  %12211 = vmatprep.mubr.msk.f32.mxu0 %vm452_vm0, %v16907_v14  ;;  %v10430_v14 = vld [vmem:[%s14307_s15 + $0x81] sm:$0xff] }
 0x291   : >> { %v15186_v27 = vadd.f32 %v11874_v48, %v2332_v24  ;;  %v2327_v37 = vadd.f32 %v2326_v19, %v15057_v32  ;;  %v2684_v1 = vpop.f32.mrf.mxu0  ;;  %v10431_v32 = vld [vmem:[%s14307_s15 + $0x91] sm:$0xff] }
 0x292   : >> { %v11821_v4 = vpop.f32.mrf.mxu1  ;;  %12156 = vmatmul.mubr.msk.f32.gmra.mxu1 %vm452_vm0, %v10428_v33 }
 0x293   : >> { %v15190_v51 = vadd.f32 %v2684_v1, %v2327_v37  ;;  %v2342_v63 = vadd.f32 %v11821_v4, %v15063_v59  ;;  %v11877_v5 = vpop.f32.mrf.mxu0  ;;  %12212 = vmatmul.mubr.msk.f32.gmra.mxu0 %vm452_vm0, %v16908_v42  ;;  %12158 = vmatprep.mubr.msk.f32.mxu1 %vm452_vm0, %v10429_v58 }
 0x294   : >> { %v2336_v40 = vpop.f32.mrf.mxu1  ;;  %12214 = vmatprep.mubr.msk.f32.mxu0 %vm452_vm0, %v16909_v12  ;;  %v10432_v12 = vld [vmem:[%s14307_s15 + $0x99] sm:$0xff] }
 0x295   : >> { %v15200_v26 = vadd.f32 %v11877_v5, %v2342_v63  ;;  %v2337_v0 = vadd.f32 %v2336_v40, %v15073_v11  ;;  %v2694_v6 = vpop.f32.mrf.mxu0  ;;  %v10433_v11 = vld [vmem:[%s14307_s15 + $0xa9] sm:$0xff] }
 0x296   : >> { %v11824_v59 = vpop.f32.mrf.mxu1  ;;  %12159 = vmatmul.mubr.msk.f32.gmra.mxu1 %vm452_vm0, %v10430_v14 }
 0x297   : >> { %v15204_v60 = vadd.f32 %v2694_v6, %v2337_v0  ;;  %v2352_v42 = vadd.f32 %v11824_v59, %v15079_v9  ;;  %v11880_v24 = vpop.f32.mrf.mxu0  ;;  %12215 = vmatmul.mubr.msk.f32.gmra.mxu0 %vm452_vm0, %v16910_v22  ;;  %12161 = vmatprep.mubr.msk.f32.mxu1 %vm452_vm0, %v10431_v32  ;;  %v10505_v6 = vld [vmem:[%s14307_s15 + $0xda] sm:$0xff] }
 0x298   : >> { %v2346_v48 = vpop.f32.mrf.mxu1  ;;  %12217 = vmatprep.mubr.msk.f32.mxu0 %vm452_vm0, %v16911_v39  ;;  %v10434_v39 = vld [vmem:[%s14307_s15 + $0xb1] sm:$0xff] }
 0x299   : >> { %v15214_v33 = vadd.f32 %v11880_v24, %v2352_v42  ;;  %v2347_v19 = vadd.f32 %v2346_v48, %v15089_v34  ;;  %v2704_v58 = vpop.f32.mrf.mxu0  ;;  %v10506_v24 = vld [vmem:[%s14307_s15 + $0xe2] sm:$0xff] }
 0x29a   : >> { %v11827_v37 = vpop.f32.mrf.mxu1  ;;  %12162 = vmatmul.mubr.msk.f32.gmra.mxu1 %vm452_vm0, %v10432_v12  ;;  %v10439_v12 = vld [vmem:[%s14307_s15 + $0x1e1] sm:$0xff] }
 0x29b   : >> { %v15218_v9 = vadd.f32 %v2704_v58, %v2347_v19  ;;  %v2362_v22 = vadd.f32 %v11827_v37, %v15095_v50  ;;  %v11883_v1 = vpop.f32.mrf.mxu0  ;;  %12218 = vmatmul.mubr.msk.f32.gmra.mxu0 %vm452_vm0, %v16912_v57  ;;  %12164 = vmatprep.mubr.msk.f32.mxu1 %vm452_vm0, %v10433_v11  ;;  %v10507_v11 = vld [vmem:[%s14307_s15 + $0x1e2] sm:$0xff] }
 0x29c   : >> { %v2356_v4 = vpop.f32.mrf.mxu1  ;;  %12220 = vmatprep.mubr.msk.f32.mxu0 %vm452_vm0, %v16913_v10 }
 0x29d   : >> { %v15227_v34 = vadd.f32 %v11883_v1, %v2362_v22  ;;  %v2357_v63 = vadd.f32 %v2356_v4, %v15105_v56  ;;  %v2714_v5 = vpop.f32.mrf.mxu0  ;;  %v10437_v56 = vld [vmem:[%s14307_s15 + $0xd9] sm:$0xff]  ;;  %v10440_v22 = vld [vmem:[%s14307_s15 + $0x1e9] sm:$0xff] }
 0x29e   : >> { %v11830_v14 = vpop.f32.mrf.mxu1  ;;  %12165 = vmatmul.mubr.msk.f32.gmra.mxu1 %vm452_vm0, %v10434_v39  ;;  %v10441_v39 = vld [vmem:[%s14307_s15 + $0x1f9] sm:$0xff] }
 0x29f   : >> { %v15231_v50 = vadd.f32 %v2714_v5, %v2357_v63  ;;  %v2372_v57 = vadd.f32 %v11830_v14, %v15111_v45  ;;  %v11886_v40 = vpop.f32.mrf.mxu0  ;;  %12221 = vmatmul.mubr.msk.f32.gmra.mxu0 %vm452_vm0, %v16914_v49  ;;  %12167 = vmatprep.mubr.msk.f32.mxu1 %vm452_vm0, %v14849_v28 }
 0x2a0   : >> { %v2366_v10 = vpop.f32.mrf.mxu1  ;;  %12223 = vmatprep.mubr.msk.f32.mxu0 %vm452_vm0, %v15006_v44  ;;  %v10438_v44 = vld [vmem:[%s14307_s15 + $0xe1] sm:$0xff] }
 0x2a1   : >> { %v15241_v32 = vadd.f32 %v11886_v40, %v2372_v57  ;;  %v2367_v0 = vadd.f32 %v2366_v10, %v15124_v35  ;;  %v2724_v45 = vpop.f32.mrf.mxu0 }
 0x2a2   : >> { %v11833_v59 = vpop.f32.mrf.mxu1  ;;  %12168 = vmatmul.mubr.msk.f32.gmra.mxu1 %vm452_vm0, %v14863_v30 }
 0x2a3   : >> { %v15247_v49 = vadd.f32 %v2724_v45, %v2367_v0  ;;  %v2382_v28 = vadd.f32 %v11833_v59, %v15131_v3  ;;  %v11889_v42 = vpop.f32.mrf.mxu0  ;;  %12224 = vmatmul.mubr.msk.f32.gmra.mxu0 %vm452_vm0, %v15016_v54  ;;  %12170 = vmatprep.mubr.msk.f32.mxu1 %vm452_vm0, %v10437_v56  ;;  %v10442_v56 = vld [vmem:[%s14307_s15 + $0x201] sm:$0xff]  ;;  %v10443_v45 = vld [vmem:[%s14307_s15 + $0x211] sm:$0xff] }
 0x2a4   : >> { %v2376_v35 = vpop.f32.mrf.mxu1  ;;  %12226 = vmatprep.mubr.msk.f32.mxu0 %vm452_vm0, %v10505_v6 }
 0x2a5   : >> { %v15257_v30 = vadd.f32 %v11889_v42, %v2382_v28  ;;  %v2377_v48 = vadd.f32 %v2376_v35, %v15145_v46  ;;  %v2734_v3 = vpop.f32.mrf.mxu0  ;;  %v10508_v46 = vld [vmem:[%s14307_s15 + $0x1ea] sm:$0xff] }
 0x2a6   : >> { %v11836_v19 = vpop.f32.mrf.mxu1  ;;  %12171 = vmatmul.mubr.msk.f32.gmra.mxu1 %vm452_vm0, %v10438_v44 }
 0x2a7   : >> { %v15262_v54 = vadd.f32 %v2734_v3, %v2377_v48  ;;  %v2392_v58 = vadd.f32 %v11836_v19, %v15151_v47  ;;  %v11892_v37 = vpop.f32.mrf.mxu0  ;;  %12227 = vmatmul.mubr.msk.f32.gmra.mxu0 %vm452_vm0, %v10506_v24  ;;  %12173 = vmatprep.mubr.msk.f32.mxu1 %vm452_vm0, %v10439_v12  ;;  %v10509_v47 = vld [vmem:[%s14307_s15 + $0x1fa] sm:$0xff]  ;;  %v10445_v3 = vld [vmem:[%s14307_s15 + $0x229] sm:$0xff] }
 0x2a8   : >> { %v2386_v1 = vpop.f32.mrf.mxu1  ;;  %12229 = vmatprep.mubr.msk.f32.mxu0 %vm452_vm0, %v10507_v11  ;;  %v10444_v12 = vld [vmem:[%s14307_s15 + $0x219] sm:$0xff] }
 0x2a9   : >> { %v15271_v4 = vadd.f32 %v11892_v37, %v2392_v58  ;;  %v2387_v63 = vadd.f32 %v2386_v1, %v15161_v20  ;;  %v2744_v5 = vpop.f32.mrf.mxu0  ;;  %v10510_v20 = vld [vmem:[%s14307_s15 + $0x202] sm:$0xff] }
 0x2aa   : >> { %v11839_v14 = vpop.f32.mrf.mxu1  ;;  %12174 = vmatmul.mubr.msk.f32.gmra.mxu1 %vm452_vm0, %v10440_v22 }
 0x2ab   : >> { %v15276_v57 = vadd.f32 %v2744_v5, %v2387_v63  ;;  %v2402_v40 = vadd.f32 %v11839_v14, %v15027_v43  ;;  %v11895_v10 = vpop.f32.mrf.mxu0  ;;  %12230 = vmatmul.mubr.msk.f32.gmra.mxu0 %vm452_vm0, %v10508_v46  ;;  %12176 = vmatprep.mubr.msk.f32.mxu1 %vm452_vm0, %v10441_v39  ;;  %v10511_v43 = vld [vmem:[%s14307_s15 + $0x212] sm:$0xff]  ;;  %v10447_v5 = vld [vmem:[%s14307_s15 + $0x241] sm:$0xff] }
 0x2ac   : >> { %v2396_v0 = vpop.f32.mrf.mxu1  ;;  %12232 = vmatprep.mubr.msk.f32.mxu0 %vm452_vm0, %v10509_v47  ;;  %v10446_v39 = vld [vmem:[%s14307_s15 + $0x231] sm:$0xff] }
 0x2ad   : >> { %v15285_v6 = vadd.f32 %v11895_v10, %v2402_v40  ;;  %v2397_v59 = vadd.f32 %v2396_v0, %v15037_v62  ;;  %v2754_v28 = vpop.f32.mrf.mxu0  ;;  %v10512_v62 = vld [vmem:[%s14307_s15 + $0x21a] sm:$0xff] }
 0x2ae   : >> { %v11842_v42 = vpop.f32.mrf.mxu1  ;;  %12177 = vmatmul.mubr.msk.f32.gmra.mxu1 %vm452_vm0, %v10442_v56 }
 0x2af   : >> { %v15290_v44 = vadd.f32 %v2754_v28, %v2397_v59  ;;  %v2412_v35 = vadd.f32 %v11842_v42, %v15043_v31  ;;  %v11898_v24 = vpop.f32.mrf.mxu0  ;;  %12233 = vmatmul.mubr.msk.f32.gmra.mxu0 %vm452_vm0, %v10510_v20  ;;  %12179 = vmatprep.mubr.msk.f32.mxu1 %vm452_vm0, %v10443_v45  ;;  %v10513_v31 = vld [vmem:[%s14307_s15 + $0x22a] sm:$0xff]  ;;  %v10449_v28 = vld [vmem:[%s14307_s15 + $0x259] sm:$0xff] }
 0x2b0   : >> { %v2406_v48 = vpop.f32.mrf.mxu1  ;;  %12235 = vmatprep.mubr.msk.f32.mxu0 %vm452_vm0, %v10511_v43  ;;  %v10448_v45 = vld [vmem:[%s14307_s15 + $0x249] sm:$0xff] }
 0x2b1   : >> { %v15299_v11 = vadd.f32 %v11898_v24, %v2412_v35  ;;  %v2407_v19 = vadd.f32 %v2406_v48, %v15053_v61  ;;  %v2764_v58 = vpop.f32.mrf.mxu0  ;;  %v10514_v61 = vld [vmem:[%s14307_s15 + $0x232] sm:$0xff]  ;;  %v10517_v24 = vld [vmem:[%s14307_s15 + $0x25a] sm:$0xff] }
 0x2b2   : >> { %v11845_v37 = vpop.f32.mrf.mxu1  ;;  %12180 = vmatmul.mubr.msk.f32.gmra.mxu1 %vm452_vm0, %v10444_v12 }
 0x2b3   : >> { %v15304_v22 = vadd.f32 %v2764_v58, %v2407_v19  ;;  %v2422_v1 = vadd.f32 %v11845_v37, %v15059_v25  ;;  %v11901_v46 = vpop.f32.mrf.mxu0  ;;  %12236 = vmatmul.mubr.msk.f32.gmra.mxu0 %vm452_vm0, %v10512_v62  ;;  %12182 = vmatprep.mubr.msk.f32.mxu1 %vm452_vm0, %v10445_v3  ;;  %v10515_v25 = vld [vmem:[%s14307_s15 + $0x242] sm:$0xff] }
 0x2b4   : >> { %v2416_v63 = vpop.f32.mrf.mxu1  ;;  %12238 = vmatprep.mubr.msk.f32.mxu0 %vm452_vm0, %v10513_v31  ;;  %v10450_v3 = vld [vmem:[%s14307_s15 + $0x261] sm:$0xff] }
 0x2b5   : >> { %v15313_v47 = vadd.f32 %v11901_v46, %v2422_v1  ;;  %v2417_v14 = vadd.f32 %v2416_v63, %v15069_v2  ;;  %v2774_v40 = vpop.f32.mrf.mxu0  ;;  %v10516_v2 = vld [vmem:[%s14307_s15 + $0x24a] sm:$0xff] }
 0x2b6   : >> { %v11848_v10 = vpop.f32.mrf.mxu1  ;;  %12183 = vmatmul.mubr.msk.f32.gmra.mxu1 %vm452_vm0, %v10446_v39 }
 0x2b7   : >> { %v15318_v56 = vadd.f32 %v2774_v40, %v2417_v14  ;;  %v2432_v0 = vadd.f32 %v11848_v10, %v15075_v38  ;;  %v11904_v20 = vpop.f32.mrf.mxu0  ;;  %12239 = vmatmul.mubr.msk.f32.gmra.mxu0 %vm452_vm0, %v10514_v61  ;;  %12185 = vmatprep.mubr.msk.f32.mxu1 %vm452_vm0, %v10447_v5  ;;  %v10521_v40 = vld [vmem:[%s14307_s15 + $0x28a] sm:$0xff] }
 0x2b8   : >> { %v2426_v59 = vpop.f32.mrf.mxu1  ;;  %12241 = vmatprep.mubr.msk.f32.mxu0 %vm452_vm0, %v10515_v25 }
 0x2b9   : >> { %v15327_v43 = vadd.f32 %v11904_v20, %v2432_v0  ;;  %v2427_v42 = vadd.f32 %v2426_v59, %v15085_v53  ;;  %v2784_v35 = vpop.f32.mrf.mxu0  ;;  %v10518_v53 = vld [vmem:[%s14307_s15 + $0x262] sm:$0xff] }
 0x2ba   : >> { %v11851_v38 = vpop.f32.mrf.mxu1  ;;  %12186 = vmatmul.mubr.msk.f32.gmra.mxu1 %vm452_vm0, %v10448_v45 }
 0x2bb   : >> { %v15332_v12 = vadd.f32 %v2784_v35, %v2427_v42  ;;  %v2442_v48 = vadd.f32 %v11851_v38, %v15091_v23  ;;  %v11907_v62 = vpop.f32.mrf.mxu0  ;;  %12242 = vmatmul.mubr.msk.f32.gmra.mxu0 %vm452_vm0, %v10516_v2  ;;  %12188 = vmatprep.mubr.msk.f32.mxu1 %vm452_vm0, %v10449_v28 }
 0x2bc   : >> { %v2436_v19 = vpop.f32.mrf.mxu1  ;;  %12244 = vmatprep.mubr.msk.f32.mxu0 %vm452_vm0, %v10517_v24 }
 0x2bd   : >> { %v15340_v58 = vadd.f32 %v11907_v62, %v2442_v48  ;;  %v2437_v31 = vadd.f32 %v2436_v19, %v15101_v13  ;;  %v2794_v37 = vpop.f32.mrf.mxu0  ;;  %v10453_v13 = vld [vmem:[%s14307_s15 + $0x289] sm:$0xff] }
 0x2be   : >> { %v11854_v1 = vpop.f32.mrf.mxu1  ;;  %12189 = vmatmul.mubr.msk.f32.gmra.mxu1 %vm452_vm0, %v10450_v3 }
 0x2bf   : >> { %v15344_v23 = vadd.f32 %v2794_v37, %v2437_v31  ;;  %v2452_v46 = vadd.f32 %v11854_v1, %v15107_v29  ;;  %v11910_v39 = vpop.f32.mrf.mxu0  ;;  %12245 = vmatmul.mubr.msk.f32.gmra.mxu0 %vm452_vm0, %v10518_v53  ;;  %12191 = vmatprep.mubr.msk.f32.mxu1 %vm452_vm0, %v14925_v52 }
 0x2c0   : >> { %v2446_v63 = vpop.f32.mrf.mxu1  ;;  %12247 = vmatprep.mubr.msk.f32.mxu0 %vm452_vm0, %v15122_v41  ;;  %v10454_v41 = vld [vmem:[%s14307_s15 + $0x291] sm:$0xff] }
 0x2c1   : >> { %v15353_v61 = vadd.f32 %v11910_v39, %v2452_v46  ;;  %v2447_v5 = vadd.f32 %v2446_v63, %v15117_v17  ;;  %v2804_v14 = vpop.f32.mrf.mxu0  ;;  %v10522_v17 = vld [vmem:[%s14307_s15 + $0x292] sm:$0xff] }
 0x2c2   : >> { %v11857_v29 = vpop.f32.mrf.mxu1  ;;  %12192 = vmatmul.mubr.msk.f32.gmra.mxu1 %vm452_vm0, %v14939_v16 }
 0x2c3   : >> { %v15359_v25 = vadd.f32 %v2804_v14, %v2447_v5  ;;  %v2462_v52 = vadd.f32 %v11857_v29, %v15127_v18  ;;  %v11913_v10 = vpop.f32.mrf.mxu0  ;;  %12248 = vmatmul.mubr.msk.f32.gmra.mxu0 %vm452_vm0, %v15138_v7  ;;  %12194 = vmatprep.mubr.msk.f32.mxu1 %vm452_vm0, %v10453_v13 }
 0x2c4   : >> { %v2456_v0 = vpop.f32.mrf.mxu1  ;;  %12250 = vmatprep.mubr.msk.f32.mxu0 %vm452_vm0, %v10521_v40 }
 0x2c5   : >> { %v15368_v20 = vadd.f32 %v11913_v10, %v2462_v52  ;;  %v2457_v45 = vadd.f32 %v2456_v0, %v15140_v21  ;;  %v2814_v16 = vpop.f32.mrf.mxu0 }
 0x2c6   : >> { %v11860_v59 = vpop.f32.mrf.mxu1  ;;  %12195 = vmatmul.mubr.msk.f32.gmra.mxu1 %vm452_vm0, %v10454_v41 }
 0x2c7   : >> { %v15372_v18 = vadd.f32 %v2814_v16, %v2457_v45  ;;  %v2472_v2 = vadd.f32 %v11860_v59, %v15147_v36  ;;  %v11916_v7 = vpop.f32.mrf.mxu0  ;;  %12251 = vmatmul.mubr.msk.f32.gmra.mxu0 %vm452_vm0, %v10522_v17 }
 0x2c8   : >> { %v2466_v28 = vpop.f32.mrf.mxu1 }
 0x2c9   : >> { %v15376_v42 = vadd.f32 %v11916_v7, %v2472_v2  ;;  %v2467_v35 = vadd.f32 %v2466_v28, %v15156_v15  ;;  %v2824_v24 = vpop.f32.mrf.mxu0 }
 0x2ca   : >> { %v11927_v38 = vpop.f32.mrf.mxu1 }
 0x2cb   : >> { %v15379_v48 = vadd.f32 %v2824_v24, %v2467_v35  ;;  %v3227_v21 = vadd.f32 %v11927_v38, %v15172_v8  ;;  %v11983_v62 = vpop.f32.mrf.mxu0 }
 0x2cc   : >> { %v3067_v3 = vpop.f32.mrf.mxu1 }
 0x2cd   : >> { %v15382_v19 = vadd.f32 %v11983_v62, %v3227_v21  ;;  %v3226_v36 = vadd.f32 %v3067_v3, %v15176_v55  ;;  %v3457_v53 = vpop.f32.mrf.mxu0 }
 0x2ce   : >> { %v11930_v31 = vpop.f32.mrf.mxu1 }
 0x2cf   : >> { %v15385_v37 = vadd.f32 %v3457_v53, %v3226_v36  ;;  %v3229_v1 = vadd.f32 %v11930_v31, %v15186_v27  ;;  %v11986_v46 = vpop.f32.mrf.mxu0 }
 0x2d0   : >> { %v3077_v15 = vpop.f32.mrf.mxu1 }
 0x2d1   : >> { %v15388_v39 = vadd.f32 %v11986_v46, %v3229_v1  ;;  %v3228_v63 = vadd.f32 %v3077_v15, %v15190_v51  ;;  %v3467_v13 = vpop.f32.mrf.mxu0 }
 0x2d2   : >> { %v11933_v8 = vpop.f32.mrf.mxu1 }
 0x2d3   : >> { %v15391_v5 = vadd.f32 %v3467_v13, %v3228_v63  ;;  %v3231_v14 = vadd.f32 %v11933_v8, %v15200_v26  ;;  %v11989_v40 = vpop.f32.mrf.mxu0 }
 0x2d4   : >> { %v3087_v55 = vpop.f32.mrf.mxu1 }
 0x2d5   : >> { %v15394_v29 = vadd.f32 %v11989_v40, %v3231_v14  ;;  %v3230_v52 = vadd.f32 %v3087_v55, %v15204_v60  ;;  %v3477_v10 = vpop.f32.mrf.mxu0 }
 0x2d6   : >> { %v11936_v27 = vpop.f32.mrf.mxu1 }
 0x2d7   : >> { %v15397_v41 = vadd.f32 %v3477_v10, %v3230_v52  ;;  %v3233_v0 = vadd.f32 %v11936_v27, %v15214_v33  ;;  %v11992_v17 = vpop.f32.mrf.mxu0 }
 0x2d8   : >> { %v3097_v51 = vpop.f32.mrf.mxu1 }
 0x2d9   : >> { %v15400_v45 = vadd.f32 %v11992_v17, %v3233_v0  ;;  %v3232_v16 = vadd.f32 %v3097_v51, %v15218_v9  ;;  %v3487_v59 = vpop.f32.mrf.mxu0 }
 0x2da   : >> { %v11939_v26 = vpop.f32.mrf.mxu1 }
 0x2db   : >> { %v15403_v2 = vadd.f32 %v3487_v59, %v3232_v16  ;;  %v3235_v7 = vadd.f32 %v11939_v26, %v15227_v34  ;;  %v11995_v28 = vpop.f32.mrf.mxu0 }
 0x2dc   : >> { %v3107_v60 = vpop.f32.mrf.mxu1 }
 0x2dd   : >> { %v15406_v35 = vadd.f32 %v11995_v28, %v3235_v7  ;;  %v3234_v24 = vadd.f32 %v3107_v60, %v15231_v50  ;;  %v3497_v38 = vpop.f32.mrf.mxu0 }
 0x2de   : >> { %v11942_v33 = vpop.f32.mrf.mxu1 }
 0x2df   : >> { %v15409_v21 = vadd.f32 %v3497_v38, %v3234_v24  ;;  %v3237_v62 = vadd.f32 %v11942_v33, %v15241_v32  ;;  %v11998_v3 = vpop.f32.mrf.mxu0 }
 0x2e0   : >> { %v3117_v9 = vpop.f32.mrf.mxu1 }
 0x2e1   : >> { %v15412_v36 = vadd.f32 %v11998_v3, %v3237_v62  ;;  %v3236_v53 = vadd.f32 %v3117_v9, %v15247_v49  ;;  %v3507_v31 = vpop.f32.mrf.mxu0 }
 0x2e2   : >> { %v11945_v34 = vpop.f32.mrf.mxu1 }
 0x2e3   : >> { %v15415_v1 = vadd.f32 %v3507_v31, %v3236_v53  ;;  %v3239_v46 = vadd.f32 %v11945_v34, %v15257_v30  ;;  %v12001_v15 = vpop.f32.mrf.mxu0 }
 0x2e4   : >> { %v3127_v50 = vpop.f32.mrf.mxu1 }
 0x2e5   : >> { %v15418_v63 = vadd.f32 %v12001_v15, %v3239_v46  ;;  %v3238_v13 = vadd.f32 %v3127_v50, %v15262_v54  ;;  %v3517_v8 = vpop.f32.mrf.mxu0 }
 0x2e6   : >> { %v11948_v32 = vpop.f32.mrf.mxu1 }
 0x2e7   : >> { %v15421_v14 = vadd.f32 %v3517_v8, %v3238_v13  ;;  %v3241_v40 = vadd.f32 %v11948_v32, %v15271_v4  ;;  %v12004_v55 = vpop.f32.mrf.mxu0 }
 0x2e8   : >> { %v3137_v49 = vpop.f32.mrf.mxu1 }
 0x2e9   : >> { %v15424_v52 = vadd.f32 %v12004_v55, %v3241_v40  ;;  %v3240_v10 = vadd.f32 %v3137_v49, %v15276_v57  ;;  %v3527_v27 = vpop.f32.mrf.mxu0 }
 0x2ea   : >> { %v11951_v30 = vpop.f32.mrf.mxu1 }
 0x2eb   : >> { %v15427_v0 = vadd.f32 %v3527_v27, %v3240_v10  ;;  %v3243_v17 = vadd.f32 %v11951_v30, %v15285_v6  ;;  %v12007_v51 = vpop.f32.mrf.mxu0 }
 0x2ec   : >> { %v3147_v54 = vpop.f32.mrf.mxu1 }
 0x2ed   : >> { %v15430_v16 = vadd.f32 %v12007_v51, %v3243_v17  ;;  %v3242_v59 = vadd.f32 %v3147_v54, %v15290_v44  ;;  %v3537_v26 = vpop.f32.mrf.mxu0 }
 0x2ee   : >> { %v11954_v4 = vpop.f32.mrf.mxu1 }
 0x2ef   : >> { %v15433_v7 = vadd.f32 %v3537_v26, %v3242_v59  ;;  %v3245_v28 = vadd.f32 %v11954_v4, %v15299_v11  ;;  %v12010_v60 = vpop.f32.mrf.mxu0 }
 0x2f0   : >> { %v3157_v57 = vpop.f32.mrf.mxu1 }
 0x2f1   : >> { %v15436_v24 = vadd.f32 %v12010_v60, %v3245_v28  ;;  %v3244_v38 = vadd.f32 %v3157_v57, %v15304_v22  ;;  %v3547_v33 = vpop.f32.mrf.mxu0 }
 0x2f2   : >> { %v11957_v6 = vpop.f32.mrf.mxu1 }
 0x2f3   : >> { %v15439_v62 = vadd.f32 %v3547_v33, %v3244_v38  ;;  %v3247_v3 = vadd.f32 %v11957_v6, %v15313_v47  ;;  %v12013_v9 = vpop.f32.mrf.mxu0 }
 0x2f4   : >> { %v3167_v44 = vpop.f32.mrf.mxu1 }
 0x2f5   : >> { %v15442_v53 = vadd.f32 %v12013_v9, %v3247_v3  ;;  %v3246_v31 = vadd.f32 %v3167_v44, %v15318_v56  ;;  %v3557_v34 = vpop.f32.mrf.mxu0 }
 0x2f6   : >> { %v11960_v11 = vpop.f32.mrf.mxu1 }
 0x2f7   : >> { %v15445_v46 = vadd.f32 %v3557_v34, %v3246_v31  ;;  %v3249_v15 = vadd.f32 %v11960_v11, %v15327_v43  ;;  %v12016_v50 = vpop.f32.mrf.mxu0 }
 0x2f8   : >> { %v3177_v22 = vpop.f32.mrf.mxu1 }
 0x2f9   : >> { %v15448_v13 = vadd.f32 %v12016_v50, %v3249_v15  ;;  %v3248_v8 = vadd.f32 %v3177_v22, %v15332_v12  ;;  %v3567_v32 = vpop.f32.mrf.mxu0 }
 0x2fa   : >> { %v11963_v47 = vpop.f32.mrf.mxu1 }
 0x2fb   : >> { %v15451_v40 = vadd.f32 %v3567_v32, %v3248_v8  ;;  %v3251_v55 = vadd.f32 %v11963_v47, %v15340_v58  ;;  %v12019_v49 = vpop.f32.mrf.mxu0 }
 0x2fc   : >> { %v3187_v56 = vpop.f32.mrf.mxu1 }
 0x2fd   : >> { %v15454_v10 = vadd.f32 %v12019_v49, %v3251_v55  ;;  %v3250_v27 = vadd.f32 %v3187_v56, %v15344_v23  ;;  %v3577_v30 = vpop.f32.mrf.mxu0 }
 0x2fe   : >> { %v11966_v43 = vpop.f32.mrf.mxu1 }
 0x2ff   : >> { %v15457_v17 = vadd.f32 %v3577_v30, %v3250_v27  ;;  %v3253_v51 = vadd.f32 %v11966_v43, %v15353_v61  ;;  %v12022_v54 = vpop.f32.mrf.mxu0 }
 0x300   : >> { %v3197_v12 = vpop.f32.mrf.mxu1 }
 0x301   : >> { %v15460_v59 = vadd.f32 %v12022_v54, %v3253_v51  ;;  %v3252_v26 = vadd.f32 %v3197_v12, %v15359_v25  ;;  %v3587_v4 = vpop.f32.mrf.mxu0 }
 0x302   : >> { %v11969_v58 = vpop.f32.mrf.mxu1 }
 0x303   : >> { %v15463_v28 = vadd.f32 %v3587_v4, %v3252_v26  ;;  %v3255_v60 = vadd.f32 %v11969_v58, %v15368_v20  ;;  %v12025_v57 = vpop.f32.mrf.mxu0 }
 0x304   : >> { %v3207_v23 = vpop.f32.mrf.mxu1 }
 0x305   : >> { %v15466_v38 = vadd.f32 %v12025_v57, %v3255_v60  ;;  %v3254_v33 = vadd.f32 %v3207_v23, %v15372_v18  ;;  %v3597_v6 = vpop.f32.mrf.mxu0 }
 0x306   : >> { %v11972_v61 = vpop.f32.mrf.mxu1 }
 0x307   : >> { %v15469_v3 = vadd.f32 %v3597_v6, %v3254_v33  ;;  %v3257_v9 = vadd.f32 %v11972_v61, %v15376_v42  ;;  %v12028_v44 = vpop.f32.mrf.mxu0 }
 0x308   : >> { %v3217_v25 = vpop.f32.mrf.mxu1 }
 0x309   : >> { %v15472_v31 = vadd.f32 %v12028_v44, %v3257_v9  ;;  %v3256_v34 = vadd.f32 %v3217_v25, %v15379_v48  ;;  %v3607_v11 = vpop.f32.mrf.mxu0 }
 0x30a   : >> { %v12039_v20 = vpop.f32.mrf.mxu1 }
 0x30b   : >> { %v15475_v15 = vadd.f32 %v3607_v11, %v3256_v34  ;;  %v4007_v50 = vadd.f32 %v12039_v20, %v15382_v19  ;;  %v12095_v22 = vpop.f32.mrf.mxu0 }
 0x30c   : >> { %v3847_v18 = vpop.f32.mrf.mxu1 }
 0x30d   : >> { %v15478_v8 = vadd.f32 %v12095_v22, %v4007_v50  ;;  %v4006_v32 = vadd.f32 %v3847_v18, %v15385_v37  ;;  %v4240_v47 = vpop.f32.mrf.mxu0 }
 0x30e   : >> { %v15481_v42 = vpop.f32.mrf.mxu1 }
 0x30f   : >> { %v15483_v55 = vadd.f32 %v4240_v47, %v4006_v32  ;;  %v15485_v49 = vpop.f32.mrf.mxu0 }
 0x310   : >> { %v15487_v48 = vpop.f32.mrf.mxu1 }
 0x311   : >> { %v15489_v56 = vpop.f32.mrf.mxu0 }
 0x312   : >> { %v12045_v27 = vpop.f32.mrf.mxu1 }
 0x313   : >> { %v4011_v19 = vadd.f32 %v12045_v27, %v15394_v29  ;;  %v12101_v30 = vpop.f32.mrf.mxu0 }
 0x314   : >> { %v3867_v43 = vpop.f32.mrf.mxu1 }
 0x315   : >> { %v15492_v51 = vadd.f32 %v12101_v30, %v4011_v19  ;;  %v4010_v37 = vadd.f32 %v3867_v43, %v15397_v41  ;;  %v4260_v54 = vpop.f32.mrf.mxu0 }
 0x316   : >> { %v15495_v12 = vpop.f32.mrf.mxu1 }
 0x317   : >> { %v15497_v26 = vadd.f32 %v4260_v54, %v4010_v37  ;;  %v15499_v4 = vpop.f32.mrf.mxu0 }
 0x318   : >> { %v15501_v58 = vpop.f32.mrf.mxu1 }
 0x319   : >> { %v15503_v60 = vpop.f32.mrf.mxu0 }
 0x31a   : >> { %v12051_v57 = vpop.f32.mrf.mxu1 }
 0x31b   : >> { %v4015_v29 = vadd.f32 %v12051_v57, %v15406_v35  ;;  %v12107_v23 = vpop.f32.mrf.mxu0 }
 0x31c   : >> { %v3887_v33 = vpop.f32.mrf.mxu1 }
 0x31d   : >> { %v15506_v6 = vadd.f32 %v12107_v23, %v4015_v29  ;;  %v4014_v41 = vadd.f32 %v3887_v33, %v15409_v21  ;;  %v4280_v61 = vpop.f32.mrf.mxu0 }
 0x31e   : >> { %v15509_v9 = vpop.f32.mrf.mxu1 }
 0x31f   : >> { %v15511_v44 = vadd.f32 %v4280_v61, %v4014_v41  ;;  %v15513_v25 = vpop.f32.mrf.mxu0 }
 0x320   : >> { %v15515_v34 = vpop.f32.mrf.mxu1 }
 0x321   : >> { %v15517_v11 = vpop.f32.mrf.mxu0 }
 0x322   : >> { %v12057_v20 = vpop.f32.mrf.mxu1 }
 0x323   : >> { %v4019_v35 = vadd.f32 %v12057_v20, %v15418_v63  ;;  %v12113_v50 = vpop.f32.mrf.mxu0 }
 0x324   : >> { %v3907_v22 = vpop.f32.mrf.mxu1 }
 0x325   : >> { %v15520_v18 = vadd.f32 %v12113_v50, %v4019_v35  ;;  %v4018_v21 = vadd.f32 %v3907_v22, %v15421_v14  ;;  %v4300_v32 = vpop.f32.mrf.mxu0 }
 0x326   : >> { %v15523_v47 = vpop.f32.mrf.mxu1 }
 0x327   : >> { %v15525_v27 = vadd.f32 %v4300_v32, %v4018_v21  ;;  %v15527_v19 = vpop.f32.mrf.mxu0 }
 0x328   : >> { %v15529_v30 = vpop.f32.mrf.mxu1 }
 0x329   : >> { %v15531_v43 = vpop.f32.mrf.mxu0 }
 0x32a   : >> { %v12063_v37 = vpop.f32.mrf.mxu1 }
 0x32b   : >> { %v4023_v63 = vadd.f32 %v12063_v37, %v15430_v16  ;;  %v12119_v54 = vpop.f32.mrf.mxu0 }
 0x32c   : >> { %v3927_v57 = vpop.f32.mrf.mxu1 }
 0x32d   : >> { %v15534_v29 = vadd.f32 %v12119_v54, %v4023_v63  ;;  %v4022_v14 = vadd.f32 %v3927_v57, %v15433_v7  ;;  %v4320_v23 = vpop.f32.mrf.mxu0 }
 0x32e   : >> { %v15537_v33 = vpop.f32.mrf.mxu1 }
 0x32f   : >> { %16928 = vst [vmem:[#allocation7_spill] sm:$0xff] %v15534_v29  ;;  %v15539_v41 = vadd.f32 %v4320_v23, %v4022_v14  ;;  %v15541_v61 = vpop.f32.mrf.mxu0 }
 0x330   : >> { %v15543_v20 = vpop.f32.mrf.mxu1 }
 0x331   : >> { %16929 = vst [vmem:[#allocation8_spill] sm:$0xff] %v15539_v41  ;;  %v15545_v35 = vpop.f32.mrf.mxu0 }
 0x332   : >> { %v12069_v50 = vpop.f32.mrf.mxu1 }
 0x333   : >> { %v4027_v16 = vadd.f32 %v12069_v50, %v15442_v53  ;;  %v12125_v22 = vpop.f32.mrf.mxu0 }
 0x334   : >> { %v3947_v21 = vpop.f32.mrf.mxu1 }
 0x335   : >> { %v15548_v32 = vadd.f32 %v12125_v22, %v4027_v16  ;;  %v4026_v7 = vadd.f32 %v3947_v21, %v15445_v46  ;;  %v4340_v37 = vpop.f32.mrf.mxu0 }
 0x336   : >> { %v12072_v63 = vpop.f32.mrf.mxu1 }
 0x337   : >> { %16930 = vst [vmem:[#allocation9_spill] sm:$0xff] %v15548_v32  ;;  %v15551_v54 = vadd.f32 %v4340_v37, %v4026_v7  ;;  %v4029_v57 = vadd.f32 %v12072_v63, %v15448_v13  ;;  %v12128_v14 = vpop.f32.mrf.mxu0 }
 0x338   : >> { %v15554_v23 = vpop.f32.mrf.mxu1 }
 0x339   : >> { %16931 = vst [vmem:[#allocation10_spill] sm:$0xff] %v15551_v54  ;;  %v15556_v41 = vadd.f32 %v12128_v14, %v4029_v57  ;;  %v15558_v29 = vpop.f32.mrf.mxu0 }
 0x33a   : >> { %v12075_v53 = vpop.f32.mrf.mxu1 }
 0x33b   : >> { %16932 = vst [vmem:[#allocation11_spill] sm:$0xff] %v15556_v41  ;;  %v4031_v50 = vadd.f32 %v12075_v53, %v15454_v10  ;;  %v12131_v16 = vpop.f32.mrf.mxu0 }
 0x33c   : >> { %v3967_v22 = vpop.f32.mrf.mxu1 }
 0x33d   : >> { %v15561_v32 = vadd.f32 %v12131_v16, %v4031_v50  ;;  %v4030_v46 = vadd.f32 %v3967_v22, %v15457_v17  ;;  %v4360_v21 = vpop.f32.mrf.mxu0 }
 0x33e   : >> { %v12078_v7 = vpop.f32.mrf.mxu1 }
 0x33f   : >> { %v15564_v37 = vadd.f32 %v4360_v21, %v4030_v46  ;;  %v4033_v13 = vadd.f32 %v12078_v7, %v15460_v59  ;;  %v12134_v63 = vpop.f32.mrf.mxu0 }
 0x340   : >> { %v3977_v57 = vpop.f32.mrf.mxu1 }
 0x341   : >> { %v15567_v14 = vadd.f32 %v12134_v63, %v4033_v13  ;;  %v4032_v41 = vadd.f32 %v3977_v57, %v15463_v28  ;;  %v4370_v54 = vpop.f32.mrf.mxu0 }
 0x342   : >> { %v12081_v10 = vpop.f32.mrf.mxu1 }
 0x343   : >> { %v15570_v53 = vadd.f32 %v4370_v54, %v4032_v41  ;;  %v4035_v50 = vadd.f32 %v12081_v10, %v15466_v38  ;;  %v12137_v16 = vpop.f32.mrf.mxu0  ;;  %v4009_v41 = vadd.f32 %v15481_v42, %v15388_v39 }
 0x344   : >> { %v3987_v17 = vpop.f32.mrf.mxu1 }
 0x345   : >> { %v15573_v22 = vadd.f32 %v12137_v16, %v4035_v50  ;;  %v4034_v46 = vadd.f32 %v3987_v17, %v15469_v3  ;;  %v4380_v59 = vpop.f32.mrf.mxu0  ;;  %v4008_v17 = vadd.f32 %v15487_v48, %v15391_v5  ;;  %v4402_v42 = vadd.f32 %v15485_v49, %v4009_v41 }
 0x346   : >> { %v12084_v21 = vpop.f32.mrf.mxu1 }
 0x347   : >> { %v15576_v7 = vadd.f32 %v4380_v59, %v4034_v46  ;;  %v4037_v13 = vadd.f32 %v12084_v21, %v15472_v31  ;;  %v12140_v28 = vpop.f32.mrf.mxu0  ;;  %v15594_v31 = vld [vmem:[%s16933_s27] ss:$0 sm:$0xff]  ;;  %v4401_v48 = vadd.f32 %v15489_v56, %v4008_v17 }
 0x348   : >> { %v3997_v63 = vpop.f32.mrf.mxu1 }
 0x349   : >> { %v15581_v54 = vadd.f32 %v12140_v28, %v4037_v13  ;;  %v4036_v38 = vadd.f32 %v3997_v63, %v15475_v15  ;;  %v4390_v57 = vpop.f32.mrf.mxu0  ;;  %v4013_v63 = vadd.f32 %v15495_v12, %v15400_v45 }
 0x34a   : >> { %v12151_v10 = vpop.f32.mrf.mxu1 }
 0x34b   : >> { %v15584_v50 = vadd.f32 %v4390_v57, %v4036_v38  ;;  %v4790_v3 = vadd.f32 %v12151_v10, %v15478_v8  ;;  %v12207_v16 = vpop.f32.mrf.mxu0  ;;  %v4406_v12 = vadd.f32 %v15499_v4, %v4013_v63 }
 0x34c   : >> { %v4630_v39 = vpop.f32.mrf.mxu1 }
 0x34d   : >> { %v5180_v15 = vadd.f32 %v12207_v16, %v4790_v3  ;;  %v4789_v46 = vadd.f32 %v4630_v39, %v15483_v55  ;;  %v5020_v59 = vpop.f32.mrf.mxu0  ;;  %v4012_v16 = vadd.f32 %v15501_v58, %v15403_v2 }
 0x34e   : >> { %v12154_v21 = vpop.f32.mrf.mxu1 }
 0x34f   : >> { %v15599_v8 = vadd.f32 %v15594_v31, %v5180_v15  ;;  %v5179_v13 = vadd.f32 %v5020_v59, %v4789_v46  ;;  %v4792_v28 = vadd.f32 %v12154_v21, %v4402_v42  ;;  %v12210_v5 = vpop.f32.mrf.mxu0  ;;  %v4017_v46 = vadd.f32 %v15509_v9, %v15412_v36 }
 0x350   : >> { %v4640_v38 = vpop.f32.mrf.mxu1  ;;  %v4405_v4 = vadd.f32 %v15503_v60, %v4012_v16  ;;  %v4016_v60 = vadd.f32 %v15515_v34, %v15415_v1  ;;  %v4025_v1 = vadd.f32 %v15537_v33, %v15436_v24 }
 0x351   : >> { %v5283_v57 = vmul.f32 0.70710677, %v15599_v8  ;;  %v15606_v49 = vadd.f32 %v15594_v31, %v5179_v13  ;;  %v5182_v55 = vadd.f32 %v12210_v5, %v4792_v28  ;;  %v5030_v41 = vpop.f32.mrf.mxu0  ;;  %v4791_v10 = vadd.f32 %v4640_v38, %v4401_v48 }
 0x352   : >> { %v12157_v3 = vpop.f32.mrf.mxu1 }
 0x353   : >> { %12797 = verf.f32 %v5283_v57  ;;  %v5282_v39 = vmul.f32 0.70710677, %v15606_v49  ;;  %v15612_v56 = vadd.f32 %v15594_v31, %v5182_v55  ;;  %v12213_v45 = vpop.f32.mrf.mxu0  ;;  %v5181_v17 = vadd.f32 %v5030_v41, %v4791_v10 }
 0x354   : >> { %v4794_v42 = vadd.f32 %v12157_v3, %v15492_v51  ;;  %v4650_v15 = vpop.f32.mrf.mxu1  ;;  %v4021_v10 = vadd.f32 %v15523_v47, %v15424_v52  ;;  %v4024_v52 = vadd.f32 %v15543_v20, %v15439_v62 }
 0x355   : >> { %12799 = verf.f32 %v5282_v39  ;;  %v5285_v59 = vmul.f32 0.70710677, %v15612_v56  ;;  %v4793_v2 = vadd.f32 %v4650_v15, %v15497_v26  ;;  %v5040_v58 = vpop.f32.mrf.mxu0  ;;  %v15621_v21 = vadd.f32 %v15594_v31, %v5181_v17 }
 0x356   : >> { %v5184_v13 = vadd.f32 %v12213_v45, %v4794_v42  ;;  %v12160_v28 = vpop.f32.mrf.mxu1  ;;  %v4410_v26 = vadd.f32 %v15513_v25, %v4017_v46  ;;  %v4020_v39 = vadd.f32 %v15529_v30, %v15427_v0  ;;  %v4028_v0 = vadd.f32 %v15554_v23, %v15451_v40 }
 0x357   : >> { %12801 = verf.f32 %v5285_v59  ;;  %v5183_v5 = vadd.f32 %v5040_v58, %v4793_v2  ;;  %v4796_v51 = vadd.f32 %v12160_v28, %v4406_v12  ;;  %v12216_v48 = vpop.f32.mrf.mxu0  ;;  %v5284_v63 = vmul.f32 0.70710677, %v15621_v21 }
 0x358   : >> { %v15626_v36 = vadd.f32 %v15594_v31, %v5184_v13  ;;  %v4660_v9 = vpop.f32.mrf.mxu1  ;;  %v4409_v46 = vadd.f32 %v15517_v11, %v4016_v60  ;;  %v4414_v24 = vadd.f32 %v15527_v19, %v4021_v10  ;;  %v15660_v58 = vadd.f32 %v15541_v61, %v4025_v1 }
 0x359   : >> { %v15630_v38 = vadd.f32 %v15594_v31, %v5183_v5  ;;  %v5186_v57 = vadd.f32 %v12216_v48, %v4796_v51  ;;  %v4795_v55 = vadd.f32 %v4660_v9, %v4405_v4  ;;  %v5050_v41 = vpop.f32.mrf.mxu0  ;;  %12803 = verf.f32 %v5284_v63 }
 0x35a   : >> { %v5287_v3 = vmul.f32 0.70710677, %v15626_v36  ;;  %v12163_v16 = vpop.f32.mrf.mxu1  ;;  %v15663_v13 = vadd.f32 %v15545_v35, %v4024_v52  ;;  %v15669_v28 = vadd.f32 %v15558_v29, %v4028_v0  ;;  %v5251_v48 = vmul.f32 0.5, %v15599_v8 }
 0x35b   : >> { %v5286_v25 = vmul.f32 0.70710677, %v15630_v38  ;;  %v15641_v45 = vadd.f32 %v15594_v31, %v5186_v57  ;;  %v5185_v12 = vadd.f32 %v5050_v41, %v4795_v55  ;;  %v12219_v17 = vpop.f32.mrf.mxu0  ;;  %v4798_v34 = vadd.f32 %v12163_v16, %v15506_v6 }
 0x35c   : >> { %12805 = verf.f32 %v5287_v3  ;;  %v4670_v47 = vpop.f32.mrf.mxu1  ;;  %v4413_v6 = vadd.f32 %v15531_v43, %v4020_v39  ;;  %v5250_v61 = vmul.f32 0.5, %v15606_v49  ;;  %v5253_v57 = vmul.f32 0.5, %v15612_v56 }
 0x35d   : >> { %12807 = verf.f32 %v5286_v25  ;;  %v5289_v30 = vmul.f32 0.70710677, %v15641_v45  ;;  %v15652_v42 = vadd.f32 %v15594_v31, %v5185_v12  ;;  %v5060_v15 = vpop.f32.mrf.mxu0  ;;  %v5188_v33 = vadd.f32 %v12219_v17, %v4798_v34 }
 0x35e   : >> { %v4797_v62 = vadd.f32 %v4670_v47, %v15511_v44  ;;  %v12166_v20 = vpop.f32.mrf.mxu1  ;;  %v5252_v10 = vmul.f32 0.5, %v15621_v21  ;;  %v5255_v25 = vmul.f32 0.5, %v15626_v36  ;;  %v5254_v36 = vmul.f32 0.5, %v15630_v38 }
 0x35f   : >> { %12809 = verf.f32 %v5289_v30  ;;  %v5288_v40 = vmul.f32 0.70710677, %v15652_v42  ;;  %v4800_v23 = vadd.f32 %v12166_v20, %v4410_v26  ;;  %v12222_v59 = vpop.f32.mrf.mxu0  ;;  %v15666_v11 = vadd.f32 %v15594_v31, %v5188_v33 }
 0x360   : >> { %v12798_v2 = vpop.eup %12797  ;;  %v5187_v19 = vadd.f32 %v5060_v15, %v4797_v62  ;;  %v4680_v44 = vpop.f32.mrf.mxu1  ;;  %v5257_v38 = vmul.f32 0.5, %v15641_v45 }
 0x361   : >> { %12811 = verf.f32 %v5288_v40  ;;  %v5190_v43 = vadd.f32 %v12222_v59, %v4800_v23  ;;  %v4799_v4 = vadd.f32 %v4680_v44, %v4409_v46  ;;  %v5070_v5 = vpop.f32.mrf.mxu0  ;;  %v5291_v35 = vmul.f32 0.70710677, %v15666_v11 }
 0x362   : >> { %v12800_v51 = vpop.eup %12799  ;;  %v15675_v63 = vadd.f32 %v15594_v31, %v5187_v19  ;;  %v12169_v9 = vpop.f32.mrf.mxu1  ;;  %v5347_v26 = vadd.f32 1.0, %v12798_v2  ;;  %v5259_v45 = vmul.f32 0.5, %v15666_v11 }
 0x363   : >> { %v15679_v29 = vadd.f32 %v15594_v31, %v5190_v43  ;;  %v5189_v55 = vadd.f32 %v5070_v5, %v4799_v4  ;;  %v12225_v41 = vpop.f32.mrf.mxu0  ;;  %12813 = verf.f32 %v5291_v35  ;;  %v4802_v49 = vadd.f32 %v12169_v9, %v15520_v18 }
 0x364   : >> { %v12802_v60 = vpop.eup %12801  ;;  %v5290_v8 = vmul.f32 0.70710677, %v15675_v63  ;;  %v4690_v3 = vpop.f32.mrf.mxu1  ;;  %v5346_v16 = vadd.f32 1.0, %v12800_v51  ;;  %v5379_v47 = vmul.f32 %v5347_v26, %v5251_v48 }
 0x365   : >> { %v5349_v39 = vadd.f32 1.0, %v12802_v60  ;;  %v5293_v56 = vmul.f32 0.70710677, %v15679_v29  ;;  %v5080_v12 = vpop.f32.mrf.mxu0  ;;  %v15687_v17 = vadd.f32 %v15594_v31, %v5189_v55  ;;  %v5192_v1 = vadd.f32 %v12225_v41, %v4802_v49 }
 0x366   : >> { %12815 = verf.f32 %v5290_v8  ;;  %v4801_v21 = vadd.f32 %v4690_v3, %v15525_v27  ;;  %v12172_v52 = vpop.f32.mrf.mxu1  ;;  %v12804_v34 = vpop.eup %12803  ;;  %v5378_v44 = vmul.f32 %v5346_v16, %v5250_v61 }
 0x367   : >> { %v5381_v0 = vmul.f32 %v5349_v39, %v5253_v57  ;;  %12817 = verf.f32 %v5293_v56  ;;  %v4804_v18 = vadd.f32 %v12172_v52, %v4414_v24  ;;  %v12228_v30 = vpop.f32.mrf.mxu0  ;;  %v5348_v15 = vadd.f32 1.0, %v12804_v34  ;;  %v16934_v57 = vld [vmem:[#allocation7_spill] sm:$0xff]  ;;  %v16935_v52 = vld [vmem:[#allocation8_spill] sm:$0xff] }
 0x368   : >> { %v5292_v46 = vmul.f32 0.70710677, %v15687_v17  ;;  %v15693_v33 = vadd.f32 %v15594_v31, %v5192_v1  ;;  %v4700_v62 = vpop.f32.mrf.mxu1  ;;  %v5191_v23 = vadd.f32 %v5080_v12, %v4801_v21 }
 0x369   : >> { %v12806_v20 = vpop.eup %12805  ;;  %v5411_v40 = vmax.f32 %v5379_v47, %v5381_v0  ;;  %v5194_v27 = vadd.f32 %v12228_v30, %v4804_v18  ;;  %v4803_v59 = vadd.f32 %v4700_v62, %v4413_v6  ;;  %v5090_v2 = vpop.f32.mrf.mxu0  ;;  %v5380_v43 = vmul.f32 %v5348_v15, %v5252_v10 }
 0x36a   : >> { %v12808_v19 = vpop.eup %12807  ;;  %v5351_v24 = vadd.f32 1.0, %v12806_v20  ;;  %12819 = verf.f32 %v5292_v46  ;;  %v12175_v4 = vpop.f32.mrf.mxu1  ;;  %v5295_v5 = vmul.f32 0.70710677, %v15693_v33  ;;  %v15699_v51 = vadd.f32 %v15594_v31, %v5191_v23 }
 0x36b   : >> { %5427 = vst.msk [vmem:[#allocation5 + $0x8] sm:$0xff] %vm562_vm2, %v5411_v40  ;;  %v15702_v48 = vadd.f32 %v15594_v31, %v5194_v27  ;;  %v12231_v6 = vpop.f32.mrf.mxu0  ;;  %v5410_v9 = vmax.f32 %v5378_v44, %v5380_v43  ;;  %v5350_v61 = vadd.f32 1.0, %v12808_v19  ;;  %v5193_v26 = vadd.f32 %v5090_v2, %v4803_v59 }
 0x36c   : >> { %v12810_v35 = vpop.eup %12809  ;;  %v4806_v55 = vadd.f32 %v12175_v4, %v16934_v57  ;;  %v4710_v41 = vpop.f32.mrf.mxu1  ;;  %v5256_v10 = vmul.f32 0.5, %v15652_v42  ;;  %12821 = verf.f32 %v5295_v5  ;;  %v5383_v3 = vmul.f32 %v5351_v24, %v5255_v25 }
 0x36d   : >> { %v5353_v60 = vadd.f32 1.0, %v12810_v35  ;;  %v5100_v8 = vpop.f32.mrf.mxu0  ;;  %5426 = vst.msk [vmem:[#allocation5] sm:$0xff] %vm562_vm2, %v5410_v9  ;;  %v5294_v16 = vmul.f32 0.70710677, %v15699_v51  ;;  %v5297_v39 = vmul.f32 0.70710677, %v15702_v48  ;;  %v15711_v56 = vadd.f32 %v15594_v31, %v5193_v26 }
 0x36e   : >> { %v12812_v49 = vpop.eup %12811  ;;  %v12178_v12 = vpop.f32.mrf.mxu1  ;;  %v5196_v42 = vadd.f32 %v12231_v6, %v4806_v55  ;;  %v4805_v11 = vadd.f32 %v4710_v41, %v16935_v52  ;;  %v5382_v47 = vmul.f32 %v5350_v61, %v5254_v36  ;;  %v5258_v40 = vmul.f32 0.5, %v15675_v63  ;;  %v16936_v26 = vld [vmem:[#allocation9_spill] sm:$0xff] }
 0x36f   : >> { %v5385_v1 = vmul.f32 %v5353_v60, %v5257_v38  ;;  %v5352_v21 = vadd.f32 1.0, %v12812_v49  ;;  %v12234_v34 = vpop.f32.mrf.mxu0  ;;  %12823 = verf.f32 %v5294_v16  ;;  %v5296_v0 = vmul.f32 0.70710677, %v15711_v56 }
 0x370   : >> { %v4808_v25 = vadd.f32 %v12178_v12, %v15660_v58  ;;  %v4720_v18 = vpop.f32.mrf.mxu1  ;;  %v12814_v30 = vpop.eup %12813  ;;  %12825 = verf.f32 %v5297_v39  ;;  %v15717_v62 = vadd.f32 %v15594_v31, %v5196_v42  ;;  %v5195_v23 = vadd.f32 %v5100_v8, %v4805_v11 }
 0x371   : >> { %v5415_v15 = vmax.f32 %v5383_v3, %v5385_v1  ;;  %v5384_v46 = vmul.f32 %v5352_v21, %v5256_v10  ;;  %v5110_v20 = vpop.f32.mrf.mxu0  ;;  %12827 = verf.f32 %v5296_v0  ;;  %v5355_v2 = vadd.f32 1.0, %v12814_v30  ;;  %v16937_v21 = vld [vmem:[#allocation10_spill] sm:$0xff] }
 0x372   : >> { %v5198_v36 = vadd.f32 %v12234_v34, %v4808_v25  ;;  %v12181_v27 = vpop.f32.mrf.mxu1  ;;  %v5299_v19 = vmul.f32 0.70710677, %v15717_v62  ;;  %v4807_v44 = vadd.f32 %v4720_v18, %v15663_v13  ;;  %v5261_v38 = vmul.f32 0.5, %v15679_v29 }
 0x373   : >> { %v12816_v59 = vpop.eup %12815  ;;  %5429 = vst.msk [vmem:[#allocation5 + $0x18] sm:$0xff] %vm562_vm2, %v5415_v15  ;;  %v5414_v58 = vmax.f32 %v5382_v47, %v5384_v46  ;;  %v12237_v43 = vpop.f32.mrf.mxu0  ;;  %v15726_v63 = vadd.f32 %v15594_v31, %v5195_v23  ;;  %v4810_v57 = vadd.f32 %v12181_v27, %v16936_v26  ;;  %v5260_v29 = vmul.f32 0.5, %v15687_v17  ;;  %v16938_v15 = vld [vmem:[#allocation11_spill] sm:$0xff] }
 0x374   : >> { %v12818_v24 = vpop.eup %12817  ;;  %v5354_v4 = vadd.f32 1.0, %v12816_v59  ;;  %v15729_v5 = vadd.f32 %v15594_v31, %v5198_v36  ;;  %v4730_v6 = vpop.f32.mrf.mxu1  ;;  %v5442_v35 = vld [vmem:[#allocation5] ss:$2 sm:$0xff]  ;;  %v5458_v9 = vld [vmem:[#allocation5 + $0x1] ss:$2 sm:$0xff]  ;;  %12829 = verf.f32 %v5299_v19  ;;  %v5197_v13 = vadd.f32 %v5110_v20, %v4807_v44 }
 0x375   : >> { %5428 = vst.msk [vmem:[#allocation5 + $0x10] sm:$0xff] %vm562_vm2, %v5414_v58  ;;  %v5357_v61 = vadd.f32 1.0, %v12818_v24  ;;  %v5120_v55 = vpop.f32.mrf.mxu0  ;;  %v5473_v41 = vmax.f32 %v5442_v35, %v5458_v9  ;;  %v5263_v60 = vmul.f32 0.5, %v15693_v33  ;;  %v5298_v10 = vmul.f32 0.70710677, %v15726_v63 }
 0x376   : >> { %v12184_v8 = vpop.f32.mrf.mxu1  ;;  %v5387_v3 = vmul.f32 %v5355_v2, %v5259_v45  ;;  %v5301_v39 = vmul.f32 0.70710677, %v15729_v5  ;;  %v15738_v12 = vadd.f32 %v15594_v31, %v5197_v13  ;;  %v5200_v33 = vadd.f32 %v12237_v43, %v4810_v57 }
 0x377   : >> { %v12820_v49 = vpop.eup %12819  ;;  %v5389_v16 = vmul.f32 %v5357_v61, %v5261_v38  ;;  %v12240_v1 = vpop.f32.mrf.mxu0  ;;  %10562 = vst.msk [vmem:[%s15742_s23 + $0x11] sm:$0xff] %vm562_vm2, %v5473_v41  ;;  %12831 = verf.f32 %v5298_v10  ;;  %v4809_v42 = vadd.f32 %v4730_v6, %v16937_v21  ;;  %v5386_v45 = vmul.f32 %v5354_v4, %v5258_v40 }
 0x378   : >> { %v5356_v17 = vadd.f32 1.0, %v12820_v49  ;;  %v4740_v52 = vpop.f32.mrf.mxu1  ;;  %12833 = verf.f32 %v5301_v39  ;;  %v5300_v34 = vmul.f32 0.70710677, %v15738_v12  ;;  %v15749_v18 = vadd.f32 %v15594_v31, %v5200_v33 }
 0x379   : >> { %v5419_v11 = vmax.f32 %v5387_v3, %v5389_v16  ;;  %v5130_v47 = vpop.f32.mrf.mxu0  ;;  %v12822_v0 = vpop.eup %12821  ;;  %v5199_v30 = vadd.f32 %v5120_v55, %v4809_v42  ;;  %v4812_v46 = vadd.f32 %v12184_v8, %v16938_v15  ;;  %v5262_v23 = vmul.f32 0.5, %v15699_v51 }
 0x37a   : >> { %v5388_v25 = vmul.f32 %v5356_v17, %v5260_v29  ;;  %v12187_v20 = vpop.f32.mrf.mxu1  ;;  %12835 = verf.f32 %v5300_v34  ;;  %v4811_v40 = vadd.f32 %v4740_v52, %v15669_v28  ;;  %v5359_v19 = vadd.f32 1.0, %v12822_v0 }
 0x37b   : >> { %5431 = vst.msk [vmem:[#allocation5 + $0x28] sm:$0xff] %vm562_vm2, %v5419_v11  ;;  %v4814_v36 = vadd.f32 %v12187_v20, %v15561_v32  ;;  %v12243_v27 = vpop.f32.mrf.mxu0  ;;  %v15757_v44 = vadd.f32 %v15594_v31, %v5199_v30  ;;  %v5202_v43 = vadd.f32 %v12240_v1, %v4812_v46  ;;  %v5265_v51 = vmul.f32 0.5, %v15702_v48 }
 0x37c   : >> { %v5444_v59 = vld [vmem:[#allocation5 + $0x10] ss:$2 sm:$0xff]  ;;  %v5460_v58 = vld [vmem:[#allocation5 + $0x11] ss:$2 sm:$0xff]  ;;  %v5418_v2 = vmax.f32 %v5386_v45, %v5388_v25  ;;  %v4750_v24 = vpop.f32.mrf.mxu1  ;;  %v12824_v4 = vpop.eup %12823  ;;  %v5303_v6 = vmul.f32 0.70710677, %v15749_v18  ;;  %v5201_v28 = vadd.f32 %v5130_v47, %v4811_v40  ;;  %v5391_v8 = vmul.f32 %v5359_v19, %v5263_v60 }
 0x37d   : >> { %v5474_v38 = vmax.f32 %v5444_v59, %v5460_v58  ;;  %v5140_v35 = vpop.f32.mrf.mxu0  ;;  %v12826_v32 = vpop.eup %12825  ;;  %v5358_v9 = vadd.f32 1.0, %v12824_v4  ;;  %v5264_v61 = vmul.f32 0.5, %v15711_v56  ;;  %v5302_v13 = vmul.f32 0.70710677, %v15757_v44 }
 0x37e   : >> { %5430 = vst.msk [vmem:[#allocation5 + $0x20] sm:$0xff] %vm562_vm2, %v5418_v2  ;;  %v15765_v26 = vadd.f32 %v15594_v31, %v5202_v43  ;;  %v12190_v57 = vpop.f32.mrf.mxu1  ;;  %v12828_v55 = vpop.eup %12827  ;;  %v5361_v48 = vadd.f32 1.0, %v12826_v32  ;;  %12837 = verf.f32 %v5303_v6  ;;  %v15770_v41 = vadd.f32 %v15594_v31, %v5201_v28 }
 0x37f   : >> { %10563 = vst.msk [vmem:[%s15742_s23 + $0x21] sm:$0xff] %vm562_vm2, %v5474_v38  ;;  %v5204_v29 = vadd.f32 %v12243_v27, %v4814_v36  ;;  %v12246_v10 = vpop.f32.mrf.mxu0  ;;  %v5360_v49 = vadd.f32 1.0, %v12828_v55  ;;  %v5267_v56 = vmul.f32 0.5, %v15717_v62  ;;  %12839 = verf.f32 %v5302_v13 }
 0x380   : >> { %v4760_v3 = vpop.f32.mrf.mxu1  ;;  %v5390_v16 = vmul.f32 %v5358_v9, %v5262_v23  ;;  %v5393_v39 = vmul.f32 %v5361_v48, %v5265_v51  ;;  %v5305_v1 = vmul.f32 0.70710677, %v15765_v26  ;;  %v5304_v17 = vmul.f32 0.70710677, %v15770_v41 }
 0x381   : >> { %v5150_v33 = vpop.f32.mrf.mxu0  ;;  %v12830_v21 = vpop.eup %12829  ;;  %v5392_v42 = vmul.f32 %v5360_v49, %v5264_v61  ;;  %v15776_v52 = vadd.f32 %v15594_v31, %v5204_v29  ;;  %v4813_v45 = vadd.f32 %v4750_v24, %v15564_v37  ;;  %v4816_v60 = vadd.f32 %v12190_v57, %v15567_v14 }
 0x382   : >> { %v12193_v11 = vpop.f32.mrf.mxu1  ;;  %v5423_v62 = vmax.f32 %v5391_v8, %v5393_v39  ;;  %v5266_v34 = vmul.f32 0.5, %v15726_v63  ;;  %12841 = verf.f32 %v5305_v1  ;;  %v4815_v47 = vadd.f32 %v4760_v3, %v15570_v53 }
 0x383   : >> { %v12249_v0 = vpop.f32.mrf.mxu0  ;;  %v5422_v25 = vmax.f32 %v5390_v16, %v5392_v42  ;;  %v5269_v30 = vmul.f32 0.5, %v15729_v5  ;;  %12843 = verf.f32 %v5304_v17  ;;  %v5307_v15 = vmul.f32 0.70710677, %v15776_v52 }
 0x384   : >> { %v4770_v46 = vpop.f32.mrf.mxu1  ;;  %v12832_v20 = vpop.eup %12831  ;;  %5433 = vst.msk [vmem:[#allocation5 + $0x38] sm:$0xff] %vm562_vm2, %v5423_v62  ;;  %v5363_v14 = vadd.f32 1.0, %v12830_v21  ;;  %v5203_v40 = vadd.f32 %v5140_v35, %v4813_v45  ;;  %v5206_v63 = vadd.f32 %v12246_v10, %v4816_v60  ;;  %v5205_v36 = vadd.f32 %v5150_v33, %v4815_v47 }
 0x385   : >> { %v5446_v23 = vld [vmem:[#allocation5 + $0x20] ss:$2 sm:$0xff]  ;;  %v5462_v37 = vld [vmem:[#allocation5 + $0x21] ss:$2 sm:$0xff]  ;;  %v12834_v27 = vpop.eup %12833  ;;  %5432 = vst.msk [vmem:[#allocation5 + $0x30] sm:$0xff] %vm562_vm2, %v5422_v25  ;;  %v5362_v59 = vadd.f32 1.0, %v12832_v20  ;;  %v4818_v58 = vadd.f32 %v12193_v11, %v15573_v22  ;;  %v5160_v2 = vpop.f32.mrf.mxu0  ;;  %12845 = verf.f32 %v5307_v15 }
 0x386   : >> { %v5475_v53 = vmax.f32 %v5446_v23, %v5462_v37  ;;  %v5268_v5 = vmul.f32 0.5, %v15738_v12  ;;  %v12196_v19 = vpop.f32.mrf.mxu1  ;;  %v5365_v43 = vadd.f32 1.0, %v12834_v27  ;;  %v15789_v24 = vadd.f32 %v15594_v31, %v5203_v40 }
 0x387   : >> { %v15792_v4 = vadd.f32 %v15594_v31, %v5206_v63  ;;  %v15795_v38 = vadd.f32 %v15594_v31, %v5205_v36  ;;  %v12836_v51 = vpop.eup %12835  ;;  %v5208_v6 = vadd.f32 %v12249_v0, %v4818_v58  ;;  %v4817_v12 = vadd.f32 %v4770_v46, %v15576_v7  ;;  %v12252_v48 = vpop.f32.mrf.mxu0 }
 0x388   : >> { %10564 = vst.msk [vmem:[%s15742_s23 + $0x31] sm:$0xff] %vm562_vm2, %v5475_v53  ;;  %v4820_v22 = vadd.f32 %v12196_v19, %v15581_v54  ;;  %v5395_v28 = vmul.f32 %v5363_v14, %v5267_v56  ;;  %v5397_v35 = vmul.f32 %v5365_v43, %v5269_v30  ;;  %v5364_v32 = vadd.f32 1.0, %v12836_v51  ;;  %v4780_v61 = vpop.f32.mrf.mxu1 }
 0x389   : >> { %v5306_v9 = vmul.f32 0.70710677, %v15789_v24  ;;  %v5394_v13 = vmul.f32 %v5362_v59, %v5266_v34  ;;  %v5309_v57 = vmul.f32 0.70710677, %v15792_v4  ;;  %v5308_v55 = vmul.f32 0.70710677, %v15795_v38  ;;  %v5170_v42 = vpop.f32.mrf.mxu0 }
 0x38a   : >> { %v5413_v29 = vmax.f32 %v5395_v28, %v5397_v35  ;;  %v5396_v10 = vmul.f32 %v5364_v32, %v5268_v5  ;;  %v15805_v8 = vadd.f32 %v15594_v31, %v5208_v6  ;;  %v5207_v54 = vadd.f32 %v5160_v2, %v4817_v12 }
 0x38b   : >> { %12847 = verf.f32 %v5306_v9  ;;  %v12838_v7 = vpop.eup %12837  ;;  %v5210_v49 = vadd.f32 %v12252_v48, %v4820_v22  ;;  %v4819_v56 = vadd.f32 %v4780_v61, %v15584_v50  ;;  %v5271_v62 = vmul.f32 0.5, %v15749_v18 }
 0x38c   : >> { %12849 = verf.f32 %v5309_v57  ;;  %v12840_v3 = vpop.eup %12839  ;;  %v5448_v16 = vld [vmem:[#allocation5 + $0x30] ss:$2 sm:$0xff]  ;;  %v5464_v39 = vld [vmem:[#allocation5 + $0x31] ss:$2 sm:$0xff]  ;;  %5435 = vst.msk [vmem:[#allocation5 + $0x48] sm:$0xff] %vm562_vm2, %v5413_v29  ;;  %v5412_v1 = vmax.f32 %v5394_v13, %v5396_v10  ;;  %v15811_v21 = vadd.f32 %v15594_v31, %v5207_v54  ;;  %v5367_v45 = vadd.f32 1.0, %v12838_v7 }
 0x38d   : >> { %12851 = verf.f32 %v5308_v55  ;;  %v5476_v17 = vmax.f32 %v5448_v16, %v5464_v39  ;;  %v5311_v33 = vmul.f32 0.70710677, %v15805_v8  ;;  %v5249_v50 = vadd.f32 %v15594_v31, %v5210_v49 }
 0x38e   : >> { %5434 = vst.msk [vmem:[#allocation5 + $0x40] sm:$0xff] %vm562_vm2, %v5412_v1  ;;  %v5209_v60 = vadd.f32 %v5170_v42, %v4819_v56  ;;  %v5366_v34 = vadd.f32 1.0, %v12840_v3  ;;  %v5310_v47 = vmul.f32 0.70710677, %v15811_v21  ;;  %v5273_v25 = vmul.f32 0.5, %v15765_v26 }
 0x38f   : >> { %v12842_v11 = vpop.eup %12841  ;;  %10565 = vst.msk [vmem:[%s15742_s23 + $0x41] sm:$0xff] %vm562_vm2, %v5476_v17  ;;  %12853 = verf.f32 %v5311_v33  ;;  %v5313_v15 = vmul.f32 0.70710677, %v5249_v50  ;;  %v5270_v20 = vmul.f32 0.5, %v15757_v44  ;;  %v5272_v23 = vmul.f32 0.5, %v15770_v41 }
 0x390   : >> { %v12844_v0 = vpop.eup %12843  ;;  %v5369_v30 = vadd.f32 1.0, %v12842_v11  ;;  %v5248_v46 = vadd.f32 %v15594_v31, %v5209_v60  ;;  %12855 = verf.f32 %v5310_v47  ;;  %v5399_v14 = vmul.f32 %v5367_v45, %v5271_v62  ;;  %v10577_v47 = vld [vmem:[%s13717_s12 + $0x78] sm:$0xff] (%p1753_p5) }
 0x391   : >> { %v5368_v37 = vadd.f32 1.0, %v12844_v0  ;;  %12857 = verf.f32 %v5313_v15  ;;  %v5398_v63 = vmul.f32 %v5366_v34, %v5270_v20  ;;  %v5275_v43 = vmul.f32 0.5, %v15776_v52  ;;  %v10576_v0 = vld [vmem:[%s13717_s12 + $0x70] sm:$0xff] (%p1753_p5)  ;;  %12625 = vmatprep.subr.mxu1 (%p1753_p5), %v10577_v47  ;;  %12253 = vmatprep.subr.mxu0 (%p1753_p5), %v10577_v47  ;;  %v10573_v15 = vld [vmem:[%s13717_s12 + $0x58] sm:$0xff] (%p1753_p5)  ;;  %v10571_v20 = vld [vmem:[%s13717_s12 + $0x48] sm:$0xff] (%p1753_p5) }
 0x392   : >> { %v5401_v40 = vmul.f32 %v5369_v30, %v5273_v25  ;;  %v5312_v18 = vmul.f32 0.70710677, %v5248_v46  ;;  %v12846_v27 = vpop.eup %12845  ;;  %v5277_v51 = vmul.f32 0.5, %v15792_v4  ;;  %v5274_v12 = vmul.f32 0.5, %v15789_v24  ;;  %12633 = vmatpush3.msra.mxu1 (%p1753_p5), %v10577_v47  ;;  %12254 = vmatpush3.msra.mxu0 (%p1753_p5), %v10577_v47  ;;  %v10575_v25 = vld [vmem:[%s13717_s12 + $0x68] sm:$0xff] (%p1753_p5)  ;;  %v10574_v30 = vld [vmem:[%s13717_s12 + $0x60] sm:$0xff] (%p1753_p5) }
 0x393   : >> { %v5400_v36 = vmul.f32 %v5368_v37, %v5272_v23  ;;  %v5371_v41 = vadd.f32 1.0, %v12846_v27  ;;  %v5276_v22 = vmul.f32 0.5, %v15795_v38  ;;  %v5279_v24 = vmul.f32 0.5, %v15805_v8  ;;  %12626 = vmatprep.subr.mxu1 (%p1753_p5), %v10576_v0  ;;  %12255 = vmatprep.subr.mxu0 (%p1753_p5), %v10576_v0  ;;  %v10570_v23 = vld [vmem:[%s13717_s12 + $0x40] sm:$0xff] (%p1753_p5)  ;;  %v5515_v27 = vld [vmem:[%s13717_s12 + $0x30] sm:$0xff] (%p1753_p5) }
 0x394   : >> { %v5417_v53 = vmax.f32 %v5399_v14, %v5401_v40  ;;  %12859 = verf.f32 %v5312_v18  ;;  %v5281_v54 = vmul.f32 0.5, %v5249_v50  ;;  %v5278_v3 = vmul.f32 0.5, %v15811_v21  ;;  %12634 = vmatpush3.msra.mxu1 (%p1753_p5), %v10576_v0  ;;  %12256 = vmatpush3.msra.mxu0 (%p1753_p5), %v10576_v0  ;;  %v5516_v18 = vld [vmem:[%s13717_s12 + $0x38] sm:$0xff] (%p1753_p5) }
 0x395   : >> { %v5450_v26 = vld [vmem:[#allocation5 + $0x40] ss:$2 sm:$0xff]  ;;  %v5466_v59 = vld [vmem:[#allocation5 + $0x41] ss:$2 sm:$0xff]  ;;  %v5416_v5 = vmax.f32 %v5398_v63, %v5400_v36  ;;  %v5403_v35 = vmul.f32 %v5371_v41, %v5275_v43  ;;  %v5280_v1 = vmul.f32 0.5, %v5248_v46  ;;  %12627 = vmatprep.subr.mxu1 (%p1753_p5), %v10575_v25  ;;  %12257 = vmatprep.subr.mxu0 (%p1753_p5), %v10575_v25  ;;  %v10572_v46 = vld [vmem:[%s13717_s12 + $0x50] sm:$0xff] (%p1753_p5) }
 0x396   : >> { %v5477_v31 = vmax.f32 %v5450_v26, %v5466_v59  ;;  %5437 = vst.msk [vmem:[#allocation5 + $0x58] sm:$0xff] %vm562_vm2, %v5417_v53  ;;  %12635 = vmatpush3.msra.mxu1 (%p1753_p5), %v10575_v25  ;;  %12258 = vmatpush3.msra.mxu0 (%p1753_p5), %v10575_v25  ;;  %v10617_v36 = vld [vmem:[%s13717_s12 + $0xb8] sm:$0xff] (%p1753_p5)  ;;  %v10616_v26 = vld [vmem:[%s13717_s12 + $0xb0] sm:$0xff] (%p1753_p5)  ;;  %v10615_v41 = vld [vmem:[%s13717_s12 + $0xa8] sm:$0xff] (%p1753_p5) }
 0x397   : >> { %5436 = vst.msk [vmem:[#allocation5 + $0x50] sm:$0xff] %vm562_vm2, %v5416_v5  ;;  %12628 = vmatprep.subr.mxu1 (%p1753_p5), %v10574_v30  ;;  %12259 = vmatprep.subr.mxu0 (%p1753_p5), %v10574_v30 }
 0x398   : >> { %v12848_v44 = vpop.eup %12847  ;;  %10566 = vst.msk [vmem:[%s15742_s23 + $0xb1] sm:$0xff] %vm562_vm2, %v5477_v31  ;;  %12636 = vmatpush3.msra.mxu1 (%p1753_p5), %v10574_v30  ;;  %12260 = vmatpush3.msra.mxu0 (%p1753_p5), %v10574_v30  ;;  %v5514_v31 = vld [vmem:[%s13717_s12 + $0x28] sm:$0xff] (%p1753_p5)  ;;  %v10637_v30 = vld [vmem:[%s13717_s12 + $0xd8] sm:$0xff] (%p1753_p5) }
 0x399   : >> { %v12850_v58 = vpop.eup %12849  ;;  %v5370_v2 = vadd.f32 1.0, %v12848_v44  ;;  %12629 = vmatprep.subr.mxu1 (%p1753_p5), %v10573_v15  ;;  %12261 = vmatprep.subr.mxu0 (%p1753_p5), %v10573_v15 }
 0x39a   : >> { %v12852_v19 = vpop.eup %12851  ;;  %v5373_v6 = vadd.f32 1.0, %v12850_v58  ;;  %12637 = vmatpush3.msra.mxu1 (%p1753_p5), %v10573_v15  ;;  %12262 = vmatpush3.msra.mxu0 (%p1753_p5), %v10573_v15  ;;  %v5513_v58 = vld [vmem:[%s13717_s12 + $0x20] sm:$0xff] (%p1753_p5) }
 0x39b   : >> { %v5372_v28 = vadd.f32 1.0, %v12852_v19  ;;  %v5402_v61 = vmul.f32 %v5370_v2, %v5274_v12  ;;  %12630 = vmatprep.subr.mxu1 (%p1753_p5), %v10572_v46  ;;  %12263 = vmatprep.subr.mxu0 (%p1753_p5), %v10572_v46  ;;  %v10614_v19 = vld [vmem:[%s13717_s12 + $0xa0] sm:$0xff] (%p1753_p5) }
 0x39c   : >> { %v5405_v32 = vmul.f32 %v5373_v6, %v5277_v51  ;;  %v12854_v9 = vpop.eup %12853  ;;  %12638 = vmatpush3.msra.mxu1 (%p1753_p5), %v10572_v46  ;;  %12264 = vmatpush3.msra.mxu0 (%p1753_p5), %v10572_v46  ;;  %v5512_v6 = vld [vmem:[%s13717_s12 + $0x18] sm:$0xff] (%p1753_p5) }
 0x39d   : >> { %v5404_v13 = vmul.f32 %v5372_v28, %v5276_v22  ;;  %v12856_v55 = vpop.eup %12855  ;;  %v5375_v52 = vadd.f32 1.0, %v12854_v9  ;;  %12631 = vmatprep.subr.mxu1 (%p1753_p5), %v10571_v20  ;;  %12265 = vmatprep.subr.mxu0 (%p1753_p5), %v10571_v20  ;;  %v10613_v22 = vld [vmem:[%s13717_s12 + $0x98] sm:$0xff] (%p1753_p5)  ;;  %v5511_v28 = vld [vmem:[%s13717_s12 + $0x10] sm:$0xff] (%p1753_p5) }
 0x39e   : >> { %v5421_v57 = vmax.f32 %v5403_v35, %v5405_v32  ;;  %v5452_v48 = vld [vmem:[#allocation5 + $0x50] ss:$2 sm:$0xff]  ;;  %v5468_v29 = vld [vmem:[#allocation5 + $0x51] ss:$2 sm:$0xff]  ;;  %v12858_v7 = vpop.eup %12857  ;;  %v5374_v38 = vadd.f32 1.0, %v12856_v55  ;;  %12639 = vmatpush3.msra.mxu1 (%p1753_p5), %v10571_v20  ;;  %12266 = vmatpush3.msra.mxu0 (%p1753_p5), %v10571_v20  ;;  %v10611_v55 = vld [vmem:[%s13717_s12 + $0x88] sm:$0xff] (%p1753_p5) }
 0x39f   : >> { %v5420_v10 = vmax.f32 %v5402_v61, %v5404_v13  ;;  %v5478_v4 = vmax.f32 %v5452_v48, %v5468_v29  ;;  %v5377_v49 = vadd.f32 1.0, %v12858_v7  ;;  %v5407_v16 = vmul.f32 %v5375_v52, %v5279_v24  ;;  %12632 = vmatprep.subr.mxu1 (%p1753_p5), %v10570_v23  ;;  %12267 = vmatprep.subr.mxu0 (%p1753_p5), %v10570_v23  ;;  %v10612_v32 = vld [vmem:[%s13717_s12 + $0x90] sm:$0xff] (%p1753_p5)  ;;  %v5510_v13 = vld [vmem:[%s13717_s12 + $0x8] sm:$0xff] (%p1753_p5)  ;;  %v5509_v48 = vld [vmem:[%s13717_s12] sm:$0xff] (%p1753_p5) }
 0x3a0   : >> { %5439 = vst.msk [vmem:[#allocation5 + $0x68] sm:$0xff] %vm562_vm2, %v5421_v57  ;;  %v5406_v33 = vmul.f32 %v5374_v38, %v5278_v3  ;;  %12640 = vmatpush3.msra.mxu1 (%p1753_p5), %v10570_v23  ;;  %12268 = vmatpush3.msra.mxu0 (%p1753_p5), %v10570_v23  ;;  %v10665_v38 = vld [vmem:[%s13717_s12 + $0x138] sm:$0xff] (%p1753_p5)  ;;  %v10640_v3 = vld [vmem:[%s13717_s12 + $0xf0] sm:$0xff] (%p1753_p5) }
 0x3a1   : >> { %5438 = vst.msk [vmem:[#allocation5 + $0x60] sm:$0xff] %vm562_vm2, %v5420_v10  ;;  %v12860_v56 = vpop.eup %12859  ;;  %10567 = vst.msk [vmem:[%s15742_s23 + $0xc1] sm:$0xff] %vm562_vm2, %v5478_v4  ;;  %v5409_v39 = vmul.f32 %v5377_v49, %v5281_v54  ;;  %12293 = vmatprep.subr.mxu1 (%p1753_p5), %v5516_v18  ;;  %12333 = vmatprep.subr.mxu0 (%p1753_p5), %v10617_v36  ;;  %v10610_v10 = vld [vmem:[%s13717_s12 + $0x80] sm:$0xff] (%p1753_p5)  ;;  %v10641_v4 = vld [vmem:[%s13717_s12 + $0xf8] sm:$0xff] (%p1753_p5) }
 0x3a2   : >> { %v5376_v17 = vadd.f32 1.0, %v12860_v56  ;;  %v10661_v46 = vld [vmem:[%s13717_s12 + $0x118] sm:$0xff] (%p1753_p5) }
 0x3a3   : >> { %v5425_v42 = vmax.f32 %v5407_v16, %v5409_v39  ;;  %v10664_v39 = vld [vmem:[%s13717_s12 + $0x130] sm:$0xff] (%p1753_p5) }
 0x3a4   : >> { %v5408_v45 = vmul.f32 %v5376_v17, %v5280_v1 }
 0x3a5   : >> { %5441 = vst.msk [vmem:[#allocation5 + $0x78] sm:$0xff] %vm562_vm2, %v5425_v42  ;;  %v10639_v42 = vld [vmem:[%s13717_s12 + $0xe8] sm:$0xff] (%p1753_p5) }
 0x3a6   : >> { %v5424_v8 = vmax.f32 %v5406_v33, %v5408_v45 }
 0x3a8   : >> { %v5454_v60 = vld [vmem:[#allocation5 + $0x60] ss:$2 sm:$0xff]  ;;  %v5470_v50 = vld [vmem:[#allocation5 + $0x61] ss:$2 sm:$0xff]  ;;  %5440 = vst.msk [vmem:[#allocation5 + $0x70] sm:$0xff] %vm562_vm2, %v5424_v8 }
 0x3a9   : >> { %v5479_v11 = vmax.f32 %v5454_v60, %v5470_v50  ;;  %v10663_v8 = vld [vmem:[%s13717_s12 + $0x128] sm:$0xff] (%p1753_p5) }
 0x3ab   : >> { %10568 = vst.msk [vmem:[%s15742_s23 + $0xd1] sm:$0xff] %vm562_vm2, %v5479_v11 }
 0x3ae   : > { %1755 = sbr.rel (!%p1753_p5) target bundleno = 416 (0x1a0), region = 205 }
 0x3af   : >> { %v5456_v62 = vld [vmem:[#allocation5 + $0x70] ss:$2 sm:$0xff]  ;;  %v5472_v21 = vld [vmem:[#allocation5 + $0x71] ss:$2 sm:$0xff] }
 0x3b0   : >> { %v5480_v34 = vmax.f32 %v5456_v62, %v5472_v21  ;;  %v10638_v62 = vld [vmem:[%s13717_s12 + $0xe0] sm:$0xff] (%p1753_p5) }
 0x3b2   : >> { %10569 = vst.msk [vmem:[%s15742_s23 + $0xe1] sm:$0xff] %vm562_vm2, %v5480_v34  ;;  %v10662_v34 = vld [vmem:[%s13717_s12 + $0x120] sm:$0xff] (%p1753_p5) }
 0x3b9   : > { %v5525_v37 = vld [vmem:[#allocation3 + $0xa1] sm:$0xff]  ;;  %v15854_v40 = vld [vmem:[#allocation3 + $0xb1] sm:$0xff] }
 0x3ba   : > { %v5517_v14 = vld [vmem:[#allocation3 + $0x1] sm:$0xff]  ;;  %12281 = vmatprep.mubr.msk.f32.mxu1 %vm562_vm2, %v5525_v37  ;;  %v15858_v63 = vld [vmem:[#allocation3 + $0x11] sm:$0xff] }
 0x3bb   : > { %12269 = vmatprep.mubr.msk.f32.mxu0 %vm562_vm2, %v5517_v14  ;;  %12282 = vmatmul.mubr.msk.f32.vlgmr.msra.gmra.mxu1 %vm562_vm2, %v15854_v40  ;;  %v15865_v53 = vld [vmem:[#allocation3 + $0xc1] sm:$0xff]  ;;  %v15872_v5 = vld [vmem:[#allocation3 + $0xd1] sm:$0xff] }
 0x3bc   : > { %12270 = vmatmul.mubr.msk.f32.vlgmr.msra.gmra.mxu0 %vm562_vm2, %v15858_v63  ;;  %12294 = vmatpush3.msra.mxu1 %v5516_v18  ;;  %v15870_v59 = vld [vmem:[#allocation3 + $0x21] sm:$0xff]  ;;  %v15877_v44 = vld [vmem:[#allocation3 + $0x31] sm:$0xff] }
 0x3bd   : > { %12295 = vmatprep.subr.mxu1 %v5515_v27  ;;  %12334 = vmatpush3.msra.mxu0 %v10617_v36  ;;  %v15885_v2 = vld [vmem:[#allocation3 + $0xe1] sm:$0xff]  ;;  %v15892_v51 = vld [vmem:[#allocation3 + $0xf1] sm:$0xff] }
 0x3be   : > { %12284 = vmatprep.mubr.msk.f32.mxu1 %vm562_vm2, %v15865_v53  ;;  %12296 = vmatpush3.msra.mxu1 %v5515_v27  ;;  %v15890_v43 = vld [vmem:[#allocation3 + $0x41] sm:$0xff]  ;;  %v15897_v12 = vld [vmem:[#allocation3 + $0x51] sm:$0xff] }
 0x3bf   : > { %12335 = vmatprep.subr.mxu0 %v10616_v26  ;;  %12272 = vmatprep.mubr.msk.f32.mxu0 %vm562_vm2, %v15870_v59  ;;  %v15905_v35 = vld [vmem:[#allocation3 + $0x101] sm:$0xff]  ;;  %v15912_v61 = vld [vmem:[#allocation3 + $0x111] sm:$0xff] }
 0x3c0   : > { %12285 = vmatmul.mubr.msk.f32.gmra.mxu1 %vm562_vm2, %v15872_v5  ;;  %12297 = vmatprep.subr.mxu1 %v5514_v31  ;;  %v15910_v9 = vld [vmem:[#allocation3 + $0x61] sm:$0xff]  ;;  %v15917_v57 = vld [vmem:[#allocation3 + $0x71] sm:$0xff] }
 0x3c1   : > { %12336 = vmatpush3.msra.mxu0 %v10616_v26  ;;  %12298 = vmatpush3.msra.mxu1 %v5514_v31  ;;  %v5493_v29 = vld [vmem:[#allocation3] sm:$0xff]  ;;  %v15928_v52 = vld [vmem:[#allocation3 + $0x10] sm:$0xff] }
 0x3c2   : > { %12273 = vmatmul.mubr.msk.f32.gmra.mxu0 %vm562_vm2, %v15877_v44  ;;  %12337 = vmatprep.subr.mxu0 %v10615_v41  ;;  %v5928_v7 = vld [vmem:[#allocation3 + $0x2] sm:$0xff]  ;;  %v15932_v24 = vld [vmem:[#allocation3 + $0x12] sm:$0xff] }
 0x3c3   : > { %12299 = vmatprep.subr.mxu1 %v5513_v58  ;;  %12338 = vmatpush3.msra.mxu0 %v10615_v41  ;;  %v15937_v54 = vld [vmem:[#allocation3 + $0x20] sm:$0xff]  ;;  %v15940_v49 = vld [vmem:[#allocation3 + $0x30] sm:$0xff]  ;;  %v10635_v41 = vld [vmem:[%s13717_s12 + $0xc8] sm:$0xff] }
 0x3c4   : > { %12287 = vmatprep.mubr.msk.f32.mxu1 %vm562_vm2, %v15885_v2  ;;  %12300 = vmatpush3.msra.mxu1 %v5513_v58  ;;  %v15942_v56 = vld [vmem:[#allocation3 + $0x22] sm:$0xff]  ;;  %v15947_v16 = vld [vmem:[#allocation3 + $0x32] sm:$0xff] }
 0x3c5   : > { %12339 = vmatprep.subr.mxu0 %v10614_v19  ;;  %12275 = vmatprep.mubr.msk.f32.mxu0 %vm562_vm2, %v15890_v43  ;;  %v15950_v1 = vld [vmem:[#allocation3 + $0x40] sm:$0xff]  ;;  %v15954_v17 = vld [vmem:[#allocation3 + $0x50] sm:$0xff] }
 0x3c6   : > { %12288 = vmatmul.mubr.msk.f32.gmra.mxu1 %vm562_vm2, %v15892_v51  ;;  %12301 = vmatprep.subr.mxu1 %v5512_v6  ;;  %v15958_v33 = vld [vmem:[#allocation3 + $0x42] sm:$0xff]  ;;  %v15963_v45 = vld [vmem:[#allocation3 + $0x52] sm:$0xff] }
 0x3c7   : > { %12340 = vmatpush3.msra.mxu0 %v10614_v19  ;;  %12302 = vmatpush3.msra.mxu1 %v5512_v6  ;;  %v15968_v60 = vld [vmem:[#allocation3 + $0x60] sm:$0xff]  ;;  %v15972_v50 = vld [vmem:[#allocation3 + $0x70] sm:$0xff]  ;;  %v10659_v19 = vld [vmem:[%s13717_s12 + $0x108] sm:$0xff] }
 0x3c8   : > { %12276 = vmatmul.mubr.msk.f32.gmra.mxu0 %vm562_vm2, %v15897_v12  ;;  %12341 = vmatprep.subr.mxu0 %v10613_v22  ;;  %v15976_v11 = vld [vmem:[#allocation3 + $0x62] sm:$0xff]  ;;  %v15981_v21 = vld [vmem:[#allocation3 + $0x72] sm:$0xff] }
 0x3c9   : > { %12303 = vmatprep.subr.mxu1 %v5511_v28  ;;  %12342 = vmatpush3.msra.mxu0 %v10613_v22  ;;  %v5501_v47 = vld [vmem:[#allocation3 + $0xa0] sm:$0xff]  ;;  %v15988_v0 = vld [vmem:[#allocation3 + $0xb0] sm:$0xff] }
 0x3ca   : > { %12290 = vmatprep.mubr.msk.f32.mxu1 %vm562_vm2, %v15905_v35  ;;  %12304 = vmatpush3.msra.mxu1 %v5511_v28  ;;  %v5936_v25 = vld [vmem:[#allocation3 + $0xa2] sm:$0xff]  ;;  %v15995_v15 = vld [vmem:[#allocation3 + $0xb2] sm:$0xff] }
 0x3cb   : > { %12343 = vmatprep.subr.mxu0 %v10612_v32  ;;  %12278 = vmatprep.mubr.msk.f32.mxu0 %vm562_vm2, %v15910_v9  ;;  %v16000_v20 = vld [vmem:[#allocation3 + $0xc0] sm:$0xff]  ;;  %v16003_v23 = vld [vmem:[#allocation3 + $0xd0] sm:$0xff] }
 0x3cc   : > { %12291 = vmatmul.mubr.msk.f32.gmra.mxu1 %vm562_vm2, %v15912_v61  ;;  %12305 = vmatprep.subr.mxu1 %v5510_v13  ;;  %v16007_v37 = vld [vmem:[#allocation3 + $0xc2] sm:$0xff]  ;;  %v10636_v14 = vld [vmem:[%s13717_s12 + $0xd0] sm:$0xff] }
 0x3cd   : > { %12344 = vmatpush3.msra.mxu0 %v10612_v32  ;;  %12306 = vmatpush3.msra.mxu1 %v5510_v13  ;;  %v16011_v18 = vld [vmem:[#allocation3 + $0xd2] sm:$0xff]  ;;  %v16016_v27 = vld [vmem:[#allocation3 + $0xe0] sm:$0xff] }
 0x3ce   : > { %12279 = vmatmul.mubr.msk.f32.gmra.mxu0 %vm562_vm2, %v15917_v57  ;;  %12345 = vmatprep.subr.mxu0 %v10611_v55  ;;  %v10660_v36 = vld [vmem:[%s13717_s12 + $0x110] sm:$0xff]  ;;  %v16024_v31 = vld [vmem:[#allocation3 + $0xe2] sm:$0xff] }
 0x3cf   : > { %12307 = vmatprep.subr.mxu1 %v5509_v48  ;;  %12346 = vmatpush3.msra.mxu0 %v10611_v55  ;;  %v16020_v26 = vld [vmem:[#allocation3 + $0xf0] sm:$0xff]  ;;  %v16034_v6 = vld [vmem:[#allocation3 + $0x100] sm:$0xff] }
 0x3d0   : > { %12308 = vmatpush3.msra.mxu1 %v5509_v48  ;;  %12309 = vmatprep.mubr.msk.f32.mxu1 %vm562_vm2, %v5493_v29  ;;  %v16029_v58 = vld [vmem:[#allocation3 + $0xf2] sm:$0xff]  ;;  %v16042_v28 = vld [vmem:[#allocation3 + $0x102] sm:$0xff] }
 0x3d1   : > { %12347 = vmatprep.subr.mxu0 %v10610_v10  ;;  %12310 = vmatmul.mubr.msk.f32.vlgmr.msra.gmra.mxu1 %vm562_vm2, %v15928_v52  ;;  %v16038_v22 = vld [vmem:[#allocation3 + $0x110] sm:$0xff]  ;;  %v10634_v32 = vld [vmem:[%s13717_s12 + $0xc0] sm:$0xff]  ;;  %v10689_v48 = vld [vmem:[%s13717_s12 + $0x178] sm:$0xff] }
 0x3d2   : > { %12348 = vmatpush3.msra.mxu0 %v10610_v10  ;;  %12349 = vmatprep.mubr.msk.f32.mxu0 %vm562_vm2, %v5928_v7  ;;  %v16047_v13 = vld [vmem:[#allocation3 + $0x112] sm:$0xff]  ;;  %v10658_v55 = vld [vmem:[%s13717_s12 + $0x100] sm:$0xff] }
 0x3d3   : > { %12373 = vmatprep.subr.mxu1 %v10641_v4  ;;  %12350 = vmatmul.mubr.msk.f32.vlgmr.msra.gmra.mxu0 %vm562_vm2, %v15932_v24  ;;  %v10713_v29 = vld [vmem:[%s13717_s12 + $0x1b8] sm:$0xff]  ;;  %v10688_v10 = vld [vmem:[%s13717_s12 + $0x170] sm:$0xff] }
 0x3d4   : > { %12374 = vmatpush3.msra.mxu1 %v10641_v4  ;;  %12413 = vmatprep.subr.mxu0 %v10665_v38  ;;  %v10712_v7 = vld [vmem:[%s13717_s12 + $0x1b0] sm:$0xff]  ;;  %v10686_v4 = vld [vmem:[%s13717_s12 + $0x160] sm:$0xff] }
 0x3d5   : > { %12312 = vmatprep.mubr.msk.f32.mxu1 %vm562_vm2, %v15937_v54  ;;  %12414 = vmatpush3.msra.mxu0 %v10665_v38  ;;  %v10685_v38 = vld [vmem:[%s13717_s12 + $0x158] sm:$0xff] }
 0x3d6   : > { %12313 = vmatmul.mubr.msk.f32.gmra.mxu1 %vm562_vm2, %v15940_v49  ;;  %12352 = vmatprep.mubr.msk.f32.mxu0 %vm562_vm2, %v15942_v56 }
 0x3d7   : > { %12375 = vmatprep.subr.mxu1 %v10640_v3  ;;  %12353 = vmatmul.mubr.msk.f32.gmra.mxu0 %vm562_vm2, %v15947_v16 }
 0x3d8   : > { %12376 = vmatpush3.msra.mxu1 %v10640_v3  ;;  %12415 = vmatprep.subr.mxu0 %v10664_v39  ;;  %v10683_v3 = vld [vmem:[%s13717_s12 + $0x148] sm:$0xff] }
 0x3d9   : > { %12315 = vmatprep.mubr.msk.f32.mxu1 %vm562_vm2, %v15950_v1  ;;  %12416 = vmatpush3.msra.mxu0 %v10664_v39  ;;  %v10682_v39 = vld [vmem:[%s13717_s12 + $0x140] sm:$0xff] }
 0x3da   : > { %12316 = vmatmul.mubr.msk.f32.gmra.mxu1 %vm562_vm2, %v15954_v17  ;;  %12355 = vmatprep.mubr.msk.f32.mxu0 %vm562_vm2, %v15958_v33 }
 0x3db   : > { %12377 = vmatprep.subr.mxu1 %v10639_v42  ;;  %12356 = vmatmul.mubr.msk.f32.gmra.mxu0 %vm562_vm2, %v15963_v45 }
 0x3dc   : > { %12378 = vmatpush3.msra.mxu1 %v10639_v42  ;;  %12417 = vmatprep.subr.mxu0 %v10663_v8  ;;  %v10737_v42 = vld [vmem:[%s13717_s12 + $0x1f8] sm:$0xff] }
 0x3dd   : > { %12318 = vmatprep.mubr.msk.f32.mxu1 %vm562_vm2, %v15968_v60  ;;  %12418 = vmatpush3.msra.mxu0 %v10663_v8  ;;  %v10732_v8 = vld [vmem:[%s13717_s12 + $0x1d0] sm:$0xff] }
 0x3de   : > { %12319 = vmatmul.mubr.msk.f32.gmra.mxu1 %vm562_vm2, %v15972_v50  ;;  %12358 = vmatprep.mubr.msk.f32.mxu0 %vm562_vm2, %v15976_v11 }
 0x3df   : > { %12379 = vmatprep.subr.mxu1 %v10638_v62  ;;  %12359 = vmatmul.mubr.msk.f32.gmra.mxu0 %vm562_vm2, %v15981_v21 }
 0x3e0   : > { %12380 = vmatpush3.msra.mxu1 %v10638_v62  ;;  %12419 = vmatprep.subr.mxu0 %v10662_v34  ;;  %v10755_v62 = vld [vmem:[%s13717_s12 + $0x208] sm:$0xff] }
 0x3e1   : > { %12321 = vmatprep.mubr.msk.f32.mxu1 %vm562_vm2, %v5501_v47  ;;  %12420 = vmatpush3.msra.mxu0 %v10662_v34  ;;  %v16217_v34 = vld [vmem:[#allocation3 + $0x122] sm:$0xff] }
 0x3e2   : > { %12322 = vmatmul.mubr.msk.f32.gmra.mxu1 %vm562_vm2, %v15988_v0  ;;  %12361 = vmatprep.mubr.msk.f32.mxu0 %vm562_vm2, %v5936_v25  ;;  %v10730_v47 = vld [vmem:[%s13717_s12 + $0x1c0] sm:$0xff] }
 0x3e3   : > { %12381 = vmatprep.subr.mxu1 %v10637_v30  ;;  %12362 = vmatmul.mubr.msk.f32.gmra.mxu0 %vm562_vm2, %v15995_v15  ;;  %v10754_v25 = vld [vmem:[%s13717_s12 + $0x200] sm:$0xff] }
 0x3e4   : > { %12382 = vmatpush3.msra.mxu1 %v10637_v30  ;;  %12421 = vmatprep.subr.mxu0 %v10661_v46  ;;  %v13281_v30 = vld [vmem:[#allocation3 + $0x21] sm:$0xff] }
 0x3e5   : > { %12324 = vmatprep.mubr.msk.f32.mxu1 %vm562_vm2, %v16000_v20  ;;  %12422 = vmatpush3.msra.mxu0 %v10661_v46  ;;  %v13283_v46 = vld [vmem:[#allocation3 + $0x22] sm:$0xff] }
 0x3e6   : > { %12325 = vmatmul.mubr.msk.f32.gmra.mxu1 %vm562_vm2, %v16003_v23  ;;  %12364 = vmatprep.mubr.msk.f32.mxu0 %vm562_vm2, %v16007_v37 }
 0x3e7   : > { %12383 = vmatprep.subr.mxu1 %v10636_v14  ;;  %12365 = vmatmul.mubr.msk.f32.gmra.mxu0 %vm562_vm2, %v16011_v18 }
 0x3e8   : > { %12384 = vmatpush3.msra.mxu1 %v10636_v14  ;;  %12423 = vmatprep.subr.mxu0 %v10660_v36  ;;  %v13286_v14 = vld [vmem:[#allocation3 + $0x42] sm:$0xff] }
 0x3e9   : > { %12327 = vmatprep.mubr.msk.f32.mxu1 %vm562_vm2, %v16016_v27  ;;  %12424 = vmatpush3.msra.mxu0 %v10660_v36  ;;  %v13287_v36 = vld [vmem:[#allocation3 + $0x51] sm:$0xff] }
 0x3ea   : > { %12328 = vmatmul.mubr.msk.f32.gmra.mxu1 %vm562_vm2, %v16020_v26  ;;  %12367 = vmatprep.mubr.msk.f32.mxu0 %vm562_vm2, %v16024_v31 }
 0x3eb   : > { %12385 = vmatprep.subr.mxu1 %v10635_v41  ;;  %12368 = vmatmul.mubr.msk.f32.gmra.mxu0 %vm562_vm2, %v16029_v58 }
 0x3ec   : > { %12386 = vmatpush3.msra.mxu1 %v10635_v41  ;;  %12425 = vmatprep.subr.mxu0 %v10659_v19  ;;  %v7107_v41 = vld [vmem:[#allocation3 + $0x91] sm:$0xff] }
 0x3ed   : > { %12330 = vmatprep.mubr.msk.f32.mxu1 %vm562_vm2, %v16034_v6  ;;  %12426 = vmatpush3.msra.mxu0 %v10659_v19  ;;  %v7341_v19 = vld [vmem:[#allocation3 + $0x92] sm:$0xff] }
 0x3ee   : > { %12331 = vmatmul.mubr.msk.f32.gmra.mxu1 %vm562_vm2, %v16038_v22  ;;  %12370 = vmatprep.mubr.msk.f32.mxu0 %vm562_vm2, %v16042_v28 }
 0x3ef   : > { %12387 = vmatprep.subr.mxu1 %v10634_v32  ;;  %12371 = vmatmul.mubr.msk.f32.gmra.mxu0 %vm562_vm2, %v16047_v13 }
 0x3f0   : > { %12388 = vmatpush3.msra.mxu1 %v10634_v32  ;;  %12427 = vmatprep.subr.mxu0 %v10658_v55  ;;  %v12861_v32 = vld [vmem:[%s13723_s20 + $0x70] ss:$8 sps:$4 sm:$0xff]  }
 0x3f1   : > { %12389 = vmatprep.mubr.msk.f32.mxu1 %vm562_vm2, %v15928_v52  ;;  %12428 = vmatpush3.msra.mxu0 %v10658_v55  ;;  %v10687_v52 = vld [vmem:[%s13717_s12 + $0x168] sm:$0xff]  ;;  %v12864_v55 = vld [vmem:[%s13723_s20 + $0x170] ss:$8 sps:$4 sm:$0xff]  }
 0x3f2   : > { %12390 = vmatmul.mubr.msk.f32.vlgmr.msra.gmra.mxu1 %vm562_vm2, %v15937_v54  ;;  %12429 = vmatprep.mubr.msk.f32.mxu0 %vm562_vm2, %v15858_v63  ;;  %v10711_v63 = vld [vmem:[%s13717_s12 + $0x1a8] sm:$0xff] }
 0x3f3   : > { %12453 = vmatprep.subr.mxu1 %v10689_v48  ;;  %12430 = vmatmul.mubr.msk.f32.vlgmr.msra.gmra.mxu0 %vm562_vm2, %v15870_v59  ;;  %v16084_v59 = vld [vmem:[#allocation3 + $0x80] sm:$0xff] }
 0x3f4   : > { %12454 = vmatpush3.msra.mxu1 %v10689_v48  ;;  %12493 = vmatprep.subr.mxu0 %v10713_v29  ;;  %v12872_v48 = vld [vmem:[%s13723_s20 + $0x164] ss:$8 sps:$4 sm:$0xff]  }
 0x3f5   : > { %12392 = vmatprep.mubr.msk.f32.mxu1 %vm562_vm2, %v15940_v49  ;;  %12494 = vmatpush3.msra.mxu0 %v10713_v29  ;;  %v12867_v29 = vld [vmem:[%s13723_s20 + $0x60] ss:$8 sps:$4 sm:$0xff]  }
 0x3f6   : > { %12393 = vmatmul.mubr.msk.f32.gmra.mxu1 %vm562_vm2, %v15950_v1  ;;  %12432 = vmatprep.mubr.msk.f32.mxu0 %vm562_vm2, %v15877_v44  ;;  %v16091_v44 = vld [vmem:[#allocation3 + $0x81] sm:$0xff] }
 0x3f7   : > { %12455 = vmatprep.subr.mxu1 %v10688_v10  ;;  %12433 = vmatmul.mubr.msk.f32.gmra.mxu0 %vm562_vm2, %v15890_v43  ;;  %v10710_v43 = vld [vmem:[%s13717_s12 + $0x1a0] sm:$0xff] }
 0x3f8   : > { %12456 = vmatpush3.msra.mxu1 %v10688_v10  ;;  %12495 = vmatprep.subr.mxu0 %v10712_v7  ;;  %v12870_v10 = vld [vmem:[%s13723_s20 + $0x160] ss:$8 sps:$4 sm:$0xff]  }
 0x3f9   : > { %12395 = vmatprep.mubr.msk.f32.mxu1 %vm562_vm2, %v15954_v17  ;;  %12496 = vmatpush3.msra.mxu0 %v10712_v7  ;;  %v12875_v7 = vld [vmem:[%s13723_s20 + $0x54] ss:$8 sps:$4 sm:$0xff]  }
 0x3fa   : > { %12396 = vmatmul.mubr.msk.f32.gmra.mxu1 %vm562_vm2, %v15968_v60  ;;  %12435 = vmatprep.mubr.msk.f32.mxu0 %vm562_vm2, %v15897_v12  ;;  %v10709_v12 = vld [vmem:[%s13717_s12 + $0x198] sm:$0xff] }
 0x3fb   : > { %12457 = vmatprep.subr.mxu1 %v10687_v52  ;;  %12436 = vmatmul.mubr.msk.f32.gmra.mxu0 %vm562_vm2, %v15910_v9  ;;  %v10684_v9 = vld [vmem:[%s13717_s12 + $0x150] sm:$0xff] }
 0x3fc   : > { %12458 = vmatpush3.msra.mxu1 %v10687_v52  ;;  %12497 = vmatprep.subr.mxu0 %v10711_v63  ;;  %v12878_v52 = vld [vmem:[%s13723_s20 + $0x154] ss:$8 sps:$4 sm:$0xff]  }
 0x3fd   : > { %12398 = vmatprep.mubr.msk.f32.mxu1 %vm562_vm2, %v15972_v50  ;;  %12498 = vmatpush3.msra.mxu0 %v10711_v63  ;;  %v12873_v63 = vld [vmem:[%s13723_s20 + $0x50] ss:$8 sps:$4 sm:$0xff]  }
 0x3fe   : > { %12399 = vmatmul.mubr.msk.f32.gmra.mxu1 %vm562_vm2, %v16084_v59  ;;  %12438 = vmatprep.mubr.msk.f32.mxu0 %vm562_vm2, %v15917_v57  ;;  %v10708_v57 = vld [vmem:[%s13717_s12 + $0x190] sm:$0xff] }
 0x3ff   : > { %12459 = vmatprep.subr.mxu1 %v10686_v4  ;;  %12439 = vmatmul.mubr.msk.f32.gmra.mxu0 %vm562_vm2, %v16091_v44 }
 0x400   : > { %12460 = vmatpush3.msra.mxu1 %v10686_v4  ;;  %12499 = vmatprep.subr.mxu0 %v10710_v43 }
 0x401   : > { %12401 = vmatprep.mubr.msk.f32.mxu1 %vm562_vm2, %v15988_v0  ;;  %12500 = vmatpush3.msra.mxu0 %v10710_v43  ;;  %v6881_v0 = vld [vmem:[#allocation3 + $0x130] sm:$0xff]  ;;  %v12881_v43 = vld [vmem:[%s13723_s20 + $0x44] ss:$8 sps:$4 sm:$0xff]  }
 0x402   : > { %12402 = vmatmul.mubr.msk.f32.gmra.mxu1 %vm562_vm2, %v16000_v20  ;;  %12441 = vmatprep.mubr.msk.f32.mxu0 %vm562_vm2, %v15854_v40  ;;  %v10707_v40 = vld [vmem:[%s13717_s12 + $0x188] sm:$0xff] }
 0x403   : > { %12461 = vmatprep.subr.mxu1 %v10685_v38  ;;  %12442 = vmatmul.mubr.msk.f32.gmra.mxu0 %vm562_vm2, %v15865_v53  ;;  %v16128_v53 = vld [vmem:[#allocation3 + $0x120] sm:$0xff] }
 0x404   : > { %12462 = vmatpush3.msra.mxu1 %v10685_v38  ;;  %12501 = vmatprep.subr.mxu0 %v10709_v12  ;;  %v12884_v38 = vld [vmem:[%s13723_s20 + $0x144] ss:$8 sps:$4 sm:$0xff]  }
 0x405   : > { %12404 = vmatprep.mubr.msk.f32.mxu1 %vm562_vm2, %v16003_v23  ;;  %12502 = vmatpush3.msra.mxu0 %v10709_v12 }
 0x406   : > { %12405 = vmatmul.mubr.msk.f32.gmra.mxu1 %vm562_vm2, %v16016_v27  ;;  %12444 = vmatprep.mubr.msk.f32.mxu0 %vm562_vm2, %v15872_v5  ;;  %v16135_v5 = vld [vmem:[#allocation3 + $0x121] sm:$0xff] }
 0x407   : > { %12463 = vmatprep.subr.mxu1 %v10684_v9  ;;  %12445 = vmatmul.mubr.msk.f32.gmra.mxu0 %vm562_vm2, %v15885_v2  ;;  %v10706_v2 = vld [vmem:[%s13717_s12 + $0x180] sm:$0xff] }
 0x408   : > { %12464 = vmatpush3.msra.mxu1 %v10684_v9  ;;  %12503 = vmatprep.subr.mxu0 %v10708_v57  ;;  %v12879_v9 = vld [vmem:[%s13723_s20 + $0x40] ss:$8 sps:$4 sm:$0xff]  }
 0x409   : > { %12407 = vmatprep.mubr.msk.f32.mxu1 %vm562_vm2, %v16020_v26  ;;  %12504 = vmatpush3.msra.mxu0 %v10708_v57  ;;  %v12882_v57 = vld [vmem:[%s13723_s20 + $0x140] ss:$8 sps:$4 sm:$0xff]  }
 0x40a   : > { %12408 = vmatmul.mubr.msk.f32.gmra.mxu1 %vm562_vm2, %v16034_v6  ;;  %12447 = vmatprep.mubr.msk.f32.mxu0 %vm562_vm2, %v15892_v51  ;;  %v10761_v51 = vld [vmem:[%s13717_s12 + $0x238] sm:$0xff] }
 0x40b   : > { %12465 = vmatprep.subr.mxu1 %v10683_v3  ;;  %12448 = vmatmul.mubr.msk.f32.gmra.mxu0 %vm562_vm2, %v15905_v35  ;;  %v10736_v35 = vld [vmem:[%s13717_s12 + $0x1f0] sm:$0xff] }
 0x40c   : > { %12466 = vmatpush3.msra.mxu1 %v10683_v3  ;;  %12505 = vmatprep.subr.mxu0 %v10707_v40 }
 0x40d   : > { %12410 = vmatprep.mubr.msk.f32.mxu1 %vm562_vm2, %v16038_v22  ;;  %12506 = vmatpush3.msra.mxu0 %v10707_v40 }
 0x40e   : > { %12411 = vmatmul.mubr.msk.f32.gmra.mxu1 %vm562_vm2, %v16128_v53  ;;  %12450 = vmatprep.mubr.msk.f32.mxu0 %vm562_vm2, %v15912_v61  ;;  %v10760_v61 = vld [vmem:[%s13717_s12 + $0x230] sm:$0xff] }
 0x40f   : > { %12467 = vmatprep.subr.mxu1 %v10682_v39  ;;  %12451 = vmatmul.mubr.msk.f32.gmra.mxu0 %vm562_vm2, %v16135_v5 }
 0x410   : > { %12468 = vmatpush3.msra.mxu1 %v10682_v39  ;;  %12507 = vmatprep.subr.mxu0 %v10706_v2  ;;  %v12890_v39 = vld [vmem:[%s13723_s20 + $0x134] ss:$8 sps:$4 sm:$0xff]  }
 0x411   : > { %12469 = vmatprep.mubr.msk.f32.mxu1 %vm562_vm2, %v15932_v24  ;;  %12508 = vmatpush3.msra.mxu0 %v10706_v2  ;;  %v10735_v24 = vld [vmem:[%s13717_s12 + $0x1e8] sm:$0xff]  ;;  %v12888_v2 = vld [vmem:[%s13723_s20 + $0x130] ss:$8 sps:$4 sm:$0xff]  }
 0x412   : > { %12470 = vmatmul.mubr.msk.f32.vlgmr.msra.gmra.mxu1 %vm562_vm2, %v15942_v56  ;;  %12509 = vmatprep.mubr.msk.f32.mxu0 %vm562_vm2, %v15937_v54  ;;  %v10759_v54 = vld [vmem:[%s13717_s12 + $0x228] sm:$0xff]  ;;  %v10734_v56 = vld [vmem:[%s13717_s12 + $0x1e0] sm:$0xff] }
 0x413   : > { %12533 = vmatprep.subr.mxu1 %v10737_v42  ;;  %12510 = vmatmul.mubr.msk.f32.vlgmr.msra.gmra.mxu0 %vm562_vm2, %v15940_v49  ;;  %v16172_v49 = vld [vmem:[#allocation3 + $0x82] sm:$0xff] }
 0x414   : > { %12534 = vmatpush3.msra.mxu1 %v10737_v42  ;;  %12573 = vmatprep.subr.mxu0 %v10761_v51 }
 0x415   : > { %12472 = vmatprep.mubr.msk.f32.mxu1 %vm562_vm2, %v15947_v16  ;;  %12574 = vmatpush3.msra.mxu0 %v10761_v51  ;;  %v6873_v16 = vld [vmem:[#allocation3 + $0x90] sm:$0xff] }
 0x416   : > { %12473 = vmatmul.mubr.msk.f32.gmra.mxu1 %vm562_vm2, %v15958_v33  ;;  %12512 = vmatprep.mubr.msk.f32.mxu0 %vm562_vm2, %v15950_v1  ;;  %v10758_v1 = vld [vmem:[%s13717_s12 + $0x220] sm:$0xff]  ;;  %v10757_v33 = vld [vmem:[%s13717_s12 + $0x218] sm:$0xff] }
 0x417   : > { %12535 = vmatprep.subr.mxu1 %v10736_v35  ;;  %12513 = vmatmul.mubr.msk.f32.gmra.mxu0 %vm562_vm2, %v15954_v17  ;;  %v10733_v17 = vld [vmem:[%s13717_s12 + $0x1d8] sm:$0xff] }
 0x418   : > { %12536 = vmatpush3.msra.mxu1 %v10736_v35  ;;  %12575 = vmatprep.subr.mxu0 %v10760_v61 }
 0x419   : > { %12475 = vmatprep.mubr.msk.f32.mxu1 %vm562_vm2, %v15963_v45  ;;  %12576 = vmatpush3.msra.mxu0 %v10760_v61  ;;  %v12893_v61 = vld [vmem:[%s13723_s20 + $0x24] ss:$8 sps:$4 sm:$0xff]  }
 0x41a   : > { %12476 = vmatmul.mubr.msk.f32.gmra.mxu1 %vm562_vm2, %v15976_v11  ;;  %12515 = vmatprep.mubr.msk.f32.mxu0 %vm562_vm2, %v15968_v60  ;;  %v10756_v60 = vld [vmem:[%s13717_s12 + $0x210] sm:$0xff] }
 0x41b   : > { %12537 = vmatprep.subr.mxu1 %v10735_v24  ;;  %12516 = vmatmul.mubr.msk.f32.gmra.mxu0 %vm562_vm2, %v15972_v50  ;;  %v10731_v50 = vld [vmem:[%s13717_s12 + $0x1c8] sm:$0xff] }
 0x41c   : > { %12538 = vmatpush3.msra.mxu1 %v10735_v24  ;;  %12577 = vmatprep.subr.mxu0 %v10759_v54  ;;  %v12896_v24 = vld [vmem:[%s13723_s20 + $0x124] ss:$8 sps:$4 sm:$0xff]  }
 0x41d   : > { %12478 = vmatprep.mubr.msk.f32.mxu1 %vm562_vm2, %v15981_v21  ;;  %12578 = vmatpush3.msra.mxu0 %v10759_v54  ;;  %v12891_v54 = vld [vmem:[%s13723_s20 + $0x20] ss:$8 sps:$4 sm:$0xff]  }
 0x41e   : > { %12479 = vmatmul.mubr.msk.f32.gmra.mxu1 %vm562_vm2, %v16172_v49  ;;  %12518 = vmatprep.mubr.msk.f32.mxu0 %vm562_vm2, %v16084_v59  ;;  %v12876_v59 = vld [vmem:[%s13723_s20 + $0x150] ss:$8 sps:$4 sm:$0xff]  }
 0x41f   : > { %12539 = vmatprep.subr.mxu1 %v10734_v56  ;;  %12519 = vmatmul.mubr.msk.f32.gmra.mxu0 %vm562_vm2, %v6873_v16 }
 0x420   : > { %12540 = vmatpush3.msra.mxu1 %v10734_v56  ;;  %12579 = vmatprep.subr.mxu0 %v10758_v1 }
 0x421   : > { %12481 = vmatprep.mubr.msk.f32.mxu1 %vm562_vm2, %v15995_v15  ;;  %12580 = vmatpush3.msra.mxu0 %v10758_v1  ;;  %v13282_v15 = vld [vmem:[#allocation3 + $0x31] sm:$0xff] }
 0x422   : > { %12482 = vmatmul.mubr.msk.f32.gmra.mxu1 %vm562_vm2, %v16007_v37  ;;  %12521 = vmatprep.mubr.msk.f32.mxu0 %vm562_vm2, %v16000_v20  ;;  %v13284_v20 = vld [vmem:[#allocation3 + $0x41] sm:$0xff] }
 0x423   : > { %12541 = vmatprep.subr.mxu1 %v10733_v17  ;;  %12522 = vmatmul.mubr.msk.f32.gmra.mxu0 %vm562_vm2, %v16003_v23  ;;  %v13285_v23 = vld [vmem:[#allocation3 + $0x32] sm:$0xff] }
 0x424   : > { %12542 = vmatpush3.msra.mxu1 %v10733_v17  ;;  %12581 = vmatprep.subr.mxu0 %v10757_v33  ;;  %v12899_v17 = vld [vmem:[%s13723_s20 + $0x14] ss:$8 sps:$4 sm:$0xff]  }
 0x425   : > { %12484 = vmatprep.mubr.msk.f32.mxu1 %vm562_vm2, %v16011_v18  ;;  %12582 = vmatpush3.msra.mxu0 %v10757_v33  ;;  %v12902_v33 = vld [vmem:[%s13723_s20 + $0x114] ss:$8 sps:$4 sm:$0xff]  }
 0x426   : > { %12485 = vmatmul.mubr.msk.f32.gmra.mxu1 %vm562_vm2, %v16024_v31  ;;  %12524 = vmatprep.mubr.msk.f32.mxu0 %vm562_vm2, %v16016_v27  ;;  %v13288_v27 = vld [vmem:[#allocation3 + $0x61] sm:$0xff] }
 0x427   : > { %12543 = vmatprep.subr.mxu1 %v10732_v8  ;;  %12525 = vmatmul.mubr.msk.f32.gmra.mxu0 %vm562_vm2, %v16020_v26  ;;  %v13289_v26 = vld [vmem:[#allocation3 + $0x71] sm:$0xff] }
 0x428   : > { %12544 = vmatpush3.msra.mxu1 %v10732_v8  ;;  %12583 = vmatprep.subr.mxu0 %v10756_v60  ;;  %v12897_v8 = vld [vmem:[%s13723_s20 + $0x10] ss:$8 sps:$4 sm:$0xff]  }
 0x429   : > { %12487 = vmatprep.mubr.msk.f32.mxu1 %vm562_vm2, %v16029_v58  ;;  %12584 = vmatpush3.msra.mxu0 %v10756_v60  ;;  %v12900_v60 = vld [vmem:[%s13723_s20 + $0x110] ss:$8 sps:$4 sm:$0xff]  }
 0x42a   : > { %12488 = vmatmul.mubr.msk.f32.gmra.mxu1 %vm562_vm2, %v16042_v28  ;;  %12527 = vmatprep.mubr.msk.f32.mxu0 %vm562_vm2, %v16034_v6  ;;  %v13292_v6 = vld [vmem:[#allocation3 + $0xe1] sm:$0xff] }
 0x42b   : > { %12545 = vmatprep.subr.mxu1 %v10731_v50  ;;  %12528 = vmatmul.mubr.msk.f32.gmra.mxu0 %vm562_vm2, %v16038_v22  ;;  %v13294_v22 = vld [vmem:[#allocation3 + $0x101] sm:$0xff] }
 0x42c   : > { %12546 = vmatpush3.msra.mxu1 %v10731_v50  ;;  %12585 = vmatprep.subr.mxu0 %v10755_v62 }
 0x42d   : > { %12490 = vmatprep.mubr.msk.f32.mxu1 %vm562_vm2, %v16047_v13  ;;  %12586 = vmatpush3.msra.mxu0 %v10755_v62 }
 0x42e   : > { %12491 = vmatmul.mubr.msk.f32.gmra.mxu1 %vm562_vm2, %v16217_v34  ;;  %12530 = vmatprep.mubr.msk.f32.mxu0 %vm562_vm2, %v16128_v53  ;;  %v12887_v53 = vld [vmem:[%s13723_s20 + $0x34] ss:$8 sps:$4 sm:$0xff]  }
 0x42f   : > { %12547 = vmatprep.subr.mxu1 %v10730_v47  ;;  %12531 = vmatmul.mubr.msk.f32.gmra.mxu0 %vm562_vm2, %v6881_v0  ;;  %v12903_v0 = vld [vmem:[%s13723_s20] ss:$8 sps:$4 sm:$0xff]  }
 0x430   : > { %12548 = vmatpush3.msra.mxu1 %v10730_v47  ;;  %12587 = vmatprep.subr.mxu0 %v10754_v25  ;;  %v12908_v47 = vld [vmem:[%s13723_s20 + $0x104] ss:$8 sps:$4 sm:$0xff]  }
 0x431   : > { %12549 = vmatprep.mubr.msk.f32.mxu1 %vm562_vm2, %v13281_v30  ;;  %12588 = vmatpush3.msra.mxu0 %v10754_v25  ;;  %v12906_v25 = vld [vmem:[%s13723_s20 + $0x100] ss:$8 sps:$4 sm:$0xff]  }
 0x432   : > { %12550 = vmatmul.mubr.msk.f32.vlgmr.msra.gmra.mxu1 %vm562_vm2, %v13282_v15  ;;  %12589 = vmatprep.mubr.msk.f32.mxu0 %vm562_vm2, %v13283_v46 }
 0x433   : > { %12552 = vmatprep.mubr.msk.f32.mxu1 %vm562_vm2, %v13284_v20  ;;  %12590 = vmatmul.mubr.msk.f32.vlgmr.msra.gmra.mxu0 %vm562_vm2, %v13285_v23  ;;  %v12911_v20 = vld [vmem:[%s13723_s20 + $0xf4] ss:$8 sps:$4 sm:$0xff]  }
 0x434   : > { %12592 = vmatprep.mubr.msk.f32.mxu0 %vm562_vm2, %v13286_v14  ;;  %v12914_v23 = vld [vmem:[%s13723_s20 + $0x1f4] ss:$8 sps:$4 sm:$0xff]  }
 0x436   : > { %12553 = vmatmul.mubr.msk.f32.gmra.mxu1 %vm562_vm2, %v13287_v36  ;;  %v12909_v36 = vld [vmem:[%s13723_s20 + $0xf0] ss:$8 sps:$4 sm:$0xff]  }
 0x437   : > { %12555 = vmatprep.mubr.msk.f32.mxu1 %vm562_vm2, %v13288_v27  ;;  %12593 = vmatmul.mubr.msk.f32.gmra.mxu0 %vm562_vm2, %v15963_v45  ;;  %v13290_v45 = vld [vmem:[#allocation3 + $0xc1] sm:$0xff]  ;;  %v12912_v27 = vld [vmem:[%s13723_s20 + $0x1f0] ss:$8 sps:$4 sm:$0xff]  }
 0x438   : > { %12595 = vmatprep.mubr.msk.f32.mxu0 %vm562_vm2, %v15976_v11  ;;  %v13291_v11 = vld [vmem:[#allocation3 + $0xd1] sm:$0xff] }
 0x43a   : > { %12556 = vmatmul.mubr.msk.f32.gmra.mxu1 %vm562_vm2, %v13289_v26 }
 0x43b   : > { %12558 = vmatprep.mubr.msk.f32.mxu1 %vm562_vm2, %v16091_v44  ;;  %12596 = vmatmul.mubr.msk.f32.gmra.mxu0 %vm562_vm2, %v15981_v21  ;;  %v13293_v21 = vld [vmem:[#allocation3 + $0xf1] sm:$0xff] }
 0x43c   : > { %12598 = vmatprep.mubr.msk.f32.mxu0 %vm562_vm2, %v16172_v49  ;;  %v12894_v49 = vld [vmem:[%s13723_s20 + $0x120] ss:$8 sps:$4 sm:$0xff]  }
 0x43e   : > { %12559 = vmatmul.mubr.msk.f32.gmra.mxu1 %vm562_vm2, %v7107_v41 }
 0x43f   : > { %12561 = vmatprep.mubr.msk.f32.mxu1 %vm562_vm2, %v13290_v45  ;;  %12599 = vmatmul.mubr.msk.f32.gmra.mxu0 %vm562_vm2, %v7341_v19 }
 0x440   : > { %12601 = vmatprep.mubr.msk.f32.mxu0 %vm562_vm2, %v16007_v37  ;;  %v13295_v37 = vld [vmem:[#allocation3 + $0x111] sm:$0xff] }
 0x442   : > { %12562 = vmatmul.mubr.msk.f32.gmra.mxu1 %vm562_vm2, %v13291_v11 }
 0x443   : > { %12564 = vmatprep.mubr.msk.f32.mxu1 %vm562_vm2, %v13292_v6  ;;  %12602 = vmatmul.mubr.msk.f32.gmra.mxu0 %vm562_vm2, %v16011_v18  ;;  %v7115_v18 = vld [vmem:[#allocation3 + $0x131] sm:$0xff]  ;;  %v12917_v6 = vld [vmem:[%s13723_s20 + $0xe4] ss:$8 sps:$4 sm:$0xff]  }
 0x444   : > { %12604 = vmatprep.mubr.msk.f32.mxu0 %vm562_vm2, %v16024_v31  ;;  %v7349_v31 = vld [vmem:[#allocation3 + $0x132] sm:$0xff] }
 0x446   : > { %12565 = vmatmul.mubr.msk.f32.gmra.mxu1 %vm562_vm2, %v13293_v21  ;;  %v12920_v21 = vld [vmem:[%s13723_s20 + $0x1e4] ss:$8 sps:$4 sm:$0xff]  }
 0x447   : > { %12567 = vmatprep.mubr.msk.f32.mxu1 %vm562_vm2, %v13294_v22  ;;  %12605 = vmatmul.mubr.msk.f32.gmra.mxu0 %vm562_vm2, %v16029_v58  ;;  %v12863_v58 = vld [vmem:[%s13723_s20 + $0x74] ss:$8 sps:$4 sm:$0xff]  }
 0x448   : > { %12607 = vmatprep.mubr.msk.f32.mxu0 %vm562_vm2, %v16042_v28  ;;  %v12866_v28 = vld [vmem:[%s13723_s20 + $0x174] ss:$8 sps:$4 sm:$0xff]   ;;  %9431 = vmatprep.subr.bf16.mxu1 %v12863_v58 }
 0x449   : > { %9472 = vmatprep.subr.bf16.mxu0 %v12866_v28  ;;  %9432 = vmatpush1.bf16.msra.mxu1 %v12861_v32 }
 0x44a   : > { %12568 = vmatmul.mubr.msk.f32.gmra.mxu1 %vm562_vm2, %v13295_v37  ;;  %9473 = vmatpush1.bf16.msra.mxu0 %v12864_v55 }
 0x44b   : > { %12570 = vmatprep.mubr.msk.f32.mxu1 %vm562_vm2, %v16135_v5  ;;  %12608 = vmatmul.mubr.msk.f32.gmra.mxu0 %vm562_vm2, %v16047_v13  ;;  %v12869_v13 = vld [vmem:[%s13723_s20 + $0x64] ss:$8 sps:$4 sm:$0xff]   ;;  %v12885_v5 = vld [vmem:[%s13723_s20 + $0x30] ss:$8 sps:$4 sm:$0xff]  }
 0x44c   : > { %12610 = vmatprep.mubr.msk.f32.mxu0 %vm562_vm2, %v16217_v34  ;;  %9433 = vmatprep.subr.bf16.mxu1 %v12869_v13  ;;  %v12905_v34 = vld [vmem:[%s13723_s20 + $0x4] ss:$8 sps:$4 sm:$0xff]  }
 0x44d   : > { %9474 = vmatprep.subr.bf16.mxu0 %v12872_v48  ;;  %9434 = vmatpush1.bf16.msra.mxu1 %v12867_v29  ;;  %v12923_v29 = vld [vmem:[%s13723_s20 + $0xd4] ss:$8 sps:$4 sm:$0xff]  }
 0x44e   : > { %12571 = vmatmul.mubr.msk.f32.gmra.mxu1 %vm562_vm2, %v7115_v18  ;;  %9475 = vmatpush1.bf16.msra.mxu0 %v12870_v10  ;;  %v12915_v18 = vld [vmem:[%s13723_s20 + $0xe0] ss:$8 sps:$4 sm:$0xff]   ;;  %v12926_v10 = vld [vmem:[%s13723_s20 + $0x1d4] ss:$8 sps:$4 sm:$0xff]  }
 0x44f   : > { %12611 = vmatmul.mubr.msk.f32.gmra.mxu0 %vm562_vm2, %v7349_v31  ;;  %9435 = vmatprep.subr.bf16.mxu1 %v12875_v7  ;;  %v12918_v31 = vld [vmem:[%s13723_s20 + $0x1e0] ss:$8 sps:$4 sm:$0xff]  }
 0x450   : > { %9476 = vmatprep.subr.bf16.mxu0 %v12878_v52 }
 0x451   : > { %9436 = vmatpush1.bf16.msra.mxu1 %v12873_v63  ;;  %v12921_v63 = vld [vmem:[%s13723_s20 + $0xd0] ss:$8 sps:$4 sm:$0xff]  }
 0x452   : > { %9477 = vmatpush1.bf16.msra.mxu0 %v12876_v59  ;;  %9437 = vmatprep.subr.bf16.mxu1 %v12881_v43  ;;  %v12924_v59 = vld [vmem:[%s13723_s20 + $0x1d0] ss:$8 sps:$4 sm:$0xff]  }
 0x453   : > { %9478 = vmatprep.subr.bf16.mxu0 %v12884_v38 }
 0x455   : > { %9438 = vmatpush1.bf16.msra.mxu1 %v12879_v9 }
 0x456   : > { %9479 = vmatpush1.bf16.msra.mxu0 %v12882_v57  ;;  %9439 = vmatprep.subr.bf16.mxu1 %v12887_v53  ;;  %v12929_v53 = vld [vmem:[%s13723_s20 + $0xc4] ss:$8 sps:$4 sm:$0xff]  }
 0x457   : > { %9480 = vmatprep.subr.bf16.mxu0 %v12890_v39  ;;  %v12932_v39 = vld [vmem:[%s13723_s20 + $0x1c4] ss:$8 sps:$4 sm:$0xff]  }
 0x459   : > { %9440 = vmatpush1.bf16.msra.mxu1 %v12885_v5 }
 0x45a   : > { %9481 = vmatpush1.bf16.msra.mxu0 %v12888_v2  ;;  %9441 = vmatprep.subr.bf16.mxu1 %v12893_v61 }
 0x45b   : > { %9482 = vmatprep.subr.bf16.mxu0 %v12896_v24 }
 0x45d   : > { %9442 = vmatpush1.bf16.msra.mxu1 %v12891_v54 }
 0x45e   : > { %9483 = vmatpush1.bf16.msra.mxu0 %v12894_v49  ;;  %9443 = vmatprep.subr.bf16.mxu1 %v12899_v17 }
 0x45f   : > { %9484 = vmatprep.subr.bf16.mxu0 %v12902_v33  ;;  %v12935_v33 = vld [vmem:[%s13723_s20 + $0xb4] ss:$8 sps:$4 sm:$0xff]  }
 0x461   : > { %9444 = vmatpush1.bf16.msra.mxu1 %v12897_v8  ;;  %v12938_v8 = vld [vmem:[%s13723_s20 + $0x1b4] ss:$8 sps:$4 sm:$0xff]  }
 0x462   : > { %9485 = vmatpush1.bf16.msra.mxu0 %v12900_v60  ;;  %9445 = vmatprep.subr.bf16.mxu1 %v12905_v34  ;;  %v12933_v34 = vld [vmem:[%s13723_s20 + $0xb0] ss:$8 sps:$4 sm:$0xff]  }
 0x463   : > { %9486 = vmatprep.subr.bf16.mxu0 %v12908_v47  ;;  %v12936_v47 = vld [vmem:[%s13723_s20 + $0x1b0] ss:$8 sps:$4 sm:$0xff]  }
 0x465   : > { %9446 = vmatpush1.bf16.msra.mxu1 %v12903_v0 }
 0x466   : > { %9487 = vmatpush1.bf16.msra.mxu0 %v12906_v25  ;;  %9447 = vmatprep.subr.bf16.mxu1 %v12911_v20 }
 0x467   : > { %9488 = vmatprep.subr.bf16.mxu0 %v12914_v23 }
 0x469   : > { %9448 = vmatpush2.bf16.msra.mxu1 %v12909_v36  ;;  %v12944_v36 = vld [vmem:[%s13723_s20 + $0x1a4] ss:$8 sps:$4 sm:$0xff]  }
 0x46a   : > { %9489 = vmatpush2.bf16.msra.mxu0 %v12912_v27  ;;  %9449 = vmatprep.subr.bf16.mxu1 %v12917_v6 }
 0x46b   : > { %9490 = vmatprep.subr.bf16.mxu0 %v12920_v21 }
 0x46d   : > { %9450 = vmatpush2.bf16.msra.mxu1 %v12915_v18  ;;  %v12950_v18 = vld [vmem:[%s13723_s20 + $0x194] ss:$8 sps:$4 sm:$0xff]  }
 0x46e   : > { %9491 = vmatpush2.bf16.msra.mxu0 %v12918_v31  ;;  %9451 = vmatprep.subr.bf16.mxu1 %v12923_v29 }
 0x46f   : > { %9492 = vmatprep.subr.bf16.mxu0 %v12926_v10 }
 0x471   : > { %9452 = vmatpush2.bf16.msra.mxu1 %v12921_v63  ;;  %v12956_v63 = vld [vmem:[%s13723_s20 + $0x184] ss:$8 sps:$4 sm:$0xff]  }
 0x472   : > { %9493 = vmatpush2.bf16.msra.mxu0 %v12924_v59  ;;  %9453 = vmatprep.subr.bf16.mxu1 %v12929_v53 }
 0x473   : > { %9494 = vmatprep.subr.bf16.mxu0 %v12932_v39 }
 0x47b   : > { %v16287_v4 = vpop.f32.mrf.mxu1 }
 0x47c   : > { %v12271_v44 = vpop.f32.mrf.mxu0 }
 0x47d   : > { %v16291_v12 = vpop.f32.mrf.mxu1 }
 0x47e   : > { %v5656_v3 = vpop.f32.mrf.mxu0 }
 0x480   : > { %v16295_v40 = vpop.f32.mrf.mxu1 }
 0x482   : > { %v12274_v42 = vpop.f32.mrf.mxu0  ;;  %v16301_v51 = vpop.f32.mrf.mxu1 }
 0x484   : > { %v5666_v35 = vpop.f32.mrf.mxu0 }
 0x486   : > { %v16307_v56 = vpop.f32.mrf.mxu1 }
 0x488   : > { %v12277_v16 = vpop.f32.mrf.mxu0  ;;  %v16309_v1 = vpop.f32.mrf.mxu1 }
 0x48a   : > { %v5676_v50 = vpop.f32.mrf.mxu0 }
 0x48c   : > { %v16315_v62 = vpop.f32.mrf.mxu1 }
 0x48e   : > { %v12280_v30 = vpop.f32.mrf.mxu0  ;;  %v16321_v15 = vpop.f32.mrf.mxu1 }
 0x490   : > { %v5686_v46 = vpop.f32.mrf.mxu0 }
 0x491   : > { %v12311_v14 = vpop.f32.mrf.mxu1 }
 0x492   : > { %v5855_v26 = vadd.f32 %v12311_v14, %v12271_v44  ;;  %v12941_v14 = vld [vmem:[%s13723_s20 + $0xa4] ss:$8 sps:$4 sm:$0xff]  }
 0x493   : > { %v12351_v41 = vpop.f32.mrf.mxu0  ;;  %v5849_v19 = vpop.f32.mrf.mxu1 }
 0x494   : > { %v16327_v45 = vadd.f32 %v12351_v41, %v5855_v26  ;;  %v5850_v11 = vadd.f32 %v5849_v19, %v5656_v3  ;;  %v12939_v41 = vld [vmem:[%s13723_s20 + $0xa0] ss:$8 sps:$4 sm:$0xff]  }
 0x495   : > { %v6067_v22 = vpop.f32.mrf.mxu0  ;;  %v12942_v19 = vld [vmem:[%s13723_s20 + $0x1a0] ss:$8 sps:$4 sm:$0xff]  }
 0x496   : > { %v12314_v37 = vpop.f32.mrf.mxu1  ;;  %v16333_v58 = vadd.f32 %v6067_v22, %v5850_v11 }
 0x497   : > { %v5865_v28 = vadd.f32 %v12314_v37, %v12274_v42  ;;  %v12354_v32 = vpop.f32.mrf.mxu0  ;;  %v12927_v42 = vld [vmem:[%s13723_s20 + $0xc0] ss:$8 sps:$4 sm:$0xff]   ;;  %v12947_v37 = vld [vmem:[%s13723_s20 + $0x94] ss:$8 sps:$4 sm:$0xff]  }
 0x498   : > { %v5859_v55 = vpop.f32.mrf.mxu1  ;;  %9454 = vmatpush2.bf16.msra.mxu1 %v12927_v42  ;;  %v12962_v42 = vld [vmem:[%s13723_s20 + $0x374] ss:$8 sps:$4 sm:$0xff]  }
 0x499   : > { %v16335_v13 = vadd.f32 %v12354_v32, %v5865_v28  ;;  %v5860_v48 = vadd.f32 %v5859_v55, %v5666_v35  ;;  %v6077_v7 = vpop.f32.mrf.mxu0  ;;  %v12930_v35 = vld [vmem:[%s13723_s20 + $0x1c0] ss:$8 sps:$4 sm:$0xff]   ;;  %9455 = vmatprep.subr.bf16.mxu1 %v12935_v33  ;;  %v12945_v32 = vld [vmem:[%s13723_s20 + $0x90] ss:$8 sps:$4 sm:$0xff]  }
 0x49a   : > { %v12317_v52 = vpop.f32.mrf.mxu1  ;;  %9495 = vmatpush2.bf16.msra.mxu0 %v12930_v35  ;;  %v12948_v55 = vld [vmem:[%s13723_s20 + $0x190] ss:$8 sps:$4 sm:$0xff]  }
 0x49b   : > { %v16341_v44 = vadd.f32 %v6077_v7, %v5860_v48  ;;  %v5875_v43 = vadd.f32 %v12317_v52, %v12277_v16  ;;  %v12357_v38 = vpop.f32.mrf.mxu0  ;;  %9496 = vmatprep.subr.bf16.mxu0 %v12938_v8  ;;  %v12953_v52 = vld [vmem:[%s13723_s20 + $0x84] ss:$8 sps:$4 sm:$0xff]  }
 0x49c   : > { %v5869_v9 = vpop.f32.mrf.mxu1  ;;  %9456 = vmatpush2.bf16.msra.mxu1 %v12933_v34 }
 0x49d   : > { %v16343_v57 = vadd.f32 %v12357_v38, %v5875_v43  ;;  %v5870_v3 = vadd.f32 %v5869_v9, %v5676_v50  ;;  %v6087_v5 = vpop.f32.mrf.mxu0  ;;  %9457 = vmatprep.subr.bf16.mxu1 %v12941_v14  ;;  %v12951_v38 = vld [vmem:[%s13723_s20 + $0x80] ss:$8 sps:$4 sm:$0xff]  }
 0x49e   : > { %v12320_v2 = vpop.f32.mrf.mxu1  ;;  %9497 = vmatpush2.bf16.msra.mxu0 %v12936_v47  ;;  %v12954_v9 = vld [vmem:[%s13723_s20 + $0x180] ss:$8 sps:$4 sm:$0xff]  }
 0x49f   : > { %v16349_v61 = vadd.f32 %v6087_v5, %v5870_v3  ;;  %v5885_v24 = vadd.f32 %v12320_v2, %v12280_v30  ;;  %v12360_v54 = vpop.f32.mrf.mxu0  ;;  %9498 = vmatprep.subr.bf16.mxu0 %v12944_v36  ;;  %v12959_v2 = vld [vmem:[%s13723_s20 + $0x274] ss:$8 sps:$4 sm:$0xff]  }
 0x4a0   : > { %v5879_v49 = vpop.f32.mrf.mxu1  ;;  %9458 = vmatpush2.bf16.msra.mxu1 %v12939_v41 }
 0x4a1   : > { %v16351_v16 = vadd.f32 %v12360_v54, %v5885_v24  ;;  %v5880_v17 = vadd.f32 %v5879_v49, %v5686_v46  ;;  %v6097_v60 = vpop.f32.mrf.mxu0  ;;  %9459 = vmatprep.subr.bf16.mxu1 %v12947_v37 }
 0x4a2   : > { %v12323_v50 = vpop.f32.mrf.mxu1  ;;  %9499 = vmatpush2.bf16.msra.mxu0 %v12942_v19 }
 0x4a3   : > { %v16357_v0 = vadd.f32 %v6097_v60, %v5880_v17  ;;  %v5895_v25 = vadd.f32 %v12323_v50, %v16287_v4  ;;  %v12363_v30 = vpop.f32.mrf.mxu0  ;;  %9500 = vmatprep.subr.bf16.mxu0 %v12950_v18 }
 0x4a4   : > { %v5889_v20 = vpop.f32.mrf.mxu1  ;;  %9460 = vmatpush2.bf16.msra.mxu1 %v12945_v32 }
 0x4a5   : > { %v16360_v46 = vadd.f32 %v12363_v30, %v5895_v25  ;;  %v5890_v23 = vadd.f32 %v5889_v20, %v16291_v12  ;;  %v6107_v27 = vpop.f32.mrf.mxu0  ;;  %9461 = vmatprep.subr.bf16.mxu1 %v12953_v52 }
 0x4a6   : > { %v12326_v26 = vpop.f32.mrf.mxu1  ;;  %9501 = vmatpush2.bf16.msra.mxu0 %v12948_v55 }
 0x4a7   : > { %v16367_v4 = vadd.f32 %v6107_v27, %v5890_v23  ;;  %v5905_v11 = vadd.f32 %v12326_v26, %v16295_v40  ;;  %v12366_v6 = vpop.f32.mrf.mxu0  ;;  %9502 = vmatprep.subr.bf16.mxu0 %v12956_v63 }
 0x4a8   : > { %v5899_v21 = vpop.f32.mrf.mxu1  ;;  %9462 = vmatpush2.bf16.msra.mxu1 %v12951_v38 }
 0x4a9   : > { %v16370_v12 = vadd.f32 %v12366_v6, %v5905_v11  ;;  %v5900_v22 = vadd.f32 %v5899_v21, %v16301_v51  ;;  %v6117_v31 = vpop.f32.mrf.mxu0  ;;  %9513 = vmatprep.subr.bf16.mxu1 %v12959_v2 }
 0x4aa   : > { %v12329_v28 = vpop.f32.mrf.mxu1  ;;  %9503 = vmatpush2.bf16.msra.mxu0 %v12954_v9 }
 0x4ab   : > { %v16377_v40 = vadd.f32 %v6117_v31, %v5900_v22  ;;  %v5915_v48 = vadd.f32 %v12329_v28, %v16307_v56  ;;  %v12369_v29 = vpop.f32.mrf.mxu0  ;;  %9554 = vmatprep.subr.bf16.mxu0 %v12962_v42 }
 0x4ac   : > { %v5909_v10 = vpop.f32.mrf.mxu1 }
 0x4ad   : > { %v16380_v51 = vadd.f32 %v12369_v29, %v5915_v48  ;;  %v5910_v7 = vadd.f32 %v5909_v10, %v16309_v1  ;;  %v6127_v59 = vpop.f32.mrf.mxu0 }
 0x4ae   : > { %v12332_v43 = vpop.f32.mrf.mxu1 }
 0x4af   : > { %v16387_v3 = vadd.f32 %v6127_v59, %v5910_v7  ;;  %v5925_v56 = vadd.f32 %v12332_v43, %v16315_v62  ;;  %v12372_v53 = vpop.f32.mrf.mxu0 }
 0x4b0   : > { %v5919_v39 = vpop.f32.mrf.mxu1 }
 0x4b1   : > { %v16390_v5 = vadd.f32 %v12372_v53, %v5925_v56  ;;  %v5920_v1 = vadd.f32 %v5919_v39, %v16321_v15  ;;  %v6137_v35 = vpop.f32.mrf.mxu0 }
 0x4b2   : > { %v12391_v24 = vpop.f32.mrf.mxu1 }
 0x4b3   : > { %16939 = vst [vmem:[#allocation31_spill] sm:$0xff] %v16390_v5  ;;  %v16395_v54 = vadd.f32 %v6137_v35, %v5920_v1  ;;  %v12431_v49 = vpop.f32.mrf.mxu0 }
 0x4b4   : > { %v6302_v62 = vpop.f32.mrf.mxu1 }
 0x4b5   : > { %16940 = vst [vmem:[#allocation32_spill] sm:$0xff] %v16395_v54  ;;  %v6536_v17 = vpop.f32.mrf.mxu0 }
 0x4b6   : > { %v12394_v33 = vpop.f32.mrf.mxu1 }
 0x4b7   : > { %v16397_v8 = vpop.f32.mrf.mxu0 }
 0x4b8   : > { %v6312_v60 = vpop.f32.mrf.mxu1 }
 0x4b9   : > { %v16399_v50 = vpop.f32.mrf.mxu0 }
 0x4ba   : > { %v12397_v34 = vpop.f32.mrf.mxu1 }
 0x4bb   : > { %v16401_v47 = vpop.f32.mrf.mxu0 }
 0x4bc   : > { %v6322_v15 = vpop.f32.mrf.mxu1 }
 0x4bd   : > { %v16403_v25 = vpop.f32.mrf.mxu0 }
 0x4be   : > { %v12400_v30 = vpop.f32.mrf.mxu1 }
 0x4bf   : > { %v16405_v20 = vpop.f32.mrf.mxu0 }
 0x4c0   : > { %v6332_v23 = vpop.f32.mrf.mxu1 }
 0x4c1   : > { %v16407_v14 = vpop.f32.mrf.mxu0 }
 0x4c2   : > { %v16409_v36 = vpop.f32.mrf.mxu1 }
 0x4c3   : > { %v16411_v27 = vpop.f32.mrf.mxu0 }
 0x4c4   : > { %v16413_v26 = vpop.f32.mrf.mxu1 }
 0x4c5   : > { %v16415_v41 = vpop.f32.mrf.mxu0 }
 0x4c6   : > { %v16417_v19 = vpop.f32.mrf.mxu1 }
 0x4c7   : > { %v16419_v11 = vpop.f32.mrf.mxu0 }
 0x4c8   : > { %v16421_v6 = vpop.f32.mrf.mxu1 }
 0x4c9   : > { %v16423_v21 = vpop.f32.mrf.mxu0 }
 0x4ca   : > { %v16425_v22 = vpop.f32.mrf.mxu1 }
 0x4cb   : > { %v16427_v37 = vpop.f32.mrf.mxu0 }
 0x4cc   : > { %v16429_v18 = vpop.f32.mrf.mxu1 }
 0x4cd   : > { %v16431_v31 = vpop.f32.mrf.mxu0 }
 0x4ce   : > { %v16433_v28 = vpop.f32.mrf.mxu1 }
 0x4cf   : > { %16941 = vst [vmem:[#allocation33_spill] sm:$0xff] %v16433_v28  ;;  %v16435_v32 = vpop.f32.mrf.mxu0 }
 0x4d0   : > { %16942 = vst [vmem:[#allocation34_spill] sm:$0xff] %v16435_v32  ;;  %v16437_v55 = vpop.f32.mrf.mxu1 }
 0x4d1   : > { %16943 = vst [vmem:[#allocation35_spill] sm:$0xff] %v16437_v55  ;;  %v16439_v48 = vpop.f32.mrf.mxu0 }
 0x4d2   : > { %16944 = vst [vmem:[#allocation36_spill] sm:$0xff] %v16439_v48  ;;  %v12471_v29 = vpop.f32.mrf.mxu1 }
 0x4d3   : > { %v12511_v10 = vpop.f32.mrf.mxu0 }
 0x4d4   : > { %v6770_v7 = vpop.f32.mrf.mxu1 }
 0x4d5   : > { %v7005_v52 = vpop.f32.mrf.mxu0 }
 0x4d6   : > { %v12474_v63 = vpop.f32.mrf.mxu1 }
 0x4d7   : > { %v12514_v59 = vpop.f32.mrf.mxu0 }
 0x4d8   : > { %v6780_v43 = vpop.f32.mrf.mxu1 }
 0x4d9   : > { %v16441_v38 = vpop.f32.mrf.mxu0 }
 0x4da   : > { %v12477_v9 = vpop.f32.mrf.mxu1 }
 0x4db   : > { %v16443_v56 = vpop.f32.mrf.mxu0 }
 0x4dc   : > { %16945 = vst [vmem:[#allocation37_spill] sm:$0xff] %v16443_v56  ;;  %v6790_v53 = vpop.f32.mrf.mxu1 }
 0x4dd   : > { %v16445_v39 = vpop.f32.mrf.mxu0 }
 0x4de   : > { %16946 = vst [vmem:[#allocation38_spill] sm:$0xff] %v16445_v39  ;;  %v16447_v1 = vpop.f32.mrf.mxu1  ;;  %v6382_v39 = vadd.f32 %v12391_v24, %v16327_v45  ;;  %v6383_v45 = vadd.f32 %v6312_v60, %v16341_v44 }
 0x4df   : > { %v16449_v2 = vpop.f32.mrf.mxu0 }
 0x4e0   : > { %16947 = vst [vmem:[#allocation39_spill] sm:$0xff] %v16449_v2  ;;  %v16451_v42 = vpop.f32.mrf.mxu1  ;;  %v6381_v2 = vadd.f32 %v6302_v62, %v16333_v58  ;;  %v6617_v44 = vadd.f32 %v16399_v50, %v6383_v45 }
 0x4e1   : > { %16948 = vst [vmem:[#allocation40_spill] sm:$0xff] %v16451_v42  ;;  %v16453_v35 = vpop.f32.mrf.mxu0 }
 0x4e2   : > { %16949 = vst [vmem:[#allocation41_spill] sm:$0xff] %v16453_v35  ;;  %v16455_v48 = vpop.f32.mrf.mxu1 }
 0x4e3   : > { %16950 = vst [vmem:[#allocation42_spill] sm:$0xff] %v16455_v48  ;;  %v16457_v32 = vpop.f32.mrf.mxu0  ;;  %v6616_v48 = vadd.f32 %v12431_v49, %v6382_v39 }
 0x4e4   : > { %16951 = vst [vmem:[#allocation43_spill] sm:$0xff] %v16457_v32  ;;  %v16459_v55 = vpop.f32.mrf.mxu1  ;;  %v6384_v32 = vadd.f32 %v12394_v33, %v16335_v13  ;;  %v6388_v13 = vadd.f32 %v12400_v30, %v16351_v16  ;;  %v6389_v16 = vadd.f32 %v16413_v26, %v16367_v4  ;;  %v6851_v4 = vadd.f32 %v6780_v43, %v6617_v44 }
 0x4e5   : > { %16952 = vst [vmem:[#allocation44_spill] sm:$0xff] %v16459_v55  ;;  %v16461_v54 = vpop.f32.mrf.mxu0  ;;  %v6850_v24 = vadd.f32 %v12471_v29, %v6616_v48 }
 0x4e6   : > { %16953 = vst [vmem:[#allocation45_spill] sm:$0xff] %v16461_v54  ;;  %v16463_v56 = vpop.f32.mrf.mxu1  ;;  %v6618_v49 = vadd.f32 %v16397_v8, %v6384_v32  ;;  %v6390_v8 = vadd.f32 %v16409_v36, %v16360_v46  ;;  %v6622_v50 = vadd.f32 %v16405_v20, %v6388_v13  ;;  %v6393_v46 = vadd.f32 %v16429_v18, %v16387_v3  ;;  %v16517_v20 = vld [vmem:[%s16958_s22] ss:$0 sm:$0xff] }
 0x4e7   : > { %16954 = vst [vmem:[#allocation46_spill] sm:$0xff] %v16463_v56  ;;  %v16466_v28 = vpop.f32.mrf.mxu0  ;;  %v6615_v56 = vadd.f32 %v6536_v17, %v6381_v2  ;;  %v6387_v17 = vadd.f32 %v6332_v23, %v16357_v0  ;;  %v6392_v0 = vadd.f32 %v16417_v19, %v16370_v12  ;;  %v16960_v2 = vld [vmem:[#allocation33_spill] sm:$0xff] }
 0x4e8   : > { %16955 = vst [vmem:[#allocation47_spill] sm:$0xff] %v16466_v28  ;;  %v16468_v5 = vpop.f32.mrf.mxu1  ;;  %v6386_v28 = vadd.f32 %v12397_v34, %v16343_v57  ;;  %v7085_v57 = vadd.f32 %v12511_v10, %v6850_v24  ;;  %v6852_v60 = vadd.f32 %v12474_v63, %v6618_v49  ;;  %v6627_v63 = vadd.f32 %v16431_v31, %v6393_v46  ;;  %v16968_v46 = vld [vmem:[#allocation34_spill] sm:$0xff] }
 0x4e9   : > { %16956 = vst [vmem:[#allocation48_spill] sm:$0xff] %v16468_v5  ;;  %v16471_v42 = vpop.f32.mrf.mxu0  ;;  %v6385_v5 = vadd.f32 %v6322_v15, %v16349_v61  ;;  %v6849_v33 = vadd.f32 %v6770_v7, %v6615_v56  ;;  %v6621_v36 = vadd.f32 %v16407_v14, %v6387_v17  ;;  %v6626_v48 = vadd.f32 %v16419_v11, %v6392_v0 }
 0x4ea   : > { %v16473_v35 = vpop.f32.mrf.mxu1  ;;  %v6620_v61 = vadd.f32 %v16401_v47, %v6386_v28  ;;  %v6391_v47 = vadd.f32 %v16421_v6, %v16377_v40  ;;  %v7087_v26 = vadd.f32 %v12514_v59, %v6852_v60  ;;  %v6624_v6 = vadd.f32 %v16411_v27, %v6390_v8  ;;  %v16965_v60 = vld [vmem:[#allocation35_spill] sm:$0xff] }
 0x4eb   : > { %v16476_v55 = vpop.f32.mrf.mxu0  ;;  %v6619_v34 = vadd.f32 %v16403_v25, %v6385_v5  ;;  %v7084_v23 = vadd.f32 %v7005_v52, %v6849_v33  ;;  %v6394_v5 = vadd.f32 %v16425_v22, %v16380_v51  ;;  %v6623_v51 = vadd.f32 %v16415_v41, %v6389_v16  ;;  %v16963_v33 = vld [vmem:[#allocation40_spill] sm:$0xff] }
 0x4ec   : > { %16957 = vst [vmem:[#allocation49_spill] sm:$0xff] %v16476_v55  ;;  %v16478_v54 = vpop.f32.mrf.mxu1  ;;  %v6854_v22 = vadd.f32 %v12477_v9, %v6620_v61  ;;  %v6625_v14 = vadd.f32 %v16423_v21, %v6391_v47  ;;  %v7086_v27 = vadd.f32 %v16441_v38, %v6851_v4  ;;  %v6856_v43 = vadd.f32 %v16447_v1, %v6622_v50  ;;  %v16961_v21 = vld [vmem:[#allocation37_spill] sm:$0xff] }
 0x4ed   : > { %v16483_v58 = vpop.f32.mrf.mxu0  ;;  %v6853_v3 = vadd.f32 %v6790_v53, %v6619_v34  ;;  %v6628_v52 = vadd.f32 %v16427_v37, %v6394_v5  ;;  %v16959_v53 = vld [vmem:[#allocation31_spill] sm:$0xff]  ;;  %v16962_v37 = vld [vmem:[#allocation38_spill] sm:$0xff]  ;;  %v6855_v44 = vadd.f32 %v16963_v33, %v6621_v36 }
 0x4ee   : > { %v16485_v62 = vpop.f32.mrf.mxu1  ;;  %v6396_v45 = vadd.f32 %v16960_v2, %v16959_v53  ;;  %v7089_v24 = vadd.f32 %v16961_v21, %v6854_v22  ;;  %v16966_v34 = vld [vmem:[#allocation42_spill] sm:$0xff]  ;;  %v16974_v21 = vld [vmem:[#allocation45_spill] sm:$0xff] }
 0x4ef   : > { %v16489_v39 = vpop.f32.mrf.mxu0  ;;  %v7088_v49 = vadd.f32 %v16962_v37, %v6853_v3  ;;  %v6858_v8 = vadd.f32 %v16966_v34, %v6624_v6  ;;  %v16970_v6 = vld [vmem:[#allocation41_spill] sm:$0xff]  ;;  %v6862_v33 = vadd.f32 %v16473_v35, %v6628_v52 }
 0x4f0   : > { %v16491_v55 = vpop.f32.mrf.mxu1  ;;  %v6630_v4 = vadd.f32 %v16968_v46, %v6396_v45  ;;  %v7090_v22 = vadd.f32 %v16970_v6, %v6855_v44  ;;  %v16975_v37 = vld [vmem:[#allocation48_spill] sm:$0xff] }
 0x4f1   : > { %v16501_v15 = vpop.f32.mrf.mxu0 }
 0x4f2   : > { %v12551_v30 = vpop.f32.mrf.mxu1 }
 0x4f3   : > { %v7319_v32 = vadd.f32 %v12551_v30, %v7085_v57  ;;  %v12591_v25 = vpop.f32.mrf.mxu0  ;;  %v16964_v57 = vld [vmem:[#allocation32_spill] sm:$0xff] }
 0x4f4   : > { %v7239_v12 = vpop.f32.mrf.mxu1  ;;  %v6395_v61 = vadd.f32 %v16965_v60, %v16964_v57  ;;  %v6861_v57 = vadd.f32 %v16478_v54, %v6627_v63  ;;  %v6864_v60 = vadd.f32 %v16485_v62, %v6630_v4 }
 0x4f5   : > { %v7553_v19 = vadd.f32 %v12591_v25, %v7319_v32  ;;  %v7318_v40 = vadd.f32 %v7239_v12, %v7084_v23  ;;  %v7473_v18 = vpop.f32.mrf.mxu0  ;;  %v16967_v23 = vld [vmem:[#allocation39_spill] sm:$0xff]  ;;  %v16969_v25 = vld [vmem:[#allocation44_spill] sm:$0xff] }
 0x4f6   : > { %v12554_v28 = vpop.f32.mrf.mxu1  ;;  %v7091_v32 = vadd.f32 %v16967_v23, %v6856_v43  ;;  %v6857_v12 = vadd.f32 %v16969_v25, %v6623_v51  ;;  %v16977_v23 = vld [vmem:[#allocation49_spill] sm:$0xff]  ;;  %v7096_v4 = vadd.f32 %v16483_v58, %v6861_v57  ;;  %v7099_v25 = vadd.f32 %v16489_v39, %v6864_v60 }
 0x4f7   : > { %v16524_v29 = vadd.f32 %v16517_v20, %v7553_v19  ;;  %v7552_v10 = vadd.f32 %v7473_v18, %v7318_v40  ;;  %v7321_v7 = vadd.f32 %v12554_v28, %v7087_v26  ;;  %v12594_v41 = vpop.f32.mrf.mxu0  ;;  %v16971_v28 = vld [vmem:[#allocation36_spill] sm:$0xff] }
 0x4f8   : > { %v7249_v59 = vpop.f32.mrf.mxu1 }
 0x4f9   : > { %v7608_v9 = vmul.f32 0.70710677, %v16524_v29  ;;  %v16533_v11 = vadd.f32 %v16517_v20, %v7552_v10  ;;  %v7555_v56 = vadd.f32 %v12594_v41, %v7321_v7  ;;  %v7320_v31 = vadd.f32 %v7249_v59, %v7086_v27  ;;  %v7483_v13 = vpop.f32.mrf.mxu0  ;;  %v16972_v7 = vld [vmem:[#allocation43_spill] sm:$0xff] }
 0x4fa   : > { %v12557_v38 = vpop.f32.mrf.mxu1  ;;  %v6629_v10 = vadd.f32 %v16971_v28, %v6395_v61  ;;  %v7093_v27 = vadd.f32 %v16972_v7, %v6858_v8  ;;  %v16976_v8 = vld [vmem:[#allocation47_spill] sm:$0xff] }
 0x4fb   : > { %13245 = verf.f32 %v7608_v9  ;;  %v7607_v1 = vmul.f32 0.70710677, %v16533_v11  ;;  %v16542_v17 = vadd.f32 %v16517_v20, %v7555_v56  ;;  %v7554_v16 = vadd.f32 %v7483_v13, %v7320_v31  ;;  %v12597_v50 = vpop.f32.mrf.mxu0  ;;  %v16973_v9 = vld [vmem:[#allocation46_spill] sm:$0xff] }
 0x4fc   : > { %v7323_v30 = vadd.f32 %v12557_v38, %v7089_v24  ;;  %v7259_v0 = vpop.f32.mrf.mxu1  ;;  %v6860_v56 = vadd.f32 %v16973_v9, %v6626_v48  ;;  %v7092_v24 = vadd.f32 %v16974_v21, %v6857_v12  ;;  %v7591_v7 = vmul.f32 0.5, %v16533_v11 }
 0x4fd   : > { %13247 = verf.f32 %v7607_v1  ;;  %v7610_v47 = vmul.f32 0.70710677, %v16542_v17  ;;  %v7322_v5 = vadd.f32 %v7259_v0, %v7088_v49  ;;  %v16552_v36 = vadd.f32 %v16517_v20, %v7554_v16  ;;  %v7493_v19 = vpop.f32.mrf.mxu0 }
 0x4fe   : > { %v7557_v26 = vadd.f32 %v12597_v50, %v7323_v30  ;;  %v12560_v40 = vpop.f32.mrf.mxu1  ;;  %v6859_v49 = vadd.f32 %v16975_v37, %v6625_v14  ;;  %v7095_v16 = vadd.f32 %v16976_v8, %v6860_v56  ;;  %v6863_v50 = vadd.f32 %v16491_v55, %v6629_v10 }
 0x4ff   : > { %13249 = verf.f32 %v7610_v47  ;;  %v7556_v3 = vadd.f32 %v7493_v19, %v7322_v5  ;;  %v7325_v18 = vadd.f32 %v12560_v40, %v7091_v32  ;;  %v7609_v41 = vmul.f32 0.70710677, %v16552_v36  ;;  %v12600_v51 = vpop.f32.mrf.mxu0 }
 0x500   : > { %v16559_v59 = vadd.f32 %v16517_v20, %v7557_v26  ;;  %v7269_v43 = vpop.f32.mrf.mxu1  ;;  %v7094_v52 = vadd.f32 %v16471_v42, %v6859_v49  ;;  %v7097_v32 = vadd.f32 %v16977_v23, %v6862_v33  ;;  %v7594_v9 = vmul.f32 0.5, %v16542_v17 }
 0x501   : > { %v16563_v53 = vadd.f32 %v16517_v20, %v7556_v3  ;;  %v7559_v2 = vadd.f32 %v12600_v51, %v7325_v18  ;;  %v7324_v45 = vadd.f32 %v7269_v43, %v7090_v22  ;;  %13251 = verf.f32 %v7609_v41  ;;  %v7503_v13 = vpop.f32.mrf.mxu0 }
 0x502   : > { %v7612_v31 = vmul.f32 0.70710677, %v16559_v59  ;;  %v12563_v38 = vpop.f32.mrf.mxu1  ;;  %v7098_v3 = vadd.f32 %v16501_v15, %v6863_v50  ;;  %v7592_v18 = vmul.f32 0.5, %v16524_v29  ;;  %v7596_v60 = vmul.f32 0.5, %v16559_v59 }
 0x503   : > { %v7611_v44 = vmul.f32 0.70710677, %v16563_v53  ;;  %v16571_v48 = vadd.f32 %v16517_v20, %v7559_v2  ;;  %v7558_v1 = vadd.f32 %v7503_v13, %v7324_v45  ;;  %v7327_v61 = vadd.f32 %v12563_v38, %v7093_v27  ;;  %v12603_v14 = vpop.f32.mrf.mxu0 }
 0x504   : > { %13253 = verf.f32 %v7612_v31  ;;  %v7279_v34 = vpop.f32.mrf.mxu1 }
 0x505   : > { %13255 = verf.f32 %v7611_v44  ;;  %v7614_v30 = vmul.f32 0.70710677, %v16571_v48  ;;  %v16578_v35 = vadd.f32 %v16517_v20, %v7558_v1  ;;  %v7561_v0 = vadd.f32 %v12603_v14, %v7327_v61  ;;  %v7513_v63 = vpop.f32.mrf.mxu0 }
 0x506   : > { %v7326_v54 = vadd.f32 %v7279_v34, %v7092_v24  ;;  %v12566_v62 = vpop.f32.mrf.mxu1  ;;  %v7593_v44 = vmul.f32 0.5, %v16552_v36 }
 0x507   : > { %13257 = verf.f32 %v7614_v30  ;;  %v7613_v47 = vmul.f32 0.70710677, %v16578_v35  ;;  %v7329_v5 = vadd.f32 %v12566_v62, %v7095_v16  ;;  %v16587_v12 = vadd.f32 %v16517_v20, %v7561_v0  ;;  %v12606_v26 = vpop.f32.mrf.mxu0 }
 0x508   : > { %v13246_v46 = vpop.eup %13245  ;;  %v7560_v42 = vadd.f32 %v7513_v63, %v7326_v54  ;;  %v7289_v55 = vpop.f32.mrf.mxu1  ;;  %v7595_v30 = vmul.f32 0.5, %v16563_v53 }
 0x509   : > { %v7640_v19 = vadd.f32 1.0, %v13246_v46  ;;  %13259 = verf.f32 %v7613_v47  ;;  %v7328_v40 = vadd.f32 %v7289_v55, %v7094_v52  ;;  %v7563_v6 = vadd.f32 %v12606_v26, %v7329_v5  ;;  %v7523_v10 = vpop.f32.mrf.mxu0 }
 0x50a   : > { %v13248_v22 = vpop.eup %13247  ;;  %v7616_v28 = vmul.f32 0.70710677, %v16587_v12  ;;  %v16593_v58 = vadd.f32 %v16517_v20, %v7560_v42  ;;  %v12569_v39 = vpop.f32.mrf.mxu1 }
 0x50b   : > { %v7639_v27 = vadd.f32 1.0, %v13248_v22  ;;  %v16597_v41 = vadd.f32 %v16517_v20, %v7563_v6  ;;  %v7331_v51 = vadd.f32 %v12569_v39, %v7097_v32  ;;  %v7562_v29 = vadd.f32 %v7523_v10, %v7328_v40  ;;  %v12609_v2 = vpop.f32.mrf.mxu0 }
 0x50c   : > { %v13250_v43 = vpop.eup %13249  ;;  %13261 = verf.f32 %v7616_v28  ;;  %v7615_v15 = vmul.f32 0.70710677, %v16593_v58  ;;  %v7299_v56 = vpop.f32.mrf.mxu1  ;;  %v7656_v45 = vmul.f32 %v7640_v19, %v7592_v18  ;;  %v7597_v18 = vmul.f32 0.5, %v16578_v35 }
 0x50d   : > { %v7655_v21 = vmul.f32 %v7639_v27, %v7591_v7  ;;  %v7642_v24 = vadd.f32 1.0, %v13250_v43  ;;  %v7618_v37 = vmul.f32 0.70710677, %v16597_v41  ;;  %v16603_v11 = vadd.f32 %v16517_v20, %v7562_v29  ;;  %v7533_v38 = vpop.f32.mrf.mxu0 }
 0x50e   : > { %13263 = verf.f32 %v7615_v15  ;;  %v7330_v49 = vadd.f32 %v7299_v56, %v7096_v4  ;;  %v7565_v31 = vadd.f32 %v12609_v2, %v7331_v51  ;;  %v12572_v13 = vpop.f32.mrf.mxu1  ;;  %v13252_v17 = vpop.eup %13251  ;;  %v7599_v29 = vmul.f32 0.5, %v16593_v58 }
 0x50f   : > { %v7671_v33 = vmax.f32 %v7655_v21, %v7656_v45  ;;  %13265 = verf.f32 %v7618_v37  ;;  %v7333_v1 = vadd.f32 %v12572_v13, %v7099_v25  ;;  %v7641_v57 = vadd.f32 1.0, %v13252_v17  ;;  %v12612_v8 = vpop.f32.mrf.mxu0 }
 0x510   : > { %v7617_v61 = vmul.f32 0.70710677, %v16603_v11  ;;  %v16609_v14 = vadd.f32 %v16517_v20, %v7565_v31  ;;  %v7309_v34 = vpop.f32.mrf.mxu1  ;;  %v7564_v52 = vadd.f32 %v7533_v38, %v7330_v49  ;;  %v7658_v54 = vmul.f32 %v7642_v24, %v7594_v9 }
 0x511   : > { %v13254_v16 = vpop.eup %13253  ;;  %7679 = vst [vmem:[#allocation6] sm:$0xff] %v7671_v33  ;;  %v7332_v50 = vadd.f32 %v7309_v34, %v7098_v3  ;;  %v7567_v0 = vadd.f32 %v12612_v8, %v7333_v1  ;;  %v7657_v63 = vmul.f32 %v7641_v57, %v7593_v44  ;;  %v7543_v59 = vpop.f32.mrf.mxu0  ;;  %v7598_v3 = vmul.f32 0.5, %v16571_v48 }
 0x512   : > { %v13256_v36 = vpop.eup %13255  ;;  %v7644_v62 = vadd.f32 1.0, %v13254_v16  ;;  %13267 = verf.f32 %v7617_v61  ;;  %v7620_v32 = vmul.f32 0.70710677, %v16609_v14  ;;  %v7587_v47 = vadd.f32 %v16517_v20, %v7564_v52 }
 0x513   : > { %v7643_v23 = vadd.f32 1.0, %v13256_v36  ;;  %v7590_v5 = vadd.f32 %v16517_v20, %v7567_v0  ;;  %v7673_v4 = vmax.f32 %v7657_v63, %v7658_v54  ;;  %v7566_v25 = vadd.f32 %v7543_v59, %v7332_v50 }
 0x514   : > { %v13258_v46 = vpop.eup %13257  ;;  %v7660_v53 = vmul.f32 %v7644_v62, %v7596_v60  ;;  %13269 = verf.f32 %v7620_v32  ;;  %v7619_v19 = vmul.f32 0.70710677, %v7587_v47  ;;  %v7602_v24 = vmul.f32 0.5, %v16597_v41 }
 0x515   : > { %v7659_v42 = vmul.f32 %v7643_v23, %v7595_v30  ;;  %v7646_v55 = vadd.f32 1.0, %v13258_v46  ;;  %7680 = vst [vmem:[#allocation6 + $0x8] sm:$0xff] %v7673_v4  ;;  %v7622_v40 = vmul.f32 0.70710677, %v7590_v5  ;;  %v7589_v6 = vadd.f32 %v16517_v20, %v7566_v25 }
 0x516   : > { %v13260_v26 = vpop.eup %13259  ;;  %13271 = verf.f32 %v7619_v19  ;;  %v7600_v20 = vmul.f32 0.5, %v16587_v12  ;;  %v7601_v37 = vmul.f32 0.5, %v16603_v11  ;;  %v7604_v58 = vmul.f32 0.5, %v16609_v14 }
 0x517   : > { %v7675_v22 = vmax.f32 %v7659_v42, %v7660_v53  ;;  %v7645_v28 = vadd.f32 1.0, %v13260_v26  ;;  %v7621_v39 = vmul.f32 0.70710677, %v7589_v6  ;;  %v7662_v7 = vmul.f32 %v7646_v55, %v7598_v3 }
 0x518   : > { %13273 = verf.f32 %v7622_v40  ;;  %v7603_v1 = vmul.f32 0.5, %v7587_v47  ;;  %v7693_v60 = vld [vmem:[#allocation6 + $0x2] sm:$0x1]  ;;  %v7695_v61 = vld [vmem:[#allocation6 + $0x3] sm:$0x1]  ;;  %v7606_v34 = vmul.f32 0.5, %v7590_v5 }
 0x519   : > { %v13262_v10 = vpop.eup %13261  ;;  %7681 = vst [vmem:[#allocation6 + $0x10] sm:$0xff] %v7675_v22  ;;  %v7661_v27 = vmul.f32 %v7645_v28, %v7597_v18  ;;  %13275 = verf.f32 %v7621_v39  ;;  %v7705_v8 = vld [vmem:[#allocation6 + $0x6] sm:$0x1]  ;;  %v7707_v16 = vld [vmem:[#allocation6 + $0x7] sm:$0x1]  ;;  %v7605_v50 = vmul.f32 0.5, %v7589_v6  ;;  %v7697_v55 = vmax.f32 %v7693_v60, %v7695_v61 }
 0x51a   : > { %v7648_v51 = vadd.f32 1.0, %v13262_v10  ;;  %v7687_v36 = vld [vmem:[#allocation6] sm:$0x1]  ;;  %v7689_v54 = vld [vmem:[#allocation6 + $0x1] sm:$0x1]  ;;  %v7709_v28 = vmax.f32 %v7705_v8, %v7707_v16 }
 0x51b   : > { %v13264_v43 = vpop.eup %13263  ;;  %v7677_v9 = vmax.f32 %v7661_v27, %v7662_v7  ;;  %v7699_v63 = vld [vmem:[#allocation6 + $0x4] sm:$0x1]  ;;  %v7701_v14 = vld [vmem:[#allocation6 + $0x5] sm:$0x1]  ;;  %v12966_v8 = vld [vmem:[%s13723_s20 + $0x360] ss:$8 sps:$4 sm:$0xff]  }
 0x51c   : > { %v13266_v15 = vpop.eup %13265  ;;  %v7647_v48 = vadd.f32 1.0, %v13264_v43  ;;  %v7664_v35 = vmul.f32 %v7648_v51, %v7600_v20  ;;  %v7718_v32 = vld [vmem:[#allocation6 + $0xa] sm:$0x1]  ;;  %v7720_v22 = vld [vmem:[#allocation6 + $0xb] sm:$0x1]  ;;  %v7691_v51 = vmax.f32 %v7687_v36, %v7689_v54 }
 0x51d   : > { %7682 = vst [vmem:[#allocation6 + $0x18] sm:$0xff] %v7677_v9  ;;  %v7650_v2 = vadd.f32 1.0, %v13266_v15  ;;  %v7730_v10 = vld [vmem:[#allocation6 + $0xe] sm:$0x1]  ;;  %v7732_v7 = vld [vmem:[#allocation6 + $0xf] sm:$0x1]  ;;  %v7703_v9 = vmax.f32 %v7699_v63, %v7701_v14 }
 0x51e   : > { %v7663_v56 = vmul.f32 %v7647_v48, %v7599_v29  ;;  %v12977_v36 = vld [vmem:[%s13723_s20 + $0x244] ss:$8 sps:$4 sm:$0xff]   ;;  %v12975_v63 = vld [vmem:[%s13723_s20 + $0x240] ss:$8 sps:$4 sm:$0xff]  }
 0x51f   : > { %v13268_v45 = vpop.eup %13267  ;;  %v7666_v13 = vmul.f32 %v7650_v2, %v7602_v24  ;;  %v12980_v54 = vld [vmem:[%s13723_s20 + $0x344] ss:$8 sps:$4 sm:$0xff]   ;;  %v12978_v14 = vld [vmem:[%s13723_s20 + $0x340] ss:$8 sps:$4 sm:$0xff]  }
 0x520   : > { %v7672_v21 = vmax.f32 %v7663_v56, %v7664_v35  ;;  %v7649_v49 = vadd.f32 1.0, %v13268_v45  ;;  %v7722_v35 = vmax.f32 %v7718_v32, %v7720_v22  ;;  %v12984_v32 = vld [vmem:[%s13723_s20 + $0x330] ss:$8 sps:$4 sm:$0xff]   ;;  %v13007_v22 = vld [vmem:[%s13723_s20 + $0x2f4] ss:$8 sps:$4 sm:$0xff]  }
 0x521   : > { %v13270_v31 = vpop.eup %13269 }
 0x522   : > { %7683 = vst [vmem:[#allocation6 + $0x20] sm:$0xff] %v7672_v21  ;;  %v7665_v38 = vmul.f32 %v7649_v49, %v7601_v37  ;;  %v7652_v12 = vadd.f32 1.0, %v13270_v31  ;;  %v12957_v37 = vld [vmem:[%s13723_s20 + $0x270] ss:$8 sps:$4 sm:$0xff]  }
 0x523   : > { %v13272_v33 = vpop.eup %13271 }
 0x524   : > { %v7674_v17 = vmax.f32 %v7665_v38, %v7666_v13  ;;  %v7651_v57 = vadd.f32 1.0, %v13272_v33  ;;  %v7668_v30 = vmul.f32 %v7652_v12, %v7604_v58  ;;  %v12960_v38 = vld [vmem:[%s13723_s20 + $0x370] ss:$8 sps:$4 sm:$0xff]   ;;  %v12965_v33 = vld [vmem:[%s13723_s20 + $0x264] ss:$8 sps:$4 sm:$0xff]  }
 0x525   : > { %v13274_v44 = vpop.eup %13273 }
 0x526   : > { %7684 = vst [vmem:[#allocation6 + $0x28] sm:$0xff] %v7674_v17  ;;  %v13276_v41 = vpop.eup %13275  ;;  %v7654_v11 = vadd.f32 1.0, %v13274_v44  ;;  %v7667_v52 = vmul.f32 %v7651_v57, %v7603_v1  ;;  %v12968_v1 = vld [vmem:[%s13723_s20 + $0x364] ss:$8 sps:$4 sm:$0xff]   ;;  %v7734_v57 = vmax.f32 %v7730_v10, %v7732_v7  ;;  %v13011_v7 = vld [vmem:[%s13723_s20 + $0x2e0] ss:$8 sps:$4 sm:$0xff]  }
 0x527   : > { %v7653_v0 = vadd.f32 1.0, %v13276_v41  ;;  %v12963_v41 = vld [vmem:[%s13723_s20 + $0x260] ss:$8 sps:$4 sm:$0xff]   ;;  %v13016_v10 = vld [vmem:[%s13723_s20 + $0x3e4] ss:$8 sps:$4 sm:$0xff]  }
 0x528   : > { %v7676_v47 = vmax.f32 %v7667_v52, %v7668_v30  ;;  %v7670_v46 = vmul.f32 %v7654_v11, %v7606_v34  ;;  %v12971_v30 = vld [vmem:[%s13723_s20 + $0x254] ss:$8 sps:$4 sm:$0xff]  }
 0x529   : > { %v7694_v62 = vld [vmem:[#allocation6 + $0x22] sm:$0x1]  ;;  %v7696_v59 = vld [vmem:[#allocation6 + $0x23] sm:$0x1]  ;;  %v7706_v23 = vld [vmem:[#allocation6 + $0x26] sm:$0x1]  ;;  %v7669_v4 = vmul.f32 %v7653_v0, %v7605_v50 }
 0x52a   : > { %v7698_v25 = vmax.f32 %v7694_v62, %v7696_v59  ;;  %v7708_v5 = vld [vmem:[#allocation6 + $0x27] sm:$0x1]  ;;  %v7688_v53 = vld [vmem:[#allocation6 + $0x20] sm:$0x1]  ;;  %v7690_v42 = vld [vmem:[#allocation6 + $0x21] sm:$0x1] }
 0x52b   : > { %v7710_v26 = vmax.f32 %v7706_v23, %v7708_v5  ;;  %v7692_v19 = vmax.f32 %v7688_v53, %v7690_v42  ;;  %v7700_v40 = vld [vmem:[#allocation6 + $0x24] sm:$0x1]  ;;  %v7702_v6 = vld [vmem:[#allocation6 + $0x25] sm:$0x1]  ;;  %7685 = vst [vmem:[#allocation6 + $0x30] sm:$0xff] %v7676_v47  ;;  %v7678_v3 = vmax.f32 %v7669_v4, %v7670_v46 }
 0x52c   : > { %v7794_v18 = vrot.slane %v7698_v25, 7  ;;  %v7704_v39 = vmax.f32 %v7700_v40, %v7702_v6  ;;  %v12974_v52 = vld [vmem:[%s13723_s20 + $0x354] ss:$8 sps:$4 sm:$0xff]   ;;  %v12969_v50 = vld [vmem:[%s13723_s20 + $0x250] ss:$8 sps:$4 sm:$0xff]  }
 0x52d   : > { %v7804_v27 = vrot.slane %v7710_v26, 7  ;;  %v7788_v43 = vrot.slane %v7692_v19, 7  ;;  %v7719_v15 = vld [vmem:[#allocation6 + $0x2a] sm:$0x1]  ;;  %v7721_v20 = vld [vmem:[#allocation6 + $0x2b] sm:$0x1] }
 0x52e   : > { %7686 = vst [vmem:[#allocation6 + $0x38] sm:$0xff] %v7678_v3  ;;  %v7795_v29 = vsel %vm7789_vm6, %v7794_v18, %v7697_v55  ;;  %v7799_v48 = vrot.slane %v7704_v39, 7  ;;  %v7723_v56 = vmax.f32 %v7719_v15, %v7721_v20  ;;  %v7731_v2 = vld [vmem:[#allocation6 + $0x2e] sm:$0x1]  ;;  %v7733_v45 = vld [vmem:[#allocation6 + $0x2f] sm:$0x1] }
 0x52f   : > { %v7868_v21 = vpack.c.bf16 %v7795_v29, %v7795_v29  ;;  %v7805_v24 = vsel %vm7789_vm6, %v7804_v27, %v7709_v28  ;;  %v7790_v49 = vsel %vm7789_vm6, %v7788_v43, %v7691_v51  ;;  %v7735_v31 = vmax.f32 %v7731_v2, %v7733_v45  ;;  %v12972_v0 = vld [vmem:[%s13723_s20 + $0x350] ss:$8 sps:$4 sm:$0xff]   ;;  %v12983_v62 = vld [vmem:[%s13723_s20 + $0x234] ss:$8 sps:$4 sm:$0xff]   ;;  %v12989_v47 = vld [vmem:[%s13723_s20 + $0x224] ss:$8 sps:$4 sm:$0xff]  }
 0x530   : > { %v7870_v13 = vpack.c.bf16 %v7805_v24, %v7805_v24  ;;  %v7867_v17 = vpack.c.bf16 %v7790_v49, %v7790_v49  ;;  %v7800_v12 = vsel %vm7789_vm6, %v7799_v48, %v7703_v9  ;;  %v7814_v58 = vrot.slane %v7723_v56, 7  ;;  %v12986_v59 = vld [vmem:[%s13723_s20 + $0x334] ss:$8 sps:$4 sm:$0xff]   ;;  %v12981_v23 = vld [vmem:[%s13723_s20 + $0x230] ss:$8 sps:$4 sm:$0xff]  }
 0x531   : > { %9463 = vmatprep.mubr.bf16.mxu1 %v7868_v21  ;;  %v7869_v44 = vpack.c.bf16 %v7800_v12, %v7800_v12  ;;  %v7824_v60 = vrot.slane %v7735_v31, 7  ;;  %v12992_v46 = vld [vmem:[%s13723_s20 + $0x324] ss:$8 sps:$4 sm:$0xff]   ;;  %v12987_v4 = vld [vmem:[%s13723_s20 + $0x220] ss:$8 sps:$4 sm:$0xff]  }
 0x532   : > { %9504 = vmatprep.mubr.bf16.mxu0 %v7870_v13  ;;  %9464 = vmatmul.mubr.bf16.vlgmr.msra.gmra.mxu1 %v7867_v17  ;;  %v7815_v61 = vsel %vm7789_vm6, %v7814_v58, %v7722_v35  ;;  %v12990_v25 = vld [vmem:[%s13723_s20 + $0x320] ss:$8 sps:$4 sm:$0xff]   ;;  %v12995_v5 = vld [vmem:[%s13723_s20 + $0x214] ss:$8 sps:$4 sm:$0xff]   ;;  %v12993_v42 = vld [vmem:[%s13723_s20 + $0x210] ss:$8 sps:$4 sm:$0xff]  }
 0x533   : > { %9505 = vmatmul.mubr.bf16.vlgmr.msra.gmra.mxu0 %v7869_v44  ;;  %9514 = vmatpush1.bf16.msra.mxu1 %v12957_v37  ;;  %v7872_v34 = vpack.c.bf16 %v7815_v61, %v7815_v61  ;;  %v7825_v11 = vsel %vm7789_vm6, %v7824_v60, %v7734_v57  ;;  %v12998_v53 = vld [vmem:[%s13723_s20 + $0x314] ss:$8 sps:$4 sm:$0xff]   ;;  %v12996_v55 = vld [vmem:[%s13723_s20 + $0x310] ss:$8 sps:$4 sm:$0xff]   ;;  %v13001_v26 = vld [vmem:[%s13723_s20 + $0x204] ss:$8 sps:$4 sm:$0xff]  }
 0x534   : > { %9555 = vmatpush1.bf16.msra.mxu0 %v12960_v38  ;;  %9515 = vmatprep.subr.bf16.mxu1 %v12965_v33  ;;  %v7874_v16 = vpack.c.bf16 %v7825_v11, %v7825_v11  ;;  %v13004_v19 = vld [vmem:[%s13723_s20 + $0x304] ss:$8 sps:$4 sm:$0xff]   ;;  %v12999_v40 = vld [vmem:[%s13723_s20 + $0x200] ss:$8 sps:$4 sm:$0xff]   ;;  %v13010_v3 = vld [vmem:[%s13723_s20 + $0x3f4] ss:$8 sps:$4 sm:$0xff]  }
 0x535   : > { %9545 = vmatprep.mubr.bf16.mxu1 %v7872_v34  ;;  %9556 = vmatprep.subr.bf16.mxu0 %v12968_v1  ;;  %v13002_v6 = vld [vmem:[%s13723_s20 + $0x300] ss:$8 sps:$4 sm:$0xff]   ;;  %v13005_v18 = vld [vmem:[%s13723_s20 + $0x2f0] ss:$8 sps:$4 sm:$0xff]   ;;  %v13013_v39 = vld [vmem:[%s13723_s20 + $0x2e4] ss:$8 sps:$4 sm:$0xff]  }
 0x536   : > { %9586 = vmatprep.mubr.bf16.mxu0 %v7874_v16  ;;  %v13008_v28 = vld [vmem:[%s13723_s20 + $0x3f0] ss:$8 sps:$4 sm:$0xff]   ;;  %v13014_v27 = vld [vmem:[%s13723_s20 + $0x3e0] ss:$8 sps:$4 sm:$0xff]   ;;  %v13019_v51 = vld [vmem:[%s13723_s20 + $0x2d4] ss:$8 sps:$4 sm:$0xff]  }
 0x537   : > { %9516 = vmatpush1.bf16.msra.mxu1 %v12963_v41  ;;  %v13022_v43 = vld [vmem:[%s13723_s20 + $0x3d4] ss:$8 sps:$4 sm:$0xff]   ;;  %v13017_v9 = vld [vmem:[%s13723_s20 + $0x2d0] ss:$8 sps:$4 sm:$0xff]   ;;  %v13025_v20 = vld [vmem:[%s13723_s20 + $0x2c4] ss:$8 sps:$4 sm:$0xff]  }
 0x538   : > { %9557 = vmatpush1.bf16.msra.mxu0 %v12966_v8  ;;  %9517 = vmatprep.subr.bf16.mxu1 %v12971_v30  ;;  %v13020_v15 = vld [vmem:[%s13723_s20 + $0x3d0] ss:$8 sps:$4 sm:$0xff]   ;;  %v13028_v29 = vld [vmem:[%s13723_s20 + $0x3c4] ss:$8 sps:$4 sm:$0xff]   ;;  %v13023_v48 = vld [vmem:[%s13723_s20 + $0x2c0] ss:$8 sps:$4 sm:$0xff]  }
 0x539   : > { %9558 = vmatprep.subr.bf16.mxu0 %v12974_v52  ;;  %v13026_v35 = vld [vmem:[%s13723_s20 + $0x3c0] ss:$8 sps:$4 sm:$0xff]   ;;  %v13031_v56 = vld [vmem:[%s13723_s20 + $0x2b4] ss:$8 sps:$4 sm:$0xff]   ;;  %v13029_v45 = vld [vmem:[%s13723_s20 + $0x2b0] ss:$8 sps:$4 sm:$0xff]  }
 0x53a   : > { %v13034_v2 = vld [vmem:[%s13723_s20 + $0x3b4] ss:$8 sps:$4 sm:$0xff]   ;;  %v13032_v21 = vld [vmem:[%s13723_s20 + $0x3b0] ss:$8 sps:$4 sm:$0xff]   ;;  %v13037_v24 = vld [vmem:[%s13723_s20 + $0x2a4] ss:$8 sps:$4 sm:$0xff]  }
 0x53b   : > { %9518 = vmatpush1.bf16.msra.mxu1 %v12969_v50  ;;  %v13040_v37 = vld [vmem:[%s13723_s20 + $0x3a4] ss:$8 sps:$4 sm:$0xff]   ;;  %v13035_v49 = vld [vmem:[%s13723_s20 + $0x2a0] ss:$8 sps:$4 sm:$0xff]   ;;  %v13043_v33 = vld [vmem:[%s13723_s20 + $0x294] ss:$8 sps:$4 sm:$0xff]  }
 0x53c   : > { %9559 = vmatpush1.bf16.msra.mxu0 %v12972_v0  ;;  %9519 = vmatprep.subr.bf16.mxu1 %v12977_v36  ;;  %v7713_v31 = vld [vmem:[#allocation6 + $0x28] sm:$0x1]  ;;  %v7715_v13 = vld [vmem:[#allocation6 + $0x29] sm:$0x1]  ;;  %v7725_v17 = vld [vmem:[#allocation6 + $0x2c] sm:$0x1] }
 0x53d   : > { %9560 = vmatprep.subr.bf16.mxu0 %v12980_v54  ;;  %v13038_v38 = vld [vmem:[%s13723_s20 + $0x3a0] ss:$8 sps:$4 sm:$0xff]   ;;  %v7727_v12 = vld [vmem:[#allocation6 + $0x2d] sm:$0x1]  ;;  %v7744_v58 = vld [vmem:[#allocation6 + $0x32] sm:$0x1]  ;;  %v7717_v57 = vmax.f32 %v7713_v31, %v7715_v13 }
 0x53e   : > { %v7746_v44 = vld [vmem:[#allocation6 + $0x33] sm:$0x1]  ;;  %v13046_v1 = vld [vmem:[%s13723_s20 + $0x394] ss:$8 sps:$4 sm:$0xff]   ;;  %v7729_v41 = vmax.f32 %v7725_v17, %v7727_v12  ;;  %v13049_v8 = vld [vmem:[%s13723_s20 + $0x284] ss:$8 sps:$4 sm:$0xff]  }
 0x53f   : > { %9520 = vmatpush1.bf16.msra.mxu1 %v12975_v63  ;;  %v7756_v60 = vld [vmem:[#allocation6 + $0x36] sm:$0x1]  ;;  %v7758_v61 = vld [vmem:[#allocation6 + $0x37] sm:$0x1]  ;;  %v13041_v34 = vld [vmem:[%s13723_s20 + $0x290] ss:$8 sps:$4 sm:$0xff]   ;;  %v7748_v16 = vmax.f32 %v7744_v58, %v7746_v44 }
 0x540   : > { %9561 = vmatpush1.bf16.msra.mxu0 %v12978_v14  ;;  %9521 = vmatprep.subr.bf16.mxu1 %v12983_v62  ;;  %v13044_v11 = vld [vmem:[%s13723_s20 + $0x390] ss:$8 sps:$4 sm:$0xff]   ;;  %v13052_v30 = vld [vmem:[%s13723_s20 + $0x384] ss:$8 sps:$4 sm:$0xff]   ;;  %v7712_v52 = vld [vmem:[#allocation6 + $0x8] sm:$0x1]  ;;  %v7760_v0 = vmax.f32 %v7756_v60, %v7758_v61 }
 0x541   : > { %9562 = vmatprep.subr.bf16.mxu0 %v12986_v59  ;;  %v7714_v50 = vld [vmem:[#allocation6 + $0x9] sm:$0x1]  ;;  %v7809_v54 = vrot.slane %v7717_v57, 7  ;;  %v7724_v63 = vld [vmem:[#allocation6 + $0xc] sm:$0x1]  ;;  %v7819_v62 = vrot.slane %v7729_v41, 7 }
 0x542   : > { %v13047_v36 = vld [vmem:[%s13723_s20 + $0x280] ss:$8 sps:$4 sm:$0xff]   ;;  %v7726_v14 = vld [vmem:[#allocation6 + $0xd] sm:$0x1]  ;;  %v7743_v59 = vld [vmem:[#allocation6 + $0x12] sm:$0x1] }
 0x543   : > { %9522 = vmatpush1.bf16.msra.mxu1 %v12981_v23  ;;  %v7745_v23 = vld [vmem:[#allocation6 + $0x13] sm:$0x1]  ;;  %v13085_v13 = vld [vmem:[%s13723_s20 + $0x424] ss:$8 sps:$4 sm:$0xff]   ;;  %v13083_v17 = vld [vmem:[%s13723_s20 + $0x420] ss:$8 sps:$4 sm:$0xff]  }
 0x544   : > { %9563 = vmatpush1.bf16.msra.mxu0 %v12984_v32  ;;  %9523 = vmatprep.subr.bf16.mxu1 %v12989_v47  ;;  %v7716_v32 = vmax.f32 %v7712_v52, %v7714_v50  ;;  %v7834_v47 = vrot.slane %v7748_v16, 7  ;;  %v13080_v31 = vld [vmem:[%s13723_s20 + $0x530] ss:$8 sps:$4 sm:$0xff]   ;;  %v13086_v12 = vld [vmem:[%s13723_s20 + $0x520] ss:$8 sps:$4 sm:$0xff]  }
 0x545   : > { %9564 = vmatprep.subr.bf16.mxu0 %v12992_v46  ;;  %v7755_v46 = vld [vmem:[#allocation6 + $0x16] sm:$0x1]  ;;  %v13089_v44 = vld [vmem:[%s13723_s20 + $0x410] ss:$8 sps:$4 sm:$0xff]   ;;  %v13097_v57 = vld [vmem:[%s13723_s20 + $0x404] ss:$8 sps:$4 sm:$0xff]  }
 0x546   : > { %v13094_v58 = vld [vmem:[%s13723_s20 + $0x514] ss:$8 sps:$4 sm:$0xff]   ;;  %v13100_v60 = vld [vmem:[%s13723_s20 + $0x504] ss:$8 sps:$4 sm:$0xff]   ;;  %v13095_v61 = vld [vmem:[%s13723_s20 + $0x400] ss:$8 sps:$4 sm:$0xff]  }
 0x547   : > { %9524 = vmatpush1.bf16.msra.mxu1 %v12987_v4  ;;  %v7757_v4 = vld [vmem:[#allocation6 + $0x17] sm:$0x1]  ;;  %v13098_v41 = vld [vmem:[%s13723_s20 + $0x500] ss:$8 sps:$4 sm:$0xff]   ;;  %v13104_v16 = vld [vmem:[%s13723_s20 + $0x5f0] ss:$8 sps:$4 sm:$0xff]  }
 0x548   : > { %9565 = vmatpush1.bf16.msra.mxu0 %v12990_v25  ;;  %9525 = vmatprep.subr.bf16.mxu1 %v12995_v5  ;;  %v13050_v25 = vld [vmem:[%s13723_s20 + $0x380] ss:$8 sps:$4 sm:$0xff]   ;;  %v7728_v5 = vmax.f32 %v7724_v63, %v7726_v14  ;;  %v13112_v52 = vld [vmem:[%s13723_s20 + $0x5e4] ss:$8 sps:$4 sm:$0xff]   ;;  %v13113_v63 = vld [vmem:[%s13723_s20 + $0x4d0] ss:$8 sps:$4 sm:$0xff]  }
 0x549   : > { %9566 = vmatprep.subr.bf16.mxu0 %v12998_v53  ;;  %v13055_v53 = vld [vmem:[%s13723_s20 + $0x474] ss:$8 sps:$4 sm:$0xff]   ;;  %v13107_v50 = vld [vmem:[%s13723_s20 + $0x4e0] ss:$8 sps:$4 sm:$0xff]   ;;  %v13116_v14 = vld [vmem:[%s13723_s20 + $0x5d0] ss:$8 sps:$4 sm:$0xff]  }
 0x54b   : > { %9526 = vmatpush1.bf16.msra.mxu1 %v12993_v42  ;;  %v7844_v42 = vrot.slane %v7760_v0, 7  ;;  %v13110_v0 = vld [vmem:[%s13723_s20 + $0x5e0] ss:$8 sps:$4 sm:$0xff]  }
 0x54c   : > { %9567 = vmatpush1.bf16.msra.mxu0 %v12996_v55  ;;  %9527 = vmatprep.subr.bf16.mxu1 %v13001_v26  ;;  %v7810_v55 = vsel %vm7789_vm6, %v7809_v54, %v7716_v32  ;;  %v13058_v26 = vld [vmem:[%s13723_s20 + $0x574] ss:$8 sps:$4 sm:$0xff]   ;;  %v13122_v32 = vld [vmem:[%s13723_s20 + $0x5c0] ss:$8 sps:$4 sm:$0xff]  }
 0x54d   : > { %9568 = vmatprep.subr.bf16.mxu0 %v13004_v19  ;;  %v7747_v19 = vmax.f32 %v7743_v59, %v7745_v23  ;;  %v13118_v54 = vld [vmem:[%s13723_s20 + $0x5d4] ss:$8 sps:$4 sm:$0xff]   ;;  %v13124_v59 = vld [vmem:[%s13723_s20 + $0x5c4] ss:$8 sps:$4 sm:$0xff]   ;;  %v13119_v23 = vld [vmem:[%s13723_s20 + $0x4c0] ss:$8 sps:$4 sm:$0xff]  }
 0x54f   : > { %9528 = vmatpush1.bf16.msra.mxu1 %v12999_v40  ;;  %v7820_v40 = vsel %vm7789_vm6, %v7819_v62, %v7728_v5  ;;  %v13121_v62 = vld [vmem:[%s13723_s20 + $0x4c4] ss:$8 sps:$4 sm:$0xff]  }
 0x550   : > { %9569 = vmatpush1.bf16.msra.mxu0 %v13002_v6  ;;  %9529 = vmatprep.subr.bf16.mxu1 %v13007_v22  ;;  %v7759_v6 = vmax.f32 %v7755_v46, %v7757_v4  ;;  %v13053_v22 = vld [vmem:[%s13723_s20 + $0x470] ss:$8 sps:$4 sm:$0xff]   ;;  %v13130_v46 = vld [vmem:[%s13723_s20 + $0x5b4] ss:$8 sps:$4 sm:$0xff]   ;;  %v13133_v5 = vld [vmem:[%s13723_s20 + $0x4a4] ss:$8 sps:$4 sm:$0xff]  }
 0x551   : > { %9570 = vmatprep.subr.bf16.mxu0 %v13010_v3  ;;  %v7835_v3 = vsel %vm7789_vm6, %v7834_v47, %v7747_v19  ;;  %v13127_v47 = vld [vmem:[%s13723_s20 + $0x4b4] ss:$8 sps:$4 sm:$0xff]   ;;  %v13125_v4 = vld [vmem:[%s13723_s20 + $0x4b0] ss:$8 sps:$4 sm:$0xff]   ;;  %v13134_v19 = vld [vmem:[%s13723_s20 + $0x5a0] ss:$8 sps:$4 sm:$0xff]  }
 0x553   : > { %9530 = vmatpush2.bf16.msra.mxu1 %v13005_v18  ;;  %v7871_v18 = vpack.c.bf16 %v7810_v55, %v7810_v55  ;;  %v7738_v55 = vld [vmem:[#allocation6 + $0x30] sm:$0x1] }
 0x554   : > { %9571 = vmatpush2.bf16.msra.mxu0 %v13008_v28  ;;  %9531 = vmatprep.subr.bf16.mxu1 %v13013_v39  ;;  %v13056_v28 = vld [vmem:[%s13723_s20 + $0x570] ss:$8 sps:$4 sm:$0xff]   ;;  %v7845_v39 = vsel %vm7789_vm6, %v7844_v42, %v7759_v6  ;;  %v13131_v42 = vld [vmem:[%s13723_s20 + $0x4a0] ss:$8 sps:$4 sm:$0xff]   ;;  %v7752_v6 = vld [vmem:[#allocation6 + $0x35] sm:$0x1] }
 0x555   : > { %9572 = vmatprep.subr.bf16.mxu0 %v13016_v10  ;;  %v7873_v10 = vpack.c.bf16 %v7820_v40, %v7820_v40  ;;  %v7750_v40 = vld [vmem:[#allocation6 + $0x34] sm:$0x1] }
 0x557   : > { %9532 = vmatpush2.bf16.msra.mxu1 %v13011_v7  ;;  %v13061_v7 = vld [vmem:[%s13723_s20 + $0x464] ss:$8 sps:$4 sm:$0xff]  }
 0x558   : > { %9573 = vmatpush2.bf16.msra.mxu0 %v13014_v27  ;;  %9533 = vmatprep.subr.bf16.mxu1 %v13019_v51  ;;  %v7876_v27 = vpack.c.bf16 %v7835_v3, %v7835_v3  ;;  %v13064_v51 = vld [vmem:[%s13723_s20 + $0x564] ss:$8 sps:$4 sm:$0xff]   ;;  %v7769_v3 = vld [vmem:[#allocation6 + $0x3a] sm:$0x1] }
 0x559   : > { %9574 = vmatprep.subr.bf16.mxu0 %v13022_v43  ;;  %v7878_v43 = vpack.c.bf16 %v7845_v39, %v7845_v39 }
 0x55b   : > { %9534 = vmatpush2.bf16.msra.mxu1 %v13017_v9  ;;  %v13059_v9 = vld [vmem:[%s13723_s20 + $0x460] ss:$8 sps:$4 sm:$0xff]  }
 0x55c   : > { %9575 = vmatpush2.bf16.msra.mxu0 %v13020_v15  ;;  %9535 = vmatprep.subr.bf16.mxu1 %v13025_v20  ;;  %v13062_v15 = vld [vmem:[%s13723_s20 + $0x560] ss:$8 sps:$4 sm:$0xff]   ;;  %v13067_v20 = vld [vmem:[%s13723_s20 + $0x454] ss:$8 sps:$4 sm:$0xff]  }
 0x55d   : > { %9576 = vmatprep.subr.bf16.mxu0 %v13028_v29  ;;  %v13070_v29 = vld [vmem:[%s13723_s20 + $0x554] ss:$8 sps:$4 sm:$0xff]  }
 0x55f   : > { %9536 = vmatpush2.bf16.msra.mxu1 %v13023_v48  ;;  %v13065_v48 = vld [vmem:[%s13723_s20 + $0x450] ss:$8 sps:$4 sm:$0xff]  }
 0x560   : > { %9577 = vmatpush2.bf16.msra.mxu0 %v13026_v35  ;;  %9537 = vmatprep.subr.bf16.mxu1 %v13031_v56  ;;  %v13068_v35 = vld [vmem:[%s13723_s20 + $0x550] ss:$8 sps:$4 sm:$0xff]   ;;  %v13073_v56 = vld [vmem:[%s13723_s20 + $0x444] ss:$8 sps:$4 sm:$0xff]  }
 0x561   : > { %9578 = vmatprep.subr.bf16.mxu0 %v13034_v2  ;;  %v13076_v2 = vld [vmem:[%s13723_s20 + $0x544] ss:$8 sps:$4 sm:$0xff]  }
 0x563   : > { %9538 = vmatpush2.bf16.msra.mxu1 %v13029_v45  ;;  %v13071_v45 = vld [vmem:[%s13723_s20 + $0x440] ss:$8 sps:$4 sm:$0xff]  }
 0x564   : > { %9579 = vmatpush2.bf16.msra.mxu0 %v13032_v21  ;;  %9539 = vmatprep.subr.bf16.mxu1 %v13037_v24  ;;  %v13074_v21 = vld [vmem:[%s13723_s20 + $0x540] ss:$8 sps:$4 sm:$0xff]   ;;  %v13079_v24 = vld [vmem:[%s13723_s20 + $0x434] ss:$8 sps:$4 sm:$0xff]  }
 0x565   : > { %9580 = vmatprep.subr.bf16.mxu0 %v13040_v37  ;;  %v13082_v37 = vld [vmem:[%s13723_s20 + $0x534] ss:$8 sps:$4 sm:$0xff]  }
 0x567   : > { %9540 = vmatpush2.bf16.msra.mxu1 %v13035_v49  ;;  %v13077_v49 = vld [vmem:[%s13723_s20 + $0x430] ss:$8 sps:$4 sm:$0xff]  }
 0x568   : > { %9581 = vmatpush2.bf16.msra.mxu0 %v13038_v38  ;;  %9541 = vmatprep.subr.bf16.mxu1 %v13043_v33  ;;  %v13088_v38 = vld [vmem:[%s13723_s20 + $0x524] ss:$8 sps:$4 sm:$0xff]   ;;  %v13091_v33 = vld [vmem:[%s13723_s20 + $0x414] ss:$8 sps:$4 sm:$0xff]  }
 0x569   : > { %9582 = vmatprep.subr.bf16.mxu0 %v13046_v1  ;;  %v13092_v1 = vld [vmem:[%s13723_s20 + $0x510] ss:$8 sps:$4 sm:$0xff]  }
 0x56b   : > { %9542 = vmatpush2.bf16.msra.mxu1 %v13041_v34  ;;  %v13103_v34 = vld [vmem:[%s13723_s20 + $0x4f4] ss:$8 sps:$4 sm:$0xff]  }
 0x56c   : > { %9583 = vmatpush2.bf16.msra.mxu0 %v13044_v11  ;;  %9543 = vmatprep.subr.bf16.mxu1 %v13049_v8  ;;  %v13106_v11 = vld [vmem:[%s13723_s20 + $0x5f4] ss:$8 sps:$4 sm:$0xff]   ;;  %v13101_v8 = vld [vmem:[%s13723_s20 + $0x4f0] ss:$8 sps:$4 sm:$0xff]  }
 0x56d   : > { %9584 = vmatprep.subr.bf16.mxu0 %v13052_v30  ;;  %v13109_v30 = vld [vmem:[%s13723_s20 + $0x4e4] ss:$8 sps:$4 sm:$0xff]  }
 0x56f   : > { %9544 = vmatpush2.bf16.msra.mxu1 %v13047_v36  ;;  %v13115_v36 = vld [vmem:[%s13723_s20 + $0x4d4] ss:$8 sps:$4 sm:$0xff]  }
 0x570   : > { %9585 = vmatpush2.bf16.msra.mxu0 %v13050_v25  ;;  %9595 = vmatprep.subr.bf16.mxu1 %v13055_v53  ;;  %v13128_v25 = vld [vmem:[%s13723_s20 + $0x5b0] ss:$8 sps:$4 sm:$0xff]   ;;  %v13136_v53 = vld [vmem:[%s13723_s20 + $0x5a4] ss:$8 sps:$4 sm:$0xff]  }
 0x571   : > { %9636 = vmatprep.subr.bf16.mxu0 %v13058_v26  ;;  %v7740_v26 = vld [vmem:[#allocation6 + $0x31] sm:$0x1] }
 0x572   : > { %9546 = vmatmul.mubr.bf16.vlgmr.msra.gmra.mxu1 %v7871_v18  ;;  %v7771_v18 = vld [vmem:[#allocation6 + $0x3b] sm:$0x1]  ;;  %v7742_v39 = vmax.f32 %v7738_v55, %v7740_v26  ;;  %v13181_v26 = vld [vmem:[%s13723_s20 + $0x624] ss:$8 sps:$4 sm:$0xff]  }
 0x573   : > { %9587 = vmatmul.mubr.bf16.vlgmr.msra.gmra.mxu0 %v7873_v10  ;;  %9596 = vmatpush1.bf16.msra.mxu1 %v13053_v22  ;;  %v13139_v22 = vld [vmem:[%s13723_s20 + $0x494] ss:$8 sps:$4 sm:$0xff]   ;;  %v13176_v55 = vld [vmem:[%s13723_s20 + $0x730] ss:$8 sps:$4 sm:$0xff]  }
 0x574   : > { %9627 = vmatprep.mubr.bf16.mxu1 %v7876_v27  ;;  %9637 = vmatpush1.bf16.msra.mxu0 %v13056_v28  ;;  %v13142_v28 = vld [vmem:[%s13723_s20 + $0x594] ss:$8 sps:$4 sm:$0xff]   ;;  %v7754_v27 = vmax.f32 %v7750_v40, %v7752_v6  ;;  %v13179_v40 = vld [vmem:[%s13723_s20 + $0x620] ss:$8 sps:$4 sm:$0xff]  }
 0x575   : > { %9668 = vmatprep.mubr.bf16.mxu0 %v7878_v43  ;;  %9597 = vmatprep.subr.bf16.mxu1 %v13061_v7  ;;  %v7781_v10 = vld [vmem:[#allocation6 + $0x3e] sm:$0x1]  ;;  %v7783_v7 = vld [vmem:[#allocation6 + $0x3f] sm:$0x1]  ;;  %v7737_v43 = vld [vmem:[#allocation6 + $0x10] sm:$0x1] }
 0x576   : > { %9638 = vmatprep.subr.bf16.mxu0 %v13064_v51  ;;  %v13137_v51 = vld [vmem:[%s13723_s20 + $0x490] ss:$8 sps:$4 sm:$0xff]   ;;  %v13182_v6 = vld [vmem:[%s13723_s20 + $0x720] ss:$8 sps:$4 sm:$0xff]  }
 0x577   : > { %9598 = vmatpush1.bf16.msra.mxu1 %v13059_v9  ;;  %v7739_v9 = vld [vmem:[#allocation6 + $0x11] sm:$0x1] }
 0x578   : > { %9639 = vmatpush1.bf16.msra.mxu0 %v13062_v15  ;;  %9599 = vmatprep.subr.bf16.mxu1 %v13067_v20  ;;  %v7773_v15 = vmax.f32 %v7769_v3, %v7771_v18  ;;  %v13140_v20 = vld [vmem:[%s13723_s20 + $0x590] ss:$8 sps:$4 sm:$0xff]   ;;  %v13190_v3 = vld [vmem:[%s13723_s20 + $0x714] ss:$8 sps:$4 sm:$0xff]  }
 0x579   : > { %9640 = vmatprep.subr.bf16.mxu0 %v13070_v29  ;;  %v13145_v29 = vld [vmem:[%s13723_s20 + $0x484] ss:$8 sps:$4 sm:$0xff]   ;;  %v13185_v18 = vld [vmem:[%s13723_s20 + $0x610] ss:$8 sps:$4 sm:$0xff]  }
 0x57b   : > { %9600 = vmatpush1.bf16.msra.mxu1 %v13065_v48  ;;  %v7749_v48 = vld [vmem:[#allocation6 + $0x14] sm:$0x1] }
 0x57c   : > { %9641 = vmatpush1.bf16.msra.mxu0 %v13068_v35  ;;  %9601 = vmatprep.subr.bf16.mxu1 %v13073_v56  ;;  %v7785_v35 = vmax.f32 %v7781_v10, %v7783_v7  ;;  %v13143_v56 = vld [vmem:[%s13723_s20 + $0x480] ss:$8 sps:$4 sm:$0xff]   ;;  %v13196_v10 = vld [vmem:[%s13723_s20 + $0x704] ss:$8 sps:$4 sm:$0xff]  }
 0x57d   : > { %9642 = vmatprep.subr.bf16.mxu0 %v13076_v2  ;;  %v13148_v2 = vld [vmem:[%s13723_s20 + $0x584] ss:$8 sps:$4 sm:$0xff]   ;;  %v13191_v7 = vld [vmem:[%s13723_s20 + $0x600] ss:$8 sps:$4 sm:$0xff]  }
 0x57f   : > { %9602 = vmatpush1.bf16.msra.mxu1 %v13071_v45  ;;  %v7829_v45 = vrot.slane %v7742_v39, 7  ;;  %v13193_v39 = vld [vmem:[%s13723_s20 + $0x604] ss:$8 sps:$4 sm:$0xff]  }
 0x580   : > { %9643 = vmatpush1.bf16.msra.mxu0 %v13074_v21  ;;  %9603 = vmatprep.subr.bf16.mxu1 %v13079_v24  ;;  %v7751_v21 = vld [vmem:[#allocation6 + $0x15] sm:$0x1]  ;;  %v7839_v24 = vrot.slane %v7754_v27, 7  ;;  %v13194_v27 = vld [vmem:[%s13723_s20 + $0x700] ss:$8 sps:$4 sm:$0xff]  }
 0x581   : > { %9644 = vmatprep.subr.bf16.mxu0 %v13082_v37  ;;  %v7768_v37 = vld [vmem:[#allocation6 + $0x1a] sm:$0x1] }
 0x583   : > { %9604 = vmatpush1.bf16.msra.mxu1 %v13077_v49  ;;  %v7770_v49 = vld [vmem:[#allocation6 + $0x1b] sm:$0x1] }
 0x584   : > { %9645 = vmatpush1.bf16.msra.mxu0 %v13080_v31  ;;  %9605 = vmatprep.subr.bf16.mxu1 %v13085_v13  ;;  %v7741_v31 = vmax.f32 %v7737_v43, %v7739_v9  ;;  %v7854_v13 = vrot.slane %v7773_v15, 7  ;;  %v13202_v43 = vld [vmem:[%s13723_s20 + $0x7f4] ss:$8 sps:$4 sm:$0xff]   ;;  %v13197_v9 = vld [vmem:[%s13723_s20 + $0x6f0] ss:$8 sps:$4 sm:$0xff]  }
 0x585   : > { %9646 = vmatprep.subr.bf16.mxu0 %v13088_v38  ;;  %v7780_v38 = vld [vmem:[#allocation6 + $0x1e] sm:$0x1]  ;;  %v13200_v15 = vld [vmem:[%s13723_s20 + $0x7f0] ss:$8 sps:$4 sm:$0xff]  }
 0x587   : > { %9606 = vmatpush1.bf16.msra.mxu1 %v13083_v17  ;;  %v7782_v17 = vld [vmem:[#allocation6 + $0x1f] sm:$0x1] }
 0x588   : > { %9647 = vmatpush1.bf16.msra.mxu0 %v13086_v12  ;;  %9607 = vmatprep.subr.bf16.mxu1 %v13091_v33  ;;  %v13146_v12 = vld [vmem:[%s13723_s20 + $0x580] ss:$8 sps:$4 sm:$0xff]   ;;  %v7753_v33 = vmax.f32 %v7749_v48, %v7751_v21  ;;  %v13212_v21 = vld [vmem:[%s13723_s20 + $0x7d0] ss:$8 sps:$4 sm:$0xff]  }
 0x589   : > { %9648 = vmatprep.subr.bf16.mxu0 %v13094_v58  ;;  %v13151_v58 = vld [vmem:[%s13723_s20 + $0x674] ss:$8 sps:$4 sm:$0xff]   ;;  %v13203_v48 = vld [vmem:[%s13723_s20 + $0x6e0] ss:$8 sps:$4 sm:$0xff]  }
 0x58b   : > { %9608 = vmatpush1.bf16.msra.mxu1 %v13089_v44  ;;  %v7864_v44 = vrot.slane %v7785_v35, 7  ;;  %v13206_v35 = vld [vmem:[%s13723_s20 + $0x7e0] ss:$8 sps:$4 sm:$0xff]  }
 0x58c   : > { %9649 = vmatpush1.bf16.msra.mxu0 %v13092_v1  ;;  %9609 = vmatprep.subr.bf16.mxu1 %v13097_v57  ;;  %v7830_v1 = vsel %vm7789_vm6, %v7829_v45, %v7741_v31  ;;  %v13154_v57 = vld [vmem:[%s13723_s20 + $0x774] ss:$8 sps:$4 sm:$0xff]   ;;  %v13209_v45 = vld [vmem:[%s13723_s20 + $0x6d0] ss:$8 sps:$4 sm:$0xff]   ;;  %v13218_v31 = vld [vmem:[%s13723_s20 + $0x7c0] ss:$8 sps:$4 sm:$0xff]  }
 0x58d   : > { %9650 = vmatprep.subr.bf16.mxu0 %v13100_v60  ;;  %v7772_v60 = vmax.f32 %v7768_v37, %v7770_v49  ;;  %v13220_v37 = vld [vmem:[%s13723_s20 + $0x7c4] ss:$8 sps:$4 sm:$0xff]   ;;  %v13215_v49 = vld [vmem:[%s13723_s20 + $0x6c0] ss:$8 sps:$4 sm:$0xff]  }
 0x58f   : > { %9610 = vmatpush1.bf16.msra.mxu1 %v13095_v61  ;;  %v7840_v61 = vsel %vm7789_vm6, %v7839_v24, %v7753_v33  ;;  %v13217_v24 = vld [vmem:[%s13723_s20 + $0x6c4] ss:$8 sps:$4 sm:$0xff]  }
 0x590   : > { %9651 = vmatpush1.bf16.msra.mxu0 %v13098_v41  ;;  %9611 = vmatprep.subr.bf16.mxu1 %v13103_v34  ;;  %v7784_v41 = vmax.f32 %v7780_v38, %v7782_v17  ;;  %v13149_v34 = vld [vmem:[%s13723_s20 + $0x670] ss:$8 sps:$4 sm:$0xff]   ;;  %v13226_v38 = vld [vmem:[%s13723_s20 + $0x7b4] ss:$8 sps:$4 sm:$0xff]   ;;  %v13229_v33 = vld [vmem:[%s13723_s20 + $0x6a4] ss:$8 sps:$4 sm:$0xff]  }
 0x591   : > { %9652 = vmatprep.subr.bf16.mxu0 %v13106_v11  ;;  %v7855_v11 = vsel %vm7789_vm6, %v7854_v13, %v7772_v60  ;;  %v13223_v13 = vld [vmem:[%s13723_s20 + $0x6b4] ss:$8 sps:$4 sm:$0xff]   ;;  %v13221_v17 = vld [vmem:[%s13723_s20 + $0x6b0] ss:$8 sps:$4 sm:$0xff]  }
 0x592   : > { %v7775_v60 = vld [vmem:[#allocation6 + $0x3c] sm:$0x1] }
 0x593   : > { %9612 = vmatpush2.bf16.msra.mxu1 %v13101_v8  ;;  %v7875_v8 = vpack.c.bf16 %v7830_v1, %v7830_v1  ;;  %v7765_v1 = vld [vmem:[#allocation6 + $0x39] sm:$0x1] }
 0x594   : > { %9653 = vmatpush2.bf16.msra.mxu0 %v13104_v16  ;;  %9613 = vmatprep.subr.bf16.mxu1 %v13109_v30  ;;  %v13152_v16 = vld [vmem:[%s13723_s20 + $0x770] ss:$8 sps:$4 sm:$0xff]   ;;  %v7865_v30 = vsel %vm7789_vm6, %v7864_v44, %v7784_v41  ;;  %v8141_v41 = vlaneseq }
 0x595   : > { %9654 = vmatprep.subr.bf16.mxu0 %v13112_v52  ;;  %v7877_v52 = vpack.c.bf16 %v7840_v61, %v7840_v61  ;;  %v7763_v44 = vld [vmem:[#allocation6 + $0x38] sm:$0x1]  ;;  %v7777_v61 = vld [vmem:[#allocation6 + $0x3d] sm:$0x1] }
 0x597   : > { %9614 = vmatpush2.bf16.msra.mxu1 %v13107_v50  ;;  %v13157_v50 = vld [vmem:[%s13723_s20 + $0x664] ss:$8 sps:$4 sm:$0xff]  }
 0x598   : > { %9655 = vmatpush2.bf16.msra.mxu0 %v13110_v0  ;;  %9615 = vmatprep.subr.bf16.mxu1 %v13115_v36  ;;  %v7880_v0 = vpack.c.bf16 %v7855_v11, %v7855_v11  ;;  %v13160_v36 = vld [vmem:[%s13723_s20 + $0x764] ss:$8 sps:$4 sm:$0xff]   ;;  %v13235_v11 = vld [vmem:[%s13723_s20 + $0x694] ss:$8 sps:$4 sm:$0xff]  }
 0x599   : > { %9656 = vmatprep.subr.bf16.mxu0 %v13118_v54  ;;  %v7882_v54 = vpack.c.bf16 %v7865_v30, %v7865_v30  ;;  %v7762_v30 = vld [vmem:[#allocation6 + $0x18] sm:$0x1] }
 0x59b   : > { %9616 = vmatpush2.bf16.msra.mxu1 %v13113_v63  ;;  %v13155_v63 = vld [vmem:[%s13723_s20 + $0x660] ss:$8 sps:$4 sm:$0xff]  }
 0x59c   : > { %9657 = vmatpush2.bf16.msra.mxu0 %v13116_v14  ;;  %9617 = vmatprep.subr.bf16.mxu1 %v13121_v62  ;;  %v13158_v14 = vld [vmem:[%s13723_s20 + $0x760] ss:$8 sps:$4 sm:$0xff]   ;;  %v13163_v62 = vld [vmem:[%s13723_s20 + $0x654] ss:$8 sps:$4 sm:$0xff]  }
 0x59d   : > { %9658 = vmatprep.subr.bf16.mxu0 %v13124_v59  ;;  %v13166_v59 = vld [vmem:[%s13723_s20 + $0x754] ss:$8 sps:$4 sm:$0xff]  }
 0x59f   : > { %9618 = vmatpush2.bf16.msra.mxu1 %v13119_v23  ;;  %v13161_v23 = vld [vmem:[%s13723_s20 + $0x650] ss:$8 sps:$4 sm:$0xff]  }
 0x5a0   : > { %9659 = vmatpush2.bf16.msra.mxu0 %v13122_v32  ;;  %9619 = vmatprep.subr.bf16.mxu1 %v13127_v47  ;;  %v13164_v32 = vld [vmem:[%s13723_s20 + $0x750] ss:$8 sps:$4 sm:$0xff]   ;;  %v13169_v47 = vld [vmem:[%s13723_s20 + $0x644] ss:$8 sps:$4 sm:$0xff]  }
 0x5a1   : > { %9660 = vmatprep.subr.bf16.mxu0 %v13130_v46  ;;  %v13172_v46 = vld [vmem:[%s13723_s20 + $0x744] ss:$8 sps:$4 sm:$0xff]  }
 0x5a3   : > { %9620 = vmatpush2.bf16.msra.mxu1 %v13125_v4  ;;  %v13167_v4 = vld [vmem:[%s13723_s20 + $0x640] ss:$8 sps:$4 sm:$0xff]  }
 0x5a4   : > { %9661 = vmatpush2.bf16.msra.mxu0 %v13128_v25  ;;  %9621 = vmatprep.subr.bf16.mxu1 %v13133_v5  ;;  %v13170_v25 = vld [vmem:[%s13723_s20 + $0x740] ss:$8 sps:$4 sm:$0xff]   ;;  %v13175_v5 = vld [vmem:[%s13723_s20 + $0x634] ss:$8 sps:$4 sm:$0xff]  }
 0x5a5   : > { %9662 = vmatprep.subr.bf16.mxu0 %v13136_v53  ;;  %v13178_v53 = vld [vmem:[%s13723_s20 + $0x734] ss:$8 sps:$4 sm:$0xff]  }
 0x5a7   : > { %9622 = vmatpush2.bf16.msra.mxu1 %v13131_v42  ;;  %v13173_v42 = vld [vmem:[%s13723_s20 + $0x630] ss:$8 sps:$4 sm:$0xff]  }
 0x5a8   : > { %9663 = vmatpush2.bf16.msra.mxu0 %v13134_v19  ;;  %9623 = vmatprep.subr.bf16.mxu1 %v13139_v22  ;;  %v13184_v19 = vld [vmem:[%s13723_s20 + $0x724] ss:$8 sps:$4 sm:$0xff]   ;;  %v13187_v22 = vld [vmem:[%s13723_s20 + $0x614] ss:$8 sps:$4 sm:$0xff]  }
 0x5a9   : > { %9664 = vmatprep.subr.bf16.mxu0 %v13142_v28  ;;  %v13188_v28 = vld [vmem:[%s13723_s20 + $0x710] ss:$8 sps:$4 sm:$0xff]  }
 0x5ab   : > { %9624 = vmatpush2.bf16.msra.mxu1 %v13137_v51  ;;  %v13199_v51 = vld [vmem:[%s13723_s20 + $0x6f4] ss:$8 sps:$4 sm:$0xff]  }
 0x5ac   : > { %9665 = vmatpush2.bf16.msra.mxu0 %v13140_v20  ;;  %9625 = vmatprep.subr.bf16.mxu1 %v13145_v29  ;;  %v13205_v20 = vld [vmem:[%s13723_s20 + $0x6e4] ss:$8 sps:$4 sm:$0xff]  }
 0x5ad   : > { %9666 = vmatprep.subr.bf16.mxu0 %v13148_v2  ;;  %v13208_v29 = vld [vmem:[%s13723_s20 + $0x7e4] ss:$8 sps:$4 sm:$0xff]   ;;  %v13214_v2 = vld [vmem:[%s13723_s20 + $0x7d4] ss:$8 sps:$4 sm:$0xff]  }
 0x5af   : > { %9626 = vmatpush2.bf16.msra.mxu1 %v13143_v56  ;;  %v13211_v56 = vld [vmem:[%s13723_s20 + $0x6d4] ss:$8 sps:$4 sm:$0xff]  }
 0x5b0   : > { %9667 = vmatpush2.bf16.msra.mxu0 %v13146_v12  ;;  %9677 = vmatprep.subr.bf16.mxu1 %v13151_v58  ;;  %v13224_v12 = vld [vmem:[%s13723_s20 + $0x7b0] ss:$8 sps:$4 sm:$0xff]   ;;  %v13232_v58 = vld [vmem:[%s13723_s20 + $0x7a4] ss:$8 sps:$4 sm:$0xff]  }
 0x5b1   : > { %9718 = vmatprep.subr.bf16.mxu0 %v13154_v57  ;;  %v13227_v57 = vld [vmem:[%s13723_s20 + $0x6a0] ss:$8 sps:$4 sm:$0xff]  }
 0x5b2   : > { %9628 = vmatmul.mubr.bf16.vlgmr.msra.gmra.mxu1 %v7875_v8  ;;  %v13238_v8 = vld [vmem:[%s13723_s20 + $0x794] ss:$8 sps:$4 sm:$0xff]  }
 0x5b3   : > { %9669 = vmatmul.mubr.bf16.vlgmr.msra.gmra.mxu0 %v7877_v52  ;;  %9678 = vmatpush1.bf16.msra.mxu1 %v13149_v34  ;;  %v13230_v34 = vld [vmem:[%s13723_s20 + $0x7a0] ss:$8 sps:$4 sm:$0xff]   ;;  %v7779_v52 = vmax.f32 %v7775_v60, %v7777_v61 }
 0x5b4   : > { %9709 = vmatprep.mubr.bf16.mxu1 %v7880_v0  ;;  %9719 = vmatpush1.bf16.msra.mxu0 %v13152_v16  ;;  %v7767_v16 = vmax.f32 %v7763_v44, %v7765_v1  ;;  %v7764_v0 = vld [vmem:[#allocation6 + $0x19] sm:$0x1] }
 0x5b5   : > { %9750 = vmatprep.mubr.bf16.mxu0 %v7882_v54  ;;  %9679 = vmatprep.subr.bf16.mxu1 %v13157_v50  ;;  %v13233_v50 = vld [vmem:[%s13723_s20 + $0x690] ss:$8 sps:$4 sm:$0xff]  }
 0x5b6   : > { %9720 = vmatprep.subr.bf16.mxu0 %v13160_v36  ;;  %v8142_v36 = vshrl.u32 %v8141_v41, 7  ;;  %v13236_v54 = vld [vmem:[%s13723_s20 + $0x790] ss:$8 sps:$4 sm:$0xff]  }
 0x5b7   : > { %9680 = vmatpush1.bf16.msra.mxu1 %v13155_v63  ;;  %v13241_v63 = vld [vmem:[%s13723_s20 + $0x684] ss:$8 sps:$4 sm:$0xff]  }
 0x5b8   : > { %9721 = vmatpush1.bf16.msra.mxu0 %v13158_v14  ;;  %9681 = vmatprep.subr.bf16.mxu1 %v13163_v62  ;;  %v7774_v14 = vld [vmem:[#allocation6 + $0x1c] sm:$0x1]  ;;  %v13244_v62 = vld [vmem:[%s13723_s20 + $0x784] ss:$8 sps:$4 sm:$0xff]  }
 0x5b9   : > { %9722 = vmatprep.subr.bf16.mxu0 %v13166_v59  ;;  %v7849_v59 = vrot.slane %v7767_v16, 7 }
 0x5bb   : > { %9682 = vmatpush1.bf16.msra.mxu1 %v13161_v23  ;;  %v7776_v23 = vld [vmem:[#allocation6 + $0x1d] sm:$0x1] }
 0x5bc   : > { %9723 = vmatpush1.bf16.msra.mxu0 %v13164_v32  ;;  %9683 = vmatprep.subr.bf16.mxu1 %v13169_v47  ;;  %v7859_v32 = vrot.slane %v7779_v52, 7  ;;  %v13239_v47 = vld [vmem:[%s13723_s20 + $0x680] ss:$8 sps:$4 sm:$0xff]  }
 0x5bd   : > { %9724 = vmatprep.subr.bf16.mxu0 %v13172_v46  ;;  %v7766_v46 = vmax.f32 %v7762_v30, %v7764_v0 }
 0x5bf   : > { %9684 = vmatpush1.bf16.msra.mxu1 %v13167_v4  ;;  %v8143_v4 = vsub.s32 0, %v8142_v36 }
 0x5c0   : > { %9725 = vmatpush1.bf16.msra.mxu0 %v13170_v25  ;;  %9685 = vmatprep.subr.bf16.mxu1 %v13175_v5  ;;  %v13242_v25 = vld [vmem:[%s13723_s20 + $0x780] ss:$8 sps:$4 sm:$0xff]   ;;  %v7778_v5 = vmax.f32 %v7774_v14, %v7776_v23 }
 0x5c1   : > { %9726 = vmatprep.subr.bf16.mxu0 %v13178_v53  ;;  %v8139_v53 = vld [vmem:[%s13729_s19] sm:$0x3] }
 0x5c3   : > { %9686 = vmatpush1.bf16.msra.mxu1 %v13173_v42  ;;  %v7850_v42 = vsel %vm7789_vm6, %v7849_v59, %v7766_v46 }
 0x5c4   : > { %9727 = vmatpush1.bf16.msra.mxu0 %v13176_v55  ;;  %9687 = vmatprep.subr.bf16.mxu1 %v13181_v26  ;;  %v8147_v55 = vsub.s32 1, %v8142_v36  ;;  %v7860_v26 = vsel %vm7789_vm6, %v7859_v32, %v7778_v5 }
 0x5c5   : > { %9728 = vmatprep.subr.bf16.mxu0 %v13184_v19  ;;  %v8144_v19 = vrot.slane %v8139_v53, %v8143_v4 }
 0x5c7   : > { %9688 = vmatpush1.bf16.msra.mxu1 %v13179_v40  ;;  %v7879_v40 = vpack.c.bf16 %v7850_v42, %v7850_v42 }
 0x5c8   : > { %9729 = vmatpush1.bf16.msra.mxu0 %v13182_v6  ;;  %9689 = vmatprep.subr.bf16.mxu1 %v13187_v22  ;;  %v7881_v6 = vpack.c.bf16 %v7860_v26, %v7860_v26  ;;  %v8148_v22 = vrot.slane %v8139_v53, %v8147_v55 }
 0x5c9   : > { %9730 = vmatprep.subr.bf16.mxu0 %v13190_v3 }
 0x5cb   : > { %9690 = vmatpush1.bf16.msra.mxu1 %v13185_v18 }
 0x5cc   : > { %9731 = vmatpush1.bf16.msra.mxu0 %v13188_v28  ;;  %9691 = vmatprep.subr.bf16.mxu1 %v13193_v39 }
 0x5cd   : > { %9732 = vmatprep.subr.bf16.mxu0 %v13196_v10 }
 0x5cf   : > { %9692 = vmatpush1.bf16.msra.mxu1 %v13191_v7 }
 0x5d0   : > { %9733 = vmatpush1.bf16.msra.mxu0 %v13194_v27  ;;  %9693 = vmatprep.subr.bf16.mxu1 %v13199_v51 }
 0x5d1   : > { %9734 = vmatprep.subr.bf16.mxu0 %v13202_v43 }
 0x5d3   : > { %9694 = vmatpush2.bf16.msra.mxu1 %v13197_v9 }
 0x5d4   : > { %9735 = vmatpush2.bf16.msra.mxu0 %v13200_v15  ;;  %9695 = vmatprep.subr.bf16.mxu1 %v13205_v20 }
 0x5d5   : > { %9736 = vmatprep.subr.bf16.mxu0 %v13208_v29 }
 0x5d7   : > { %9696 = vmatpush2.bf16.msra.mxu1 %v13203_v48 }
 0x5d8   : > { %9737 = vmatpush2.bf16.msra.mxu0 %v13206_v35  ;;  %9697 = vmatprep.subr.bf16.mxu1 %v13211_v56 }
 0x5d9   : > { %9738 = vmatprep.subr.bf16.mxu0 %v13214_v2 }
 0x5db   : > { %9698 = vmatpush2.bf16.msra.mxu1 %v13209_v45 }
 0x5dc   : > { %9739 = vmatpush2.bf16.msra.mxu0 %v13212_v21  ;;  %9699 = vmatprep.subr.bf16.mxu1 %v13217_v24 }
 0x5dd   : > { %9740 = vmatprep.subr.bf16.mxu0 %v13220_v37 }
 0x5df   : > { %9700 = vmatpush2.bf16.msra.mxu1 %v13215_v49 }
 0x5e0   : > { %9741 = vmatpush2.bf16.msra.mxu0 %v13218_v31  ;;  %9701 = vmatprep.subr.bf16.mxu1 %v13223_v13 }
 0x5e1   : > { %9742 = vmatprep.subr.bf16.mxu0 %v13226_v38 }
 0x5e3   : > { %9702 = vmatpush2.bf16.msra.mxu1 %v13221_v17 }
 0x5e4   : > { %9743 = vmatpush2.bf16.msra.mxu0 %v13224_v12  ;;  %9703 = vmatprep.subr.bf16.mxu1 %v13229_v33 }
 0x5e5   : > { %9744 = vmatprep.subr.bf16.mxu0 %v13232_v58 }
 0x5e7   : > { %9704 = vmatpush2.bf16.msra.mxu1 %v13227_v57 }
 0x5e8   : > { %9745 = vmatpush2.bf16.msra.mxu0 %v13230_v34  ;;  %9705 = vmatprep.subr.bf16.mxu1 %v13235_v11 }
 0x5e9   : > { %9746 = vmatprep.subr.bf16.mxu0 %v13238_v8 }
 0x5eb   : > { %9706 = vmatpush2.bf16.msra.mxu1 %v13233_v50 }
 0x5ec   : > { %9747 = vmatpush2.bf16.msra.mxu0 %v13236_v54  ;;  %9707 = vmatprep.subr.bf16.mxu1 %v13241_v63 }
 0x5ed   : > { %9748 = vmatprep.subr.bf16.mxu0 %v13244_v62 }
 0x5ef   : > { %9708 = vmatpush2.bf16.msra.mxu1 %v13239_v47 }
 0x5f0   : > { %9749 = vmatpush2.bf16.msra.mxu0 %v13242_v25 }
 0x5f2   : > { %9710 = vmatmul.mubr.bf16.vlgmr.msra.gmra.mxu1 %v7879_v40  ;;  %v9465_v3 = vpop.f32.mrf.mxu1 }
 0x5f3   : > { %9751 = vmatmul.mubr.bf16.vlgmr.msra.gmra.mxu0 %v7881_v6  ;;  %v9466_v18 = vadd.f32 %v9465_v3, %v8144_v19  ;;  %v9506_v28 = vpop.f32.mrf.mxu0 }
 0x5f4   : > { %v9467_v39 = vpop.f32.mrf.mxu1 }
 0x5f5   : > { %v9507_v10 = vadd.f32 %v9506_v28, %v9466_v18  ;;  %v9468_v7 = vadd.f32 %v9467_v39, %v8148_v22  ;;  %v9508_v27 = vpop.f32.mrf.mxu0 }
 0x5f6   : > { %v9469_v51 = vpop.f32.mrf.mxu1 }
 0x5f7   : > { %v9509_v43 = vadd.f32 %v9508_v27, %v9468_v7  ;;  %v9510_v9 = vpop.f32.mrf.mxu0 }
 0x5f8   : > { %v9470_v15 = vpop.f32.mrf.mxu1 }
 0x5f9   : > { %v9511_v20 = vpop.f32.mrf.mxu0 }
 0x632   : > { %v9547_v29 = vpop.f32.mrf.mxu1 }
 0x633   : > { %v9548_v48 = vadd.f32 %v9547_v29, %v9507_v10  ;;  %v9588_v35 = vpop.f32.mrf.mxu0 }
 0x634   : > { %v9549_v56 = vpop.f32.mrf.mxu1 }
 0x635   : > { %v9589_v2 = vadd.f32 %v9588_v35, %v9548_v48  ;;  %v9550_v45 = vadd.f32 %v9549_v56, %v9509_v43  ;;  %v9590_v21 = vpop.f32.mrf.mxu0 }
 0x636   : > { %v9551_v24 = vpop.f32.mrf.mxu1 }
 0x637   : > { %v9591_v37 = vadd.f32 %v9590_v21, %v9550_v45  ;;  %v9592_v49 = vpop.f32.mrf.mxu0 }
 0x638   : > { %v9552_v31 = vpop.f32.mrf.mxu1 }
 0x639   : > { %v9593_v13 = vpop.f32.mrf.mxu0 }
 0x672   : > { %v9629_v38 = vpop.f32.mrf.mxu1 }
 0x673   : > { %v9670_v17 = vpop.f32.mrf.mxu0  ;;  %v9630_v60 = vadd.f32 %v9629_v38, %v9589_v2 }
 0x674   : > { %v9631_v12 = vpop.f32.mrf.mxu1 }
 0x675   : > { %v9672_v33 = vpop.f32.mrf.mxu0  ;;  %v9632_v61 = vadd.f32 %v9631_v12, %v9591_v37  ;;  %v9671_v41 = vadd.f32 %v9670_v17, %v9630_v60 }
 0x676   : > { %v9633_v58 = vpop.f32.mrf.mxu1 }
 0x677   : > { %v9674_v44 = vpop.f32.mrf.mxu0  ;;  %v9673_v11 = vadd.f32 %v9672_v33, %v9632_v61 }
 0x678   : > { %v9634_v1 = vpop.f32.mrf.mxu1 }
 0x679   : > { %v9675_v57 = vpop.f32.mrf.mxu0 }
 0x6b2   : > { %v9711_v34 = vpop.f32.mrf.mxu1 }
 0x6b3   : > { %v9712_v8 = vadd.f32 %v9711_v34, %v9671_v41  ;;  %v9752_v16 = vpop.f32.mrf.mxu0 }
 0x6b4   : > { %v9713_v30 = vpop.f32.mrf.mxu1 }
 0x6b5   : > { %v9753_v52 = vadd.f32 %v9752_v16, %v9712_v8  ;;  %v9714_v50 = vadd.f32 %v9713_v30, %v9673_v11  ;;  %v9754_v0 = vpop.f32.mrf.mxu0 }
 0x6b6   : > { %v9715_v36 = vpop.f32.mrf.mxu1 }
 0x6b7   : > { %v9761_v54 = vmul.f32 0.70710677, %v9753_v52  ;;  %v9755_v63 = vadd.f32 %v9754_v0, %v9714_v50  ;;  %v9756_v14 = vpop.f32.mrf.mxu0  ;;  %v9759_v4 = vmul.f32 0.5, %v9753_v52 }
 0x6b8   : > { %v9716_v62 = vpop.f32.mrf.mxu1 }
 0x6b9   : > { %13277 = verf.f32 %v9761_v54  ;;  %v9762_v59 = vmul.f32 0.70710677, %v9755_v63  ;;  %v9757_v23 = vpop.f32.mrf.mxu0  ;;  %v9760_v25 = vmul.f32 0.5, %v9755_v63 }
 0x6bb   : > { %13279 = verf.f32 %v9762_v59 }
 0x6c6   : > { %v13278_v32 = vpop.eup %13277 }
 0x6c7   : > { %v9765_v47 = vadd.f32 1.0, %v13278_v32 }
 0x6c8   : > { %v13280_v46 = vpop.eup %13279 }
 0x6c9   : > { %v9766_v5 = vadd.f32 1.0, %v13280_v46  ;;  %v9767_v53 = vmul.f32 %v9765_v47, %v9759_v4 }
 0x6cb   : > { %v9768_v42 = vmul.f32 %v9766_v5, %v9760_v25 }
 0x6cd   : > { %v9771_v55 = vcombine.low %v9767_v53, %v9768_v42 }
 0x6cf   : > { %11035 = vst.sshfl [vmem:[%s13735_s29] sm:$0x33 pattern:$0x76325410] %v9771_v55 }
 0x6d0 PF: > { %s19_s30 = sadd.s32 1, %s13310_s30  }
 0x6d1   : > { %p16_p6 = scmp.ge.s32.totalorder %s19_s30, 7  }
 0x6d3   :  { %18 = sbr.rel (!%p16_p6) target bundleno = 1 (0x1), region = 216 }

</bundles_post_ra>
